<compile_context>
chip_gen: v6e
topology: v6e:2x2x1
jax: 0.10.0
libtpu: 0.0.40
codegen_flags: <defaults>
</compile_context>

<pallas_src>
import jax
import jax.numpy as jnp
from jax.experimental import pallas as pl
from jax.experimental.pallas import tpu as pltpu

# ---------------------------------------------------------------------------
# Packed-layout constants (all segments 128-lane aligned)
# ---------------------------------------------------------------------------
SEG = 128        # generic lane-aligned segment width
Z_PAD = 128      # z_t padded width (also K of the z-side merged matmul)
H_PAD = 128      # hidden-state carry padded width (K of the h-side matmul)
OUT_PAD = 128    # packed per-step output slab: [y0 | y1 | ps0 | ps1 | 0 ...]
FC1_DIM = 100    # ps_predictor d_fc1 width (as in the torch module)


# ---------------------------------------------------------------------------
# Pallas kernel: whole forward pass in one invocation
# ---------------------------------------------------------------------------
def covid_rnn_kernel(
    # batched / per-step inputs
    x_ref,        # (T*N, x_dim)   all timesteps' node features, row-stacked
    a_ref,        # (T, N, N)      sym-normalized dense adjacency per step
    cy_ref,       # (T*N, cy_dim)  [C | Y_hist], row-stacked
    wgc_ref,      # (T, h_dim, g_dim)  spectral-normed per-step GCN weight
    bgc_ref,      # (T, 1, g_dim)
    h0_ref,       # (N, H_PAD)     initial hidden, zero-padded to 128 lanes
    # shared weights (VMEM resident)
    w_phi_ref, b_phi_ref,          # phi_x Linear: (x_dim, h_dim), (1, h_dim)
    wf_phi_ref, b_fuse_ref,        # fuse, phi segment (padded to Z_PAD)
    wf_rep_ref,                    # fuse, rep segment (g_dim, Z_PAD)
    w_icy_ref, b_i_ref,            # GRU input [C|y_hist] weights, (cy, 3*SEG)
    w_hall_ref, b_hall_ref,        # merged h matmul: (H_PAD, 4*SEG), (1, 4*SEG)
    w_zall_ref,                    # merged z matmul: (Z_PAD, 6*SEG)
    b_head_ref,                    # (1, 3*SEG) bias of [t00 | t10 | fc1(+BN)]
    w_out_ref, b_out_ref,          # packed output projection (3*SEG, OUT_PAD)
    # outputs
    z_out_ref,    # (T, N, Z_PAD)
    slab_out_ref, # (T, N, OUT_PAD)
    h_out_ref,    # (N, H_PAD)  final hidden (written once)
):
    f32 = jnp.float32
    T, N, _ = a_ref.shape

    def mm(p, q):
        return jnp.dot(p, q, preferred_element_type=f32)

    # ---- Phase 1: h-independent precompute, batched over M = T*N rows -----
    phi_flat = jnp.maximum(mm(x_ref[...], w_phi_ref[...]) + b_phi_ref[...], 0.0)
    fuse_phi = mm(phi_flat, wf_phi_ref[...]) + b_fuse_ref[...]   # (T*N, Z_PAD)
    pre_gi = mm(cy_ref[...], w_icy_ref[...]) + b_i_ref[...]      # (T*N, 3*SEG)

    # per-step GCN aggregation (per-step A_hat / W_gc -> cannot be flattened),
    # still h-independent so the unrolled iterations have no cross-step deps.
    wf_rep = wf_rep_ref[...]
    pre_fuse = []     # per-step h-independent part of the fuse pre-activation
    pre_gi_t = []     # per-step [C|y_hist] contribution to the GRU gates
    for t in range(T):
        r0 = t * N
        phi_t = phi_flat[r0:r0 + N, :]
        rep_t = jnp.maximum(mm(a_ref[t], mm(phi_t, wgc_ref[t])) + bgc_ref[t],
                            0.0)                       # dropout = id (eval)
        pre_fuse.append(mm(rep_t, wf_rep) + fuse_phi[r0:r0 + N, :])
        pre_gi_t.append(pre_gi[r0:r0 + N, :])

    # ---- Phase 2: sequential recurrence (only the h-dependent chain) ------
    w_hall = w_hall_ref[...]
    w_zall = w_zall_ref[...]
    w_out = w_out_ref[...]
    # hoist broadcasts / iota masks out of the unrolled loop
    b_hall = jnp.broadcast_to(b_hall_ref[...], (N, 4 * SEG))
    b_head = jnp.broadcast_to(b_head_ref[...], (N, 3 * SEG))
    b_out = jnp.broadcast_to(b_out_ref[...], (N, OUT_PAD))
    lane_h = jax.lax.broadcasted_iota(jnp.int32, (N, 3 * SEG), 1)
    relu_mask = lane_h < 2 * SEG          # segs 0-1: ReLU, seg 2: sigmoid
    lane_o = jax.lax.broadcasted_iota(jnp.int32, (N, OUT_PAD), 1)
    ps_mask = jnp.logical_and(lane_o >= 2, lane_o < 4)

    h = h0_ref[...]                       # (N, H_PAD); padding lanes stay 0
    for t in range(T):
        # one wide h matmul: [fuse_h | gh_r | gh_u | gh_n]
        hp = mm(h, w_hall) + b_hall                       # (N, 4*SEG)
        z = jnp.maximum(hp[:, 0:SEG] + pre_fuse[t], 0.0)  # (N, Z_PAD)

        # one wide z matmul: [gi_r | gi_u | gi_n | t00 | t10 | fc1]
        zp = mm(z, w_zall)                                # (N, 6*SEG)
        gi = zp[:, 0:3 * SEG] + pre_gi_t[t]

        # GRUCell (r, u, n ordering as in torch.nn.GRUCell)
        r = jax.nn.sigmoid(gi[:, 0:SEG] + hp[:, SEG:2 * SEG])
        u = jax.nn.sigmoid(gi[:, SEG:2 * SEG] + hp[:, 2 * SEG:3 * SEG])
        n = jnp.tanh(gi[:, 2 * SEG:3 * SEG] + r * hp[:, 3 * SEG:4 * SEG])
        h = (1.0 - u) * n + u * h

        # heads: per-segment activation via lane mask, then one packed matmul
        head = zp[:, 3 * SEG:6 * SEG] + b_head
        head_act = jnp.where(relu_mask, jnp.maximum(head, 0.0),
                             jax.nn.sigmoid(head))
        out = mm(head_act, w_out) + b_out                 # (N, OUT_PAD)
        # lanes 2:4 hold the 2-class logit differences -> exact softmax via
        # a per-lane sigmoid (no cross-lane max/sum, no exp, no reciprocal)
        slab = jnp.where(ps_mask, jax.nn.sigmoid(out), out)

        z_out_ref[t] = z
        slab_out_ref[t] = slab

    h_out_ref[...] = h                    # single HBM write of the carry


# ---------------------------------------------------------------------------
# pallas_call wrapper (single invocation; everything VMEM-resident)
# ---------------------------------------------------------------------------
# TODO(synk): for large N / many graphs, reintroduce a grid (row-tiled A_hat,
# 'parallel' axis for v7x's second TensorCore, bf16 matmul operands).
@jax.jit
def covid_rnn_pallas(X_flat, A, CY_flat, Wgc, bgc, h0_pad, pp):
    T, N, _ = A.shape
    args = (X_flat, A, CY_flat, Wgc, bgc, h0_pad,
            pp["w_phi"], pp["b_phi"], pp["wf_phi"], pp["b_fuse"], pp["wf_rep"],
            pp["w_icy"], pp["b_i"], pp["w_hall"], pp["b_hall"], pp["w_zall"],
            pp["b_head"], pp["w_out"], pp["b_out"])
    vmem = lambda: pl.BlockSpec(memory_space=pltpu.MemorySpace.VMEM)
    return pl.pallas_call(
        covid_rnn_kernel,
        out_shape=(
            jax.ShapeDtypeStruct((T, N, Z_PAD), jnp.float32),
            jax.ShapeDtypeStruct((T, N, OUT_PAD), jnp.float32),
            jax.ShapeDtypeStruct((N, H_PAD), jnp.float32),
        ),
        in_specs=[vmem() for _ in args],
        out_specs=(vmem(), vmem(), vmem()),
    )(*args)


def covid_rnn_forward(X_list, A_hat_list, C_list, Y_hist_list,
                      packed, gc_w, gc_b, z_dim, hidden_in=None):
    """Mirrors CovidRNN.forward (eval mode).

    Returns (all_y1, all_y0, all_z_t, all_ps, h) matching the PyTorch module.
    """
    T = len(X_list)
    N = X_list[-1].shape[0]
    h_dim = packed["w_phi"].shape[1]

    h0 = jnp.zeros((N, H_PAD), jnp.float32)
    if hidden_in is not None:
        h0 = h0.at[:, :h_dim].set(hidden_in.astype(jnp.float32))

    X_flat = jnp.concatenate([x.astype(jnp.float32) for x in X_list], axis=0)
    A = jnp.stack(A_hat_list).astype(jnp.float32)
    CY_flat = jnp.concatenate([
        jnp.concatenate([C_list[t].astype(jnp.float32).reshape(N, -1),
                         Y_hist_list[t].astype(jnp.float32)], axis=1)
        for t in range(T)], axis=0)

    z_slab, out_slab, h_pad = covid_rnn_pallas(
        X_flat, A, CY_flat, gc_w, gc_b, h0, packed)

    all_y0 = out_slab[:, :, 0:1]
    all_y1 = out_slab[:, :, 1:2]
    all_ps = [out_slab[t, :, 2:4] for t in range(T)]
    all_z_t = [z_slab[t, :, :z_dim] for t in range(T)]
    h = h_pad[:, :h_dim]
    return all_y1, all_y0, all_z_t, all_ps, h


# ---------------------------------------------------------------------------
# Parameter construction (synthetic, deterministic) + packing for the kernel
# ---------------------------------------------------------------------------
def _init(key, shape, scale=0.1):
    return (scale * jax.random.normal(key, shape)).astype(jnp.float32)


def make_raw_params(key, x_dim, h_dim, g_dim, z_dim, t_dim, y_hist_dim):
    cy_dim = t_dim + y_hist_dim
    ks = iter(jax.random.split(key, 48))
    nk = lambda: next(ks)
    raw = {
        # phi_x: Linear(x_dim, h_dim) + ReLU   (weights stored [in, out])
        "w_phi": _init(nk(), (x_dim, h_dim)), "b_phi": _init(nk(), (1, h_dim)),
        # fuse: Linear(2*h_dim + g_dim, z_dim), split by concat segment
        "wf_h": _init(nk(), (h_dim, z_dim)),
        "wf_rep": _init(nk(), (g_dim, z_dim)),
        "wf_phi": _init(nk(), (h_dim, z_dim)),
        "b_fuse": _init(nk(), (1, z_dim)),
        # GRUCell(z_dim + t_dim + y_hist_dim, h_dim), per gate (r, u, n),
        # input weights split by segment [z | (C,y_hist)]
        "w_iz": jnp.stack([_init(nk(), (z_dim, h_dim)) for _ in range(3)]),
        "w_icy": jnp.stack([_init(nk(), (cy_dim, h_dim)) for _ in range(3)]),
        "b_i": jnp.stack([_init(nk(), (1, h_dim)) for _ in range(3)]),
        "w_hh": jnp.stack([_init(nk(), (h_dim, h_dim)) for _ in range(3)]),
        "b_hh": jnp.stack([_init(nk(), (1, h_dim)) for _ in range(3)]),
        # out_t00 / out_t10 (n_out = 1) and out_t01 / out_t11
        "w00": _init(nk(), (z_dim, z_dim)), "b00": _init(nk(), (1, z_dim)),
        "w10": _init(nk(), (z_dim, z_dim)), "b10": _init(nk(), (1, z_dim)),
        "w01": _init(nk(), (z_dim, 1)), "b01": _init(nk(), (1, 1)),
        "w11": _init(nk(), (z_dim, 1)), "b11": _init(nk(), (1, 1)),
        # ps_predictor: Linear(z,100) -> BatchNorm(100) -> Sigmoid -> Linear(100,2)
        "w_fc1": _init(nk(), (z_dim, FC1_DIM)), "b_fc1": _init(nk(), (1, FC1_DIM)),
        "bn_g": 1.0 + _init(nk(), (1, FC1_DIM)),
        "bn_b": _init(nk(), (1, FC1_DIM)),
        "bn_m": _init(nk(), (1, FC1_DIM)),
        "bn_v": 1.0 + jnp.abs(_init(nk(), (1, FC1_DIM))),
        "w_fc2": _init(nk(), (FC1_DIM, 2)), "b_fc2": _init(nk(), (1, 2)),
    }
    return raw


def pack_params(raw, z_dim):
    """Build the padded / merged weights the kernel consumes (done once)."""
    h_dim = raw["w_phi"].shape[1]
    cy_dim = raw["w_icy"].shape[1]
    assert z_dim <= Z_PAD and h_dim <= SEG and h_dim <= H_PAD and FC1_DIM <= SEG

    def pad_cols(w, width):
        return jnp.zeros((w.shape[0], width), jnp.float32).at[:, :w.shape[1]].set(w)

    # eval-mode BatchNorm folded into fc1:  y = (x - m) * g/sqrt(v+eps) + b
    bn_scale = raw["bn_g"] * jax.lax.rsqrt(raw["bn_v"] + 1e-5)
    w_fc1_f = raw["w_fc1"] * bn_scale
    b_fc1_f = (raw["b_fc1"] - raw["bn_m"]) * bn_scale + raw["bn_b"]

    # GRU input weights for the [C | y_hist] segment, gate-segmented (r|u|n)
    w_icy = jnp.zeros((cy_dim, 3 * SEG), jnp.float32)
    b_i = jnp.zeros((1, 3 * SEG), jnp.float32)
    for g in range(3):
        w_icy = w_icy.at[:, g * SEG:g * SEG + h_dim].set(raw["w_icy"][g])
        b_i = b_i.at[:, g * SEG:g * SEG + h_dim].set(raw["b_i"][g])

    # merged h-side matmul: [fuse_h | gh_r | gh_u | gh_n]
    w_hall = jnp.zeros((H_PAD, 4 * SEG), jnp.float32)
    b_hall = jnp.zeros((1, 4 * SEG), jnp.float32)
    w_hall = w_hall.at[:h_dim, 0:z_dim].set(raw["wf_h"])
    for g in range(3):
        c0 = (g + 1) * SEG
        w_hall = w_hall.at[:h_dim, c0:c0 + h_dim].set(raw["w_hh"][g])
        b_hall = b_hall.at[:, c0:c0 + h_dim].set(raw["b_hh"][g])

    # merged z-side matmul: [gi_r | gi_u | gi_n | out_t00 | out_t10 | fc1(+BN)]
    w_zall = jnp.zeros((Z_PAD, 6 * SEG), jnp.float32)
    for g in range(3):
        w_zall = w_zall.at[:z_dim, g * SEG:g * SEG + h_dim].set(raw["w_iz"][g])
    w_zall = w_zall.at[:z_dim, 3 * SEG:3 * SEG + z_dim].set(raw["w00"])
    w_zall = w_zall.at[:z_dim, 4 * SEG:4 * SEG + z_dim].set(raw["w10"])
    w_zall = w_zall.at[:z_dim, 5 * SEG:5 * SEG + FC1_DIM].set(w_fc1_f)
    b_head = jnp.zeros((1, 3 * SEG), jnp.float32)
    b_head = b_head.at[:, 0:z_dim].set(raw["b00"])
    b_head = b_head.at[:, SEG:SEG + z_dim].set(raw["b10"])
    b_head = b_head.at[:, 2 * SEG:2 * SEG + FC1_DIM].set(b_fc1_f)

    # packed final projection: lane0=y0, lane1=y1, lanes2:4 = 2-class logit
    # DIFFERENCES so the kernel-side softmax is an exact per-lane sigmoid.
    w_out = jnp.zeros((3 * SEG, OUT_PAD), jnp.float32)
    w_out = w_out.at[0:z_dim, 0].set(raw["w01"][:, 0])
    w_out = w_out.at[SEG:SEG + z_dim, 1].set(raw["w11"][:, 0])
    d_w = raw["w_fc2"][:, 0] - raw["w_fc2"][:, 1]
    w_out = w_out.at[2 * SEG:2 * SEG + FC1_DIM, 2].set(d_w)
    w_out = w_out.at[2 * SEG:2 * SEG + FC1_DIM, 3].set(-d_w)
    b_out = jnp.zeros((1, OUT_PAD), jnp.float32)
    b_out = b_out.at[:, 0:1].set(raw["b01"])
    b_out = b_out.at[:, 1:2].set(raw["b11"])
    d_b = raw["b_fc2"][0, 0] - raw["b_fc2"][0, 1]
    b_out = b_out.at[0, 2].set(d_b)
    b_out = b_out.at[0, 3].set(-d_b)

    return {
        "w_phi": raw["w_phi"], "b_phi": raw["b_phi"],
        "wf_phi": pad_cols(raw["wf_phi"], Z_PAD),
        "b_fuse": pad_cols(raw["b_fuse"], Z_PAD),
        "wf_rep": pad_cols(raw["wf_rep"], Z_PAD),
        "w_icy": w_icy, "b_i": b_i,
        "w_hall": w_hall, "b_hall": b_hall,
        "w_zall": w_zall, "b_head": b_head,
        "w_out": w_out, "b_out": b_out,
    }


def make_gc_params(key, T, h_dim, g_dim):
    """Per-timestep GCNConv weights with spectral norm folded in (W / sigma)."""
    ws, bs = [], []
    for _ in range(T):
        key, kw, kb = jax.random.split(key, 3)
        w = _init(kw, (h_dim, g_dim), scale=0.2)
        sigma = jnp.linalg.svd(w, compute_uv=False)[0]
        ws.append((w / sigma).astype(jnp.float32))
        bs.append(_init(kb, (1, g_dim)))
    return jnp.stack(ws), jnp.stack(bs)


def make_adjacency(key, T, N):
    """Dense sym-normalized adjacencies: D^-1/2 (sigmoid(1)*A + I) D^-1/2."""
    ew = jax.nn.sigmoid(jnp.float32(1.0))   # learned edge weight (ones) -> sigmoid
    eye = jnp.eye(N, dtype=jnp.float32)
    a_list = []
    for _ in range(T):
        key, k = jax.random.split(key)
        mask = (jax.random.uniform(k, (N, N)) < 0.25).astype(jnp.float32)
        adj = jnp.maximum(mask, mask.T) * (1.0 - eye)
        ring = jnp.roll(eye, 1, axis=1)
        adj = jnp.maximum(adj, jnp.maximum(ring, ring.T))
        a_tilde = ew * adj + eye
        d_inv_sqrt = jax.lax.rsqrt(jnp.sum(a_tilde, axis=1))
        a_list.append(d_inv_sqrt[:, None] * a_tilde * d_inv_sqrt[None, :])
    return jnp.stack(a_list)


# ---------------------------------------------------------------------------
# Plain-JAX reference (mirrors the PyTorch forward, unpadded / unmerged)
# ---------------------------------------------------------------------------
def reference_forward(X, A, CY, gc_w, gc_b, raw, h0):
    T = X.shape[0]
    h = h0
    zs, y0s, y1s, pss = [], [], [], []
    for t in range(T):
        x, a, cy = X[t], A[t], CY[t]
        phi = jax.nn.relu(x @ raw["w_phi"] + raw["b_phi"])
        rep = jax.nn.relu(a @ (phi @ gc_w[t]) + gc_b[t])
        z = jax.nn.relu(h @ raw["wf_h"] + rep @ raw["wf_rep"]
                        + phi @ raw["wf_phi"] + raw["b_fuse"])

        def gi(g):
            return z @ raw["w_iz"][g] + cy @ raw["w_icy"][g] + raw["b_i"][g]

        def gh(g):
            return h @ raw["w_hh"][g] + raw["b_hh"][g]

        r = jax.nn.sigmoid(gi(0) + gh(0))
        u = jax.nn.sigmoid(gi(1) + gh(1))
        n = jnp.tanh(gi(2) + r * gh(2))
        h = (1.0 - u) * n + u * h

        y00 = jax.nn.relu(z @ raw["w00"] + raw["b00"])
        y10 = jax.nn.relu(z @ raw["w10"] + raw["b10"])
        y0 = y00 @ raw["w01"] + raw["b01"]
        y1 = y10 @ raw["w11"] + raw["b11"]

        p1 = z @ raw["w_fc1"] + raw["b_fc1"]
        p1 = (p1 - raw["bn_m"]) * jax.lax.rsqrt(raw["bn_v"] + 1e-5) \
            * raw["bn_g"] + raw["bn_b"]
        p1 = jax.nn.sigmoid(p1)
        ps = jax.nn.softmax(p1 @ raw["w_fc2"] + raw["b_fc2"], axis=1)

        zs.append(z); y0s.append(y0); y1s.append(y1); pss.append(ps)
    return jnp.stack(y1s), jnp.stack(y0s), jnp.stack(zs), jnp.stack(pss), h


# ---------------------------------------------------------------------------
if __name__ == "__main__":
    # small shapes consistent with CovidRNN.forward
    T = 6            # number of timesteps
    N = 16           # num_node
    x_dim = 8
    h_dim = 32       # args.h_dim
    g_dim = 16       # args.g_dim
    z_dim = 32       # args.z_dim
    t_dim = 1        # treatment dim
    y_hist_dim = 4   # outcome-history dim

    key = jax.random.PRNGKey(0)
    kp, kg, ka, kx, kc, ky = jax.random.split(key, 6)

    raw = make_raw_params(kp, x_dim, h_dim, g_dim, z_dim, t_dim, y_hist_dim)
    packed = pack_params(raw, z_dim)
    gc_w, gc_b = make_gc_params(kg, T, h_dim, g_dim)
    A = make_adjacency(ka, T, N)
    A_list = [A[t] for t in range(T)]

    X_list = [jax.random.normal(jax.random.fold_in(kx, t), (N, x_dim),
                                dtype=jnp.float32) for t in range(T)]
    C_list = [(jax.random.uniform(jax.random.fold_in(kc, t), (N, t_dim)) < 0.5
               ).astype(jnp.float32) for t in range(T)]
    Y_hist_list = [jax.random.normal(jax.random.fold_in(ky, t), (N, y_hist_dim),
                                     dtype=jnp.float32) for t in range(T)]

    all_y1, all_y0, all_z_t, all_ps, h = covid_rnn_forward(
        X_list, A_list, C_list, Y_hist_list, packed, gc_w, gc_b, z_dim)
    jax.block_until_ready((all_y1, all_y0, all_z_t, all_ps, h))

    # shape checks (mirror the PyTorch return structure)
    assert all_y1.shape == (T, N, 1) and all_y0.shape == (T, N, 1)
    assert len(all_z_t) == T and all_z_t[0].shape == (N, z_dim)
    assert len(all_ps) == T and all_ps[0].shape == (N, 2)
    assert h.shape == (N, h_dim)

    # numerical check against the plain-JAX reference
    X = jnp.stack(X_list)
    CY = jnp.stack([jnp.concatenate([c, y], axis=1)
                    for c, y in zip(C_list, Y_hist_list)])
    h0 = jnp.zeros((N, h_dim), jnp.float32)
    ref_y1, ref_y0, ref_z, ref_ps, ref_h = reference_forward(
        X, A, CY, gc_w, gc_b, raw, h0)

    def maxdiff(p, q):
        return float(jnp.max(jnp.abs(p - q)))

    tol = 5e-2
    assert maxdiff(all_y1, ref_y1) < tol, maxdiff(all_y1, ref_y1)
    assert maxdiff(all_y0, ref_y0) < tol, maxdiff(all_y0, ref_y0)
    assert maxdiff(jnp.stack(all_z_t), ref_z) < tol, maxdiff(jnp.stack(all_z_t), ref_z)
    assert maxdiff(jnp.stack(all_ps), ref_ps) < tol, maxdiff(jnp.stack(all_ps), ref_ps)
    assert maxdiff(h, ref_h) < tol, maxdiff(h, ref_h)

    print("KERNEL_OK")
</pallas_src>

<mosaic_0001>
module attributes {stable_mosaic.version = 11 : i64} {
  func.func @covid_rnn_kernel(%arg0: memref<96x8xf32, #tpu.memory_space<vmem>>, %arg1: memref<6x16x16xf32, #tpu.memory_space<vmem>>, %arg2: memref<96x5xf32, #tpu.memory_space<vmem>>, %arg3: memref<6x32x16xf32, #tpu.memory_space<vmem>>, %arg4: memref<6x1x16xf32, #tpu.memory_space<vmem>>, %arg5: memref<16x128xf32, #tpu.memory_space<vmem>>, %arg6: memref<8x32xf32, #tpu.memory_space<vmem>>, %arg7: memref<1x32xf32, #tpu.memory_space<vmem>>, %arg8: memref<32x128xf32, #tpu.memory_space<vmem>>, %arg9: memref<1x128xf32, #tpu.memory_space<vmem>>, %arg10: memref<16x128xf32, #tpu.memory_space<vmem>>, %arg11: memref<5x384xf32, #tpu.memory_space<vmem>>, %arg12: memref<1x384xf32, #tpu.memory_space<vmem>>, %arg13: memref<128x512xf32, #tpu.memory_space<vmem>>, %arg14: memref<1x512xf32, #tpu.memory_space<vmem>>, %arg15: memref<128x768xf32, #tpu.memory_space<vmem>>, %arg16: memref<1x384xf32, #tpu.memory_space<vmem>>, %arg17: memref<384x128xf32, #tpu.memory_space<vmem>>, %arg18: memref<1x128xf32, #tpu.memory_space<vmem>>, %arg19: memref<6x16x128xf32, #tpu.memory_space<vmem>>, %arg20: memref<6x16x128xf32, #tpu.memory_space<vmem>>, %arg21: memref<16x128xf32, #tpu.memory_space<vmem>>) attributes {dimension_semantics = [], scalar_prefetch = 0 : i64, scratch_operands = 0 : i64, tpu.core_type = #tpu.core_type<tc>} {
    %c0 = arith.constant 0 : index
    %c0_0 = arith.constant 0 : index
    %0 = vector.load %arg0[%c0, %c0_0] : memref<96x8xf32, #tpu.memory_space<vmem>>, vector<96x8xf32>
    %c0_1 = arith.constant 0 : index
    %c0_2 = arith.constant 0 : index
    %1 = vector.load %arg6[%c0_1, %c0_2] : memref<8x32xf32, #tpu.memory_space<vmem>>, vector<8x32xf32>
    %cst = arith.constant dense<0.000000e+00> : vector<96x32xf32>
    %2 = tpu.matmul %0, %1, %cst {dimension_numbers = #tpu.dot_dimension_numbers<[1], [0], [0], [1], [0, 0, 1, 1], [], []>} : vector<96x8xf32>, vector<8x32xf32>, vector<96x32xf32> -> vector<96x32xf32>
    %c0_3 = arith.constant 0 : index
    %c0_4 = arith.constant 0 : index
    %3 = vector.load %arg7[%c0_3, %c0_4] : memref<1x32xf32, #tpu.memory_space<vmem>>, vector<1x32xf32>
    %4 = vector.broadcast %3 : vector<1x32xf32> to vector<96x32xf32>
    %5 = arith.addf %2, %4 : vector<96x32xf32>
    %cst_5 = arith.constant 0.000000e+00 : f32
    %6 = vector.broadcast %cst_5 : f32 to vector<96x32xf32>
    %7 = arith.maximumf %5, %6 : vector<96x32xf32>
    %c0_6 = arith.constant 0 : index
    %c0_7 = arith.constant 0 : index
    %8 = vector.load %arg8[%c0_6, %c0_7] : memref<32x128xf32, #tpu.memory_space<vmem>>, vector<32x128xf32>
    %cst_8 = arith.constant dense<0.000000e+00> : vector<96x128xf32>
    %9 = tpu.matmul %7, %8, %cst_8 {dimension_numbers = #tpu.dot_dimension_numbers<[1], [0], [0], [1], [0, 0, 1, 1], [], []>} : vector<96x32xf32>, vector<32x128xf32>, vector<96x128xf32> -> vector<96x128xf32>
    %c0_9 = arith.constant 0 : index
    %c0_10 = arith.constant 0 : index
    %10 = vector.load %arg9[%c0_9, %c0_10] : memref<1x128xf32, #tpu.memory_space<vmem>>, vector<1x128xf32>
    %11 = vector.broadcast %10 : vector<1x128xf32> to vector<96x128xf32>
    %12 = arith.addf %9, %11 : vector<96x128xf32>
    %c0_11 = arith.constant 0 : index
    %c0_12 = arith.constant 0 : index
    %13 = vector.load %arg2[%c0_11, %c0_12] : memref<96x5xf32, #tpu.memory_space<vmem>>, vector<96x5xf32>
    %c0_13 = arith.constant 0 : index
    %c0_14 = arith.constant 0 : index
    %14 = vector.load %arg11[%c0_13, %c0_14] : memref<5x384xf32, #tpu.memory_space<vmem>>, vector<5x384xf32>
    %cst_15 = arith.constant dense<0.000000e+00> : vector<96x384xf32>
    %15 = tpu.matmul %13, %14, %cst_15 {dimension_numbers = #tpu.dot_dimension_numbers<[1], [0], [0], [1], [0, 0, 1, 1], [], []>} : vector<96x5xf32>, vector<5x384xf32>, vector<96x384xf32> -> vector<96x384xf32>
    %c0_16 = arith.constant 0 : index
    %c0_17 = arith.constant 0 : index
    %16 = vector.load %arg12[%c0_16, %c0_17] : memref<1x384xf32, #tpu.memory_space<vmem>>, vector<1x384xf32>
    %17 = vector.broadcast %16 : vector<1x384xf32> to vector<96x384xf32>
    %18 = arith.addf %15, %17 : vector<96x384xf32>
    %c0_18 = arith.constant 0 : index
    %c0_19 = arith.constant 0 : index
    %19 = vector.load %arg10[%c0_18, %c0_19] : memref<16x128xf32, #tpu.memory_space<vmem>>, vector<16x128xf32>
    %20 = vector.extract_strided_slice %7 {offsets = [0, 0], sizes = [16, 32], strides = [1, 1]} : vector<96x32xf32> to vector<16x32xf32>
    %c0_20 = arith.constant 0 : index
    %c0_21 = arith.constant 0 : index
    %c0_22 = arith.constant 0 : index
    %21 = vector.load %arg1[%c0_20, %c0_21, %c0_22] : memref<6x16x16xf32, #tpu.memory_space<vmem>>, vector<1x16x16xf32>
    %22 = vector.shape_cast %21 : vector<1x16x16xf32> to vector<16x16xf32>
    %c0_23 = arith.constant 0 : index
    %c0_24 = arith.constant 0 : index
    %c0_25 = arith.constant 0 : index
    %23 = vector.load %arg3[%c0_23, %c0_24, %c0_25] : memref<6x32x16xf32, #tpu.memory_space<vmem>>, vector<1x32x16xf32>
    %24 = vector.shape_cast %23 : vector<1x32x16xf32> to vector<32x16xf32>
    %cst_26 = arith.constant dense<0.000000e+00> : vector<16x16xf32>
    %25 = tpu.matmul %20, %24, %cst_26 {dimension_numbers = #tpu.dot_dimension_numbers<[1], [0], [0], [1], [0, 0, 1, 1], [], []>} : vector<16x32xf32>, vector<32x16xf32>, vector<16x16xf32> -> vector<16x16xf32>
    %cst_27 = arith.constant dense<0.000000e+00> : vector<16x16xf32>
    %26 = tpu.matmul %22, %25, %cst_27 {dimension_numbers = #tpu.dot_dimension_numbers<[1], [0], [0], [1], [0, 0, 1, 1], [], []>} : vector<16x16xf32>, vector<16x16xf32>, vector<16x16xf32> -> vector<16x16xf32>
    %c0_28 = arith.constant 0 : index
    %c0_29 = arith.constant 0 : index
    %c0_30 = arith.constant 0 : index
    %27 = vector.load %arg4[%c0_28, %c0_29, %c0_30] : memref<6x1x16xf32, #tpu.memory_space<vmem>>, vector<1x1x16xf32>
    %28 = vector.shape_cast %27 : vector<1x1x16xf32> to vector<1x16xf32>
    %29 = vector.broadcast %28 : vector<1x16xf32> to vector<16x16xf32>
    %30 = arith.addf %26, %29 : vector<16x16xf32>
    %cst_31 = arith.constant 0.000000e+00 : f32
    %31 = vector.broadcast %cst_31 : f32 to vector<16x16xf32>
    %32 = arith.maximumf %30, %31 : vector<16x16xf32>
    %cst_32 = arith.constant dense<0.000000e+00> : vector<16x128xf32>
    %33 = tpu.matmul %32, %19, %cst_32 {dimension_numbers = #tpu.dot_dimension_numbers<[1], [0], [0], [1], [0, 0, 1, 1], [], []>} : vector<16x16xf32>, vector<16x128xf32>, vector<16x128xf32> -> vector<16x128xf32>
    %34 = vector.extract_strided_slice %12 {offsets = [0, 0], sizes = [16, 128], strides = [1, 1]} : vector<96x128xf32> to vector<16x128xf32>
    %35 = arith.addf %33, %34 : vector<16x128xf32>
    %36 = vector.extract_strided_slice %18 {offsets = [0, 0], sizes = [16, 384], strides = [1, 1]} : vector<96x384xf32> to vector<16x384xf32>
    %37 = vector.extract_strided_slice %7 {offsets = [16, 0], sizes = [16, 32], strides = [1, 1]} : vector<96x32xf32> to vector<16x32xf32>
    %c1 = arith.constant 1 : index
    %c0_33 = arith.constant 0 : index
    %c0_34 = arith.constant 0 : index
    %38 = vector.load %arg1[%c1, %c0_33, %c0_34] : memref<6x16x16xf32, #tpu.memory_space<vmem>>, vector<1x16x16xf32>
    %39 = vector.shape_cast %38 : vector<1x16x16xf32> to vector<16x16xf32>
    %c1_35 = arith.constant 1 : index
    %c0_36 = arith.constant 0 : index
    %c0_37 = arith.constant 0 : index
    %40 = vector.load %arg3[%c1_35, %c0_36, %c0_37] : memref<6x32x16xf32, #tpu.memory_space<vmem>>, vector<1x32x16xf32>
    %41 = vector.shape_cast %40 : vector<1x32x16xf32> to vector<32x16xf32>
    %cst_38 = arith.constant dense<0.000000e+00> : vector<16x16xf32>
    %42 = tpu.matmul %37, %41, %cst_38 {dimension_numbers = #tpu.dot_dimension_numbers<[1], [0], [0], [1], [0, 0, 1, 1], [], []>} : vector<16x32xf32>, vector<32x16xf32>, vector<16x16xf32> -> vector<16x16xf32>
    %cst_39 = arith.constant dense<0.000000e+00> : vector<16x16xf32>
    %43 = tpu.matmul %39, %42, %cst_39 {dimension_numbers = #tpu.dot_dimension_numbers<[1], [0], [0], [1], [0, 0, 1, 1], [], []>} : vector<16x16xf32>, vector<16x16xf32>, vector<16x16xf32> -> vector<16x16xf32>
    %c1_40 = arith.constant 1 : index
    %c0_41 = arith.constant 0 : index
    %c0_42 = arith.constant 0 : index
    %44 = vector.load %arg4[%c1_40, %c0_41, %c0_42] : memref<6x1x16xf32, #tpu.memory_space<vmem>>, vector<1x1x16xf32>
    %45 = vector.shape_cast %44 : vector<1x1x16xf32> to vector<1x16xf32>
    %46 = vector.broadcast %45 : vector<1x16xf32> to vector<16x16xf32>
    %47 = arith.addf %43, %46 : vector<16x16xf32>
    %cst_43 = arith.constant 0.000000e+00 : f32
    %48 = vector.broadcast %cst_43 : f32 to vector<16x16xf32>
    %49 = arith.maximumf %47, %48 : vector<16x16xf32>
    %cst_44 = arith.constant dense<0.000000e+00> : vector<16x128xf32>
    %50 = tpu.matmul %49, %19, %cst_44 {dimension_numbers = #tpu.dot_dimension_numbers<[1], [0], [0], [1], [0, 0, 1, 1], [], []>} : vector<16x16xf32>, vector<16x128xf32>, vector<16x128xf32> -> vector<16x128xf32>
    %51 = vector.extract_strided_slice %12 {offsets = [16, 0], sizes = [16, 128], strides = [1, 1]} : vector<96x128xf32> to vector<16x128xf32>
    %52 = arith.addf %50, %51 : vector<16x128xf32>
    %53 = vector.extract_strided_slice %18 {offsets = [16, 0], sizes = [16, 384], strides = [1, 1]} : vector<96x384xf32> to vector<16x384xf32>
    %54 = vector.extract_strided_slice %7 {offsets = [32, 0], sizes = [16, 32], strides = [1, 1]} : vector<96x32xf32> to vector<16x32xf32>
    %c2 = arith.constant 2 : index
    %c0_45 = arith.constant 0 : index
    %c0_46 = arith.constant 0 : index
    %55 = vector.load %arg1[%c2, %c0_45, %c0_46] : memref<6x16x16xf32, #tpu.memory_space<vmem>>, vector<1x16x16xf32>
    %56 = vector.shape_cast %55 : vector<1x16x16xf32> to vector<16x16xf32>
    %c2_47 = arith.constant 2 : index
    %c0_48 = arith.constant 0 : index
    %c0_49 = arith.constant 0 : index
    %57 = vector.load %arg3[%c2_47, %c0_48, %c0_49] : memref<6x32x16xf32, #tpu.memory_space<vmem>>, vector<1x32x16xf32>
    %58 = vector.shape_cast %57 : vector<1x32x16xf32> to vector<32x16xf32>
    %cst_50 = arith.constant dense<0.000000e+00> : vector<16x16xf32>
    %59 = tpu.matmul %54, %58, %cst_50 {dimension_numbers = #tpu.dot_dimension_numbers<[1], [0], [0], [1], [0, 0, 1, 1], [], []>} : vector<16x32xf32>, vector<32x16xf32>, vector<16x16xf32> -> vector<16x16xf32>
    %cst_51 = arith.constant dense<0.000000e+00> : vector<16x16xf32>
    %60 = tpu.matmul %56, %59, %cst_51 {dimension_numbers = #tpu.dot_dimension_numbers<[1], [0], [0], [1], [0, 0, 1, 1], [], []>} : vector<16x16xf32>, vector<16x16xf32>, vector<16x16xf32> -> vector<16x16xf32>
    %c2_52 = arith.constant 2 : index
    %c0_53 = arith.constant 0 : index
    %c0_54 = arith.constant 0 : index
    %61 = vector.load %arg4[%c2_52, %c0_53, %c0_54] : memref<6x1x16xf32, #tpu.memory_space<vmem>>, vector<1x1x16xf32>
    %62 = vector.shape_cast %61 : vector<1x1x16xf32> to vector<1x16xf32>
    %63 = vector.broadcast %62 : vector<1x16xf32> to vector<16x16xf32>
    %64 = arith.addf %60, %63 : vector<16x16xf32>
    %cst_55 = arith.constant 0.000000e+00 : f32
    %65 = vector.broadcast %cst_55 : f32 to vector<16x16xf32>
    %66 = arith.maximumf %64, %65 : vector<16x16xf32>
    %cst_56 = arith.constant dense<0.000000e+00> : vector<16x128xf32>
    %67 = tpu.matmul %66, %19, %cst_56 {dimension_numbers = #tpu.dot_dimension_numbers<[1], [0], [0], [1], [0, 0, 1, 1], [], []>} : vector<16x16xf32>, vector<16x128xf32>, vector<16x128xf32> -> vector<16x128xf32>
    %68 = vector.extract_strided_slice %12 {offsets = [32, 0], sizes = [16, 128], strides = [1, 1]} : vector<96x128xf32> to vector<16x128xf32>
    %69 = arith.addf %67, %68 : vector<16x128xf32>
    %70 = vector.extract_strided_slice %18 {offsets = [32, 0], sizes = [16, 384], strides = [1, 1]} : vector<96x384xf32> to vector<16x384xf32>
    %71 = vector.extract_strided_slice %7 {offsets = [48, 0], sizes = [16, 32], strides = [1, 1]} : vector<96x32xf32> to vector<16x32xf32>
    %c3 = arith.constant 3 : index
    %c0_57 = arith.constant 0 : index
    %c0_58 = arith.constant 0 : index
    %72 = vector.load %arg1[%c3, %c0_57, %c0_58] : memref<6x16x16xf32, #tpu.memory_space<vmem>>, vector<1x16x16xf32>
    %73 = vector.shape_cast %72 : vector<1x16x16xf32> to vector<16x16xf32>
    %c3_59 = arith.constant 3 : index
    %c0_60 = arith.constant 0 : index
    %c0_61 = arith.constant 0 : index
    %74 = vector.load %arg3[%c3_59, %c0_60, %c0_61] : memref<6x32x16xf32, #tpu.memory_space<vmem>>, vector<1x32x16xf32>
    %75 = vector.shape_cast %74 : vector<1x32x16xf32> to vector<32x16xf32>
    %cst_62 = arith.constant dense<0.000000e+00> : vector<16x16xf32>
    %76 = tpu.matmul %71, %75, %cst_62 {dimension_numbers = #tpu.dot_dimension_numbers<[1], [0], [0], [1], [0, 0, 1, 1], [], []>} : vector<16x32xf32>, vector<32x16xf32>, vector<16x16xf32> -> vector<16x16xf32>
    %cst_63 = arith.constant dense<0.000000e+00> : vector<16x16xf32>
    %77 = tpu.matmul %73, %76, %cst_63 {dimension_numbers = #tpu.dot_dimension_numbers<[1], [0], [0], [1], [0, 0, 1, 1], [], []>} : vector<16x16xf32>, vector<16x16xf32>, vector<16x16xf32> -> vector<16x16xf32>
    %c3_64 = arith.constant 3 : index
    %c0_65 = arith.constant 0 : index
    %c0_66 = arith.constant 0 : index
    %78 = vector.load %arg4[%c3_64, %c0_65, %c0_66] : memref<6x1x16xf32, #tpu.memory_space<vmem>>, vector<1x1x16xf32>
    %79 = vector.shape_cast %78 : vector<1x1x16xf32> to vector<1x16xf32>
    %80 = vector.broadcast %79 : vector<1x16xf32> to vector<16x16xf32>
    %81 = arith.addf %77, %80 : vector<16x16xf32>
    %cst_67 = arith.constant 0.000000e+00 : f32
    %82 = vector.broadcast %cst_67 : f32 to vector<16x16xf32>
    %83 = arith.maximumf %81, %82 : vector<16x16xf32>
    %cst_68 = arith.constant dense<0.000000e+00> : vector<16x128xf32>
    %84 = tpu.matmul %83, %19, %cst_68 {dimension_numbers = #tpu.dot_dimension_numbers<[1], [0], [0], [1], [0, 0, 1, 1], [], []>} : vector<16x16xf32>, vector<16x128xf32>, vector<16x128xf32> -> vector<16x128xf32>
    %85 = vector.extract_strided_slice %12 {offsets = [48, 0], sizes = [16, 128], strides = [1, 1]} : vector<96x128xf32> to vector<16x128xf32>
    %86 = arith.addf %84, %85 : vector<16x128xf32>
    %87 = vector.extract_strided_slice %18 {offsets = [48, 0], sizes = [16, 384], strides = [1, 1]} : vector<96x384xf32> to vector<16x384xf32>
    %88 = vector.extract_strided_slice %7 {offsets = [64, 0], sizes = [16, 32], strides = [1, 1]} : vector<96x32xf32> to vector<16x32xf32>
    %c4 = arith.constant 4 : index
    %c0_69 = arith.constant 0 : index
    %c0_70 = arith.constant 0 : index
    %89 = vector.load %arg1[%c4, %c0_69, %c0_70] : memref<6x16x16xf32, #tpu.memory_space<vmem>>, vector<1x16x16xf32>
    %90 = vector.shape_cast %89 : vector<1x16x16xf32> to vector<16x16xf32>
    %c4_71 = arith.constant 4 : index
    %c0_72 = arith.constant 0 : index
    %c0_73 = arith.constant 0 : index
    %91 = vector.load %arg3[%c4_71, %c0_72, %c0_73] : memref<6x32x16xf32, #tpu.memory_space<vmem>>, vector<1x32x16xf32>
    %92 = vector.shape_cast %91 : vector<1x32x16xf32> to vector<32x16xf32>
    %cst_74 = arith.constant dense<0.000000e+00> : vector<16x16xf32>
    %93 = tpu.matmul %88, %92, %cst_74 {dimension_numbers = #tpu.dot_dimension_numbers<[1], [0], [0], [1], [0, 0, 1, 1], [], []>} : vector<16x32xf32>, vector<32x16xf32>, vector<16x16xf32> -> vector<16x16xf32>
    %cst_75 = arith.constant dense<0.000000e+00> : vector<16x16xf32>
    %94 = tpu.matmul %90, %93, %cst_75 {dimension_numbers = #tpu.dot_dimension_numbers<[1], [0], [0], [1], [0, 0, 1, 1], [], []>} : vector<16x16xf32>, vector<16x16xf32>, vector<16x16xf32> -> vector<16x16xf32>
    %c4_76 = arith.constant 4 : index
    %c0_77 = arith.constant 0 : index
    %c0_78 = arith.constant 0 : index
    %95 = vector.load %arg4[%c4_76, %c0_77, %c0_78] : memref<6x1x16xf32, #tpu.memory_space<vmem>>, vector<1x1x16xf32>
    %96 = vector.shape_cast %95 : vector<1x1x16xf32> to vector<1x16xf32>
    %97 = vector.broadcast %96 : vector<1x16xf32> to vector<16x16xf32>
    %98 = arith.addf %94, %97 : vector<16x16xf32>
    %cst_79 = arith.constant 0.000000e+00 : f32
    %99 = vector.broadcast %cst_79 : f32 to vector<16x16xf32>
    %100 = arith.maximumf %98, %99 : vector<16x16xf32>
    %cst_80 = arith.constant dense<0.000000e+00> : vector<16x128xf32>
    %101 = tpu.matmul %100, %19, %cst_80 {dimension_numbers = #tpu.dot_dimension_numbers<[1], [0], [0], [1], [0, 0, 1, 1], [], []>} : vector<16x16xf32>, vector<16x128xf32>, vector<16x128xf32> -> vector<16x128xf32>
    %102 = vector.extract_strided_slice %12 {offsets = [64, 0], sizes = [16, 128], strides = [1, 1]} : vector<96x128xf32> to vector<16x128xf32>
    %103 = arith.addf %101, %102 : vector<16x128xf32>
    %104 = vector.extract_strided_slice %18 {offsets = [64, 0], sizes = [16, 384], strides = [1, 1]} : vector<96x384xf32> to vector<16x384xf32>
    %105 = vector.extract_strided_slice %7 {offsets = [80, 0], sizes = [16, 32], strides = [1, 1]} : vector<96x32xf32> to vector<16x32xf32>
    %c5 = arith.constant 5 : index
    %c0_81 = arith.constant 0 : index
    %c0_82 = arith.constant 0 : index
    %106 = vector.load %arg1[%c5, %c0_81, %c0_82] : memref<6x16x16xf32, #tpu.memory_space<vmem>>, vector<1x16x16xf32>
    %107 = vector.shape_cast %106 : vector<1x16x16xf32> to vector<16x16xf32>
    %c5_83 = arith.constant 5 : index
    %c0_84 = arith.constant 0 : index
    %c0_85 = arith.constant 0 : index
    %108 = vector.load %arg3[%c5_83, %c0_84, %c0_85] : memref<6x32x16xf32, #tpu.memory_space<vmem>>, vector<1x32x16xf32>
    %109 = vector.shape_cast %108 : vector<1x32x16xf32> to vector<32x16xf32>
    %cst_86 = arith.constant dense<0.000000e+00> : vector<16x16xf32>
    %110 = tpu.matmul %105, %109, %cst_86 {dimension_numbers = #tpu.dot_dimension_numbers<[1], [0], [0], [1], [0, 0, 1, 1], [], []>} : vector<16x32xf32>, vector<32x16xf32>, vector<16x16xf32> -> vector<16x16xf32>
    %cst_87 = arith.constant dense<0.000000e+00> : vector<16x16xf32>
    %111 = tpu.matmul %107, %110, %cst_87 {dimension_numbers = #tpu.dot_dimension_numbers<[1], [0], [0], [1], [0, 0, 1, 1], [], []>} : vector<16x16xf32>, vector<16x16xf32>, vector<16x16xf32> -> vector<16x16xf32>
    %c5_88 = arith.constant 5 : index
    %c0_89 = arith.constant 0 : index
    %c0_90 = arith.constant 0 : index
    %112 = vector.load %arg4[%c5_88, %c0_89, %c0_90] : memref<6x1x16xf32, #tpu.memory_space<vmem>>, vector<1x1x16xf32>
    %113 = vector.shape_cast %112 : vector<1x1x16xf32> to vector<1x16xf32>
    %114 = vector.broadcast %113 : vector<1x16xf32> to vector<16x16xf32>
    %115 = arith.addf %111, %114 : vector<16x16xf32>
    %cst_91 = arith.constant 0.000000e+00 : f32
    %116 = vector.broadcast %cst_91 : f32 to vector<16x16xf32>
    %117 = arith.maximumf %115, %116 : vector<16x16xf32>
    %cst_92 = arith.constant dense<0.000000e+00> : vector<16x128xf32>
    %118 = tpu.matmul %117, %19, %cst_92 {dimension_numbers = #tpu.dot_dimension_numbers<[1], [0], [0], [1], [0, 0, 1, 1], [], []>} : vector<16x16xf32>, vector<16x128xf32>, vector<16x128xf32> -> vector<16x128xf32>
    %119 = vector.extract_strided_slice %12 {offsets = [80, 0], sizes = [16, 128], strides = [1, 1]} : vector<96x128xf32> to vector<16x128xf32>
    %120 = arith.addf %118, %119 : vector<16x128xf32>
    %121 = vector.extract_strided_slice %18 {offsets = [80, 0], sizes = [16, 384], strides = [1, 1]} : vector<96x384xf32> to vector<16x384xf32>
    %c0_93 = arith.constant 0 : index
    %c0_94 = arith.constant 0 : index
    %122 = vector.load %arg13[%c0_93, %c0_94] : memref<128x512xf32, #tpu.memory_space<vmem>>, vector<128x512xf32>
    %c0_95 = arith.constant 0 : index
    %c0_96 = arith.constant 0 : index
    %123 = vector.load %arg15[%c0_95, %c0_96] : memref<128x768xf32, #tpu.memory_space<vmem>>, vector<128x768xf32>
    %c0_97 = arith.constant 0 : index
    %c0_98 = arith.constant 0 : index
    %124 = vector.load %arg17[%c0_97, %c0_98] : memref<384x128xf32, #tpu.memory_space<vmem>>, vector<384x128xf32>
    %c0_99 = arith.constant 0 : index
    %c0_100 = arith.constant 0 : index
    %125 = vector.load %arg14[%c0_99, %c0_100] : memref<1x512xf32, #tpu.memory_space<vmem>>, vector<1x512xf32>
    %126 = vector.shape_cast %125 : vector<1x512xf32> to vector<1x512xf32>
    %127 = vector.broadcast %126 : vector<1x512xf32> to vector<16x512xf32>
    %c0_101 = arith.constant 0 : index
    %c0_102 = arith.constant 0 : index
    %128 = vector.load %arg16[%c0_101, %c0_102] : memref<1x384xf32, #tpu.memory_space<vmem>>, vector<1x384xf32>
    %129 = vector.shape_cast %128 : vector<1x384xf32> to vector<1x384xf32>
    %130 = vector.broadcast %129 : vector<1x384xf32> to vector<16x384xf32>
    %c0_103 = arith.constant 0 : index
    %c0_104 = arith.constant 0 : index
    %131 = vector.load %arg18[%c0_103, %c0_104] : memref<1x128xf32, #tpu.memory_space<vmem>>, vector<1x128xf32>
    %132 = vector.shape_cast %131 : vector<1x128xf32> to vector<1x128xf32>
    %133 = vector.broadcast %132 : vector<1x128xf32> to vector<16x128xf32>
    %134 = tpu.iota {dimensions = array<i32: 1>} : vector<16x384xi32>
    %c256_i32 = arith.constant 256 : i32
    %135 = vector.broadcast %c256_i32 : i32 to vector<16x384xi32>
    %136 = arith.cmpi slt, %134, %135 : vector<16x384xi32>
    %137 = tpu.iota {dimensions = array<i32: 1>} : vector<16x128xi32>
    %c2_i32 = arith.constant 2 : i32
    %138 = vector.broadcast %c2_i32 : i32 to vector<16x128xi32>
    %139 = arith.cmpi sge, %137, %138 : vector<16x128xi32>
    %c4_i32 = arith.constant 4 : i32
    %140 = vector.broadcast %c4_i32 : i32 to vector<16x128xi32>
    %141 = arith.cmpi slt, %137, %140 : vector<16x128xi32>
    %142 = arith.andi %139, %141 : vector<16x128xi1>
    %c0_105 = arith.constant 0 : index
    %c0_106 = arith.constant 0 : index
    %143 = vector.load %arg5[%c0_105, %c0_106] : memref<16x128xf32, #tpu.memory_space<vmem>>, vector<16x128xf32>
    %cst_107 = arith.constant dense<0.000000e+00> : vector<16x512xf32>
    %144 = tpu.matmul %143, %122, %cst_107 {dimension_numbers = #tpu.dot_dimension_numbers<[1], [0], [0], [1], [0, 0, 1, 1], [], []>} : vector<16x128xf32>, vector<128x512xf32>, vector<16x512xf32> -> vector<16x512xf32>
    %145 = arith.addf %144, %127 : vector<16x512xf32>
    %146 = vector.extract_strided_slice %145 {offsets = [0, 0], sizes = [16, 128], strides = [1, 1]} : vector<16x512xf32> to vector<16x128xf32>
    %147 = arith.addf %146, %35 : vector<16x128xf32>
    %cst_108 = arith.constant 0.000000e+00 : f32
    %148 = vector.broadcast %cst_108 : f32 to vector<16x128xf32>
    %149 = arith.maximumf %147, %148 : vector<16x128xf32>
    %cst_109 = arith.constant dense<0.000000e+00> : vector<16x768xf32>
    %150 = tpu.matmul %149, %123, %cst_109 {dimension_numbers = #tpu.dot_dimension_numbers<[1], [0], [0], [1], [0, 0, 1, 1], [], []>} : vector<16x128xf32>, vector<128x768xf32>, vector<16x768xf32> -> vector<16x768xf32>
    %151 = vector.extract_strided_slice %150 {offsets = [0, 0], sizes = [16, 384], strides = [1, 1]} : vector<16x768xf32> to vector<16x384xf32>
    %152 = arith.addf %151, %36 : vector<16x384xf32>
    %153 = vector.extract_strided_slice %152 {offsets = [0, 0], sizes = [16, 128], strides = [1, 1]} : vector<16x384xf32> to vector<16x128xf32>
    %154 = vector.extract_strided_slice %145 {offsets = [0, 128], sizes = [16, 128], strides = [1, 1]} : vector<16x512xf32> to vector<16x128xf32>
    %155 = arith.addf %153, %154 : vector<16x128xf32>
    %156 = arith.negf %155 : vector<16x128xf32>
    %157 = math.exp %156 : vector<16x128xf32>
    %cst_110 = arith.constant 1.000000e+00 : f32
    %158 = vector.broadcast %cst_110 : f32 to vector<16x128xf32>
    %159 = arith.addf %158, %157 : vector<16x128xf32>
    %160 = arith.divf %158, %159 : vector<16x128xf32>
    %161 = vector.extract_strided_slice %152 {offsets = [0, 128], sizes = [16, 128], strides = [1, 1]} : vector<16x384xf32> to vector<16x128xf32>
    %162 = vector.extract_strided_slice %145 {offsets = [0, 256], sizes = [16, 128], strides = [1, 1]} : vector<16x512xf32> to vector<16x128xf32>
    %163 = arith.addf %161, %162 : vector<16x128xf32>
    %164 = arith.negf %163 : vector<16x128xf32>
    %165 = math.exp %164 : vector<16x128xf32>
    %cst_111 = arith.constant 1.000000e+00 : f32
    %166 = vector.broadcast %cst_111 : f32 to vector<16x128xf32>
    %167 = arith.addf %166, %165 : vector<16x128xf32>
    %168 = arith.divf %166, %167 : vector<16x128xf32>
    %169 = vector.extract_strided_slice %152 {offsets = [0, 256], sizes = [16, 128], strides = [1, 1]} : vector<16x384xf32> to vector<16x128xf32>
    %170 = vector.extract_strided_slice %145 {offsets = [0, 384], sizes = [16, 128], strides = [1, 1]} : vector<16x512xf32> to vector<16x128xf32>
    %171 = arith.mulf %160, %170 : vector<16x128xf32>
    %172 = arith.addf %169, %171 : vector<16x128xf32>
    %173 = math.tanh %172 : vector<16x128xf32>
    %cst_112 = arith.constant 1.000000e+00 : f32
    %174 = vector.broadcast %cst_112 : f32 to vector<16x128xf32>
    %175 = arith.subf %174, %168 : vector<16x128xf32>
    %176 = arith.mulf %175, %173 : vector<16x128xf32>
    %177 = arith.mulf %168, %143 : vector<16x128xf32>
    %178 = arith.addf %176, %177 : vector<16x128xf32>
    %179 = vector.extract_strided_slice %150 {offsets = [0, 384], sizes = [16, 384], strides = [1, 1]} : vector<16x768xf32> to vector<16x384xf32>
    %180 = arith.addf %179, %130 : vector<16x384xf32>
    %cst_113 = arith.constant 0.000000e+00 : f32
    %181 = vector.broadcast %cst_113 : f32 to vector<16x384xf32>
    %182 = arith.maximumf %180, %181 : vector<16x384xf32>
    %183 = arith.negf %180 : vector<16x384xf32>
    %184 = math.exp %183 : vector<16x384xf32>
    %cst_114 = arith.constant 1.000000e+00 : f32
    %185 = vector.broadcast %cst_114 : f32 to vector<16x384xf32>
    %186 = arith.addf %185, %184 : vector<16x384xf32>
    %187 = arith.divf %185, %186 : vector<16x384xf32>
    %188 = arith.select %136, %182, %187 : vector<16x384xi1>, vector<16x384xf32>
    %cst_115 = arith.constant dense<0.000000e+00> : vector<16x128xf32>
    %189 = tpu.matmul %188, %124, %cst_115 {dimension_numbers = #tpu.dot_dimension_numbers<[1], [0], [0], [1], [0, 0, 1, 1], [], []>} : vector<16x384xf32>, vector<384x128xf32>, vector<16x128xf32> -> vector<16x128xf32>
    %190 = arith.addf %189, %133 : vector<16x128xf32>
    %191 = arith.negf %190 : vector<16x128xf32>
    %192 = math.exp %191 : vector<16x128xf32>
    %cst_116 = arith.constant 1.000000e+00 : f32
    %193 = vector.broadcast %cst_116 : f32 to vector<16x128xf32>
    %194 = arith.addf %193, %192 : vector<16x128xf32>
    %195 = arith.divf %193, %194 : vector<16x128xf32>
    %196 = arith.select %142, %195, %190 : vector<16x128xi1>, vector<16x128xf32>
    %c0_117 = arith.constant 0 : index
    %c0_118 = arith.constant 0 : index
    %c0_119 = arith.constant 0 : index
    %197 = vector.load %arg19[%c0_117, %c0_118, %c0_119] : memref<6x16x128xf32, #tpu.memory_space<vmem>>, vector<1x16x128xf32>
    %198 = vector.shape_cast %197 : vector<1x16x128xf32> to vector<16x128xf32>
    %199 = vector.shape_cast %149 : vector<16x128xf32> to vector<1x16x128xf32>
    tpu.vector_store %arg19[%c0_117, %c0_118, %c0_119], %199 {strides = array<i32>} : memref<6x16x128xf32, #tpu.memory_space<vmem>>, vector<1x16x128xf32>,
    %c0_120 = arith.constant 0 : index
    %c0_121 = arith.constant 0 : index
    %c0_122 = arith.constant 0 : index
    %200 = vector.load %arg20[%c0_120, %c0_121, %c0_122] : memref<6x16x128xf32, #tpu.memory_space<vmem>>, vector<1x16x128xf32>
    %201 = vector.shape_cast %200 : vector<1x16x128xf32> to vector<16x128xf32>
    %202 = vector.shape_cast %196 : vector<16x128xf32> to vector<1x16x128xf32>
    tpu.vector_store %arg20[%c0_120, %c0_121, %c0_122], %202 {strides = array<i32>} : memref<6x16x128xf32, #tpu.memory_space<vmem>>, vector<1x16x128xf32>,
    %cst_123 = arith.constant dense<0.000000e+00> : vector<16x512xf32>
    %203 = tpu.matmul %178, %122, %cst_123 {dimension_numbers = #tpu.dot_dimension_numbers<[1], [0], [0], [1], [0, 0, 1, 1], [], []>} : vector<16x128xf32>, vector<128x512xf32>, vector<16x512xf32> -> vector<16x512xf32>
    %204 = arith.addf %203, %127 : vector<16x512xf32>
    %205 = vector.extract_strided_slice %204 {offsets = [0, 0], sizes = [16, 128], strides = [1, 1]} : vector<16x512xf32> to vector<16x128xf32>
    %206 = arith.addf %205, %52 : vector<16x128xf32>
    %cst_124 = arith.constant 0.000000e+00 : f32
    %207 = vector.broadcast %cst_124 : f32 to vector<16x128xf32>
    %208 = arith.maximumf %206, %207 : vector<16x128xf32>
    %cst_125 = arith.constant dense<0.000000e+00> : vector<16x768xf32>
    %209 = tpu.matmul %208, %123, %cst_125 {dimension_numbers = #tpu.dot_dimension_numbers<[1], [0], [0], [1], [0, 0, 1, 1], [], []>} : vector<16x128xf32>, vector<128x768xf32>, vector<16x768xf32> -> vector<16x768xf32>
    %210 = vector.extract_strided_slice %209 {offsets = [0, 0], sizes = [16, 384], strides = [1, 1]} : vector<16x768xf32> to vector<16x384xf32>
    %211 = arith.addf %210, %53 : vector<16x384xf32>
    %212 = vector.extract_strided_slice %211 {offsets = [0, 0], sizes = [16, 128], strides = [1, 1]} : vector<16x384xf32> to vector<16x128xf32>
    %213 = vector.extract_strided_slice %204 {offsets = [0, 128], sizes = [16, 128], strides = [1, 1]} : vector<16x512xf32> to vector<16x128xf32>
    %214 = arith.addf %212, %213 : vector<16x128xf32>
    %215 = arith.negf %214 : vector<16x128xf32>
    %216 = math.exp %215 : vector<16x128xf32>
    %cst_126 = arith.constant 1.000000e+00 : f32
    %217 = vector.broadcast %cst_126 : f32 to vector<16x128xf32>
    %218 = arith.addf %217, %216 : vector<16x128xf32>
    %219 = arith.divf %217, %218 : vector<16x128xf32>
    %220 = vector.extract_strided_slice %211 {offsets = [0, 128], sizes = [16, 128], strides = [1, 1]} : vector<16x384xf32> to vector<16x128xf32>
    %221 = vector.extract_strided_slice %204 {offsets = [0, 256], sizes = [16, 128], strides = [1, 1]} : vector<16x512xf32> to vector<16x128xf32>
    %222 = arith.addf %220, %221 : vector<16x128xf32>
    %223 = arith.negf %222 : vector<16x128xf32>
    %224 = math.exp %223 : vector<16x128xf32>
    %cst_127 = arith.constant 1.000000e+00 : f32
    %225 = vector.broadcast %cst_127 : f32 to vector<16x128xf32>
    %226 = arith.addf %225, %224 : vector<16x128xf32>
    %227 = arith.divf %225, %226 : vector<16x128xf32>
    %228 = vector.extract_strided_slice %211 {offsets = [0, 256], sizes = [16, 128], strides = [1, 1]} : vector<16x384xf32> to vector<16x128xf32>
    %229 = vector.extract_strided_slice %204 {offsets = [0, 384], sizes = [16, 128], strides = [1, 1]} : vector<16x512xf32> to vector<16x128xf32>
    %230 = arith.mulf %219, %229 : vector<16x128xf32>
    %231 = arith.addf %228, %230 : vector<16x128xf32>
    %232 = math.tanh %231 : vector<16x128xf32>
    %cst_128 = arith.constant 1.000000e+00 : f32
    %233 = vector.broadcast %cst_128 : f32 to vector<16x128xf32>
    %234 = arith.subf %233, %227 : vector<16x128xf32>
    %235 = arith.mulf %234, %232 : vector<16x128xf32>
    %236 = arith.mulf %227, %178 : vector<16x128xf32>
    %237 = arith.addf %235, %236 : vector<16x128xf32>
    %238 = vector.extract_strided_slice %209 {offsets = [0, 384], sizes = [16, 384], strides = [1, 1]} : vector<16x768xf32> to vector<16x384xf32>
    %239 = arith.addf %238, %130 : vector<16x384xf32>
    %cst_129 = arith.constant 0.000000e+00 : f32
    %240 = vector.broadcast %cst_129 : f32 to vector<16x384xf32>
    %241 = arith.maximumf %239, %240 : vector<16x384xf32>
    %242 = arith.negf %239 : vector<16x384xf32>
    %243 = math.exp %242 : vector<16x384xf32>
    %cst_130 = arith.constant 1.000000e+00 : f32
    %244 = vector.broadcast %cst_130 : f32 to vector<16x384xf32>
    %245 = arith.addf %244, %243 : vector<16x384xf32>
    %246 = arith.divf %244, %245 : vector<16x384xf32>
    %247 = arith.select %136, %241, %246 : vector<16x384xi1>, vector<16x384xf32>
    %cst_131 = arith.constant dense<0.000000e+00> : vector<16x128xf32>
    %248 = tpu.matmul %247, %124, %cst_131 {dimension_numbers = #tpu.dot_dimension_numbers<[1], [0], [0], [1], [0, 0, 1, 1], [], []>} : vector<16x384xf32>, vector<384x128xf32>, vector<16x128xf32> -> vector<16x128xf32>
    %249 = arith.addf %248, %133 : vector<16x128xf32>
    %250 = arith.negf %249 : vector<16x128xf32>
    %251 = math.exp %250 : vector<16x128xf32>
    %cst_132 = arith.constant 1.000000e+00 : f32
    %252 = vector.broadcast %cst_132 : f32 to vector<16x128xf32>
    %253 = arith.addf %252, %251 : vector<16x128xf32>
    %254 = arith.divf %252, %253 : vector<16x128xf32>
    %255 = arith.select %142, %254, %249 : vector<16x128xi1>, vector<16x128xf32>
    %c1_133 = arith.constant 1 : index
    %c0_134 = arith.constant 0 : index
    %c0_135 = arith.constant 0 : index
    %256 = vector.load %arg19[%c1_133, %c0_134, %c0_135] : memref<6x16x128xf32, #tpu.memory_space<vmem>>, vector<1x16x128xf32>
    %257 = vector.shape_cast %256 : vector<1x16x128xf32> to vector<16x128xf32>
    %258 = vector.shape_cast %208 : vector<16x128xf32> to vector<1x16x128xf32>
    tpu.vector_store %arg19[%c1_133, %c0_134, %c0_135], %258 {strides = array<i32>} : memref<6x16x128xf32, #tpu.memory_space<vmem>>, vector<1x16x128xf32>,
    %c1_136 = arith.constant 1 : index
    %c0_137 = arith.constant 0 : index
    %c0_138 = arith.constant 0 : index
    %259 = vector.load %arg20[%c1_136, %c0_137, %c0_138] : memref<6x16x128xf32, #tpu.memory_space<vmem>>, vector<1x16x128xf32>
    %260 = vector.shape_cast %259 : vector<1x16x128xf32> to vector<16x128xf32>
    %261 = vector.shape_cast %255 : vector<16x128xf32> to vector<1x16x128xf32>
    tpu.vector_store %arg20[%c1_136, %c0_137, %c0_138], %261 {strides = array<i32>} : memref<6x16x128xf32, #tpu.memory_space<vmem>>, vector<1x16x128xf32>,
    %cst_139 = arith.constant dense<0.000000e+00> : vector<16x512xf32>
    %262 = tpu.matmul %237, %122, %cst_139 {dimension_numbers = #tpu.dot_dimension_numbers<[1], [0], [0], [1], [0, 0, 1, 1], [], []>} : vector<16x128xf32>, vector<128x512xf32>, vector<16x512xf32> -> vector<16x512xf32>
    %263 = arith.addf %262, %127 : vector<16x512xf32>
    %264 = vector.extract_strided_slice %263 {offsets = [0, 0], sizes = [16, 128], strides = [1, 1]} : vector<16x512xf32> to vector<16x128xf32>
    %265 = arith.addf %264, %69 : vector<16x128xf32>
    %cst_140 = arith.constant 0.000000e+00 : f32
    %266 = vector.broadcast %cst_140 : f32 to vector<16x128xf32>
    %267 = arith.maximumf %265, %266 : vector<16x128xf32>
    %cst_141 = arith.constant dense<0.000000e+00> : vector<16x768xf32>
    %268 = tpu.matmul %267, %123, %cst_141 {dimension_numbers = #tpu.dot_dimension_numbers<[1], [0], [0], [1], [0, 0, 1, 1], [], []>} : vector<16x128xf32>, vector<128x768xf32>, vector<16x768xf32> -> vector<16x768xf32>
    %269 = vector.extract_strided_slice %268 {offsets = [0, 0], sizes = [16, 384], strides = [1, 1]} : vector<16x768xf32> to vector<16x384xf32>
    %270 = arith.addf %269, %70 : vector<16x384xf32>
    %271 = vector.extract_strided_slice %270 {offsets = [0, 0], sizes = [16, 128], strides = [1, 1]} : vector<16x384xf32> to vector<16x128xf32>
    %272 = vector.extract_strided_slice %263 {offsets = [0, 128], sizes = [16, 128], strides = [1, 1]} : vector<16x512xf32> to vector<16x128xf32>
    %273 = arith.addf %271, %272 : vector<16x128xf32>
    %274 = arith.negf %273 : vector<16x128xf32>
    %275 = math.exp %274 : vector<16x128xf32>
    %cst_142 = arith.constant 1.000000e+00 : f32
    %276 = vector.broadcast %cst_142 : f32 to vector<16x128xf32>
    %277 = arith.addf %276, %275 : vector<16x128xf32>
    %278 = arith.divf %276, %277 : vector<16x128xf32>
    %279 = vector.extract_strided_slice %270 {offsets = [0, 128], sizes = [16, 128], strides = [1, 1]} : vector<16x384xf32> to vector<16x128xf32>
    %280 = vector.extract_strided_slice %263 {offsets = [0, 256], sizes = [16, 128], strides = [1, 1]} : vector<16x512xf32> to vector<16x128xf32>
    %281 = arith.addf %279, %280 : vector<16x128xf32>
    %282 = arith.negf %281 : vector<16x128xf32>
    %283 = math.exp %282 : vector<16x128xf32>
    %cst_143 = arith.constant 1.000000e+00 : f32
    %284 = vector.broadcast %cst_143 : f32 to vector<16x128xf32>
    %285 = arith.addf %284, %283 : vector<16x128xf32>
    %286 = arith.divf %284, %285 : vector<16x128xf32>
    %287 = vector.extract_strided_slice %270 {offsets = [0, 256], sizes = [16, 128], strides = [1, 1]} : vector<16x384xf32> to vector<16x128xf32>
    %288 = vector.extract_strided_slice %263 {offsets = [0, 384], sizes = [16, 128], strides = [1, 1]} : vector<16x512xf32> to vector<16x128xf32>
    %289 = arith.mulf %278, %288 : vector<16x128xf32>
    %290 = arith.addf %287, %289 : vector<16x128xf32>
    %291 = math.tanh %290 : vector<16x128xf32>
    %cst_144 = arith.constant 1.000000e+00 : f32
    %292 = vector.broadcast %cst_144 : f32 to vector<16x128xf32>
    %293 = arith.subf %292, %286 : vector<16x128xf32>
    %294 = arith.mulf %293, %291 : vector<16x128xf32>
    %295 = arith.mulf %286, %237 : vector<16x128xf32>
    %296 = arith.addf %294, %295 : vector<16x128xf32>
    %297 = vector.extract_strided_slice %268 {offsets = [0, 384], sizes = [16, 384], strides = [1, 1]} : vector<16x768xf32> to vector<16x384xf32>
    %298 = arith.addf %297, %130 : vector<16x384xf32>
    %cst_145 = arith.constant 0.000000e+00 : f32
    %299 = vector.broadcast %cst_145 : f32 to vector<16x384xf32>
    %300 = arith.maximumf %298, %299 : vector<16x384xf32>
    %301 = arith.negf %298 : vector<16x384xf32>
    %302 = math.exp %301 : vector<16x384xf32>
    %cst_146 = arith.constant 1.000000e+00 : f32
    %303 = vector.broadcast %cst_146 : f32 to vector<16x384xf32>
    %304 = arith.addf %303, %302 : vector<16x384xf32>
    %305 = arith.divf %303, %304 : vector<16x384xf32>
    %306 = arith.select %136, %300, %305 : vector<16x384xi1>, vector<16x384xf32>
    %cst_147 = arith.constant dense<0.000000e+00> : vector<16x128xf32>
    %307 = tpu.matmul %306, %124, %cst_147 {dimension_numbers = #tpu.dot_dimension_numbers<[1], [0], [0], [1], [0, 0, 1, 1], [], []>} : vector<16x384xf32>, vector<384x128xf32>, vector<16x128xf32> -> vector<16x128xf32>
    %308 = arith.addf %307, %133 : vector<16x128xf32>
    %309 = arith.negf %308 : vector<16x128xf32>
    %310 = math.exp %309 : vector<16x128xf32>
    %cst_148 = arith.constant 1.000000e+00 : f32
    %311 = vector.broadcast %cst_148 : f32 to vector<16x128xf32>
    %312 = arith.addf %311, %310 : vector<16x128xf32>
    %313 = arith.divf %311, %312 : vector<16x128xf32>
    %314 = arith.select %142, %313, %308 : vector<16x128xi1>, vector<16x128xf32>
    %c2_149 = arith.constant 2 : index
    %c0_150 = arith.constant 0 : index
    %c0_151 = arith.constant 0 : index
    %315 = vector.load %arg19[%c2_149, %c0_150, %c0_151] : memref<6x16x128xf32, #tpu.memory_space<vmem>>, vector<1x16x128xf32>
    %316 = vector.shape_cast %315 : vector<1x16x128xf32> to vector<16x128xf32>
    %317 = vector.shape_cast %267 : vector<16x128xf32> to vector<1x16x128xf32>
    tpu.vector_store %arg19[%c2_149, %c0_150, %c0_151], %317 {strides = array<i32>} : memref<6x16x128xf32, #tpu.memory_space<vmem>>, vector<1x16x128xf32>,
    %c2_152 = arith.constant 2 : index
    %c0_153 = arith.constant 0 : index
    %c0_154 = arith.constant 0 : index
    %318 = vector.load %arg20[%c2_152, %c0_153, %c0_154] : memref<6x16x128xf32, #tpu.memory_space<vmem>>, vector<1x16x128xf32>
    %319 = vector.shape_cast %318 : vector<1x16x128xf32> to vector<16x128xf32>
    %320 = vector.shape_cast %314 : vector<16x128xf32> to vector<1x16x128xf32>
    tpu.vector_store %arg20[%c2_152, %c0_153, %c0_154], %320 {strides = array<i32>} : memref<6x16x128xf32, #tpu.memory_space<vmem>>, vector<1x16x128xf32>,
    %cst_155 = arith.constant dense<0.000000e+00> : vector<16x512xf32>
    %321 = tpu.matmul %296, %122, %cst_155 {dimension_numbers = #tpu.dot_dimension_numbers<[1], [0], [0], [1], [0, 0, 1, 1], [], []>} : vector<16x128xf32>, vector<128x512xf32>, vector<16x512xf32> -> vector<16x512xf32>
    %322 = arith.addf %321, %127 : vector<16x512xf32>
    %323 = vector.extract_strided_slice %322 {offsets = [0, 0], sizes = [16, 128], strides = [1, 1]} : vector<16x512xf32> to vector<16x128xf32>
    %324 = arith.addf %323, %86 : vector<16x128xf32>
    %cst_156 = arith.constant 0.000000e+00 : f32
    %325 = vector.broadcast %cst_156 : f32 to vector<16x128xf32>
    %326 = arith.maximumf %324, %325 : vector<16x128xf32>
    %cst_157 = arith.constant dense<0.000000e+00> : vector<16x768xf32>
    %327 = tpu.matmul %326, %123, %cst_157 {dimension_numbers = #tpu.dot_dimension_numbers<[1], [0], [0], [1], [0, 0, 1, 1], [], []>} : vector<16x128xf32>, vector<128x768xf32>, vector<16x768xf32> -> vector<16x768xf32>
    %328 = vector.extract_strided_slice %327 {offsets = [0, 0], sizes = [16, 384], strides = [1, 1]} : vector<16x768xf32> to vector<16x384xf32>
    %329 = arith.addf %328, %87 : vector<16x384xf32>
    %330 = vector.extract_strided_slice %329 {offsets = [0, 0], sizes = [16, 128], strides = [1, 1]} : vector<16x384xf32> to vector<16x128xf32>
    %331 = vector.extract_strided_slice %322 {offsets = [0, 128], sizes = [16, 128], strides = [1, 1]} : vector<16x512xf32> to vector<16x128xf32>
    %332 = arith.addf %330, %331 : vector<16x128xf32>
    %333 = arith.negf %332 : vector<16x128xf32>
    %334 = math.exp %333 : vector<16x128xf32>
    %cst_158 = arith.constant 1.000000e+00 : f32
    %335 = vector.broadcast %cst_158 : f32 to vector<16x128xf32>
    %336 = arith.addf %335, %334 : vector<16x128xf32>
    %337 = arith.divf %335, %336 : vector<16x128xf32>
    %338 = vector.extract_strided_slice %329 {offsets = [0, 128], sizes = [16, 128], strides = [1, 1]} : vector<16x384xf32> to vector<16x128xf32>
    %339 = vector.extract_strided_slice %322 {offsets = [0, 256], sizes = [16, 128], strides = [1, 1]} : vector<16x512xf32> to vector<16x128xf32>
    %340 = arith.addf %338, %339 : vector<16x128xf32>
    %341 = arith.negf %340 : vector<16x128xf32>
    %342 = math.exp %341 : vector<16x128xf32>
    %cst_159 = arith.constant 1.000000e+00 : f32
    %343 = vector.broadcast %cst_159 : f32 to vector<16x128xf32>
    %344 = arith.addf %343, %342 : vector<16x128xf32>
    %345 = arith.divf %343, %344 : vector<16x128xf32>
    %346 = vector.extract_strided_slice %329 {offsets = [0, 256], sizes = [16, 128], strides = [1, 1]} : vector<16x384xf32> to vector<16x128xf32>
    %347 = vector.extract_strided_slice %322 {offsets = [0, 384], sizes = [16, 128], strides = [1, 1]} : vector<16x512xf32> to vector<16x128xf32>
    %348 = arith.mulf %337, %347 : vector<16x128xf32>
    %349 = arith.addf %346, %348 : vector<16x128xf32>
    %350 = math.tanh %349 : vector<16x128xf32>
    %cst_160 = arith.constant 1.000000e+00 : f32
    %351 = vector.broadcast %cst_160 : f32 to vector<16x128xf32>
    %352 = arith.subf %351, %345 : vector<16x128xf32>
    %353 = arith.mulf %352, %350 : vector<16x128xf32>
    %354 = arith.mulf %345, %296 : vector<16x128xf32>
    %355 = arith.addf %353, %354 : vector<16x128xf32>
    %356 = vector.extract_strided_slice %327 {offsets = [0, 384], sizes = [16, 384], strides = [1, 1]} : vector<16x768xf32> to vector<16x384xf32>
    %357 = arith.addf %356, %130 : vector<16x384xf32>
    %cst_161 = arith.constant 0.000000e+00 : f32
    %358 = vector.broadcast %cst_161 : f32 to vector<16x384xf32>
    %359 = arith.maximumf %357, %358 : vector<16x384xf32>
    %360 = arith.negf %357 : vector<16x384xf32>
    %361 = math.exp %360 : vector<16x384xf32>
    %cst_162 = arith.constant 1.000000e+00 : f32
    %362 = vector.broadcast %cst_162 : f32 to vector<16x384xf32>
    %363 = arith.addf %362, %361 : vector<16x384xf32>
    %364 = arith.divf %362, %363 : vector<16x384xf32>
    %365 = arith.select %136, %359, %364 : vector<16x384xi1>, vector<16x384xf32>
    %cst_163 = arith.constant dense<0.000000e+00> : vector<16x128xf32>
    %366 = tpu.matmul %365, %124, %cst_163 {dimension_numbers = #tpu.dot_dimension_numbers<[1], [0], [0], [1], [0, 0, 1, 1], [], []>} : vector<16x384xf32>, vector<384x128xf32>, vector<16x128xf32> -> vector<16x128xf32>
    %367 = arith.addf %366, %133 : vector<16x128xf32>
    %368 = arith.negf %367 : vector<16x128xf32>
    %369 = math.exp %368 : vector<16x128xf32>
    %cst_164 = arith.constant 1.000000e+00 : f32
    %370 = vector.broadcast %cst_164 : f32 to vector<16x128xf32>
    %371 = arith.addf %370, %369 : vector<16x128xf32>
    %372 = arith.divf %370, %371 : vector<16x128xf32>
    %373 = arith.select %142, %372, %367 : vector<16x128xi1>, vector<16x128xf32>
    %c3_165 = arith.constant 3 : index
    %c0_166 = arith.constant 0 : index
    %c0_167 = arith.constant 0 : index
    %374 = vector.load %arg19[%c3_165, %c0_166, %c0_167] : memref<6x16x128xf32, #tpu.memory_space<vmem>>, vector<1x16x128xf32>
    %375 = vector.shape_cast %374 : vector<1x16x128xf32> to vector<16x128xf32>
    %376 = vector.shape_cast %326 : vector<16x128xf32> to vector<1x16x128xf32>
    tpu.vector_store %arg19[%c3_165, %c0_166, %c0_167], %376 {strides = array<i32>} : memref<6x16x128xf32, #tpu.memory_space<vmem>>, vector<1x16x128xf32>,
    %c3_168 = arith.constant 3 : index
    %c0_169 = arith.constant 0 : index
    %c0_170 = arith.constant 0 : index
    %377 = vector.load %arg20[%c3_168, %c0_169, %c0_170] : memref<6x16x128xf32, #tpu.memory_space<vmem>>, vector<1x16x128xf32>
    %378 = vector.shape_cast %377 : vector<1x16x128xf32> to vector<16x128xf32>
    %379 = vector.shape_cast %373 : vector<16x128xf32> to vector<1x16x128xf32>
    tpu.vector_store %arg20[%c3_168, %c0_169, %c0_170], %379 {strides = array<i32>} : memref<6x16x128xf32, #tpu.memory_space<vmem>>, vector<1x16x128xf32>,
    %cst_171 = arith.constant dense<0.000000e+00> : vector<16x512xf32>
    %380 = tpu.matmul %355, %122, %cst_171 {dimension_numbers = #tpu.dot_dimension_numbers<[1], [0], [0], [1], [0, 0, 1, 1], [], []>} : vector<16x128xf32>, vector<128x512xf32>, vector<16x512xf32> -> vector<16x512xf32>
    %381 = arith.addf %380, %127 : vector<16x512xf32>
    %382 = vector.extract_strided_slice %381 {offsets = [0, 0], sizes = [16, 128], strides = [1, 1]} : vector<16x512xf32> to vector<16x128xf32>
    %383 = arith.addf %382, %103 : vector<16x128xf32>
    %cst_172 = arith.constant 0.000000e+00 : f32
    %384 = vector.broadcast %cst_172 : f32 to vector<16x128xf32>
    %385 = arith.maximumf %383, %384 : vector<16x128xf32>
    %cst_173 = arith.constant dense<0.000000e+00> : vector<16x768xf32>
    %386 = tpu.matmul %385, %123, %cst_173 {dimension_numbers = #tpu.dot_dimension_numbers<[1], [0], [0], [1], [0, 0, 1, 1], [], []>} : vector<16x128xf32>, vector<128x768xf32>, vector<16x768xf32> -> vector<16x768xf32>
    %387 = vector.extract_strided_slice %386 {offsets = [0, 0], sizes = [16, 384], strides = [1, 1]} : vector<16x768xf32> to vector<16x384xf32>
    %388 = arith.addf %387, %104 : vector<16x384xf32>
    %389 = vector.extract_strided_slice %388 {offsets = [0, 0], sizes = [16, 128], strides = [1, 1]} : vector<16x384xf32> to vector<16x128xf32>
    %390 = vector.extract_strided_slice %381 {offsets = [0, 128], sizes = [16, 128], strides = [1, 1]} : vector<16x512xf32> to vector<16x128xf32>
    %391 = arith.addf %389, %390 : vector<16x128xf32>
    %392 = arith.negf %391 : vector<16x128xf32>
    %393 = math.exp %392 : vector<16x128xf32>
    %cst_174 = arith.constant 1.000000e+00 : f32
    %394 = vector.broadcast %cst_174 : f32 to vector<16x128xf32>
    %395 = arith.addf %394, %393 : vector<16x128xf32>
    %396 = arith.divf %394, %395 : vector<16x128xf32>
    %397 = vector.extract_strided_slice %388 {offsets = [0, 128], sizes = [16, 128], strides = [1, 1]} : vector<16x384xf32> to vector<16x128xf32>
    %398 = vector.extract_strided_slice %381 {offsets = [0, 256], sizes = [16, 128], strides = [1, 1]} : vector<16x512xf32> to vector<16x128xf32>
    %399 = arith.addf %397, %398 : vector<16x128xf32>
    %400 = arith.negf %399 : vector<16x128xf32>
    %401 = math.exp %400 : vector<16x128xf32>
    %cst_175 = arith.constant 1.000000e+00 : f32
    %402 = vector.broadcast %cst_175 : f32 to vector<16x128xf32>
    %403 = arith.addf %402, %401 : vector<16x128xf32>
    %404 = arith.divf %402, %403 : vector<16x128xf32>
    %405 = vector.extract_strided_slice %388 {offsets = [0, 256], sizes = [16, 128], strides = [1, 1]} : vector<16x384xf32> to vector<16x128xf32>
    %406 = vector.extract_strided_slice %381 {offsets = [0, 384], sizes = [16, 128], strides = [1, 1]} : vector<16x512xf32> to vector<16x128xf32>
    %407 = arith.mulf %396, %406 : vector<16x128xf32>
    %408 = arith.addf %405, %407 : vector<16x128xf32>
    %409 = math.tanh %408 : vector<16x128xf32>
    %cst_176 = arith.constant 1.000000e+00 : f32
    %410 = vector.broadcast %cst_176 : f32 to vector<16x128xf32>
    %411 = arith.subf %410, %404 : vector<16x128xf32>
    %412 = arith.mulf %411, %409 : vector<16x128xf32>
    %413 = arith.mulf %404, %355 : vector<16x128xf32>
    %414 = arith.addf %412, %413 : vector<16x128xf32>
    %415 = vector.extract_strided_slice %386 {offsets = [0, 384], sizes = [16, 384], strides = [1, 1]} : vector<16x768xf32> to vector<16x384xf32>
    %416 = arith.addf %415, %130 : vector<16x384xf32>
    %cst_177 = arith.constant 0.000000e+00 : f32
    %417 = vector.broadcast %cst_177 : f32 to vector<16x384xf32>
    %418 = arith.maximumf %416, %417 : vector<16x384xf32>
    %419 = arith.negf %416 : vector<16x384xf32>
    %420 = math.exp %419 : vector<16x384xf32>
    %cst_178 = arith.constant 1.000000e+00 : f32
    %421 = vector.broadcast %cst_178 : f32 to vector<16x384xf32>
    %422 = arith.addf %421, %420 : vector<16x384xf32>
    %423 = arith.divf %421, %422 : vector<16x384xf32>
    %424 = arith.select %136, %418, %423 : vector<16x384xi1>, vector<16x384xf32>
    %cst_179 = arith.constant dense<0.000000e+00> : vector<16x128xf32>
    %425 = tpu.matmul %424, %124, %cst_179 {dimension_numbers = #tpu.dot_dimension_numbers<[1], [0], [0], [1], [0, 0, 1, 1], [], []>} : vector<16x384xf32>, vector<384x128xf32>, vector<16x128xf32> -> vector<16x128xf32>
    %426 = arith.addf %425, %133 : vector<16x128xf32>
    %427 = arith.negf %426 : vector<16x128xf32>
    %428 = math.exp %427 : vector<16x128xf32>
    %cst_180 = arith.constant 1.000000e+00 : f32
    %429 = vector.broadcast %cst_180 : f32 to vector<16x128xf32>
    %430 = arith.addf %429, %428 : vector<16x128xf32>
    %431 = arith.divf %429, %430 : vector<16x128xf32>
    %432 = arith.select %142, %431, %426 : vector<16x128xi1>, vector<16x128xf32>
    %c4_181 = arith.constant 4 : index
    %c0_182 = arith.constant 0 : index
    %c0_183 = arith.constant 0 : index
    %433 = vector.load %arg19[%c4_181, %c0_182, %c0_183] : memref<6x16x128xf32, #tpu.memory_space<vmem>>, vector<1x16x128xf32>
    %434 = vector.shape_cast %433 : vector<1x16x128xf32> to vector<16x128xf32>
    %435 = vector.shape_cast %385 : vector<16x128xf32> to vector<1x16x128xf32>
    tpu.vector_store %arg19[%c4_181, %c0_182, %c0_183], %435 {strides = array<i32>} : memref<6x16x128xf32, #tpu.memory_space<vmem>>, vector<1x16x128xf32>,
    %c4_184 = arith.constant 4 : index
    %c0_185 = arith.constant 0 : index
    %c0_186 = arith.constant 0 : index
    %436 = vector.load %arg20[%c4_184, %c0_185, %c0_186] : memref<6x16x128xf32, #tpu.memory_space<vmem>>, vector<1x16x128xf32>
    %437 = vector.shape_cast %436 : vector<1x16x128xf32> to vector<16x128xf32>
    %438 = vector.shape_cast %432 : vector<16x128xf32> to vector<1x16x128xf32>
    tpu.vector_store %arg20[%c4_184, %c0_185, %c0_186], %438 {strides = array<i32>} : memref<6x16x128xf32, #tpu.memory_space<vmem>>, vector<1x16x128xf32>,
    %cst_187 = arith.constant dense<0.000000e+00> : vector<16x512xf32>
    %439 = tpu.matmul %414, %122, %cst_187 {dimension_numbers = #tpu.dot_dimension_numbers<[1], [0], [0], [1], [0, 0, 1, 1], [], []>} : vector<16x128xf32>, vector<128x512xf32>, vector<16x512xf32> -> vector<16x512xf32>
    %440 = arith.addf %439, %127 : vector<16x512xf32>
    %441 = vector.extract_strided_slice %440 {offsets = [0, 0], sizes = [16, 128], strides = [1, 1]} : vector<16x512xf32> to vector<16x128xf32>
    %442 = arith.addf %441, %120 : vector<16x128xf32>
    %cst_188 = arith.constant 0.000000e+00 : f32
    %443 = vector.broadcast %cst_188 : f32 to vector<16x128xf32>
    %444 = arith.maximumf %442, %443 : vector<16x128xf32>
    %cst_189 = arith.constant dense<0.000000e+00> : vector<16x768xf32>
    %445 = tpu.matmul %444, %123, %cst_189 {dimension_numbers = #tpu.dot_dimension_numbers<[1], [0], [0], [1], [0, 0, 1, 1], [], []>} : vector<16x128xf32>, vector<128x768xf32>, vector<16x768xf32> -> vector<16x768xf32>
    %446 = vector.extract_strided_slice %445 {offsets = [0, 0], sizes = [16, 384], strides = [1, 1]} : vector<16x768xf32> to vector<16x384xf32>
    %447 = arith.addf %446, %121 : vector<16x384xf32>
    %448 = vector.extract_strided_slice %447 {offsets = [0, 0], sizes = [16, 128], strides = [1, 1]} : vector<16x384xf32> to vector<16x128xf32>
    %449 = vector.extract_strided_slice %440 {offsets = [0, 128], sizes = [16, 128], strides = [1, 1]} : vector<16x512xf32> to vector<16x128xf32>
    %450 = arith.addf %448, %449 : vector<16x128xf32>
    %451 = arith.negf %450 : vector<16x128xf32>
    %452 = math.exp %451 : vector<16x128xf32>
    %cst_190 = arith.constant 1.000000e+00 : f32
    %453 = vector.broadcast %cst_190 : f32 to vector<16x128xf32>
    %454 = arith.addf %453, %452 : vector<16x128xf32>
    %455 = arith.divf %453, %454 : vector<16x128xf32>
    %456 = vector.extract_strided_slice %447 {offsets = [0, 128], sizes = [16, 128], strides = [1, 1]} : vector<16x384xf32> to vector<16x128xf32>
    %457 = vector.extract_strided_slice %440 {offsets = [0, 256], sizes = [16, 128], strides = [1, 1]} : vector<16x512xf32> to vector<16x128xf32>
    %458 = arith.addf %456, %457 : vector<16x128xf32>
    %459 = arith.negf %458 : vector<16x128xf32>
    %460 = math.exp %459 : vector<16x128xf32>
    %cst_191 = arith.constant 1.000000e+00 : f32
    %461 = vector.broadcast %cst_191 : f32 to vector<16x128xf32>
    %462 = arith.addf %461, %460 : vector<16x128xf32>
    %463 = arith.divf %461, %462 : vector<16x128xf32>
    %464 = vector.extract_strided_slice %447 {offsets = [0, 256], sizes = [16, 128], strides = [1, 1]} : vector<16x384xf32> to vector<16x128xf32>
    %465 = vector.extract_strided_slice %440 {offsets = [0, 384], sizes = [16, 128], strides = [1, 1]} : vector<16x512xf32> to vector<16x128xf32>
    %466 = arith.mulf %455, %465 : vector<16x128xf32>
    %467 = arith.addf %464, %466 : vector<16x128xf32>
    %468 = math.tanh %467 : vector<16x128xf32>
    %cst_192 = arith.constant 1.000000e+00 : f32
    %469 = vector.broadcast %cst_192 : f32 to vector<16x128xf32>
    %470 = arith.subf %469, %463 : vector<16x128xf32>
    %471 = arith.mulf %470, %468 : vector<16x128xf32>
    %472 = arith.mulf %463, %414 : vector<16x128xf32>
    %473 = arith.addf %471, %472 : vector<16x128xf32>
    %474 = vector.extract_strided_slice %445 {offsets = [0, 384], sizes = [16, 384], strides = [1, 1]} : vector<16x768xf32> to vector<16x384xf32>
    %475 = arith.addf %474, %130 : vector<16x384xf32>
    %cst_193 = arith.constant 0.000000e+00 : f32
    %476 = vector.broadcast %cst_193 : f32 to vector<16x384xf32>
    %477 = arith.maximumf %475, %476 : vector<16x384xf32>
    %478 = arith.negf %475 : vector<16x384xf32>
    %479 = math.exp %478 : vector<16x384xf32>
    %cst_194 = arith.constant 1.000000e+00 : f32
    %480 = vector.broadcast %cst_194 : f32 to vector<16x384xf32>
    %481 = arith.addf %480, %479 : vector<16x384xf32>
    %482 = arith.divf %480, %481 : vector<16x384xf32>
    %483 = arith.select %136, %477, %482 : vector<16x384xi1>, vector<16x384xf32>
    %cst_195 = arith.constant dense<0.000000e+00> : vector<16x128xf32>
    %484 = tpu.matmul %483, %124, %cst_195 {dimension_numbers = #tpu.dot_dimension_numbers<[1], [0], [0], [1], [0, 0, 1, 1], [], []>} : vector<16x384xf32>, vector<384x128xf32>, vector<16x128xf32> -> vector<16x128xf32>
    %485 = arith.addf %484, %133 : vector<16x128xf32>
    %486 = arith.negf %485 : vector<16x128xf32>
    %487 = math.exp %486 : vector<16x128xf32>
    %cst_196 = arith.constant 1.000000e+00 : f32
    %488 = vector.broadcast %cst_196 : f32 to vector<16x128xf32>
    %489 = arith.addf %488, %487 : vector<16x128xf32>
    %490 = arith.divf %488, %489 : vector<16x128xf32>
    %491 = arith.select %142, %490, %485 : vector<16x128xi1>, vector<16x128xf32>
    %c5_197 = arith.constant 5 : index
    %c0_198 = arith.constant 0 : index
    %c0_199 = arith.constant 0 : index
    %492 = vector.load %arg19[%c5_197, %c0_198, %c0_199] : memref<6x16x128xf32, #tpu.memory_space<vmem>>, vector<1x16x128xf32>
    %493 = vector.shape_cast %492 : vector<1x16x128xf32> to vector<16x128xf32>
    %494 = vector.shape_cast %444 : vector<16x128xf32> to vector<1x16x128xf32>
    tpu.vector_store %arg19[%c5_197, %c0_198, %c0_199], %494 {strides = array<i32>} : memref<6x16x128xf32, #tpu.memory_space<vmem>>, vector<1x16x128xf32>,
    %c5_200 = arith.constant 5 : index
    %c0_201 = arith.constant 0 : index
    %c0_202 = arith.constant 0 : index
    %495 = vector.load %arg20[%c5_200, %c0_201, %c0_202] : memref<6x16x128xf32, #tpu.memory_space<vmem>>, vector<1x16x128xf32>
    %496 = vector.shape_cast %495 : vector<1x16x128xf32> to vector<16x128xf32>
    %497 = vector.shape_cast %491 : vector<16x128xf32> to vector<1x16x128xf32>
    tpu.vector_store %arg20[%c5_200, %c0_201, %c0_202], %497 {strides = array<i32>} : memref<6x16x128xf32, #tpu.memory_space<vmem>>, vector<1x16x128xf32>,
    %c0_203 = arith.constant 0 : index
    %c0_204 = arith.constant 0 : index
    %498 = vector.load %arg21[%c0_203, %c0_204] : memref<16x128xf32, #tpu.memory_space<vmem>>, vector<16x128xf32>
    tpu.vector_store %arg21[%c0_203, %c0_204], %473 {strides = array<i32>} : memref<16x128xf32, #tpu.memory_space<vmem>>, vector<16x128xf32>,
    return
  }
}

</mosaic_0001>

<bundles_post_ra>
// kernel: covid_rnn_pallas.1
= control target key start
LH: loop header
LB: loop body
LE: loop exit
PB: predicated region body
PF: predicated region fallthrough
CT: control target
= control target key end

     0   :  { %s13017_s0 = inlined_call_operand.vmem [shape: f32[96,8], index: 0, kind: input, shape index: {}]   ;;  %s13018_s1 = inlined_call_operand.hbm [shape: f32[6,16,16], index: 1, kind: input, shape index: {}]   ;;  %s13019_s2 = inlined_call_operand.vmem [shape: f32[96,5], index: 2, kind: input, shape index: {}]   ;;  %s13020_s3 = inlined_call_operand.vmem [shape: f32[6,32,16], index: 3, kind: input, shape index: {}]   ;;  %s13021_s4 = inlined_call_operand.hbm [shape: f32[6,1,16], index: 4, kind: input, shape index: {}]   ;;  %s13022_s5 = inlined_call_operand.hbm [shape: f32[16,128], index: 5, kind: input, shape index: {}]   ;;  %s13023_s6 = inlined_call_operand.hbm [shape: f32[8,32], index: 6, kind: input, shape index: {}]   ;;  %s13024_s7 = inlined_call_operand.hbm [shape: f32[1,32], index: 7, kind: input, shape index: {}]   ;;  %s13025_s8 = inlined_call_operand.hbm [shape: f32[32,128], index: 8, kind: input, shape index: {}]   ;;  %s13026_s9 = inlined_call_operand.hbm [shape: f32[1,128], index: 9, kind: input, shape index: {}]   ;;  %s13027_s10 = inlined_call_operand.vmem [shape: f32[16,128], index: 10, kind: input, shape index: {}]   ;;  %s13028_s11 = inlined_call_operand.hbm [shape: f32[5,384], index: 11, kind: input, shape index: {}]   ;;  %s13029_s12 = inlined_call_operand.hbm [shape: f32[1,384], index: 12, kind: input, shape index: {}]   ;;  %s13030_s13 = inlined_call_operand.vmem [shape: f32[128,512], index: 13, kind: input, shape index: {}]   ;;  %s13031_s14 = inlined_call_operand.hbm [shape: f32[1,512], index: 14, kind: input, shape index: {}]   ;;  %s13032_s15 = inlined_call_operand.hbm [shape: f32[128,768], index: 15, kind: input, shape index: {}]   ;;  %s13033_s16 = inlined_call_operand.hbm [shape: f32[1,384], index: 16, kind: input, shape index: {}]   ;;  %s13034_s17 = inlined_call_operand.hbm [shape: f32[384,128], index: 17, kind: input, shape index: {}]   ;;  %s13035_s18 = inlined_call_operand.hbm [shape: f32[1,128], index: 18, kind: input, shape index: {}]   ;;  %s13036_s19 = inlined_call_operand.hbm [shape: f32[6,16,128], index: 19, kind: output, shape index: {0}]   ;;  %s13037_s20 = inlined_call_operand.hbm [shape: f32[6,16,128], index: 20, kind: output, shape index: {1}]   ;;  %s13038_s21 = inlined_call_operand.hbm [shape: f32[16,128], index: 21, kind: output, shape index: {2}]  }
   0x1   :  { %13427 = sst [smem:[#allocation165_spill]] %s13017_s0 }
   0x2   :  { %13428 = sst [smem:[#allocation166_spill]] %s13018_s1 }
   0x3   :  { %13429 = sst [smem:[#allocation167_spill]] %s13019_s2 }
   0x4   :  { %13430 = sst [smem:[#allocation168_spill]] %s13020_s3 }
   0x5   :  { %13431 = sst [smem:[#allocation169_spill]] %s13021_s4 }
   0x6   :  { %13432 = sst [smem:[#allocation170_spill]] %s13022_s5 }
   0x7   :  { %27 = vsyncpa [#allocation3], 0 }
   0x8   :  { %28 = vsyncpa [#allocation6], 0 }
   0x9   :  { %29 = vsyncpa [#allocation9], 0 }
   0xa   :  { %30 = vsyncpa [#allocation12], 0 }
   0xb   :  { %31 = vsyncpa [#allocation15], 0 }
   0xc   :  { %32 = vsyncpa [#allocation18], 0 }
   0xd   :  { %33 = vsyncpa [#allocation21], 0 }
   0xe   :  { %34 = vsyncpa [#allocation24], 0 }
   0xf   :  { %35 = vsyncpa [#allocation4], 0 }
  0x10   :  { %36 = vsyncpa [#allocation27], 0  ;;  %s8978_s2 = smov [#allocation5]  }
  0x11   :  { %s60_s25 = sshll.u32 %s8978_s2, 4  ;;  %s61_s25 = int_to_ptr.vmem [resolvable:$true] %s60_s25 }
  0x12   :  { %s8626_s26 = scalar_lea.vmem %s61_s25, 96  ;;  %p8631_p1 = scmp.lt.s32.totalorder %s61_s25, %s61_s25 }
  0x13   :  { %p8627_p0 = scmp.ne.s32.totalorder %s61_s25, %s8626_s26  ;;  %p8632_p2 = scmp.lt.s32.totalorder %s8626_s26, %s8626_s26 }
  0x15   :  { %p8633_p3 = por %p8632_p2, %p8631_p1 }
  0x17   :  { %p8634_p4 = pnand %p8633_p3, %p8627_p0 }
  0x19   :  { %8637 = shalt.err (!%p8634_p4)
}
  0x1a   :  { %s8979_s27 = smov 16   ;;  %s8980_s3 = smov 1  }
  0x1b   :  { %s13433_s0 = sld [smem:[#allocation169_spill]]  ;;  %s8981_s4 = smov [#allocation8]  }
  0x1c   :  { %s85_s30 = sshll.u32 %s8981_s4, 4  ;;  %s86_s30 = int_to_ptr.vmem [resolvable:$true] %s85_s30 }
  0x1d   :  { %s8646_s5 = scalar_lea.vmem %s86_s30, 128  ;;  %p8651_p6 = scmp.lt.s32.totalorder %s86_s30, %s86_s30 }
  0x1e   :  { %p8647_p5 = scmp.ne.s32.totalorder %s86_s30, %s8646_s5  ;;  %p8652_p7 = scmp.lt.s32.totalorder %s8646_s5, %s8646_s5 }
  0x20   :  { %p8653_p8 = por %p8652_p7, %p8651_p6 }
  0x21   :  { %66 = dma.hbm_to_vmem [thread:$0]  %s13433_s0, 96, %s61_s25, [#allocation6], %s8979_s27, %s8979_s27, %s8980_s3  }
  0x22   :  { %p8654_p9 = pnand %p8653_p8, %p8647_p5 }
  0x24   :  { %8657 = shalt.err (!%p8654_p9)
}
  0x25   :  { %88 = dma.hbm_to_vmem [thread:$0]  %s13023_s6, 128, %s86_s30, [#allocation9]  }
  0x26   :  { %s8982_s1 = smov [#allocation11]   ;;  %s8983_s2 = smov [#allocation14]  }
  0x27   :  { %s104_s24 = sshll.u32 %s8982_s1, 4  ;;  %s129_s26 = sshll.u32 %s8983_s2, 4  ;;  %s105_s24 = int_to_ptr.vmem [resolvable:$true] %s104_s24  ;;  %s130_s26 = int_to_ptr.vmem [resolvable:$true] %s129_s26 }
  0x28   :  { %s8666_s25 = scalar_lea.vmem %s105_s24, 512  ;;  %p8671_p11 = scmp.lt.s32.totalorder %s105_s24, %s105_s24 }
  0x29   :  { %p8667_p10 = scmp.ne.s32.totalorder %s105_s24, %s8666_s25  ;;  %p8672_p12 = scmp.lt.s32.totalorder %s8666_s25, %s8666_s25 }
  0x2b   :  { %p8673_p13 = por %p8672_p12, %p8671_p11 }
  0x2d   :  { %p8674_p0 = pnand %p8673_p13, %p8667_p10 }
  0x2f   :  { %8677 = shalt.err (!%p8674_p0)
}
  0x30   :  { %s8984_s27 = smov 128   ;;  %s8985_s3 = smov 8  }
  0x31   :  { %110 = dma.hbm_to_vmem [thread:$0]  %s13025_s8, 512, %s105_s24, [#allocation12], %s8984_s27, %s8984_s27, %s8985_s3  }
  0x32   :  { %s8686_s29 = scalar_lea.vmem %s130_s26, 384  ;;  %p8691_p2 = scmp.lt.s32.totalorder %s130_s26, %s130_s26 }
  0x33   :  { %p8687_p1 = scmp.ne.s32.totalorder %s130_s26, %s8686_s29  ;;  %p8692_p3 = scmp.lt.s32.totalorder %s8686_s29, %s8686_s29 }
  0x35   :  { %p8693_p4 = por %p8692_p3, %p8691_p2 }
  0x37   :  { %p8694_p5 = pnand %p8693_p4, %p8687_p1 }
  0x39   :  { %8697 = shalt.err (!%p8694_p5)
}
  0x3a   :  { %132 = dma.hbm_to_vmem [thread:$0]  %s13028_s11, 384, %s130_s26, [#allocation15]  }
  0x3b   :  { %s8986_s30 = smov [#allocation17]   ;;  %s8987_s22 = smov [#allocation20]  }
  0x3c   :  { %s151_s5 = sshll.u32 %s8986_s30, 4  ;;  %s173_s23 = sshll.u32 %s8987_s22, 4  ;;  %s152_s5 = int_to_ptr.vmem [resolvable:$true] %s151_s5  ;;  %s174_s23 = int_to_ptr.vmem [resolvable:$true] %s173_s23 }
  0x3d   :  { %s8706_s1 = scalar_lea.vmem %s152_s5, 64  ;;  %p8711_p7 = scmp.lt.s32.totalorder %s152_s5, %s152_s5 }
  0x3e   :  { %p8707_p6 = scmp.ne.s32.totalorder %s152_s5, %s8706_s1  ;;  %p8712_p8 = scmp.lt.s32.totalorder %s8706_s1, %s8706_s1 }
  0x40   :  { %p8713_p9 = por %p8712_p8, %p8711_p7 }
  0x42   :  { %p8714_p10 = pnand %p8713_p9, %p8707_p6 }
  0x44   :  { %8717 = shalt.err (!%p8714_p10)
}
  0x45   :  { %154 = dma.hbm_to_vmem [thread:$0]  %s13031_s14, 64, %s152_s5, [#allocation18]  }
  0x46   :  { %s8726_s2 = scalar_lea.vmem %s174_s23, 48  ;;  %s8730_s11 = scalar_lea.vmem %s174_s23, 64 }
  0x47   :  { %p8727_p11 = scmp.ne.s32.totalorder %s174_s23, %s8726_s2  ;;  %p8731_p12 = scmp.lt.s32.totalorder %s174_s23, %s174_s23 }
  0x48   :  { %p8732_p13 = scmp.lt.s32.totalorder %s8730_s11, %s8726_s2 }
  0x4a   :  { %p8733_p0 = por %p8732_p13, %p8731_p12 }
  0x4c   :  { %p8734_p1 = pnand %p8733_p0, %p8727_p11 }
  0x4e   :  { %8737 = shalt.err (!%p8734_p1)
}
  0x4f   :  { %176 = dma.hbm_to_vmem [thread:$0]  %s13033_s16, 48, %s174_s23, [#allocation21]  }
  0x50   :  { %s8988_s28 = smov [#allocation2]   ;;  %s8989_s29 = smov [#allocation7]  }
  0x51   :  { %s44_s6 = sshll.u32 %s8988_s28, 4  ;;  %s72_s0 = sshll.u32 %s8989_s29, 4  ;;  %s45_s6 = int_to_ptr.vmem [resolvable:$true] %s44_s6  ;;  %s73_s0 = int_to_ptr.vmem [resolvable:$true] %s72_s0 }
  0x52   :  { %s8746_s4 = scalar_lea.vmem %s45_s6, 1536  ;;  %p8751_p3 = scmp.lt.s32.totalorder %s45_s6, %s45_s6 }
  0x53   :  { %p8747_p2 = scmp.ne.s32.totalorder %s45_s6, %s8746_s4  ;;  %p8752_p4 = scmp.lt.s32.totalorder %s8746_s4, %s8746_s4 }
  0x55   :  { %p8753_p5 = por %p8752_p4, %p8751_p3 }
  0x57   :  { %p8754_p6 = pnand %p8753_p5, %p8747_p2 }
  0x59   :  { %8757 = shalt.err (!%p8754_p6)
}
  0x5a   :  { %s13434_s5 = sld [smem:[#allocation166_spill]]  ;;  %s8766_s16 = scalar_lea.vmem %s73_s0, 256 }
  0x5b   :  { %p8767_p7 = scmp.ne.s32.totalorder %s73_s0, %s8766_s16  ;;  %p8771_p8 = scmp.lt.s32.totalorder %s73_s0, %s73_s0 }
  0x5c   :  { %p8772_p9 = scmp.lt.s32.totalorder %s8766_s16, %s8766_s16 }
  0x5e   :  { %p8773_p10 = por %p8772_p9, %p8771_p8 }
  0x60   :  { %50 = dma.hbm_to_vmem [thread:$0]  %s13434_s5, 1536, %s45_s6, [#allocation3], %s8984_s27, %s8984_s27, %s8985_s3  }
  0x61   :  { %p8774_p11 = pnand %p8773_p10, %p8767_p7 }
  0x63   :  { %8777 = shalt.err (!%p8774_p11)
}
  0x64   :  { %s13435_s1 = sld [smem:[#allocation170_spill]]  ;;  %s8990_s8 = smov [#allocation10]  }
  0x65   :  { %s95_s24 = sshll.u32 %s8990_s8, 4  ;;  %s8991_s2 = smov [#allocation13]   ;;  %s96_s24 = int_to_ptr.vmem [resolvable:$true] %s95_s24 }
  0x66   :  { %s117_s11 = sshll.u32 %s8991_s2, 4  ;;  %s8786_s26 = scalar_lea.vmem %s96_s24, 16  ;;  %s118_s11 = int_to_ptr.vmem [resolvable:$true] %s117_s11 }
  0x67   :  { %p8787_p12 = scmp.ne.s32.totalorder %s96_s24, %s8786_s26  ;;  %s8790_s25 = scalar_lea.vmem %s96_s24, 32 }
  0x68   :  { %p8791_p13 = scmp.lt.s32.totalorder %s96_s24, %s96_s24  ;;  %p8792_p0 = scmp.lt.s32.totalorder %s8790_s25, %s8786_s26 }
  0x6a   :  { %78 = dma.hbm_to_vmem [thread:$0]  %s13435_s1, 256, %s73_s0, [#allocation6], %s8984_s27, %s8984_s27, %s8985_s3  }
  0x6b   :  { %p8793_p1 = por %p8792_p0, %p8791_p13 }
  0x6d   :  { %p8794_p2 = pnand %p8793_p1, %p8787_p12 }
  0x6f   :  { %8797 = shalt.err (!%p8794_p2)
}
  0x70   :  { %98 = dma.hbm_to_vmem [thread:$0]  %s13024_s7, 16, %s96_s24, [#allocation9]  }
  0x71   :  { %s8806_s29 = scalar_lea.vmem %s118_s11, 16  ;;  %s8810_s0 = scalar_lea.vmem %s118_s11, 32 }
  0x72   :  { %p8807_p3 = scmp.ne.s32.totalorder %s118_s11, %s8806_s29  ;;  %p8811_p4 = scmp.lt.s32.totalorder %s118_s11, %s118_s11 }
  0x73   :  { %p8812_p5 = scmp.lt.s32.totalorder %s8810_s0, %s8806_s29 }
  0x75   :  { %p8813_p6 = por %p8812_p5, %p8811_p4 }
  0x77   :  { %p8814_p7 = pnand %p8813_p6, %p8807_p3 }
  0x79   :  { %8817 = shalt.err (!%p8814_p7)
}
  0x7a   :  { %120 = dma.hbm_to_vmem [thread:$0]  %s13026_s9, 16, %s118_s11, [#allocation12]  }
  0x7b   :  { %s8992_s30 = smov [#allocation16]   ;;  %s8993_s16 = smov [#allocation19]  }
  0x7c   :  { %s139_s5 = sshll.u32 %s8992_s30, 4  ;;  %s160_s22 = sshll.u32 %s8993_s16, 4  ;;  %s140_s5 = int_to_ptr.vmem [resolvable:$true] %s139_s5  ;;  %s161_s22 = int_to_ptr.vmem [resolvable:$true] %s160_s22 }
  0x7d   :  { %s8826_s23 = scalar_lea.vmem %s140_s5, 48  ;;  %s8830_s7 = scalar_lea.vmem %s140_s5, 64 }
  0x7e   :  { %p8827_p8 = scmp.ne.s32.totalorder %s140_s5, %s8826_s23  ;;  %p8831_p9 = scmp.lt.s32.totalorder %s140_s5, %s140_s5 }
  0x7f   :  { %p8832_p10 = scmp.lt.s32.totalorder %s8830_s7, %s8826_s23 }
  0x81   :  { %p8833_p11 = por %p8832_p10, %p8831_p9 }
  0x83   :  { %p8834_p12 = pnand %p8833_p11, %p8827_p8 }
  0x85   :  { %8837 = shalt.err (!%p8834_p12)
}
  0x86   :  { %142 = dma.hbm_to_vmem [thread:$0]  %s13029_s12, 48, %s140_s5, [#allocation15]  }
  0x87   :  { %s8846_s24 = scalar_lea.vmem %s161_s22, 12288  ;;  %p8851_p0 = scmp.lt.s32.totalorder %s161_s22, %s161_s22 }
  0x88   :  { %p8847_p13 = scmp.ne.s32.totalorder %s161_s22, %s8846_s24  ;;  %p8852_p1 = scmp.lt.s32.totalorder %s8846_s24, %s8846_s24 }
  0x8a   :  { %p8853_p2 = por %p8852_p1, %p8851_p0 }
  0x8c   :  { %p8854_p3 = pnand %p8853_p2, %p8847_p13 }
  0x8e   :  { %8857 = shalt.err (!%p8854_p3)
}
  0x8f   :  { %s8994_s9 = smov 768   ;;  %s8995_s2 = smov 48  }
  0x90   :  { %166 = dma.hbm_to_vmem [thread:$0]  %s13032_s15, 12288, %s161_s22, [#allocation18], %s8994_s9, %s8994_s9, %s8995_s2  }
  0x91   :  { %s8996_s25 = smov [#allocation22]   ;;  %s8997_s6 = smov [#allocation23]  }
  0x92   :  { %s182_s28 = sshll.u32 %s8996_s25, 4  ;;  %s195_s29 = sshll.u32 %s8997_s6, 4  ;;  %s183_s28 = int_to_ptr.vmem [resolvable:$true] %s182_s28  ;;  %s196_s29 = int_to_ptr.vmem [resolvable:$true] %s195_s29 }
  0x93   :  { %s8866_s12 = scalar_lea.vmem %s183_s28, 6144  ;;  %p8871_p5 = scmp.lt.s32.totalorder %s183_s28, %s183_s28 }
  0x94   :  { %p8867_p4 = scmp.ne.s32.totalorder %s183_s28, %s8866_s12  ;;  %p8872_p6 = scmp.lt.s32.totalorder %s8866_s12, %s8866_s12 }
  0x96   :  { %p8873_p7 = por %p8872_p6, %p8871_p5 }
  0x98   :  { %p8874_p8 = pnand %p8873_p7, %p8867_p4 }
  0x9a   :  { %8877 = shalt.err (!%p8874_p8)
}
  0x9b   :  { %188 = dma.hbm_to_vmem [thread:$0]  %s13034_s17, 6144, %s183_s28, [#allocation21], %s8984_s27, %s8984_s27, %s8985_s3  }
  0x9c   :  { %s8886_s15 = scalar_lea.vmem %s196_s29, 16  ;;  %s8890_s14 = scalar_lea.vmem %s196_s29, 32 }
  0x9d   :  { %p8887_p9 = scmp.ne.s32.totalorder %s196_s29, %s8886_s15  ;;  %p8891_p10 = scmp.lt.s32.totalorder %s196_s29, %s196_s29 }
  0x9e   :  { %p8892_p11 = scmp.lt.s32.totalorder %s8890_s14, %s8886_s15 }
  0xa0   :  { %p8893_p12 = por %p8892_p11, %p8891_p10 }
  0xa2   :  { %p8894_p13 = pnand %p8893_p12, %p8887_p9 }
  0xa4   :  { %8897 = shalt.err (!%p8894_p13)
}
  0xa5   :  { %198 = dma.hbm_to_vmem [thread:$0]  %s13035_s18, 16, %s196_s29, [#allocation24]  }
  0xa6   :  { %8958 = dma.done.wait [#allocation3], 1536  }
  0xa7   :  { %8959 = vsyncadd [#allocation3], 4294965760 }
  0xa8   :  { %8960 = dma.done.wait [#allocation6], 352  }
  0xa9   :  { %8961 = vsyncadd [#allocation6], 4294966944 }
  0xaa   :  { %8962 = dma.done.wait [#allocation9], 144  }
  0xab   :  { %8963 = vsyncadd [#allocation9], 4294967152 }
  0xac   :  { %8964 = dma.done.wait [#allocation12], 528  }
  0xad   :  { %8965 = vsyncadd [#allocation12], 4294966768 }
  0xae   :  { %8966 = dma.done.wait [#allocation15], 432  }
  0xaf   :  { %8967 = vsyncadd [#allocation15], 4294966864 }
  0xb0   :  { %8968 = dma.done.wait [#allocation18], 12352  }
  0xb1   :  { %8969 = vsyncadd [#allocation18], 4294954944 }
  0xb2   :  { %8970 = dma.done.wait [#allocation21], 6192  }
  0xb3   :  { %8971 = vsyncadd [#allocation21], 4294961104 }
  0xb4   :  { %8972 = dma.done.wait [#allocation24], 16  }
  0xb5   :  { %8973 = vsyncadd [#allocation24], 4294967280  ;;  %vm261_vm0 = vcmask 64512   ;;  %v253_v0 = vld [vmem:[#allocation8] sm:$0xff]  ;;  %s13436_s16 = sld [smem:[#allocation165_spill]]  ;;  %v436_v15 = vld [vmem:[#allocation11 + $0x8] sm:$0xff] }
  0xb6   :  { %7416 = vmatprep.subr.mxu0 %v253_v0  ;;  %v438_v13 = vld [vmem:[#allocation11 + $0x18] sm:$0xff]  ;;  %v437_v14 = vld [vmem:[#allocation11 + $0x10] sm:$0xff]  ;;  %v435_v16 = vld [vmem:[#allocation11] sm:$0xff]  ;;  %vm677_vm1 = vcmask 1044480   ;;  %vm446_vm2 = vcmask 261120   ;;  %s13437_s22 = sld [smem:[#allocation168_spill]] }
  0xb7   :  { %7417 = vmatpush3.msra.mxu0 %v253_v0  ;;  %7436 = vmatprep.subr.mxu1 %v438_v13  ;;  %v622_v17 = vld [vmem:[#allocation14 + $0x10] sm:$0x1f]  ;;  %v6766_v18 = vld [vmem:[#allocation10] ss:$0 sm:$0xff]  ;;  %s13438_s1 = sld [smem:[#allocation167_spill]]  ;;  %vm640_vm3 = vcmask 39936  }
  0xb8   :  { %7437 = vmatpush3.msra.mxu1 %v438_v13  ;;  %vm1039_vm4 = vcmask 130048  }
  0xb9   :  { %7438 = vmatprep.subr.mxu1 %v437_v14 }
  0xba   :  { %7439 = vmatpush3.msra.mxu1 %v437_v14 }
  0xbb   :  { %v241_v1 = vld [vmem:[%s13436_s16] sm:$0xff]  ;;  %v242_v2 = vld [vmem:[%s13436_s16 + $0x8] sm:$0xff]  ;;  %v243_v3 = vld [vmem:[%s13436_s16 + $0x10] sm:$0xff]  ;;  %7440 = vmatprep.subr.mxu1 %v436_v15 }
  0xbc   :  { %7418 = vmatprep.mubr.msk.f32.mxu0 %vm261_vm0, %v241_v1  ;;  %v244_v4 = vld [vmem:[%s13436_s16 + $0x18] sm:$0xff]  ;;  %v245_v5 = vld [vmem:[%s13436_s16 + $0x20] sm:$0xff]  ;;  %v246_v6 = vld [vmem:[%s13436_s16 + $0x28] sm:$0xff]  ;;  %7441 = vmatpush3.msra.mxu1 %v436_v15 }
  0xbd   :  { %7419 = vmatmul.mubr.msk.f32.vlgmr.msra.gmra.mxu0 %vm261_vm0, %v242_v2  ;;  %v247_v7 = vld [vmem:[%s13436_s16 + $0x30] sm:$0xff]  ;;  %v248_v8 = vld [vmem:[%s13436_s16 + $0x38] sm:$0xff]  ;;  %v249_v9 = vld [vmem:[%s13436_s16 + $0x40] sm:$0xff]  ;;  %7442 = vmatprep.subr.mxu1 %v435_v16 }
  0xbe   :  { %7421 = vmatprep.mubr.msk.f32.mxu0 %vm261_vm0, %v243_v3  ;;  %v250_v10 = vld [vmem:[%s13436_s16 + $0x48] sm:$0xff]  ;;  %v251_v11 = vld [vmem:[%s13436_s16 + $0x50] sm:$0xff]  ;;  %v252_v12 = vld [vmem:[%s13436_s16 + $0x58] sm:$0xff]  ;;  %7443 = vmatpush3.msra.mxu1 %v435_v16 }
  0xbf   :  { %7462 = vmatprep.subr.msk.mxu1 %vm677_vm1, %v622_v17  ;;  %v956_v29 = vld [vmem:[%s13437_s22 + $0x18] sm:$0xff]  ;;  %v9288_v56 = vld [vmem:[%s13438_s1] sm:$0xff]  ;;  %v9301_v57 = vld [vmem:[%s13438_s1 + $0x8] sm:$0xff] }
  0xc0   :  { %v9306_v58 = vld [vmem:[%s13438_s1 + $0x10] sm:$0xff]  ;;  %v9318_v60 = vld [vmem:[%s13438_s1 + $0x18] sm:$0xff]  ;;  %v954_v61 = vld [vmem:[%s13437_s22 + $0x8] sm:$0xff] }
  0xc1   :  { %7422 = vmatmul.mubr.msk.f32.gmra.mxu0 %vm261_vm0, %v244_v4  ;;  %v955_v59 = vld [vmem:[%s13437_s22 + $0x10] sm:$0xff]  ;;  %v9326_v62 = vld [vmem:[%s13438_s1 + $0x20] sm:$0xff]  ;;  %v9338_v0 = vld [vmem:[%s13438_s1 + $0x28] sm:$0xff] }
  0xc2   :  { %7424 = vmatprep.mubr.msk.f32.mxu0 %vm261_vm0, %v245_v5  ;;  %v953_v63 = vld [vmem:[%s13437_s22] sm:$0xff]  ;;  %v9343_v1 = vld [vmem:[%s13438_s1 + $0x30] sm:$0xff]  ;;  %v9352_v2 = vld [vmem:[%s13438_s1 + $0x38] sm:$0xff] }
  0xc3   :  { %v9357_v3 = vld [vmem:[%s13438_s1 + $0x40] sm:$0xff]  ;;  %v9366_v4 = vld [vmem:[%s13438_s1 + $0x48] sm:$0xff]  ;;  %v9371_v5 = vld [vmem:[%s13438_s1 + $0x50] sm:$0xff] }
  0xc5   :  { %7425 = vmatmul.mubr.msk.f32.gmra.mxu0 %vm261_vm0, %v246_v6  ;;  %v9380_v6 = vld [vmem:[%s13438_s1 + $0x58] sm:$0xff] }
  0xc6   :  { %7427 = vmatprep.mubr.msk.f32.mxu0 %vm261_vm0, %v247_v7  ;;  %v951_v7 = vld [vmem:[#allocation2] sm:$0xff] }
  0xc9   :  { %7428 = vmatmul.mubr.msk.f32.gmra.mxu0 %vm261_vm0, %v248_v8 }
  0xca   :  { %7430 = vmatprep.mubr.msk.f32.mxu0 %vm261_vm0, %v249_v9 }
  0xcd   :  { %7431 = vmatmul.mubr.msk.f32.gmra.mxu0 %vm261_vm0, %v250_v10  ;;  %v9395_v10 = vld [vmem:[#allocation13] ss:$0 sm:$0xff] }
  0xce   :  { %7433 = vmatprep.mubr.msk.f32.mxu0 %vm261_vm0, %v251_v11 }
  0xd1   :  { %7434 = vmatmul.mubr.msk.f32.gmra.mxu0 %vm261_vm0, %v252_v12 }
 0x17d   :  { %v7420_v19 = vpop.f32.mrf.mxu0 }
 0x17e   :  { %v9215_v20 = vadd.f32 %v7420_v19, %v6766_v18 }
 0x17f   :  { %v364_v21 = vpop.f32.mrf.mxu0 }
 0x180   :  { %v9217_v22 = vadd.f32 %v6766_v18, %v364_v21  ;;  %v424_v25 = vmax.f32 %v9215_v20, 0.0  ;;  %v13042_v20 = vlaneseq }
 0x181   :  { %v7423_v23 = vpop.f32.mrf.mxu0 }
 0x182   :  { %v423_v24 = vmax.f32 %v9217_v22, 0.0  ;;  %v9221_v26 = vadd.f32 %v7423_v23, %v6766_v18 }
 0x183   :  { %v374_v27 = vpop.f32.mrf.mxu0 }
 0x184   :  { %v9223_v28 = vadd.f32 %v6766_v18, %v374_v27  ;;  %7444 = vmatprep.mubr.msk.f32.mxu1 %vm446_vm2, %v423_v24  ;;  %v426_v32 = vmax.f32 %v9221_v26, 0.0 }
 0x185   :  { %v7426_v30 = vpop.f32.mrf.mxu0  ;;  %7445 = vmatmul.mubr.msk.f32.vlgmr.msra.gmra.mxu1 %vm446_vm2, %v424_v25 }
 0x186   :  { %v425_v31 = vmax.f32 %v9223_v28, 0.0  ;;  %7463 = vmatpush3.msk.msra.mxu1 %vm677_vm1, %v622_v17  ;;  %v9237_v33 = vadd.f32 %v7426_v30, %v6766_v18  ;;  %v1205_v28 = vld [vmem:[#allocation2 + $0x10] sm:$0xff] }
 0x187   :  { %v384_v34 = vpop.f32.mrf.mxu0  ;;  %7482 = vmatprep.subr.mxu1 %v956_v29 }
 0x188   :  { %v9239_v35 = vadd.f32 %v6766_v18, %v384_v34  ;;  %7447 = vmatprep.mubr.msk.f32.mxu1 %vm446_vm2, %v425_v31  ;;  %v13051_v38 = vmax.f32 %v9237_v33, 0.0  ;;  %v9428_v34 = vld [vmem:[#allocation16] sm:$0x7] }
 0x189   :  { %v7429_v36 = vpop.f32.mrf.mxu0  ;;  %7448 = vmatmul.mubr.msk.f32.gmra.mxu1 %vm446_vm2, %v426_v32 }
 0x18a   :  { %v13052_v37 = vmax.f32 %v9239_v35, 0.0  ;;  %v9249_v39 = vadd.f32 %v7429_v36, %v6766_v18 }
 0x18b   :  { %v394_v40 = vpop.f32.mrf.mxu0 }
 0x18c   :  { %v9251_v41 = vadd.f32 %v6766_v18, %v394_v40  ;;  %7450 = vmatprep.mubr.msk.f32.mxu1 %vm446_vm2, %v13052_v37  ;;  %v13049_v44 = vmax.f32 %v9249_v39, 0.0 }
 0x18d   :  { %v7432_v42 = vpop.f32.mrf.mxu0  ;;  %7451 = vmatmul.mubr.msk.f32.gmra.mxu1 %vm446_vm2, %v13051_v38 }
 0x18e   :  { %v13050_v43 = vmax.f32 %v9251_v41, 0.0  ;;  %v9261_v45 = vadd.f32 %v7432_v42, %v6766_v18 }
 0x18f   :  { %v404_v46 = vpop.f32.mrf.mxu0 }
 0x190   :  { %v9263_v47 = vadd.f32 %v6766_v18, %v404_v46  ;;  %7453 = vmatprep.mubr.msk.f32.mxu1 %vm446_vm2, %v13050_v43  ;;  %v13045_v50 = vmax.f32 %v9261_v45, 0.0 }
 0x191   :  { %v7435_v48 = vpop.f32.mrf.mxu0  ;;  %7454 = vmatmul.mubr.msk.f32.gmra.mxu1 %vm446_vm2, %v13049_v44 }
 0x192   :  { %v13046_v49 = vmax.f32 %v9263_v47, 0.0  ;;  %v9273_v51 = vadd.f32 %v7435_v48, %v6766_v18 }
 0x193   :  { %v414_v52 = vpop.f32.mrf.mxu0 }
 0x194   :  { %v9275_v53 = vadd.f32 %v6766_v18, %v414_v52  ;;  %7456 = vmatprep.mubr.msk.f32.mxu1 %vm446_vm2, %v13046_v49  ;;  %v13043_v55 = vmax.f32 %v9273_v51, 0.0  ;;  %v952_v49 = vld [vmem:[#allocation2 + $0x8] sm:$0xff] }
 0x195   :  { %7457 = vmatmul.mubr.msk.f32.gmra.mxu1 %vm446_vm2, %v13045_v50 }
 0x196   :  { %v13044_v54 = vmax.f32 %v9275_v53, 0.0 }
 0x198   :  { %7459 = vmatprep.mubr.msk.f32.mxu1 %vm446_vm2, %v13044_v54 }
 0x199   :  { %7460 = vmatmul.mubr.msk.f32.gmra.mxu1 %vm446_vm2, %v13043_v55 }
 0x19a   :  { %7464 = vmatprep.mubr.msk.f32.mxu1 %vm640_vm3, %v9288_v56 }
 0x19d   :  { %7465 = vmatmul.mubr.msk.f32.vlgmr.msra.gmra.mxu1 %vm640_vm3, %v9301_v57 }
 0x19e   :  { %7467 = vmatprep.mubr.msk.f32.mxu1 %vm640_vm3, %v9306_v58  ;;  %7483 = vmatpush3.msra.mxu1 %v956_v29 }
 0x19f   :  { %7484 = vmatprep.subr.mxu1 %v955_v59 }
 0x1a0   :  { %7485 = vmatpush3.msra.mxu1 %v955_v59 }
 0x1a1   :  { %7468 = vmatmul.mubr.msk.f32.gmra.mxu1 %vm640_vm3, %v9318_v60  ;;  %7486 = vmatprep.subr.mxu1 %v954_v61 }
 0x1a2   :  { %7470 = vmatprep.mubr.msk.f32.mxu1 %vm640_vm3, %v9326_v62  ;;  %7487 = vmatpush3.msra.mxu1 %v954_v61 }
 0x1a3   :  { %7488 = vmatprep.subr.mxu1 %v953_v63 }
 0x1a4   :  { %7489 = vmatpush3.msra.mxu1 %v953_v63 }
 0x1a5   :  { %7471 = vmatmul.mubr.msk.f32.gmra.mxu1 %vm640_vm3, %v9338_v0 }
 0x1a6   :  { %7473 = vmatprep.mubr.msk.f32.mxu1 %vm640_vm3, %v9343_v1 }
 0x1a9   :  { %7474 = vmatmul.mubr.msk.f32.gmra.mxu1 %vm640_vm3, %v9352_v2 }
 0x1aa   :  { %7476 = vmatprep.mubr.msk.f32.mxu1 %vm640_vm3, %v9357_v3 }
 0x1ad   :  { %7477 = vmatmul.mubr.msk.f32.gmra.mxu1 %vm640_vm3, %v9366_v4 }
 0x1ae   :  { %7479 = vmatprep.mubr.msk.f32.mxu1 %vm640_vm3, %v9371_v5 }
 0x1b1   :  { %7480 = vmatmul.mubr.msk.f32.gmra.mxu1 %vm640_vm3, %v9380_v6 }
 0x1b2   :  { %7490 = vmatprep.mubr.msk.f32.mxu1 %vm446_vm2, %v423_v24  ;;  %v9418_v24 = vshrl.u32 %v13042_v20, 7 }
 0x1b4   :  { %13439 = vst [vmem:[#allocation39_spill] sm:$0xff] %v9418_v24  ;;  %v9426_v30 = vsub.s32 2, %v9418_v24 }
 0x1b5   :  { %7491 = vmatmul.mubr.msk.f32.vlgmr.msra.gmra.mxu1 %vm446_vm2, %v424_v25 }
 0x1b6   :  { %7497 = vmatprep.mubr.msk.f32.mxu1 %vm1039_vm4, %v951_v7  ;;  %v9436_v42 = vrot.slane %v9428_v34, %v9426_v30 }
 0x1b8   :  { %13442 = vst [vmem:[#allocation42_spill] sm:$0xff] %v9436_v42 }
 0x245   :  { %v9391_v8 = vpop.f32.mrf.mxu1 }
 0x247   :  { %v9393_v9 = vpop.f32.mrf.mxu1 }
 0x249   :  { %v7449_v11 = vpop.f32.mrf.mxu1 }
 0x24a   :  { %v9398_v12 = vadd.f32 %v7449_v11, %v9395_v10 }
 0x24b   :  { %v9400_v13 = vpop.f32.mrf.mxu1 }
 0x24d   :  { %v7452_v14 = vpop.f32.mrf.mxu1 }
 0x24e   :  { %v9403_v15 = vadd.f32 %v7452_v14, %v9395_v10 }
 0x24f   :  { %v9405_v16 = vpop.f32.mrf.mxu1 }
 0x251   :  { %v7455_v17 = vpop.f32.mrf.mxu1 }
 0x252   :  { %v9408_v18 = vadd.f32 %v7455_v17, %v9395_v10 }
 0x253   :  { %v9410_v19 = vpop.f32.mrf.mxu1 }
 0x255   :  { %v7458_v21 = vpop.f32.mrf.mxu1 }
 0x256   :  { %v9413_v22 = vadd.f32 %v7458_v21, %v9395_v10 }
 0x257   :  { %v9415_v23 = vpop.f32.mrf.mxu1 }
 0x259   :  { %v7461_v25 = vpop.f32.mrf.mxu1 }
 0x25a   :  { %v9421_v27 = vadd.f32 %v7461_v25, %v9395_v10 }
 0x25b   :  { %v9423_v29 = vpop.f32.mrf.mxu1 }
 0x25d   :  { %v9430_v36 = vpop.f32.mrf.mxu1 }
 0x25e   :  { %13440 = vst [vmem:[#allocation40_spill] sm:$0xff] %v9430_v36  ;;  %v6876_v36 = vld [vmem:[#allocation5 + $0x5] ss:$0 sm:$0xff] }
 0x25f   :  { %v9432_v40 = vpop.f32.mrf.mxu1 }
 0x260   :  { %13441 = vst [vmem:[#allocation41_spill] sm:$0xff] %v9432_v40 }
 0x261   :  { %v7469_v46 = vpop.f32.mrf.mxu1 }
 0x262   :  { %v9439_v48 = vadd.f32 %v7469_v46, %v9436_v42 }
 0x263   :  { %v9441_v52 = vpop.f32.mrf.mxu1 }
 0x264   :  { %13443 = vst [vmem:[#allocation43_spill] sm:$0xff] %v9439_v48  ;;  %13444 = vst [vmem:[#allocation44_spill] sm:$0xff] %v9441_v52  ;;  %v2486_v48 = vld [vmem:[%s13030_s13 + $0x38] sm:$0xff] }
 0x265   :  { %v7472_v59 = vpop.f32.mrf.mxu1  ;;  %v2482_v52 = vld [vmem:[%s13030_s13 + $0x18] sm:$0xff] }
 0x266   :  { %v9444_v61 = vadd.f32 %v7472_v59, %v9436_v42 }
 0x267   :  { %v910_v63 = vpop.f32.mrf.mxu1 }
 0x268   :  { %13445 = vst [vmem:[#allocation45_spill] sm:$0xff] %v9444_v61  ;;  %v9447_v7 = vadd.f32 %v910_v63, %v9436_v42 }
 0x269   :  { %v7475_v11 = vpop.f32.mrf.mxu1 }
 0x26a   :  { %13446 = vst [vmem:[#allocation46_spill] sm:$0xff] %v9447_v7  ;;  %v9450_v14 = vadd.f32 %v7475_v11, %v9436_v42 }
 0x26b   :  { %v920_v17 = vpop.f32.mrf.mxu1 }
 0x26c   :  { %13447 = vst [vmem:[#allocation47_spill] sm:$0xff] %v9450_v14  ;;  %v9453_v21 = vadd.f32 %v920_v17, %v9436_v42 }
 0x26d   :  { %v7478_v25 = vpop.f32.mrf.mxu1 }
 0x26e   :  { %13448 = vst [vmem:[#allocation48_spill] sm:$0xff] %v9453_v21  ;;  %v9456_v46 = vadd.f32 %v7478_v25, %v9436_v42  ;;  %v13047_v25 = vmov 0.0  }
 0x26f   :  { %v930_v20 = vpop.f32.mrf.mxu1  ;;  %751 = vmatprep.mubr.f32.mxu0 %v13047_v25 }
 0x270   :  { %13449 = vst [vmem:[#allocation49_spill] sm:$0xff] %v9456_v46  ;;  %v9459_v59 = vadd.f32 %v930_v20, %v9436_v42  ;;  %v9471_v20 = vld [vmem:[%s13027_s10 + $0x8] sm:$0xff] }
 0x271   :  { %v7481_v55 = vpop.f32.mrf.mxu1 }
 0x272   :  { %13450 = vst [vmem:[#allocation50_spill] sm:$0xff] %v9459_v59  ;;  %v9462_v63 = vadd.f32 %v7481_v55, %v9436_v42  ;;  %v620_v55 = vld [vmem:[#allocation14] sm:$0x1f] }
 0x273   :  { %v940_v54 = vpop.f32.mrf.mxu1 }
 0x274   :  { %13451 = vst [vmem:[#allocation51_spill] sm:$0xff] %v9462_v63  ;;  %v9465_v11 = vadd.f32 %v940_v54, %v9436_v42  ;;  %v9478_v54 = vld [vmem:[%s13027_s10] sm:$0xff] }
 0x275   :  { %v7492_v50 = vpop.f32.mrf.mxu1 }
 0x276   :  { %13452 = vst [vmem:[#allocation52_spill] sm:$0xff] %v9465_v11  ;;  %7493 = vmatprep.subr.mxu1 %v7492_v50 }
 0x277   :  { %v1023_v17 = vpop.f32.mrf.mxu1  ;;  %7494 = vmatpush3.msra.mxu1 %v7492_v50  ;;  %v621_v50 = vld [vmem:[#allocation14 + $0x8] sm:$0x1f] }
 0x278   :  { %7495 = vmatprep.subr.mxu1 %v1023_v17  ;;  %6792 = vmatprep.subr.msk.mxu0 %vm677_vm1, %v621_v50 }
 0x279   :  { %7496 = vmatpush3.msra.mxu1 %v1023_v17  ;;  %6793 = vmatpush1.msk.msra.mxu0 %vm677_vm1, %v620_v55 }
 0x27a   :  { %7498 = vmatmul.mubr.msk.f32.vlgmr.msra.gmra.mxu1 %vm1039_vm4, %v952_v49  ;;  %7500 = vmatprep.subr.mxu1 %v9471_v20  ;;  %v6829_v49 = vld [vmem:[%s13437_s22 + $0x38] sm:$0xff] }
 0x27b   :  { %7501 = vmatpush3.msra.mxu1 %v9471_v20  ;;  %6794 = vmatmul.mubr.msk.f32.vlgmr.msra.gmra.mxu0 %vm640_vm3, %v9288_v56  ;;  %v6821_v56 = vld [vmem:[#allocation5] ss:$0 sm:$0xff] }
 0x27c   :  { %7502 = vmatprep.subr.mxu1 %v9478_v54  ;;  %757 = vmatprep.mubr.f32.mxu0 %v13047_v25 }
 0x27d   :  { %7503 = vmatpush3.msra.mxu1 %v9478_v54 }
 0x27e   :  { %7507 = vmatprep.subr.mxu1 %v6829_v49 }
 0x27f   :  { %6795 = vmatmul.mubr.msk.f32.gmra.mxu0 %vm640_vm3, %v9301_v57 }
 0x280   :  { %763 = vmatprep.mubr.f32.mxu0 %v13047_v25 }
 0x283   :  { %6796 = vmatmul.mubr.msk.f32.gmra.mxu0 %vm640_vm3, %v9306_v58 }
 0x284   :  { %769 = vmatprep.mubr.f32.mxu0 %v13047_v25 }
 0x287   :  { %6797 = vmatmul.mubr.msk.f32.gmra.mxu0 %vm640_vm3, %v9318_v60 }
 0x288   :  { %775 = vmatprep.mubr.f32.mxu0 %v13047_v25 }
 0x28b   :  { %6798 = vmatmul.mubr.msk.f32.gmra.mxu0 %vm640_vm3, %v9326_v62 }
 0x28c   :  { %781 = vmatprep.mubr.f32.mxu0 %v13047_v25 }
 0x28f   :  { %6799 = vmatmul.mubr.msk.f32.gmra.mxu0 %vm640_vm3, %v9338_v0 }
 0x290   :  { %787 = vmatprep.mubr.f32.mxu0 %v13047_v25 }
 0x293   :  { %6800 = vmatmul.mubr.msk.f32.gmra.mxu0 %vm640_vm3, %v9343_v1 }
 0x294   :  { %793 = vmatprep.mubr.f32.mxu0 %v13047_v25 }
 0x297   :  { %6801 = vmatmul.mubr.msk.f32.gmra.mxu0 %vm640_vm3, %v9352_v2  ;;  %v6828_v2 = vld [vmem:[%s13437_s22 + $0x30] sm:$0xff] }
 0x298   :  { %799 = vmatprep.mubr.f32.mxu0 %v13047_v25 }
 0x29b   :  { %6802 = vmatmul.mubr.msk.f32.gmra.mxu0 %vm640_vm3, %v9357_v3  ;;  %v6827_v3 = vld [vmem:[%s13437_s22 + $0x28] sm:$0xff] }
 0x29c   :  { %805 = vmatprep.mubr.f32.mxu0 %v13047_v25 }
 0x29f   :  { %6803 = vmatmul.mubr.msk.f32.gmra.mxu0 %vm640_vm3, %v9366_v4  ;;  %v6826_v4 = vld [vmem:[%s13437_s22 + $0x20] sm:$0xff] }
 0x2a0   :  { %811 = vmatprep.mubr.f32.mxu0 %v13047_v25 }
 0x2a3   :  { %6804 = vmatmul.mubr.msk.f32.gmra.mxu0 %vm640_vm3, %v9371_v5 }
 0x2a4   :  { %817 = vmatprep.mubr.f32.mxu0 %v13047_v25 }
 0x2a7   :  { %6805 = vmatmul.mubr.msk.f32.gmra.mxu0 %vm640_vm3, %v9380_v6  ;;  %v9550_v6 = vsub.s32 0, %v9418_v24 }
 0x2a8   :  { %7522 = vmatprep.mubr.msk.f32.mxu0 %vm1039_vm4, %v1205_v28 }
 0x2a9   :  { %13453 = vst [vmem:[#allocation53_spill] sm:$0xff] %v9550_v6 }
 0x33a   :  { %v7499_v57 = vpop.f32.mrf.mxu1 }
 0x33b   :  { %v1118_v58 = vadd.f32 %v7499_v57, %v6821_v56 }
 0x33c   :  { %v1112_v60 = vpop.f32.mrf.mxu1 }
 0x33d   :  { %v1113_v62 = vadd.f32 %v6821_v56, %v1112_v60  ;;  %v1122_v1 = vmax.f32 %v1118_v58, 0.0 }
 0x33f   :  { %v1121_v0 = vmax.f32 %v1113_v62, 0.0 }
 0x341   :  { %7504 = vmatprep.mubr.msk.f32.mxu1 %vm1039_vm4, %v1121_v0 }
 0x342   :  { %7505 = vmatmul.mubr.msk.f32.vlgmr.msra.gmra.mxu1 %vm1039_vm4, %v1122_v1 }
 0x343   :  { %7508 = vmatpush3.msra.mxu1 %v6829_v49  ;;  %7515 = vmatprep.mubr.msk.f32.mxu1 %vm446_vm2, %v425_v31  ;;  %v9545_v31 = vpop.f32.mrf.mxu0  ;;  %v9561_v49 = vrot.slane %v9428_v34, %v9550_v6 }
 0x344   :  { %7509 = vmatprep.subr.mxu1 %v6828_v2 }
 0x345   :  { %7510 = vmatpush3.msra.mxu1 %v6828_v2  ;;  %v9547_v5 = vpop.f32.mrf.mxu0 }
 0x346   :  { %7511 = vmatprep.subr.mxu1 %v6827_v3 }
 0x347   :  { %7512 = vmatpush3.msra.mxu1 %v6827_v3  ;;  %v9552_v26 = vpop.f32.mrf.mxu0 }
 0x348   :  { %7513 = vmatprep.subr.mxu1 %v6826_v4 }
 0x349   :  { %7514 = vmatpush3.msra.mxu1 %v6826_v4  ;;  %v9557_v17 = vpop.f32.mrf.mxu0 }
 0x34a   :  { %7516 = vmatmul.mubr.msk.f32.vlgmr.msra.gmra.mxu1 %vm446_vm2, %v426_v32  ;;  %7525 = vmatprep.subr.mxu1 %v9471_v20  ;;  %v9555_v32 = vsub.s32 1, %v9418_v24 }
 0x34b   :  { %7526 = vmatpush3.msra.mxu1 %v9471_v20  ;;  %v765_v50 = vpop.f32.mrf.mxu0 }
 0x34c   :  { %7527 = vmatprep.subr.mxu1 %v9478_v54  ;;  %v9565_v55 = vrot.slane %v9428_v34, %v9555_v32  ;;  %v9568_v56 = vadd.f32 %v765_v50, %v9561_v49 }
 0x34d   :  { %7528 = vmatpush3.msra.mxu1 %v9478_v54  ;;  %v767_v57 = vpop.f32.mrf.mxu0 }
 0x34e   :  { %13454 = vst [vmem:[#allocation54_spill] sm:$0xff] %v9565_v55  ;;  %13455 = vst [vmem:[#allocation55_spill] sm:$0xff] %v9568_v56  ;;  %v9571_v58 = vadd.f32 %v767_v57, %v9565_v55 }
 0x34f   :  { %v771_v60 = vpop.f32.mrf.mxu0 }
 0x350   :  { %13456 = vst [vmem:[#allocation56_spill] sm:$0xff] %v9571_v58  ;;  %v9574_v62 = vadd.f32 %v771_v60, %v9561_v49 }
 0x351   :  { %v773_v0 = vpop.f32.mrf.mxu0 }
 0x352   :  { %13457 = vst [vmem:[#allocation57_spill] sm:$0xff] %v9574_v62  ;;  %v9577_v1 = vadd.f32 %v773_v0, %v9565_v55  ;;  %v2636_v62 = vld [vmem:[#allocation19 + $0x2e8] sm:$0xff] }
 0x353   :  { %v777_v2 = vpop.f32.mrf.mxu0 }
 0x354   :  { %13458 = vst [vmem:[#allocation58_spill] sm:$0xff] %v9577_v1  ;;  %v9580_v3 = vadd.f32 %v777_v2, %v9561_v49  ;;  %v2481_v1 = vld [vmem:[%s13030_s13 + $0x10] sm:$0xff] }
 0x355   :  { %v779_v34 = vpop.f32.mrf.mxu0 }
 0x356   :  { %13459 = vst [vmem:[#allocation59_spill] sm:$0xff] %v9580_v3  ;;  %v9583_v4 = vadd.f32 %v779_v34, %v9565_v55  ;;  %v2493_v3 = vld [vmem:[%s13030_s13 + $0x70] sm:$0xff] }
 0x357   :  { %v783_v28 = vpop.f32.mrf.mxu0 }
 0x358   :  { %13460 = vst [vmem:[#allocation60_spill] sm:$0xff] %v9583_v4  ;;  %v9586_v50 = vadd.f32 %v783_v28, %v9561_v49  ;;  %v2494_v4 = vld [vmem:[%s13030_s13 + $0x78] sm:$0xff] }
 0x359   :  { %v785_v57 = vpop.f32.mrf.mxu0 }
 0x35a   :  { %13461 = vst [vmem:[#allocation61_spill] sm:$0xff] %v9586_v50  ;;  %v9589_v60 = vadd.f32 %v785_v57, %v9565_v55  ;;  %v2497_v50 = vld [vmem:[%s13030_s13 + $0x90] sm:$0xff] }
 0x35b   :  { %v789_v25 = vpop.f32.mrf.mxu0 }
 0x35c   :  { %13462 = vst [vmem:[#allocation62_spill] sm:$0xff] %v9589_v60  ;;  %v9592_v0 = vadd.f32 %v789_v25, %v9561_v49  ;;  %v2498_v60 = vld [vmem:[%s13030_s13 + $0x98] sm:$0xff] }
 0x35d   :  { %v791_v44 = vpop.f32.mrf.mxu0 }
 0x35e   :  { %13463 = vst [vmem:[#allocation63_spill] sm:$0xff] %v9592_v0  ;;  %v9595_v2 = vadd.f32 %v791_v44, %v9565_v55 }
 0x35f   :  { %v795_v43 = vpop.f32.mrf.mxu0 }
 0x360   :  { %13464 = vst [vmem:[#allocation64_spill] sm:$0xff] %v9595_v2  ;;  %v9598_v34 = vadd.f32 %v795_v43, %v9561_v49  ;;  %v2632_v2 = vld [vmem:[#allocation19 + $0x2c8] sm:$0xff] }
 0x361   :  { %v797_v38 = vpop.f32.mrf.mxu0 }
 0x362   :  { %13465 = vst [vmem:[#allocation65_spill] sm:$0xff] %v9598_v34  ;;  %v9601_v28 = vadd.f32 %v797_v38, %v9565_v55  ;;  %v2637_v34 = vld [vmem:[#allocation19 + $0x2f0] sm:$0xff] }
 0x363   :  { %v801_v37 = vpop.f32.mrf.mxu0 }
 0x364   :  { %13466 = vst [vmem:[#allocation66_spill] sm:$0xff] %v9601_v28  ;;  %v9604_v57 = vadd.f32 %v801_v37, %v9561_v49 }
 0x365   :  { %v803_v63 = vpop.f32.mrf.mxu0 }
 0x366   :  { %13467 = vst [vmem:[#allocation67_spill] sm:$0xff] %v9604_v57  ;;  %v9607_v25 = vadd.f32 %v803_v63, %v9565_v55 }
 0x367   :  { %v807_v11 = vpop.f32.mrf.mxu0 }
 0x368   :  { %13468 = vst [vmem:[#allocation68_spill] sm:$0xff] %v9607_v25  ;;  %v9610_v44 = vadd.f32 %v807_v11, %v9561_v49  ;;  %v555_v11 = vadd.f32 %v9391_v8, %v9395_v10  ;;  %v6839_v8 = vld [vmem:[%s13437_s22 + $0x50] sm:$0xff] }
 0x369   :  { %v809_v46 = vpop.f32.mrf.mxu0 }
 0x36a   :  { %13469 = vst [vmem:[#allocation69_spill] sm:$0xff] %v9610_v44  ;;  %v9613_v43 = vadd.f32 %v809_v46, %v9565_v55 }
 0x36b   :  { %v813_v59 = vpop.f32.mrf.mxu0 }
 0x36c   :  { %13470 = vst [vmem:[#allocation70_spill] sm:$0xff] %v9613_v43  ;;  %v9616_v38 = vadd.f32 %v813_v59, %v9561_v49 }
 0x36d   :  { %v815_v14 = vpop.f32.mrf.mxu0 }
 0x36e   :  { %13471 = vst [vmem:[#allocation71_spill] sm:$0xff] %v9616_v38  ;;  %v9619_v37 = vadd.f32 %v815_v14, %v9565_v55  ;;  %v1206_v38 = vld [vmem:[#allocation2 + $0x18] sm:$0xff] }
 0x36f   :  { %v819_v57 = vpop.f32.mrf.mxu0  ;;  %v6840_v14 = vld [vmem:[%s13437_s22 + $0x58] sm:$0xff] }
 0x370   :  { %13472 = vst [vmem:[#allocation72_spill] sm:$0xff] %v9619_v37  ;;  %v9622_v63 = vadd.f32 %v819_v57, %v9561_v49  ;;  %v13474_v57 = vmax.f32 %v9239_v35, 0.0  ;;  %v6850_v35 = vld [vmem:[%s13437_s22 + $0x70] sm:$0xff] }
 0x372   :  { %13473 = vst [vmem:[#allocation73_spill] sm:$0xff] %v9622_v63 }
 0x402   :  { %v7506_v44 = vpop.f32.mrf.mxu1 }
 0x403   :  { %v9626_v25 = vadd.f32 %v7506_v44, %v555_v11  ;;  %v6838_v44 = vld [vmem:[%s13437_s22 + $0x48] sm:$0xff]  ;;  %v13475_v11 = vmax.f32 %v9237_v33, 0.0  ;;  %v6862_v33 = vld [vmem:[%s13437_s22 + $0x98] sm:$0xff] }
 0x404   :  { %v9628_v46 = vpop.f32.mrf.mxu1 }
 0x40a   :  { %v7517_v43 = vpop.f32.mrf.mxu1 }
 0x40b   :  { %7518 = vmatprep.subr.mxu0 %v7517_v43 }
 0x40c   :  { %v1278_v59 = vpop.f32.mrf.mxu1  ;;  %7519 = vmatpush3.msra.mxu0 %v7517_v43  ;;  %v6837_v43 = vld [vmem:[%s13437_s22 + $0x40] sm:$0xff] }
 0x40d   :  { %7520 = vmatprep.subr.mxu0 %v1278_v59 }
 0x40e   :  { %7521 = vmatpush3.msra.mxu0 %v1278_v59  ;;  %v13476_v59 = vmax.f32 %v9251_v41, 0.0  ;;  %v6861_v41 = vld [vmem:[%s13437_s22 + $0x90] sm:$0xff] }
 0x40f   :  { %7523 = vmatmul.mubr.msk.f32.vlgmr.msra.gmra.mxu0 %vm1039_vm4, %v1206_v38  ;;  %7532 = vmatprep.subr.mxu0 %v6840_v14  ;;  %v6851_v38 = vld [vmem:[%s13437_s22 + $0x78] sm:$0xff] }
 0x410   :  { %7533 = vmatpush3.msra.mxu0 %v6840_v14  ;;  %7540 = vmatprep.mubr.msk.f32.mxu0 %vm446_vm2, %v13474_v57  ;;  %v6849_v14 = vld [vmem:[%s13437_s22 + $0x68] sm:$0xff]  ;;  %v13477_v57 = vmax.f32 %v9249_v39, 0.0  ;;  %v6873_v39 = vld [vmem:[%s13437_s22 + $0xb8] sm:$0xff] }
 0x411   :  { %7534 = vmatprep.subr.mxu0 %v6839_v8 }
 0x412   :  { %7535 = vmatpush3.msra.mxu0 %v6839_v8  ;;  %v6848_v8 = vld [vmem:[%s13437_s22 + $0x60] sm:$0xff] }
 0x413   :  { %7536 = vmatprep.subr.mxu0 %v6838_v44 }
 0x414   :  { %7537 = vmatpush3.msra.mxu0 %v6838_v44  ;;  %v13478_v44 = vmax.f32 %v9263_v47, 0.0  ;;  %v6872_v47 = vld [vmem:[%s13437_s22 + $0xb0] sm:$0xff] }
 0x415   :  { %7538 = vmatprep.subr.mxu0 %v6837_v43 }
 0x416   :  { %7539 = vmatpush3.msra.mxu0 %v6837_v43  ;;  %v6860_v43 = vld [vmem:[%s13437_s22 + $0x88] sm:$0xff] }
 0x417   :  { %7541 = vmatmul.mubr.msk.f32.vlgmr.msra.gmra.mxu0 %vm446_vm2, %v13475_v11  ;;  %7557 = vmatprep.subr.mxu0 %v6851_v38  ;;  %v13480_v11 = vmax.f32 %v9275_v53, 0.0  ;;  %v2539_v53 = vld [vmem:[%s13030_s13 + $0x1e0] sm:$0xff] }
 0x418   :  { %7558 = vmatpush3.msra.mxu0 %v6851_v38  ;;  %7565 = vmatprep.mubr.msk.f32.mxu0 %vm446_vm2, %v13476_v59  ;;  %v6859_v38 = vld [vmem:[%s13437_s22 + $0x80] sm:$0xff]  ;;  %v6871_v59 = vld [vmem:[%s13437_s22 + $0xa8] sm:$0xff] }
 0x419   :  { %7559 = vmatprep.subr.mxu0 %v6850_v35 }
 0x41a   :  { %7560 = vmatpush3.msra.mxu0 %v6850_v35  ;;  %v13479_v35 = vmax.f32 %v9261_v45, 0.0  ;;  %v2540_v45 = vld [vmem:[%s13030_s13 + $0x1e8] sm:$0xff] }
 0x41b   :  { %7561 = vmatprep.subr.mxu0 %v6849_v14 }
 0x41c   :  { %7562 = vmatpush3.msra.mxu0 %v6849_v14  ;;  %v6870_v14 = vld [vmem:[%s13437_s22 + $0xa0] sm:$0xff] }
 0x41d   :  { %7563 = vmatprep.subr.mxu0 %v6848_v8 }
 0x41e   :  { %7564 = vmatpush3.msra.mxu0 %v6848_v8  ;;  %v2536_v8 = vld [vmem:[%s13030_s13 + $0x1c8] sm:$0xff] }
 0x41f   :  { %7566 = vmatmul.mubr.msk.f32.vlgmr.msra.gmra.mxu0 %vm446_vm2, %v13477_v57  ;;  %7582 = vmatprep.subr.mxu0 %v6862_v33  ;;  %v2532_v57 = vld [vmem:[%s13030_s13 + $0x1a8] sm:$0xff] }
 0x420   :  { %7583 = vmatpush3.msra.mxu0 %v6862_v33  ;;  %7590 = vmatprep.mubr.msk.f32.mxu0 %vm446_vm2, %v13478_v44  ;;  %v13481_v33 = vmax.f32 %v9273_v51, 0.0  ;;  %v13482_v44 = vmov 0.0   ;;  %v2528_v51 = vld [vmem:[%s13030_s13 + $0x188] sm:$0xff] }
 0x421   :  { %7584 = vmatprep.subr.mxu0 %v6861_v41 }
 0x422   :  { %7585 = vmatpush3.msra.mxu0 %v6861_v41  ;;  %v2535_v41 = vld [vmem:[%s13030_s13 + $0x1c0] sm:$0xff] }
 0x423   :  { %7586 = vmatprep.subr.mxu0 %v6860_v43 }
 0x424   :  { %7587 = vmatpush3.msra.mxu0 %v6860_v43  ;;  %v2531_v43 = vld [vmem:[%s13030_s13 + $0x1a0] sm:$0xff] }
 0x425   :  { %7588 = vmatprep.subr.mxu0 %v6859_v38 }
 0x426   :  { %7589 = vmatpush3.msra.mxu0 %v6859_v38  ;;  %v2527_v38 = vld [vmem:[%s13030_s13 + $0x180] sm:$0xff] }
 0x427   :  { %7591 = vmatmul.mubr.msk.f32.vlgmr.msra.gmra.mxu0 %vm446_vm2, %v13479_v35  ;;  %7607 = vmatprep.subr.mxu0 %v6873_v39  ;;  %v2520_v35 = vld [vmem:[%s13030_s13 + $0x148] sm:$0xff] }
 0x428   :  { %7608 = vmatpush3.msra.mxu0 %v6873_v39  ;;  %7615 = vmatprep.mubr.msk.f32.mxu0 %vm446_vm2, %v13480_v11  ;;  %v2524_v39 = vld [vmem:[%s13030_s13 + $0x168] sm:$0xff]  ;;  %v2519_v11 = vld [vmem:[%s13030_s13 + $0x140] sm:$0xff] }
 0x429   :  { %7609 = vmatprep.subr.mxu0 %v6872_v47 }
 0x42a   :  { %7610 = vmatpush3.msra.mxu0 %v6872_v47  ;;  %v2523_v47 = vld [vmem:[%s13030_s13 + $0x160] sm:$0xff] }
 0x42b   :  { %7611 = vmatprep.subr.mxu0 %v6871_v59 }
 0x42c   :  { %7612 = vmatpush3.msra.mxu0 %v6871_v59  ;;  %v2516_v59 = vld [vmem:[%s13030_s13 + $0x128] sm:$0xff] }
 0x42d   :  { %7613 = vmatprep.subr.mxu0 %v6870_v14 }
 0x42e   :  { %7614 = vmatpush3.msra.mxu0 %v6870_v14  ;;  %v2515_v14 = vld [vmem:[%s13030_s13 + $0x120] sm:$0xff] }
 0x42f   :  { %7616 = vmatmul.mubr.msk.f32.vlgmr.msra.gmra.mxu0 %vm446_vm2, %v13481_v33  ;;  %2745 = vmatprep.subr.mxu0 %v2540_v45  ;;  %v2512_v45 = vld [vmem:[%s13030_s13 + $0x108] sm:$0xff]  ;;  %v2507_v33 = vld [vmem:[%s13030_s13 + $0xe0] sm:$0xff] }
 0x430   :  { %2746 = vmatpush1.msra.mxu0 %v2539_v53  ;;  %2809 = vmatprep.mubr.f32.mxu0 %v13482_v44  ;;  %v2511_v53 = vld [vmem:[%s13030_s13 + $0x100] sm:$0xff] }
 0x431   :  { %2747 = vmatprep.subr.mxu0 %v2536_v8  ;;  %v2508_v8 = vld [vmem:[%s13030_s13 + $0xe8] sm:$0xff] }
 0x432   :  { %2748 = vmatpush1.msra.mxu0 %v2535_v41  ;;  %v2504_v41 = vld [vmem:[%s13030_s13 + $0xc8] sm:$0xff] }
 0x433   :  { %2749 = vmatprep.subr.mxu0 %v2532_v57  ;;  %v2503_v57 = vld [vmem:[%s13030_s13 + $0xc0] sm:$0xff] }
 0x434   :  { %2750 = vmatpush1.msra.mxu0 %v2531_v43  ;;  %v2500_v43 = vld [vmem:[%s13030_s13 + $0xa8] sm:$0xff] }
 0x435   :  { %2751 = vmatprep.subr.mxu0 %v2528_v51  ;;  %v2499_v51 = vld [vmem:[%s13030_s13 + $0xa0] sm:$0xff] }
 0x436   :  { %2752 = vmatpush1.msra.mxu0 %v2527_v38  ;;  %v2496_v38 = vld [vmem:[%s13030_s13 + $0x88] sm:$0xff] }
 0x437   :  { %2753 = vmatprep.subr.mxu0 %v2524_v39  ;;  %v2495_v39 = vld [vmem:[%s13030_s13 + $0x80] sm:$0xff] }
 0x438   :  { %2754 = vmatpush1.msra.mxu0 %v2523_v47  ;;  %v2492_v47 = vld [vmem:[%s13030_s13 + $0x68] sm:$0xff] }
 0x439   :  { %2755 = vmatprep.subr.mxu0 %v2520_v35  ;;  %v2491_v35 = vld [vmem:[%s13030_s13 + $0x60] sm:$0xff] }
 0x43a   :  { %2756 = vmatpush1.msra.mxu0 %v2519_v11  ;;  %v2488_v11 = vld [vmem:[%s13030_s13 + $0x48] sm:$0xff] }
 0x43b   :  { %2757 = vmatprep.subr.mxu0 %v2516_v59  ;;  %v2487_v59 = vld [vmem:[%s13030_s13 + $0x40] sm:$0xff] }
 0x43c   :  { %2758 = vmatpush1.msra.mxu0 %v2515_v14  ;;  %v2484_v14 = vld [vmem:[%s13030_s13 + $0x28] sm:$0xff] }
 0x43d   :  { %2759 = vmatprep.subr.mxu0 %v2512_v45  ;;  %v2483_v45 = vld [vmem:[%s13030_s13 + $0x20] sm:$0xff] }
 0x43e   :  { %2760 = vmatpush1.msra.mxu0 %v2511_v53  ;;  %v2480_v53 = vld [vmem:[%s13030_s13 + $0x8] sm:$0xff] }
 0x43f   :  { %2761 = vmatprep.subr.mxu0 %v2508_v8  ;;  %v2479_v8 = vld [vmem:[%s13030_s13] sm:$0xff] }
 0x440   :  { %2762 = vmatpush1.msra.mxu0 %v2507_v33  ;;  %v9800_v33 = vld [vmem:[#allocation7] sm:$0xff] }
 0x441   :  { %2763 = vmatprep.subr.mxu0 %v2504_v41  ;;  %v9804_v41 = vld [vmem:[#allocation7 + $0x8] sm:$0xff] }
 0x442   :  { %2764 = vmatpush1.msra.mxu0 %v2503_v57  ;;  %v2634_v57 = vld [vmem:[#allocation19 + $0x2d8] sm:$0xff] }
 0x443   :  { %2765 = vmatprep.subr.mxu0 %v2500_v43  ;;  %v2633_v43 = vld [vmem:[#allocation19 + $0x2d0] sm:$0xff] }
 0x444   :  { %2766 = vmatpush1.msra.mxu0 %v2499_v51  ;;  %v2628_v51 = vld [vmem:[#allocation19 + $0x2a8] sm:$0xff] }
 0x445   :  { %2767 = vmatprep.subr.mxu0 %v2496_v38  ;;  %v2627_v38 = vld [vmem:[#allocation19 + $0x2a0] sm:$0xff] }
 0x446   :  { %2768 = vmatpush1.msra.mxu0 %v2495_v39  ;;  %v2622_v39 = vld [vmem:[#allocation19 + $0x278] sm:$0xff] }
 0x447   :  { %2769 = vmatprep.subr.mxu0 %v2492_v47  ;;  %v2621_v47 = vld [vmem:[#allocation19 + $0x270] sm:$0xff] }
 0x448   :  { %2770 = vmatpush1.msra.mxu0 %v2491_v35  ;;  %v2616_v35 = vld [vmem:[#allocation19 + $0x248] sm:$0xff] }
 0x449   :  { %2771 = vmatprep.subr.mxu0 %v2488_v11  ;;  %v2615_v11 = vld [vmem:[#allocation19 + $0x240] sm:$0xff] }
 0x44a   :  { %2772 = vmatpush1.msra.mxu0 %v2487_v59  ;;  %v2610_v59 = vld [vmem:[#allocation19 + $0x218] sm:$0xff] }
 0x44b   :  { %2773 = vmatprep.subr.mxu0 %v2484_v14  ;;  %v2609_v14 = vld [vmem:[#allocation19 + $0x210] sm:$0xff] }
 0x44c   :  { %2774 = vmatpush1.msra.mxu0 %v2483_v45  ;;  %v2604_v45 = vld [vmem:[#allocation19 + $0x1e8] sm:$0xff] }
 0x44d   :  { %2775 = vmatprep.subr.mxu0 %v2480_v53  ;;  %v2603_v53 = vld [vmem:[#allocation19 + $0x1e0] sm:$0xff] }
 0x44e   :  { %2776 = vmatpush1.msra.mxu0 %v2479_v8  ;;  %v2598_v8 = vld [vmem:[#allocation19 + $0x1b8] sm:$0xff] }
 0x44f   :  { %2810 = vmatmul.mubr.f32.vlgmr.msra.gmra.mxu0 %v9800_v33  ;;  %2903 = vmatprep.subr.mxu0 %v2634_v57  ;;  %v2597_v57 = vld [vmem:[#allocation19 + $0x1b0] sm:$0xff] }
 0x450   :  { %2815 = vmatprep.mubr.f32.mxu0 %v13482_v44  ;;  %2904 = vmatpush1.msra.mxu0 %v2633_v43  ;;  %v2592_v43 = vld [vmem:[#allocation19 + $0x188] sm:$0xff] }
 0x451   :  { %2905 = vmatprep.subr.mxu0 %v2628_v51  ;;  %v2591_v51 = vld [vmem:[#allocation19 + $0x180] sm:$0xff] }
 0x452   :  { %2906 = vmatpush1.msra.mxu0 %v2627_v38  ;;  %v2586_v38 = vld [vmem:[#allocation19 + $0x158] sm:$0xff] }
 0x453   :  { %2816 = vmatmul.mubr.f32.gmra.mxu0 %v9804_v41  ;;  %2907 = vmatprep.subr.mxu0 %v2622_v39  ;;  %v2585_v39 = vld [vmem:[#allocation19 + $0x150] sm:$0xff] }
 0x454   :  { %2967 = vmatprep.mubr.f32.mxu0 %v13482_v44  ;;  %2908 = vmatpush1.msra.mxu0 %v2621_v47  ;;  %v2580_v47 = vld [vmem:[#allocation19 + $0x128] sm:$0xff] }
 0x455   :  { %2909 = vmatprep.subr.mxu0 %v2616_v35  ;;  %v2579_v35 = vld [vmem:[#allocation19 + $0x120] sm:$0xff] }
 0x456   :  { %2910 = vmatpush1.msra.mxu0 %v2615_v11  ;;  %v2574_v11 = vld [vmem:[#allocation19 + $0xf8] sm:$0xff] }
 0x457   :  { %2911 = vmatprep.subr.mxu0 %v2610_v59  ;;  %v2573_v59 = vld [vmem:[#allocation19 + $0xf0] sm:$0xff] }
 0x458   :  { %2912 = vmatpush1.msra.mxu0 %v2609_v14  ;;  %v2568_v14 = vld [vmem:[#allocation19 + $0xc8] sm:$0xff] }
 0x459   :  { %2913 = vmatprep.subr.mxu0 %v2604_v45  ;;  %v2567_v45 = vld [vmem:[#allocation19 + $0xc0] sm:$0xff] }
 0x45a   :  { %2914 = vmatpush1.msra.mxu0 %v2603_v53  ;;  %v2562_v53 = vld [vmem:[#allocation19 + $0x98] sm:$0xff] }
 0x45b   :  { %2915 = vmatprep.subr.mxu0 %v2598_v8  ;;  %v2561_v8 = vld [vmem:[#allocation19 + $0x90] sm:$0xff] }
 0x45c   :  { %2916 = vmatpush1.msra.mxu0 %v2597_v57  ;;  %v2556_v57 = vld [vmem:[#allocation19 + $0x68] sm:$0xff] }
 0x45d   :  { %2917 = vmatprep.subr.mxu0 %v2592_v43  ;;  %v2555_v43 = vld [vmem:[#allocation19 + $0x60] sm:$0xff] }
 0x45e   :  { %2918 = vmatpush1.msra.mxu0 %v2591_v51  ;;  %v2550_v51 = vld [vmem:[#allocation19 + $0x38] sm:$0xff] }
 0x45f   :  { %2919 = vmatprep.subr.mxu0 %v2586_v38  ;;  %v2549_v38 = vld [vmem:[#allocation19 + $0x30] sm:$0xff] }
 0x460   :  { %2920 = vmatpush1.msra.mxu0 %v2585_v39  ;;  %v2544_v39 = vld [vmem:[#allocation19 + $0x8] sm:$0xff] }
 0x461   :  { %2921 = vmatprep.subr.mxu0 %v2580_v47  ;;  %v2543_v47 = vld [vmem:[#allocation19] sm:$0xff] }
 0x462   :  { %2922 = vmatpush1.msra.mxu0 %v2579_v35  ;;  %v2638_v35 = vld [vmem:[#allocation19 + $0x2f8] sm:$0xff] }
 0x463   :  { %2923 = vmatprep.subr.mxu0 %v2574_v11  ;;  %v9808_v11 = vpop.f32.mrf.mxu0 }
 0x464   :  { %2924 = vmatpush1.msra.mxu0 %v2573_v59  ;;  %13483 = vst [vmem:[#allocation74_spill] sm:$0xff] %v9808_v11  ;;  %v6832_v59 = vld [vmem:[#allocation5 + $0x1] ss:$0 sm:$0xff] }
 0x465   :  { %2925 = vmatprep.subr.mxu0 %v2568_v14 }
 0x466   :  { %2926 = vmatpush1.msra.mxu0 %v2567_v45 }
 0x467   :  { %2927 = vmatprep.subr.mxu0 %v2562_v53 }
 0x468   :  { %2928 = vmatpush1.msra.mxu0 %v2561_v8 }
 0x469   :  { %2929 = vmatprep.subr.mxu0 %v2556_v57 }
 0x46a   :  { %2930 = vmatpush1.msra.mxu0 %v2555_v43  ;;  %v1460_v43 = vld [vmem:[#allocation2 + $0x20] sm:$0xff] }
 0x46b   :  { %2931 = vmatprep.subr.mxu0 %v2550_v51 }
 0x46c   :  { %2932 = vmatpush1.msra.mxu0 %v2549_v38 }
 0x46d   :  { %2933 = vmatprep.subr.mxu0 %v2544_v39  ;;  %v1461_v39 = vld [vmem:[#allocation2 + $0x28] sm:$0xff] }
 0x46e   :  { %2934 = vmatpush1.msra.mxu0 %v2543_v47 }
 0x46f   :  { %3057 = vmatprep.subr.mxu0 %v2638_v35 }
 0x4cf   :  { %v7524_v14 = vpop.f32.mrf.mxu0 }
 0x4d0   :  { %v1373_v45 = vadd.f32 %v7524_v14, %v6832_v59 }
 0x4d1   :  { %v1367_v53 = vpop.f32.mrf.mxu0 }
 0x4d2   :  { %v1368_v8 = vadd.f32 %v6832_v59, %v1367_v53  ;;  %v1377_v63 = vmax.f32 %v1373_v45, 0.0  ;;  %v9829_v45 = vld [vmem:[#allocation17] sm:$0xf] }
 0x4d3   :  { %v9833_v53 = vrot.slane %v9829_v45, %v9550_v6 }
 0x4d4   :  { %v1376_v57 = vmax.f32 %v1368_v8, 0.0 }
 0x4d5   :  { %13484 = vst [vmem:[#allocation75_spill] sm:$0xff] %v9833_v53 }
 0x4d6   :  { %7529 = vmatprep.mubr.msk.f32.mxu1 %vm1039_vm4, %v1376_v57  ;;  %v550_v57 = vadd.f32 %v9395_v10, %v9393_v9  ;;  %v2631_v9 = vld [vmem:[#allocation19 + $0x2c0] sm:$0xff]  ;;  %v2626_v10 = vld [vmem:[#allocation19 + $0x298] sm:$0xff] }
 0x4d7   :  { %7530 = vmatmul.mubr.msk.f32.vlgmr.msra.gmra.mxu1 %vm1039_vm4, %v1377_v63  ;;  %v7542_v51 = vpop.f32.mrf.mxu0 }
 0x4d8   :  { %7543 = vmatprep.subr.mxu1 %v7542_v51  ;;  %7547 = vmatprep.mubr.msk.f32.mxu1 %vm1039_vm4, %v1460_v43 }
 0x4d9   :  { %v1533_v38 = vpop.f32.mrf.mxu0  ;;  %7544 = vmatpush3.msra.mxu1 %v7542_v51  ;;  %v1196_v51 = vadd.f32 %v9628_v46, %v550_v57  ;;  %v2620_v57 = vld [vmem:[#allocation19 + $0x268] sm:$0xff] }
 0x4da   :  { %7545 = vmatprep.subr.mxu1 %v1533_v38 }
 0x4db   :  { %7546 = vmatpush3.msra.mxu1 %v1533_v38 }
 0x4dc   :  { %7548 = vmatmul.mubr.msk.f32.vlgmr.msra.gmra.mxu1 %vm1039_vm4, %v1461_v39  ;;  %7550 = vmatprep.subr.mxu1 %v9471_v20 }
 0x4dd   :  { %7551 = vmatpush3.msra.mxu1 %v9471_v20 }
 0x4de   :  { %7552 = vmatprep.subr.mxu1 %v9478_v54 }
 0x4df   :  { %7553 = vmatpush3.msra.mxu1 %v9478_v54  ;;  %v9818_v63 = vpop.f32.mrf.mxu0 }
 0x4e0   :  { %7568 = vmatprep.subr.mxu1 %v9818_v63 }
 0x4e1   :  { %v9821_v47 = vpop.f32.mrf.mxu0 }
 0x4e7   :  { %v9823_v35 = vpop.f32.mrf.mxu0 }
 0x4e9   :  { %v9825_v59 = vpop.f32.mrf.mxu0 }
 0x4ef   :  { %v9827_v14 = vpop.f32.mrf.mxu0 }
 0x4f1   :  { %v9835_v8 = vpop.f32.mrf.mxu0 }
 0x50f   :  { %v2811_v43 = vpop.f32.mrf.mxu0 }
 0x510   :  { %v2812_v38 = vadd.f32 %v2811_v43, %v9833_v53  ;;  %v2601_v43 = vld [vmem:[#allocation19 + $0x1d0] sm:$0xff] }
 0x511   :  { %v9841_v39 = vpop.f32.mrf.mxu0 }
 0x512   :  { %v2899_v11 = vadd.f32 %v2812_v38, %v1196_v51  ;;  %v2596_v51 = vld [vmem:[#allocation19 + $0x1a8] sm:$0xff]  ;;  %v2595_v38 = vld [vmem:[#allocation19 + $0x1a0] sm:$0xff] }
 0x513   :  { %v2817_v37 = vpop.f32.mrf.mxu0 }
 0x514   :  { %v9843_v21 = vmax.f32 %v2899_v11, 0.0  ;;  %v2818_v28 = vadd.f32 %v2817_v37, %v9833_v53  ;;  %v2625_v11 = vld [vmem:[#allocation19 + $0x290] sm:$0xff]  ;;  %v2619_v37 = vld [vmem:[#allocation19 + $0x260] sm:$0xff] }
 0x516   :  { %3400 = vst [vmem:[#allocation25] sm:$0xff] %v9843_v21  ;;  %v2900_v0 = vadd.f32 %v2818_v28, %v9626_v25  ;;  %2968 = vmatmul.mubr.f32.vlgmr.msra.gmra.mxu0 %v9843_v21  ;;  %v2614_v28 = vld [vmem:[#allocation19 + $0x238] sm:$0xff]  ;;  %v2608_v25 = vld [vmem:[#allocation19 + $0x208] sm:$0xff] }
 0x517   :  { %3058 = vmatpush1.msra.mxu0 %v2637_v34  ;;  %2973 = vmatprep.mubr.f32.mxu0 %v13482_v44  ;;  %v2613_v34 = vld [vmem:[#allocation19 + $0x230] sm:$0xff] }
 0x518   :  { %v9850_v46 = vmax.f32 %v2900_v0, 0.0  ;;  %3059 = vmatprep.subr.mxu0 %v2632_v2  ;;  %v2607_v0 = vld [vmem:[#allocation19 + $0x200] sm:$0xff]  ;;  %v2602_v2 = vld [vmem:[#allocation19 + $0x1d8] sm:$0xff] }
 0x519   :  { %3060 = vmatpush1.msra.mxu0 %v2631_v9  ;;  %v2590_v9 = vld [vmem:[#allocation19 + $0x178] sm:$0xff] }
 0x51a   :  { %3401 = vst [vmem:[#allocation25 + $0x8] sm:$0xff] %v9850_v46  ;;  %3061 = vmatprep.subr.mxu0 %v2626_v10  ;;  %2974 = vmatmul.mubr.f32.gmra.mxu0 %v9850_v46  ;;  %v2589_v10 = vld [vmem:[#allocation19 + $0x170] sm:$0xff] }
 0x51b   :  { %3062 = vmatpush1.msra.mxu0 %v2625_v11  ;;  %3121 = vmatprep.mubr.f32.mxu0 %v13482_v44  ;;  %v2584_v11 = vld [vmem:[#allocation19 + $0x148] sm:$0xff] }
 0x51c   :  { %3063 = vmatprep.subr.mxu0 %v2620_v57  ;;  %v2583_v57 = vld [vmem:[#allocation19 + $0x140] sm:$0xff] }
 0x51d   :  { %3064 = vmatpush1.msra.mxu0 %v2619_v37  ;;  %v2578_v37 = vld [vmem:[#allocation19 + $0x118] sm:$0xff] }
 0x51e   :  { %3065 = vmatprep.subr.mxu0 %v2614_v28  ;;  %v2577_v28 = vld [vmem:[#allocation19 + $0x110] sm:$0xff] }
 0x51f   :  { %3066 = vmatpush1.msra.mxu0 %v2613_v34  ;;  %v2572_v34 = vld [vmem:[#allocation19 + $0xe8] sm:$0xff] }
 0x520   :  { %3067 = vmatprep.subr.mxu0 %v2608_v25  ;;  %v2571_v25 = vld [vmem:[#allocation19 + $0xe0] sm:$0xff] }
 0x521   :  { %3068 = vmatpush1.msra.mxu0 %v2607_v0  ;;  %v2566_v0 = vld [vmem:[#allocation19 + $0xb8] sm:$0xff] }
 0x522   :  { %3069 = vmatprep.subr.mxu0 %v2602_v2  ;;  %v2565_v2 = vld [vmem:[#allocation19 + $0xb0] sm:$0xff] }
 0x523   :  { %3070 = vmatpush1.msra.mxu0 %v2601_v43  ;;  %v2560_v43 = vld [vmem:[#allocation19 + $0x88] sm:$0xff] }
 0x524   :  { %3071 = vmatprep.subr.mxu0 %v2596_v51  ;;  %v2559_v51 = vld [vmem:[#allocation19 + $0x80] sm:$0xff] }
 0x525   :  { %3072 = vmatpush1.msra.mxu0 %v2595_v38  ;;  %v2554_v38 = vld [vmem:[#allocation19 + $0x58] sm:$0xff] }
 0x526   :  { %3073 = vmatprep.subr.mxu0 %v2590_v9  ;;  %v2553_v9 = vld [vmem:[#allocation19 + $0x50] sm:$0xff] }
 0x527   :  { %3074 = vmatpush1.msra.mxu0 %v2589_v10  ;;  %v2548_v10 = vld [vmem:[#allocation19 + $0x28] sm:$0xff] }
 0x528   :  { %3075 = vmatprep.subr.mxu0 %v2584_v11  ;;  %v2547_v11 = vld [vmem:[#allocation19 + $0x20] sm:$0xff] }
 0x529   :  { %3076 = vmatpush1.msra.mxu0 %v2583_v57  ;;  %v2686_v57 = vld [vmem:[#allocation22 + $0x178] sm:$0xff] }
 0x52a   :  { %3077 = vmatprep.subr.mxu0 %v2578_v37  ;;  %v2685_v37 = vld [vmem:[#allocation22 + $0x170] sm:$0xff] }
 0x52b   :  { %3078 = vmatpush1.msra.mxu0 %v2577_v28  ;;  %v2684_v28 = vld [vmem:[#allocation22 + $0x168] sm:$0xff] }
 0x52c   :  { %3079 = vmatprep.subr.mxu0 %v2572_v34  ;;  %v2683_v34 = vld [vmem:[#allocation22 + $0x160] sm:$0xff] }
 0x52d   :  { %3080 = vmatpush1.msra.mxu0 %v2571_v25  ;;  %v2682_v25 = vld [vmem:[#allocation22 + $0x158] sm:$0xff] }
 0x52e   :  { %3081 = vmatprep.subr.mxu0 %v2566_v0  ;;  %v2681_v0 = vld [vmem:[#allocation22 + $0x150] sm:$0xff] }
 0x52f   :  { %3082 = vmatpush1.msra.mxu0 %v2565_v2  ;;  %v2680_v2 = vld [vmem:[#allocation22 + $0x148] sm:$0xff] }
 0x530   :  { %3083 = vmatprep.subr.mxu0 %v2560_v43  ;;  %v2679_v43 = vld [vmem:[#allocation22 + $0x140] sm:$0xff] }
 0x531   :  { %3084 = vmatpush1.msra.mxu0 %v2559_v51  ;;  %v2678_v51 = vld [vmem:[#allocation22 + $0x138] sm:$0xff] }
 0x532   :  { %3085 = vmatprep.subr.mxu0 %v2554_v38  ;;  %v2677_v38 = vld [vmem:[#allocation22 + $0x130] sm:$0xff] }
 0x533   :  { %3086 = vmatpush1.msra.mxu0 %v2553_v9  ;;  %v2676_v9 = vld [vmem:[#allocation22 + $0x128] sm:$0xff] }
 0x534   :  { %3087 = vmatprep.subr.mxu0 %v2548_v10  ;;  %v2675_v10 = vld [vmem:[#allocation22 + $0x120] sm:$0xff] }
 0x535   :  { %3088 = vmatpush1.msra.mxu0 %v2547_v11  ;;  %v2674_v11 = vld [vmem:[#allocation22 + $0x118] sm:$0xff] }
 0x536   :  { %3122 = vmatmul.mubr.f32.vlgmr.msra.gmra.mxu0 %v9843_v21  ;;  %7632 = vmatprep.subr.mxu0 %v2686_v57 }
 0x537   :  { %3127 = vmatprep.mubr.f32.mxu0 %v13482_v44  ;;  %7633 = vmatpush3.msra.mxu0 %v2686_v57  ;;  %v2673_v57 = vld [vmem:[#allocation22 + $0x110] sm:$0xff] }
 0x538   :  { %7634 = vmatprep.subr.mxu0 %v2685_v37 }
 0x539   :  { %7635 = vmatpush3.msra.mxu0 %v2685_v37 }
 0x53a   :  { %3128 = vmatmul.mubr.f32.gmra.mxu0 %v9850_v46  ;;  %7636 = vmatprep.subr.mxu0 %v2684_v28 }
 0x53b   :  { %7637 = vmatpush3.msra.mxu0 %v2684_v28  ;;  %v9858_v28 = vld [vmem:[#allocation13] ss:$0 sm:$0xff] }
 0x53c   :  { %7638 = vmatprep.subr.mxu0 %v2683_v34  ;;  %v590_v56 = vadd.f32 %v9858_v28, %v9415_v23  ;;  %v10127_v23 = vld [vmem:[#allocation19 + $0x2b8] sm:$0xff] }
 0x53d   :  { %7639 = vmatpush3.msra.mxu0 %v2683_v34  ;;  %v560_v34 = vadd.f32 %v9858_v28, %v9400_v13 }
 0x53e   :  { %7640 = vmatprep.subr.mxu0 %v2682_v25 }
 0x53f   :  { %7641 = vmatpush3.msra.mxu0 %v2682_v25 }
 0x540   :  { %7642 = vmatprep.subr.mxu0 %v2681_v0 }
 0x541   :  { %7643 = vmatpush3.msra.mxu0 %v2681_v0  ;;  %v2672_v0 = vld [vmem:[#allocation22 + $0x108] sm:$0xff] }
 0x542   :  { %7644 = vmatprep.subr.mxu0 %v2680_v2 }
 0x543   :  { %7645 = vmatpush3.msra.mxu0 %v2680_v2 }
 0x544   :  { %7646 = vmatprep.subr.mxu0 %v2679_v43 }
 0x545   :  { %7647 = vmatpush3.msra.mxu0 %v2679_v43 }
 0x546   :  { %7648 = vmatprep.subr.mxu0 %v2678_v51 }
 0x547   :  { %7649 = vmatpush3.msra.mxu0 %v2678_v51  ;;  %v6843_v51 = vld [vmem:[#allocation5 + $0x2] ss:$0 sm:$0xff] }
 0x548   :  { %7650 = vmatprep.subr.mxu0 %v2677_v38 }
 0x549   :  { %7651 = vmatpush3.msra.mxu0 %v2677_v38  ;;  %v2671_v38 = vld [vmem:[#allocation22 + $0x100] sm:$0xff] }
 0x54a   :  { %7652 = vmatprep.subr.mxu0 %v2676_v9 }
 0x54b   :  { %7653 = vmatpush3.msra.mxu0 %v2676_v9 }
 0x54c   :  { %7654 = vmatprep.subr.mxu0 %v2675_v10 }
 0x54d   :  { %7655 = vmatpush3.msra.mxu0 %v2675_v10 }
 0x54e   :  { %7656 = vmatprep.subr.mxu0 %v2674_v11 }
 0x54f   :  { %7657 = vmatpush3.msra.mxu0 %v2674_v11  ;;  %v1716_v11 = vld [vmem:[#allocation2 + $0x38] sm:$0xff] }
 0x550   :  { %7658 = vmatprep.subr.mxu0 %v2673_v57 }
 0x551   :  { %7659 = vmatpush3.msra.mxu0 %v2673_v57 }
 0x552   :  { %7660 = vmatprep.subr.mxu0 %v2672_v0 }
 0x553   :  { %7661 = vmatpush3.msra.mxu0 %v2672_v0  ;;  %v760_v0 = vadd.f32 %v9552_v26, %v9561_v49 }
 0x554   :  { %7662 = vmatprep.subr.mxu0 %v2671_v38 }
 0x555   :  { %7663 = vmatpush3.msra.mxu0 %v2671_v38 }
 0x597   :  { %v7531_v37 = vpop.f32.mrf.mxu1 }
 0x598   :  { %v9863_v25 = vadd.f32 %v7531_v37, %v9398_v12  ;;  %v1715_v37 = vld [vmem:[#allocation2 + $0x30] sm:$0xff] }
 0x599   :  { %v1450_v2 = vpop.f32.mrf.mxu1 }
 0x59a   :  { %13485 = vst [vmem:[#allocation76_spill] sm:$0xff] %v9863_v25  ;;  %v9865_v43 = vadd.f32 %v1450_v2, %v560_v34 }
 0x59c   :  { %13486 = vst [vmem:[#allocation77_spill] sm:$0xff] %v9865_v43  ;;  %v7549_v9 = vpop.f32.mrf.mxu1 }
 0x59d   :  { %v1628_v10 = vadd.f32 %v7549_v9, %v6843_v51 }
 0x59e   :  { %v1622_v61 = vpop.f32.mrf.mxu1 }
 0x59f   :  { %v1623_v13 = vadd.f32 %v6843_v51, %v1622_v61  ;;  %v1632_v12 = vmax.f32 %v1628_v10, 0.0  ;;  %v9881_v61 = vrot.slane %v9829_v45, %v9555_v32 }
 0x5a1   :  { %v1631_v7 = vmax.f32 %v1623_v13, 0.0  ;;  %13487 = vst [vmem:[#allocation78_spill] sm:$0xff] %v9881_v61  ;;  %v9903_v13 = vld [vmem:[#allocation20] sm:$0x7] }
 0x5a3   :  { %7554 = vmatprep.mubr.msk.f32.mxu1 %vm1039_vm4, %v1631_v7  ;;  %v9883_v7 = vpop.f32.mrf.mxu0 }
 0x5a4   :  { %7555 = vmatmul.mubr.msk.f32.vlgmr.msra.gmra.mxu1 %vm1039_vm4, %v1632_v12 }
 0x5a5   :  { %7569 = vmatpush3.msra.mxu1 %v9818_v63  ;;  %7572 = vmatprep.mubr.msk.f32.mxu1 %vm1039_vm4, %v1715_v37  ;;  %v754_v63 = vadd.f32 %v9545_v31, %v9561_v49  ;;  %v762_v31 = vadd.f32 %v9557_v17, %v9565_v55 }
 0x5a6   :  { %7570 = vmatprep.subr.mxu1 %v9821_v47 }
 0x5a7   :  { %7571 = vmatpush3.msra.mxu1 %v9821_v47  ;;  %v2814_v47 = vadd.f32 %v9841_v39, %v9881_v61 }
 0x5a8   :  { %7575 = vmatprep.subr.mxu1 %v9471_v20  ;;  %7573 = vmatmul.mubr.msk.f32.vlgmr.msra.gmra.mxu1 %vm1039_vm4, %v1716_v11 }
 0x5a9   :  { %7576 = vmatpush3.msra.mxu1 %v9471_v20  ;;  %v756_v20 = vadd.f32 %v9547_v5, %v9565_v55  ;;  %v9907_v5 = vrot.slane %v9903_v13, %v9426_v30  ;;  %v2505_v55 = vld [vmem:[%s13030_s13 + $0xd0] sm:$0xff] }
 0x5aa   :  { %7577 = vmatprep.subr.mxu1 %v9478_v54 }
 0x5ab   :  { %7578 = vmatpush3.msra.mxu1 %v9478_v54  ;;  %13489 = vst [vmem:[#allocation80_spill] sm:$0xff] %v9907_v5 }
 0x5ac   :  { %7593 = vmatprep.subr.mxu1 %v9823_v35 }
 0x5d6   :  { %v2969_v57 = vpop.f32.mrf.mxu0 }
 0x5d7   :  { %v3134_v34 = vadd.f32 %v2969_v57, %v754_v63 }
 0x5d8   :  { %v2971_v54 = vpop.f32.mrf.mxu0 }
 0x5d9   :  { %v9893_v2 = vadd.f32 %v3134_v34, %v2814_v47  ;;  %v9895_v51 = vadd.f32 %v2971_v54, %v756_v20 }
 0x5da   :  { %v2975_v38 = vpop.f32.mrf.mxu0 }
 0x5db   :  { %v9899_v9 = vadd.f32 %v2975_v38, %v760_v0 }
 0x5dc   :  { %v2977_v39 = vpop.f32.mrf.mxu0 }
 0x5dd   :  { %v9901_v10 = vadd.f32 %v2977_v39, %v762_v31  ;;  %v570_v39 = vadd.f32 %v9858_v28, %v9405_v16  ;;  %v8083_v16 = vld [vmem:[%s13027_s10 + $0x8] sm:$0xff] }
 0x5df   :  { %13488 = vst [vmem:[#allocation79_spill] sm:$0xff] %v9901_v10 }
 0x5f6   :  { %v9909_v26 = vpop.f32.mrf.mxu0 }
 0x5f8   :  { %v3125_v49 = vpop.f32.mrf.mxu0 }
 0x5f9   :  { %v3184_v12 = vadd.f32 %v3125_v49, %v9907_v5 }
 0x5fa   :  { %v9912_v37 = vpop.f32.mrf.mxu0 }
 0x5fb   :  { %13490 = vst [vmem:[#allocation81_spill] sm:$0xff] %v9912_v37  ;;  %v6888_v11 = vmul.f32 -1.442695, %v3184_v12 }
 0x5fc   :  { %v3131_v17 = vpop.f32.mrf.mxu0 }
 0x5fd   :  { %7866 = vpow2.f32 %v6888_v11  ;;  %v3187_v63 = vadd.f32 %v3131_v17, %v9907_v5  ;;  %v6854_v17 = vld [vmem:[#allocation5 + $0x3] ss:$0 sm:$0xff]  ;;  %v2485_v5 = vld [vmem:[%s13030_s13 + $0x30] sm:$0xff] }
 0x5ff   :  { %v6891_v47 = vmul.f32 -1.442695, %v3187_v63 }
 0x601   :  { %7868 = vpow2.f32 %v6891_v47 }
 0x60a   :  { %v7867_v57 = vpop.eup %7866 }
 0x60b   :  { %v3214_v20 = vadd.f32 1.0, %v7867_v57 }
 0x60d   :  { %7870 = vrcp.f32 %v3214_v20 }
 0x60e   :  { %v7869_v34 = vpop.eup %7868 }
 0x60f   :  { %v3217_v54 = vadd.f32 1.0, %v7869_v34 }
 0x611   :  { %7872 = vrcp.f32 %v3217_v54 }
 0x61a   :  { %v7871_v0 = vpop.eup %7870 }
 0x61b   :  { %7664 = vmatprep.mubr.f32.mxu0 %v7871_v0  ;;  %v1970_v0 = vld [vmem:[#allocation2 + $0x40] sm:$0xff] }
 0x61e   :  { %v7873_v38 = vpop.eup %7872 }
 0x61f   :  { %7665 = vmatmul.mubr.f32.vlgmr.msra.gmra.mxu0 %v7873_v38  ;;  %v8084_v38 = vld [vmem:[%s13027_s10] sm:$0xff] }
 0x620   :  { %3545 = vmatprep.mubr.f32.mxu0 %v13482_v44 }
 0x664   :  { %v7556_v31 = vpop.f32.mrf.mxu1 }
 0x665   :  { %v9919_v49 = vadd.f32 %v7556_v31, %v9403_v15  ;;  %v1971_v15 = vld [vmem:[#allocation2 + $0x48] sm:$0xff] }
 0x666   :  { %v1705_v12 = vpop.f32.mrf.mxu1 }
 0x667   :  { %13491 = vst [vmem:[#allocation82_spill] sm:$0xff] %v9919_v49  ;;  %v9921_v11 = vadd.f32 %v1705_v12, %v570_v39  ;;  %v2490_v49 = vld [vmem:[%s13030_s13 + $0x58] sm:$0xff] }
 0x668   :  { %v7574_v63 = vpop.f32.mrf.mxu1 }
 0x669   :  { %13492 = vst [vmem:[#allocation83_spill] sm:$0xff] %v9921_v11  ;;  %v1883_v47 = vadd.f32 %v7574_v63, %v6854_v17  ;;  %v2489_v11 = vld [vmem:[%s13030_s13 + $0x50] sm:$0xff] }
 0x66a   :  { %v1877_v57 = vpop.f32.mrf.mxu1 }
 0x66b   :  { %v1878_v20 = vadd.f32 %v6854_v17, %v1877_v57  ;;  %v1887_v54 = vmax.f32 %v1883_v47, 0.0  ;;  %v6865_v17 = vld [vmem:[#allocation5 + $0x4] ss:$0 sm:$0xff] }
 0x66d   :  { %v1886_v34 = vmax.f32 %v1878_v20, 0.0 }
 0x66f   :  { %7579 = vmatprep.mubr.msk.f32.mxu1 %vm1039_vm4, %v1886_v34 }
 0x670   :  { %7580 = vmatmul.mubr.msk.f32.vlgmr.msra.gmra.mxu1 %vm1039_vm4, %v1887_v54 }
 0x671   :  { %7594 = vmatpush3.msra.mxu1 %v9823_v35  ;;  %7597 = vmatprep.mubr.msk.f32.mxu1 %vm1039_vm4, %v1970_v0  ;;  %v2225_v0 = vld [vmem:[#allocation2 + $0x50] sm:$0xff] }
 0x672   :  { %7595 = vmatprep.subr.mxu1 %v9825_v59 }
 0x673   :  { %7596 = vmatpush3.msra.mxu1 %v9825_v59  ;;  %v580_v59 = vadd.f32 %v9858_v28, %v9410_v19  ;;  %v2542_v19 = vld [vmem:[%s13030_s13 + $0x1f8] sm:$0xff] }
 0x674   :  { %7600 = vmatprep.subr.mxu1 %v8083_v16  ;;  %7598 = vmatmul.mubr.msk.f32.vlgmr.msra.gmra.mxu1 %vm1039_vm4, %v1971_v15  ;;  %v9968_v15 = vld [vmem:[%s13030_s13 + $0x1d0] sm:$0xff] }
 0x675   :  { %7601 = vmatpush3.msra.mxu1 %v8083_v16  ;;  %3481 = vmatprep.subr.mxu0 %v2542_v19 }
 0x676   :  { %7602 = vmatprep.subr.mxu1 %v8084_v38 }
 0x677   :  { %7603 = vmatpush3.msra.mxu1 %v8084_v38 }
 0x678   :  { %7618 = vmatprep.subr.mxu1 %v9827_v14 }
 0x730   :  { %v7581_v35 = vpop.f32.mrf.mxu1 }
 0x731   :  { %v9940_v31 = vadd.f32 %v7581_v35, %v9408_v18  ;;  %v2226_v18 = vld [vmem:[#allocation2 + $0x58] sm:$0xff] }
 0x732   :  { %v1960_v39 = vpop.f32.mrf.mxu1  ;;  %v9986_v35 = vld [vmem:[%s13030_s13 + $0x198] sm:$0xff] }
 0x733   :  { %13493 = vst [vmem:[#allocation84_spill] sm:$0xff] %v9940_v31  ;;  %v9942_v12 = vadd.f32 %v1960_v39, %v580_v59  ;;  %v9992_v59 = vld [vmem:[%s13030_s13 + $0x190] sm:$0xff]  ;;  %v9998_v39 = vld [vmem:[%s13030_s13 + $0x178] sm:$0xff] }
 0x734   :  { %v7599_v63 = vpop.f32.mrf.mxu1  ;;  %v2502_v31 = vld [vmem:[%s13030_s13 + $0xb8] sm:$0xff] }
 0x735   :  { %13494 = vst [vmem:[#allocation85_spill] sm:$0xff] %v9942_v12  ;;  %v2138_v47 = vadd.f32 %v7599_v63, %v6865_v17  ;;  %v10010_v63 = vld [vmem:[%s13030_s13 + $0x158] sm:$0xff]  ;;  %v2501_v12 = vld [vmem:[%s13030_s13 + $0xb0] sm:$0xff] }
 0x736   :  { %v2132_v57 = vpop.f32.mrf.mxu1 }
 0x737   :  { %v2133_v20 = vadd.f32 %v6865_v17, %v2132_v57  ;;  %v2142_v54 = vmax.f32 %v2138_v47, 0.0  ;;  %v10004_v17 = vld [vmem:[%s13030_s13 + $0x170] sm:$0xff]  ;;  %v10022_v57 = vld [vmem:[%s13030_s13 + $0x138] sm:$0xff] }
 0x738   :  { %v10016_v47 = vld [vmem:[%s13030_s13 + $0x150] sm:$0xff] }
 0x739   :  { %v2141_v34 = vmax.f32 %v2133_v20, 0.0  ;;  %v10028_v20 = vld [vmem:[%s13030_s13 + $0x130] sm:$0xff] }
 0x73b   :  { %7604 = vmatprep.mubr.msk.f32.mxu1 %vm1039_vm4, %v2141_v34  ;;  %v10034_v34 = vld [vmem:[%s13030_s13 + $0x118] sm:$0xff] }
 0x73c   :  { %7605 = vmatmul.mubr.msk.f32.vlgmr.msra.gmra.mxu1 %vm1039_vm4, %v2142_v54  ;;  %v10040_v54 = vld [vmem:[%s13030_s13 + $0x110] sm:$0xff] }
 0x73d   :  { %7619 = vmatpush3.msra.mxu1 %v9827_v14  ;;  %7622 = vmatprep.mubr.msk.f32.mxu1 %vm1039_vm4, %v2225_v0  ;;  %v9957_v14 = vld [vmem:[%s13030_s13 + $0x1f0] sm:$0xff]  ;;  %v10046_v0 = vld [vmem:[%s13030_s13 + $0xf8] sm:$0xff] }
 0x73e   :  { %7620 = vmatprep.subr.mxu1 %v9835_v8  ;;  %3482 = vmatpush1.msra.mxu0 %v9957_v14 }
 0x73f   :  { %7621 = vmatpush3.msra.mxu1 %v9835_v8  ;;  %v9962_v8 = vld [vmem:[%s13030_s13 + $0x1d8] sm:$0xff] }
 0x740   :  { %7623 = vmatmul.mubr.msk.f32.vlgmr.msra.gmra.mxu1 %vm1039_vm4, %v2226_v18  ;;  %7625 = vmatprep.subr.mxu1 %v8083_v16  ;;  %v10052_v18 = vld [vmem:[%s13030_s13 + $0xf0] sm:$0xff] }
 0x741   :  { %7626 = vmatpush3.msra.mxu1 %v8083_v16  ;;  %3483 = vmatprep.subr.mxu0 %v9962_v8  ;;  %v9974_v16 = vld [vmem:[%s13030_s13 + $0x1b8] sm:$0xff] }
 0x742   :  { %7627 = vmatprep.subr.mxu1 %v8084_v38  ;;  %3484 = vmatpush1.msra.mxu0 %v9968_v15 }
 0x743   :  { %7628 = vmatpush3.msra.mxu1 %v8084_v38  ;;  %v9980_v38 = vld [vmem:[%s13030_s13 + $0x1b0] sm:$0xff]  ;;  %3485 = vmatprep.subr.mxu0 %v9974_v16 }
 0x744   :  { %2822 = vmatprep.subr.mxu1 %v2542_v19  ;;  %3486 = vmatpush1.msra.mxu0 %v9980_v38  ;;  %v2506_v19 = vld [vmem:[%s13030_s13 + $0xd8] sm:$0xff] }
 0x745   :  { %3487 = vmatprep.subr.mxu0 %v9986_v35 }
 0x746   :  { %3488 = vmatpush1.msra.mxu0 %v9992_v59 }
 0x747   :  { %3489 = vmatprep.subr.mxu0 %v9998_v39 }
 0x748   :  { %3490 = vmatpush1.msra.mxu0 %v10004_v17 }
 0x749   :  { %3491 = vmatprep.subr.mxu0 %v10010_v63 }
 0x74a   :  { %3492 = vmatpush1.msra.mxu0 %v10016_v47 }
 0x74b   :  { %3493 = vmatprep.subr.mxu0 %v10022_v57 }
 0x74c   :  { %3494 = vmatpush1.msra.mxu0 %v10028_v20 }
 0x74d   :  { %3495 = vmatprep.subr.mxu0 %v10034_v34 }
 0x74e   :  { %3496 = vmatpush1.msra.mxu0 %v10040_v54 }
 0x74f   :  { %3497 = vmatprep.subr.mxu0 %v10046_v0 }
 0x750   :  { %3498 = vmatpush1.msra.mxu0 %v10052_v18 }
 0x751   :  { %3499 = vmatprep.subr.mxu0 %v2506_v19 }
 0x752   :  { %3500 = vmatpush1.msra.mxu0 %v2505_v55 }
 0x753   :  { %3501 = vmatprep.subr.mxu0 %v2502_v31 }
 0x754   :  { %3502 = vmatpush1.msra.mxu0 %v2501_v12 }
 0x755   :  { %3503 = vmatprep.subr.mxu0 %v2498_v60 }
 0x756   :  { %3504 = vmatpush1.msra.mxu0 %v2497_v50 }
 0x757   :  { %3505 = vmatprep.subr.mxu0 %v2494_v4 }
 0x758   :  { %3506 = vmatpush1.msra.mxu0 %v2493_v3 }
 0x759   :  { %3507 = vmatprep.subr.mxu0 %v2490_v49 }
 0x75a   :  { %3508 = vmatpush1.msra.mxu0 %v2489_v11 }
 0x75b   :  { %3509 = vmatprep.subr.mxu0 %v2486_v48 }
 0x75c   :  { %3510 = vmatpush1.msra.mxu0 %v2485_v5 }
 0x75d   :  { %3511 = vmatprep.subr.mxu0 %v2482_v52 }
 0x75e   :  { %3512 = vmatpush1.msra.mxu0 %v2481_v1 }
 0x75f   :  { %3639 = vmatprep.subr.mxu0 %v2636_v62 }
 0x7fc   :  { %v7606_v58 = vpop.f32.mrf.mxu1 }
 0x7fd   :  { %v10101_v25 = vadd.f32 %v7606_v58, %v9413_v22  ;;  %v10125_v22 = vld [vmem:[#allocation19 + $0x2e0] sm:$0xff]  ;;  %v10160_v58 = vld [vmem:[#allocation19 + $0x1c8] sm:$0xff] }
 0x7fe   :  { %v2215_v43 = vpop.f32.mrf.mxu1 }
 0x7ff   :  { %13495 = vst [vmem:[#allocation86_spill] sm:$0xff] %v10101_v25  ;;  %v10103_v53 = vadd.f32 %v2215_v43, %v590_v56  ;;  %v10157_v56 = vld [vmem:[#allocation19 + $0x1f0] sm:$0xff]  ;;  %v10187_v43 = vld [vmem:[#allocation19 + $0x100] sm:$0xff] }
 0x800   :  { %v7624_v37 = vpop.f32.mrf.mxu1  ;;  %v10285_v25 = vld [vmem:[#allocation22 + $0xb0] sm:$0xff] }
 0x801   :  { %13496 = vst [vmem:[#allocation87_spill] sm:$0xff] %v10103_v53  ;;  %v2393_v6 = vadd.f32 %v7624_v37, %v6876_v36  ;;  %v10196_v37 = vld [vmem:[#allocation19 + $0xa8] sm:$0xff]  ;;  %13507 = vst [vmem:[#allocation98_spill] sm:$0xff] %v10285_v25  ;;  %v10288_v53 = vld [vmem:[#allocation22 + $0x30] sm:$0xff] }
 0x802   :  { %v2387_v40 = vpop.f32.mrf.mxu1  ;;  %13508 = vst [vmem:[#allocation99_spill] sm:$0xff] %v10288_v53 }
 0x803   :  { %v2388_v42 = vadd.f32 %v6876_v36, %v2387_v40  ;;  %v2397_v10 = vmax.f32 %v2393_v6, 0.0  ;;  %v10134_v36 = vld [vmem:[#allocation19 + $0x288] sm:$0xff]  ;;  %v10137_v40 = vld [vmem:[#allocation19 + $0x280] sm:$0xff] }
 0x804   :  { %v10151_v6 = vld [vmem:[#allocation19 + $0x220] sm:$0xff] }
 0x805   :  { %v2396_v24 = vmax.f32 %v2388_v42, 0.0  ;;  %v10140_v42 = vld [vmem:[#allocation19 + $0x258] sm:$0xff] }
 0x807   :  { %7629 = vmatprep.mubr.msk.f32.mxu1 %vm1039_vm4, %v2396_v24  ;;  %v10130_v24 = vld [vmem:[#allocation19 + $0x2b0] sm:$0xff] }
 0x808   :  { %7630 = vmatmul.mubr.msk.f32.vlgmr.msra.gmra.mxu1 %vm1039_vm4, %v2397_v10  ;;  %v10190_v10 = vld [vmem:[#allocation19 + $0xd8] sm:$0xff] }
 0x809   :  { %2823 = vmatpush1.msra.mxu1 %v9957_v14  ;;  %2886 = vmatprep.mubr.f32.mxu1 %v13482_v44  ;;  %v10211_v14 = vld [vmem:[#allocation19 + $0x40] sm:$0xff] }
 0x80a   :  { %2824 = vmatprep.subr.mxu1 %v9962_v8  ;;  %v10215_v8 = vrot.slane %v9903_v13, %v9555_v32 }
 0x80b   :  { %2825 = vmatpush1.msra.mxu1 %v9968_v15  ;;  %v10218_v15 = vld [vmem:[#allocation19 + $0x18] sm:$0xff] }
 0x80c   :  { %2826 = vmatprep.subr.mxu1 %v9974_v16  ;;  %v10221_v16 = vld [vmem:[#allocation19 + $0x10] sm:$0xff] }
 0x80d   :  { %2827 = vmatpush1.msra.mxu1 %v9980_v38  ;;  %v3183_v38 = vadd.f32 %v9909_v26, %v10215_v8  ;;  %v10240_v26 = vld [vmem:[#allocation22 + $0x70] sm:$0xff] }
 0x80e   :  { %2828 = vmatprep.subr.mxu1 %v9986_v35  ;;  %v10231_v35 = vld [vmem:[#allocation22 + $0xf8] sm:$0xff] }
 0x80f   :  { %2829 = vmatpush1.msra.mxu1 %v9992_v59  ;;  %v3189_v32 = vmax.f32 %v3183_v38, 0.0  ;;  %v10234_v59 = vld [vmem:[#allocation22 + $0x78] sm:$0xff] }
 0x810   :  { %2830 = vmatprep.subr.mxu1 %v9998_v39  ;;  %v10237_v39 = vld [vmem:[#allocation22 + $0xf0] sm:$0xff]  ;;  %v10279_v38 = vld [vmem:[#allocation22 + $0xb8] sm:$0xff] }
 0x811   :  { %2831 = vmatpush1.msra.mxu1 %v10004_v17  ;;  %v10249_v17 = vld [vmem:[#allocation22 + $0xe0] sm:$0xff]  ;;  %13505 = vst [vmem:[#allocation96_spill] sm:$0xff] %v10279_v38 }
 0x812   :  { %2832 = vmatprep.subr.mxu1 %v10010_v63  ;;  %v10252_v63 = vld [vmem:[#allocation22 + $0x60] sm:$0xff] }
 0x813   :  { %2833 = vmatpush1.msra.mxu1 %v10016_v47  ;;  %v10255_v47 = vld [vmem:[#allocation22 + $0xd8] sm:$0xff] }
 0x814   :  { %2834 = vmatprep.subr.mxu1 %v10022_v57  ;;  %13497 = vst [vmem:[#allocation88_spill] sm:$0xff] %v10255_v47  ;;  %v10258_v57 = vld [vmem:[#allocation22 + $0x58] sm:$0xff] }
 0x815   :  { %2835 = vmatpush1.msra.mxu1 %v10028_v20  ;;  %13498 = vst [vmem:[#allocation89_spill] sm:$0xff] %v10258_v57  ;;  %v10261_v20 = vld [vmem:[#allocation22 + $0xd0] sm:$0xff] }
 0x816   :  { %2836 = vmatprep.subr.mxu1 %v10034_v34  ;;  %13499 = vst [vmem:[#allocation90_spill] sm:$0xff] %v10261_v20  ;;  %v10264_v34 = vld [vmem:[#allocation22 + $0x50] sm:$0xff] }
 0x817   :  { %2837 = vmatpush1.msra.mxu1 %v10040_v54  ;;  %13500 = vst [vmem:[#allocation91_spill] sm:$0xff] %v10264_v34  ;;  %v10267_v54 = vld [vmem:[#allocation22 + $0xc8] sm:$0xff] }
 0x818   :  { %2838 = vmatprep.subr.mxu1 %v10046_v0  ;;  %13501 = vst [vmem:[#allocation92_spill] sm:$0xff] %v10267_v54  ;;  %v10270_v0 = vld [vmem:[#allocation22 + $0x48] sm:$0xff] }
 0x819   :  { %2839 = vmatpush1.msra.mxu1 %v10052_v18  ;;  %13502 = vst [vmem:[#allocation93_spill] sm:$0xff] %v10270_v0  ;;  %v10273_v18 = vld [vmem:[#allocation22 + $0xc0] sm:$0xff] }
 0x81a   :  { %2840 = vmatprep.subr.mxu1 %v2506_v19  ;;  %13503 = vst [vmem:[#allocation94_spill] sm:$0xff] %v10273_v18  ;;  %v10276_v19 = vld [vmem:[#allocation22 + $0x40] sm:$0xff] }
 0x81b   :  { %2841 = vmatpush1.msra.mxu1 %v2505_v55  ;;  %v10154_v55 = vld [vmem:[#allocation19 + $0x1f8] sm:$0xff]  ;;  %13504 = vst [vmem:[#allocation95_spill] sm:$0xff] %v10276_v19 }
 0x81c   :  { %2842 = vmatprep.subr.mxu1 %v2502_v31  ;;  %v10205_v31 = vld [vmem:[#allocation19 + $0x70] sm:$0xff] }
 0x81d   :  { %2843 = vmatpush1.msra.mxu1 %v2501_v12  ;;  %v10208_v12 = vld [vmem:[#allocation19 + $0x48] sm:$0xff] }
 0x81e   :  { %2844 = vmatprep.subr.mxu1 %v2498_v60  ;;  %v10178_v60 = vld [vmem:[#allocation19 + $0x138] sm:$0xff] }
 0x81f   :  { %2845 = vmatpush1.msra.mxu1 %v2497_v50  ;;  %v10175_v50 = vld [vmem:[#allocation19 + $0x160] sm:$0xff] }
 0x820   :  { %2846 = vmatprep.subr.mxu1 %v2494_v4  ;;  %v10172_v4 = vld [vmem:[#allocation19 + $0x168] sm:$0xff] }
 0x821   :  { %2847 = vmatpush1.msra.mxu1 %v2493_v3  ;;  %v10169_v3 = vld [vmem:[#allocation19 + $0x190] sm:$0xff] }
 0x822   :  { %2848 = vmatprep.subr.mxu1 %v2490_v49  ;;  %v10199_v49 = vld [vmem:[#allocation19 + $0xa0] sm:$0xff] }
 0x823   :  { %2849 = vmatpush1.msra.mxu1 %v2489_v11  ;;  %v10202_v11 = vld [vmem:[#allocation19 + $0x78] sm:$0xff] }
 0x824   :  { %2850 = vmatprep.subr.mxu1 %v2486_v48  ;;  %v10144_v48 = vld [vmem:[#allocation19 + $0x250] sm:$0xff] }
 0x825   :  { %2851 = vmatpush1.msra.mxu1 %v2485_v5  ;;  %v10193_v5 = vld [vmem:[#allocation19 + $0xd0] sm:$0xff] }
 0x826   :  { %2852 = vmatprep.subr.mxu1 %v2482_v52  ;;  %v10147_v52 = vld [vmem:[#allocation19 + $0x228] sm:$0xff] }
 0x827   :  { %2853 = vmatpush1.msra.mxu1 %v2481_v1  ;;  %v10166_v1 = vld [vmem:[#allocation19 + $0x198] sm:$0xff] }
 0x828   :  { %2887 = vmatmul.mubr.f32.vlgmr.msra.gmra.mxu1 %v9800_v33  ;;  %2980 = vmatprep.subr.mxu1 %v2636_v62  ;;  %v10163_v62 = vld [vmem:[#allocation19 + $0x1c0] sm:$0xff]  ;;  %v10181_v33 = vld [vmem:[#allocation19 + $0x130] sm:$0xff] }
 0x829   :  { %2981 = vmatpush1.msra.mxu1 %v10125_v22  ;;  %2892 = vmatprep.mubr.f32.mxu1 %v13482_v44 }
 0x82a   :  { %2982 = vmatprep.subr.mxu1 %v10127_v23 }
 0x82b   :  { %2983 = vmatpush1.msra.mxu1 %v10130_v24 }
 0x82c   :  { %2893 = vmatmul.mubr.f32.gmra.mxu1 %v9804_v41  ;;  %2984 = vmatprep.subr.mxu1 %v10134_v36  ;;  %v10184_v41 = vld [vmem:[#allocation19 + $0x108] sm:$0xff] }
 0x82d   :  { %2985 = vmatpush1.msra.mxu1 %v10137_v40  ;;  %3044 = vmatprep.mubr.f32.mxu1 %v13482_v44 }
 0x82e   :  { %2986 = vmatprep.subr.mxu1 %v10140_v42 }
 0x82f   :  { %2987 = vmatpush1.msra.mxu1 %v10144_v48 }
 0x830   :  { %2988 = vmatprep.subr.mxu1 %v10147_v52 }
 0x831   :  { %2989 = vmatpush1.msra.mxu1 %v10151_v6 }
 0x832   :  { %2990 = vmatprep.subr.mxu1 %v10154_v55 }
 0x833   :  { %2991 = vmatpush1.msra.mxu1 %v10157_v56 }
 0x834   :  { %2992 = vmatprep.subr.mxu1 %v10160_v58 }
 0x835   :  { %2993 = vmatpush1.msra.mxu1 %v10163_v62 }
 0x836   :  { %2994 = vmatprep.subr.mxu1 %v10166_v1 }
 0x837   :  { %2995 = vmatpush1.msra.mxu1 %v10169_v3 }
 0x838   :  { %2996 = vmatprep.subr.mxu1 %v10172_v4 }
 0x839   :  { %2997 = vmatpush1.msra.mxu1 %v10175_v50 }
 0x83a   :  { %2998 = vmatprep.subr.mxu1 %v10178_v60 }
 0x83b   :  { %2999 = vmatpush1.msra.mxu1 %v10181_v33 }
 0x83c   :  { %3000 = vmatprep.subr.mxu1 %v10184_v41 }
 0x83d   :  { %3001 = vmatpush1.msra.mxu1 %v10187_v43 }
 0x83e   :  { %3002 = vmatprep.subr.mxu1 %v10190_v10 }
 0x83f   :  { %3003 = vmatpush1.msra.mxu1 %v10193_v5 }
 0x840   :  { %3004 = vmatprep.subr.mxu1 %v10196_v37 }
 0x841   :  { %3005 = vmatpush1.msra.mxu1 %v10199_v49 }
 0x842   :  { %3006 = vmatprep.subr.mxu1 %v10202_v11 }
 0x843   :  { %3007 = vmatpush1.msra.mxu1 %v10205_v31 }
 0x844   :  { %3008 = vmatprep.subr.mxu1 %v10208_v12 }
 0x845   :  { %3009 = vmatpush1.msra.mxu1 %v10211_v14 }
 0x846   :  { %3010 = vmatprep.subr.mxu1 %v10218_v15 }
 0x847   :  { %3011 = vmatpush1.msra.mxu1 %v10221_v16 }
 0x848   :  { %3045 = vmatmul.mubr.f32.vlgmr.msra.gmra.mxu1 %v9843_v21  ;;  %7080 = vmatprep.subr.mxu1 %v10231_v35  ;;  %v10243_v21 = vld [vmem:[#allocation22 + $0xe8] sm:$0xff] }
 0x849   :  { %3050 = vmatprep.mubr.f32.mxu1 %v13482_v44  ;;  %7081 = vmatpush3.msra.mxu1 %v10234_v59 }
 0x84a   :  { %7082 = vmatprep.subr.mxu1 %v10237_v39 }
 0x84b   :  { %7083 = vmatpush3.msra.mxu1 %v10240_v26 }
 0x84c   :  { %3051 = vmatmul.mubr.f32.gmra.mxu1 %v9850_v46  ;;  %7084 = vmatprep.subr.mxu1 %v10243_v21  ;;  %v10246_v46 = vld [vmem:[#allocation22 + $0x68] sm:$0xff] }
 0x84d   :  { %3300 = vmatprep.mubr.f32.mxu1 %v3189_v32  ;;  %7085 = vmatpush3.msra.mxu1 %v10246_v46  ;;  %v10282_v32 = vld [vmem:[#allocation22 + $0x38] sm:$0xff] }
 0x84e   :  { %7086 = vmatprep.subr.mxu1 %v10249_v17  ;;  %13506 = vst [vmem:[#allocation97_spill] sm:$0xff] %v10282_v32 }
 0x84f   :  { %7087 = vmatpush3.msra.mxu1 %v10252_v63 }
 0x850   :  { %7088 = vmatprep.subr.mxu1 %v10255_v47 }
 0x851   :  { %7089 = vmatpush3.msra.mxu1 %v10258_v57 }
 0x852   :  { %7090 = vmatprep.subr.mxu1 %v10261_v20 }
 0x853   :  { %7091 = vmatpush3.msra.mxu1 %v10264_v34 }
 0x854   :  { %7092 = vmatprep.subr.mxu1 %v10267_v54  ;;  %v6882_v54 = vmul.f32 -1.442695, %v9893_v2 }
 0x855   :  { %7093 = vmatpush3.msra.mxu1 %v10270_v0  ;;  %v10299_v0 = vld [vmem:[#allocation22 + $0x20] sm:$0xff] }
 0x856   :  { %7094 = vmatprep.subr.mxu1 %v10273_v18  ;;  %v10291_v18 = vld [vmem:[#allocation22 + $0xa8] sm:$0xff]  ;;  %13512 = vst [vmem:[#allocation103_spill] sm:$0xff] %v10299_v0  ;;  %7874 = vpow2.f32 %v6882_v54  ;;  %v13526_v54 = vld [vmem:[#allocation39_spill] sm:$0xff] }
 0x857   :  { %7095 = vmatpush3.msra.mxu1 %v10276_v19  ;;  %13509 = vst [vmem:[#allocation100_spill] sm:$0xff] %v10291_v18  ;;  %v10294_v19 = vld [vmem:[#allocation22 + $0x28] sm:$0xff] }
 0x858   :  { %7096 = vmatprep.subr.mxu1 %v10279_v38  ;;  %13510 = vst [vmem:[#allocation101_spill] sm:$0xff] %v10294_v19  ;;  %v10297_v38 = vld [vmem:[#allocation22 + $0xa0] sm:$0xff] }
 0x859   :  { %7097 = vmatpush3.msra.mxu1 %v10282_v32  ;;  %13511 = vst [vmem:[#allocation102_spill] sm:$0xff] %v10297_v38  ;;  %v10301_v32 = vld [vmem:[#allocation22 + $0x98] sm:$0xff] }
 0x85a   :  { %7098 = vmatprep.subr.mxu1 %v10285_v25  ;;  %13513 = vst [vmem:[#allocation104_spill] sm:$0xff] %v10301_v32  ;;  %v10304_v25 = vld [vmem:[#allocation22 + $0x18] sm:$0xff] }
 0x85b   :  { %7099 = vmatpush3.msra.mxu1 %v10288_v53  ;;  %13514 = vst [vmem:[#allocation105_spill] sm:$0xff] %v10304_v25  ;;  %v10315_v53 = vld [vmem:[#allocation22 + $0x88] sm:$0xff] }
 0x85c   :  { %7100 = vmatprep.subr.mxu1 %v10291_v18  ;;  %v10309_v18 = vld [vmem:[#allocation22 + $0x90] sm:$0xff]  ;;  %13517 = vst [vmem:[#allocation108_spill] sm:$0xff] %v10315_v53 }
 0x85d   :  { %7101 = vmatpush3.msra.mxu1 %v10294_v19  ;;  %13515 = vst [vmem:[#allocation106_spill] sm:$0xff] %v10309_v18  ;;  %v10312_v19 = vld [vmem:[#allocation22 + $0x10] sm:$0xff] }
 0x85e   :  { %7102 = vmatprep.subr.mxu1 %v10297_v38  ;;  %13516 = vst [vmem:[#allocation107_spill] sm:$0xff] %v10312_v19  ;;  %v10318_v38 = vld [vmem:[#allocation22 + $0x8] sm:$0xff] }
 0x85f   :  { %7103 = vmatpush3.msra.mxu1 %v10299_v0  ;;  %13518 = vst [vmem:[#allocation109_spill] sm:$0xff] %v10318_v38  ;;  %v10321_v0 = vld [vmem:[#allocation22 + $0x80] sm:$0xff] }
 0x860   :  { %7104 = vmatprep.subr.mxu1 %v10301_v32  ;;  %13519 = vst [vmem:[#allocation110_spill] sm:$0xff] %v10321_v0 }
 0x861   :  { %7105 = vmatpush3.msra.mxu1 %v10304_v25  ;;  %v10324_v25 = vld [vmem:[#allocation22] sm:$0xff] }
 0x862   :  { %7106 = vmatprep.subr.mxu1 %v10309_v18  ;;  %13520 = vst [vmem:[#allocation111_spill] sm:$0xff] %v10324_v25  ;;  %v600_v18 = vadd.f32 %v9858_v28, %v9423_v29 }
 0x863   :  { %7107 = vmatpush3.msra.mxu1 %v10312_v19  ;;  %v10330_v19 = vld [vmem:[%s13030_s13 + $0x1e8] sm:$0xff] }
 0x864   :  { %7108 = vmatprep.subr.mxu1 %v10315_v53  ;;  %13521 = vst [vmem:[#allocation112_spill] sm:$0xff] %v10330_v19 }
 0x865   :  { %7109 = vmatpush3.msra.mxu1 %v10318_v38 }
 0x866   :  { %7110 = vmatprep.subr.mxu1 %v10321_v0 }
 0x867   :  { %7111 = vmatpush3.msra.mxu1 %v10324_v25  ;;  %v2820_v25 = vadd.f32 %v9883_v7, %v9881_v61  ;;  %v13531_v61 = vld [vmem:[#allocation40_spill] sm:$0xff] }
 0x868   :  { %3404 = vmatprep.subr.mxu1 %v10330_v19  ;;  %v10346_v19 = vrot.slane %v9829_v45, %v9426_v30 }
 0x869   :  { %v3141_v34 = vadd.f32 %v9899_v9, %v2820_v25  ;;  %v7875_v25 = vpop.eup %7874 }
 0x86a   :  { %13524 = vst [vmem:[#allocation115_spill] sm:$0xff] %v10346_v19  ;;  %v3148_v30 = vadd.f32 1.0, %v7875_v25  ;;  %v13529_v25 = vld [vmem:[#allocation53_spill] sm:$0xff] }
 0x86b   :  { %v6883_v20 = vmul.f32 -1.442695, %v3141_v34 }
 0x86d   :  { %7876 = vpow2.f32 %v6883_v20  ;;  %v8086_v20 = vld [vmem:[#allocation17] sm:$0xf] }
 0x87a   :  { %v7877_v45 = vpop.eup %7876 }
 0x87b   :  { %v3149_v34 = vadd.f32 1.0, %v7877_v45 }
 0x8c8   :  { %v7631_v53 = vpop.f32.mrf.mxu1 }
 0x8c9   :  { %v10336_v38 = vadd.f32 %v7631_v53, %v9421_v27 }
 0x8ca   :  { %v2470_v32 = vpop.f32.mrf.mxu1 }
 0x8cb   :  { %13522 = vst [vmem:[#allocation113_spill] sm:$0xff] %v10336_v38  ;;  %v10338_v0 = vadd.f32 %v2470_v32, %v600_v18  ;;  %v13525_v32 = vld [vmem:[#allocation79_spill] sm:$0xff] }
 0x8cd   :  { %13523 = vst [vmem:[#allocation114_spill] sm:$0xff] %v10338_v0 }
 0x8e8   :  { %v2888_v29 = vpop.f32.mrf.mxu1 }
 0x8e9   :  { %v2889_v27 = vadd.f32 %v2888_v29, %v10346_v19  ;;  %v2703_v29 = vsub.s32 3, %v13526_v54 }
 0x8ea   :  { %v2890_v53 = vpop.f32.mrf.mxu1 }
 0x8eb   :  { %v3154_v18 = vadd.f32 %v9895_v51, %v2889_v27  ;;  %v10353_v0 = vrot.slane %v8086_v20, %v2703_v29 }
 0x8ec   :  { %v2894_v28 = vpop.f32.mrf.mxu1 }
 0x8ed   :  { %v2895_v7 = vadd.f32 %v2894_v28, %v10346_v19  ;;  %v6884_v38 = vmul.f32 -1.442695, %v3154_v18 }
 0x8ee   :  { %v2896_v18 = vpop.f32.mrf.mxu1 }
 0x8ef   :  { %v3155_v2 = vadd.f32 %v13525_v32, %v2895_v7  ;;  %7878 = vpow2.f32 %v6884_v38  ;;  %v2891_v7 = vadd.f32 %v2890_v53, %v10353_v0  ;;  %v13527_v32 = vld [vmem:[#allocation42_spill] sm:$0xff]  ;;  %v2897_v29 = vadd.f32 %v2896_v18, %v10353_v0 }
 0x8f0   :  { %v896_v57 = vadd.f32 %v13531_v61, %v13527_v32  ;;  %v10372_v61 = vld [vmem:[%s13030_s13 + $0x1e0] sm:$0xff] }
 0x8f1   :  { %v6885_v9 = vmul.f32 -1.442695, %v3155_v2  ;;  %v13528_v2 = vld [vmem:[#allocation41_spill] sm:$0xff] }
 0x8f2   :  { %v891_v38 = vadd.f32 %v13528_v2, %v13527_v32 }
 0x8f3   :  { %7880 = vpow2.f32 %v6885_v9  ;;  %v10360_v9 = vrot.slane %v9903_v13, %v13529_v25 }
 0x8f4   :  { %7882 = vrcp.f32 %v3148_v30 }
 0x8f5   :  { %7884 = vrcp.f32 %v3149_v34 }
 0x8fc   :  { %v7879_v51 = vpop.eup %7878 }
 0x8fd   :  { %v3162_v28 = vadd.f32 1.0, %v7879_v51  ;;  %v13530_v51 = vld [vmem:[#allocation81_spill] sm:$0xff] }
 0x8fe   :  { %v3186_v19 = vadd.f32 %v13530_v51, %v10215_v8  ;;  %v10409_v51 = vld [vmem:[%s13030_s13 + $0x180] sm:$0xff] }
 0x8ff   :  { %7886 = vrcp.f32 %v3162_v28 }
 0x900   :  { %v7881_v27 = vpop.eup %7880 }
 0x901   :  { %v7883_v30 = vpop.eup %7882  ;;  %v3163_v45 = vadd.f32 1.0, %v7881_v27 }
 0x902   :  { %v3168_v34 = vmul.f32 %v7883_v30, %v2891_v7  ;;  %v7885_v13 = vpop.eup %7884  ;;  %v3192_v30 = vmax.f32 %v3186_v19, 0.0  ;;  %v10390_v19 = vld [vmem:[%s13030_s13 + $0x1a8] sm:$0xff] }
 0x903   :  { %7888 = vrcp.f32 %v3163_v45  ;;  %v3169_v27 = vmul.f32 %v7885_v13, %v2897_v29  ;;  %v10403_v29 = vld [vmem:[%s13030_s13 + $0x188] sm:$0xff] }
 0x908   :  { %v3046_v54 = vpop.f32.mrf.mxu1 }
 0x909   :  { %v3136_v20 = vadd.f32 %v3046_v54, %v891_v38 }
 0x90a   :  { %v3048_v53 = vpop.f32.mrf.mxu1 }
 0x90b   :  { %v3170_v2 = vadd.f32 %v3168_v34, %v3136_v20  ;;  %v3182_v47 = vadd.f32 %v3048_v53, %v10360_v9  ;;  %v10396_v34 = vld [vmem:[%s13030_s13 + $0x1a0] sm:$0xff]  ;;  %v10415_v53 = vld [vmem:[%s13030_s13 + $0x168] sm:$0xff] }
 0x90c   :  { %v3052_v25 = vpop.f32.mrf.mxu1  ;;  %v7887_v20 = vpop.eup %7886 }
 0x90d   :  { %7890 = vtanh.f32 %v3170_v2  ;;  %v3188_v28 = vmax.f32 %v3182_v47, 0.0  ;;  %v3139_v7 = vadd.f32 %v3052_v25, %v896_v57  ;;  %v10378_v47 = vld [vmem:[%s13030_s13 + $0x1c8] sm:$0xff]  ;;  %v10384_v57 = vld [vmem:[%s13030_s13 + $0x1c0] sm:$0xff] }
 0x90e   :  { %v3054_v18 = vpop.f32.mrf.mxu1  ;;  %v10421_v2 = vld [vmem:[%s13030_s13 + $0x160] sm:$0xff]  ;;  %v10427_v25 = vld [vmem:[%s13030_s13 + $0x148] sm:$0xff] }
 0x90f   :  { %v3171_v38 = vadd.f32 %v3169_v27, %v3139_v7  ;;  %v3185_v54 = vadd.f32 %v3054_v18, %v10360_v9  ;;  %3301 = vmatmul.mubr.f32.vlgmr.msra.gmra.mxu1 %v3188_v28  ;;  %13532 = vst [vmem:[#allocation79_spill] sm:$0xff] %v10427_v25  ;;  %v3174_v27 = vsub.f32 1.0, %v7887_v20  ;;  %v10433_v7 = vld [vmem:[%s13030_s13 + $0x140] sm:$0xff] }
 0x910   :  { %3405 = vmatpush1.msra.mxu1 %v10372_v61  ;;  %3305 = vmatprep.mubr.f32.mxu1 %v3192_v30  ;;  %v7889_v13 = vpop.eup %7888  ;;  %13533 = vst [vmem:[#allocation39_spill] sm:$0xff] %v10433_v7  ;;  %v10439_v30 = vld [vmem:[%s13030_s13 + $0x128] sm:$0xff] }
 0x911   :  { %7892 = vtanh.f32 %v3171_v38  ;;  %v3191_v45 = vmax.f32 %v3185_v54, 0.0  ;;  %3406 = vmatprep.subr.mxu1 %v10378_v47  ;;  %13534 = vst [vmem:[#allocation42_spill] sm:$0xff] %v10439_v30  ;;  %v8099_v38 = vld [vmem:[#allocation7] sm:$0xff] }
 0x912   :  { %3407 = vmatpush1.msra.mxu1 %v10384_v57  ;;  %v3178_v54 = vmul.f32 %v8099_v38, %v7887_v20  ;;  %v10459_v20 = vld [vmem:[%s13030_s13 + $0x100] sm:$0xff]  ;;  %v8104_v38 = vld [vmem:[#allocation7 + $0x8] sm:$0xff] }
 0x913   :  { %3408 = vmatprep.subr.mxu1 %v10390_v19  ;;  %3306 = vmatmul.mubr.f32.gmra.mxu1 %v3191_v45  ;;  %v10445_v45 = vld [vmem:[%s13030_s13 + $0x120] sm:$0xff]  ;;  %13536 = vst [vmem:[#allocation53_spill] sm:$0xff] %v10459_v20 }
 0x914   :  { %3409 = vmatpush1.msra.mxu1 %v10396_v34  ;;  %3468 = vmatprep.mubr.f32.mxu1 %v13482_v44 }
 0x915   :  { %3410 = vmatprep.subr.mxu1 %v10403_v29 }
 0x916   :  { %3411 = vmatpush1.msra.mxu1 %v10409_v51 }
 0x917   :  { %3412 = vmatprep.subr.mxu1 %v10415_v53 }
 0x918   :  { %3413 = vmatpush1.msra.mxu1 %v10421_v2 }
 0x919   :  { %3414 = vmatprep.subr.mxu1 %v10427_v25 }
 0x91a   :  { %v7891_v28 = vpop.eup %7890  ;;  %3415 = vmatpush1.msra.mxu1 %v10433_v7  ;;  %v10451_v7 = vld [vmem:[%s13030_s13 + $0x108] sm:$0xff] }
 0x91b   :  { %3416 = vmatprep.subr.mxu1 %v10439_v30  ;;  %v3176_v18 = vmul.f32 %v7891_v28, %v3174_v27  ;;  %13535 = vst [vmem:[#allocation41_spill] sm:$0xff] %v10451_v7  ;;  %v3175_v30 = vsub.f32 1.0, %v7889_v13  ;;  %v10465_v28 = vld [vmem:[%s13030_s13 + $0xe8] sm:$0xff] }
 0x91c   :  { %3417 = vmatpush1.msra.mxu1 %v10445_v45  ;;  %13537 = vst [vmem:[#allocation81_spill] sm:$0xff] %v10465_v28 }
 0x91d   :  { %3418 = vmatprep.subr.mxu1 %v10451_v7  ;;  %v10454_v25 = vadd.f32 %v3178_v54, %v3176_v18  ;;  %v3179_v54 = vmul.f32 %v8104_v38, %v7889_v13  ;;  %v10472_v7 = vld [vmem:[%s13030_s13 + $0xe0] sm:$0xff] }
 0x91e   :  { %v7893_v27 = vpop.eup %7892  ;;  %3419 = vmatpush1.msra.mxu1 %v10459_v20  ;;  %v10479_v20 = vld [vmem:[%s13030_s13 + $0xc8] sm:$0xff]  ;;  %v10488_v13 = vld [vmem:[%s13030_s13 + $0xc0] sm:$0xff] }
 0x91f   :  { %3420 = vmatprep.subr.mxu1 %v10465_v28  ;;  %3546 = vmatmul.mubr.f32.vlgmr.msra.gmra.mxu0 %v10454_v25  ;;  %v3177_v18 = vmul.f32 %v7893_v27, %v3175_v30  ;;  %v10495_v30 = vld [vmem:[%s13030_s13 + $0xa8] sm:$0xff]  ;;  %v10516_v27 = vld [vmem:[%s13030_s13 + $0x80] sm:$0xff] }
 0x920   :  { %3421 = vmatpush1.msra.mxu1 %v10472_v7  ;;  %3551 = vmatprep.mubr.f32.mxu0 %v13482_v44  ;;  %v10588_v38 = vld [vmem:[#allocation19 + $0x2a0] sm:$0xff] }
 0x921   :  { %3422 = vmatprep.subr.mxu1 %v10479_v20  ;;  %v10482_v28 = vadd.f32 %v3179_v54, %v3177_v18  ;;  %3640 = vmatpush1.msra.mxu0 %v10125_v22  ;;  %v10502_v22 = vld [vmem:[%s13030_s13 + $0xa0] sm:$0xff]  ;;  %v10581_v18 = vld [vmem:[#allocation19 + $0x2d0] sm:$0xff] }
 0x922   :  { %3423 = vmatpush1.msra.mxu1 %v10488_v13  ;;  %3641 = vmatprep.subr.mxu0 %v10127_v23  ;;  %v10509_v23 = vld [vmem:[%s13030_s13 + $0x88] sm:$0xff]  ;;  %v10596_v54 = vld [vmem:[#allocation19 + $0x270] sm:$0xff] }
 0x923   :  { %3424 = vmatprep.subr.mxu1 %v10495_v30  ;;  %3552 = vmatmul.mubr.f32.gmra.mxu0 %v10482_v28  ;;  %13539 = vst [vmem:[#allocation116_spill] sm:$0xff] %v10596_v54 }
 0x924   :  { %3425 = vmatpush1.msra.mxu1 %v10502_v22  ;;  %3642 = vmatpush1.msra.mxu0 %v10130_v24  ;;  %v10523_v24 = vld [vmem:[%s13030_s13 + $0x68] sm:$0xff] }
 0x925   :  { %3426 = vmatprep.subr.mxu1 %v10509_v23  ;;  %3643 = vmatprep.subr.mxu0 %v10134_v36  ;;  %v10530_v36 = vld [vmem:[%s13030_s13 + $0x60] sm:$0xff] }
 0x926   :  { %3427 = vmatpush1.msra.mxu1 %v10516_v27  ;;  %3644 = vmatpush1.msra.mxu0 %v10137_v40  ;;  %v10537_v40 = vld [vmem:[%s13030_s13 + $0x48] sm:$0xff] }
 0x927   :  { %3428 = vmatprep.subr.mxu1 %v10523_v24  ;;  %3645 = vmatprep.subr.mxu0 %v10140_v42  ;;  %v10544_v42 = vld [vmem:[%s13030_s13 + $0x40] sm:$0xff] }
 0x928   :  { %3429 = vmatpush1.msra.mxu1 %v10530_v36  ;;  %3646 = vmatpush1.msra.mxu0 %v10144_v48  ;;  %v10551_v48 = vld [vmem:[%s13030_s13 + $0x28] sm:$0xff] }
 0x929   :  { %3430 = vmatprep.subr.mxu1 %v10537_v40  ;;  %3647 = vmatprep.subr.mxu0 %v10147_v52  ;;  %v10558_v52 = vld [vmem:[%s13030_s13 + $0x20] sm:$0xff] }
 0x92a   :  { %3431 = vmatpush1.msra.mxu1 %v10544_v42  ;;  %3648 = vmatpush1.msra.mxu0 %v10151_v6  ;;  %v10565_v6 = vld [vmem:[%s13030_s13 + $0x8] sm:$0xff] }
 0x92b   :  { %3432 = vmatprep.subr.mxu1 %v10551_v48  ;;  %3649 = vmatprep.subr.mxu0 %v10154_v55  ;;  %v10572_v55 = vld [vmem:[%s13030_s13] sm:$0xff] }
 0x92c   :  { %3433 = vmatpush1.msra.mxu1 %v10558_v52  ;;  %3650 = vmatpush1.msra.mxu0 %v10157_v56  ;;  %v10577_v56 = vld [vmem:[#allocation19 + $0x2d8] sm:$0xff] }
 0x92d   :  { %3434 = vmatprep.subr.mxu1 %v10565_v6  ;;  %3651 = vmatprep.subr.mxu0 %v10160_v58  ;;  %v10584_v58 = vld [vmem:[#allocation19 + $0x2a8] sm:$0xff] }
 0x92e   :  { %3435 = vmatpush1.msra.mxu1 %v10572_v55  ;;  %3652 = vmatpush1.msra.mxu0 %v10163_v62  ;;  %13538 = vst [vmem:[#allocation40_spill] sm:$0xff] %v10584_v58  ;;  %v10593_v62 = vld [vmem:[#allocation19 + $0x278] sm:$0xff] }
 0x92f   :  { %3469 = vmatmul.mubr.f32.vlgmr.msra.gmra.mxu1 %v10454_v25  ;;  %3562 = vmatprep.subr.mxu1 %v10577_v56 }
 0x930   :  { %3474 = vmatprep.mubr.f32.mxu1 %v13482_v44  ;;  %3563 = vmatpush1.msra.mxu1 %v10581_v18 }
 0x931   :  { %3564 = vmatprep.subr.mxu1 %v10584_v58  ;;  %3653 = vmatprep.subr.mxu0 %v10166_v1  ;;  %v10600_v58 = vld [vmem:[#allocation19 + $0x248] sm:$0xff]  ;;  %v10604_v1 = vld [vmem:[#allocation19 + $0x240] sm:$0xff] }
 0x932   :  { %3565 = vmatpush1.msra.mxu1 %v10588_v38  ;;  %3654 = vmatpush1.msra.mxu0 %v10169_v3  ;;  %13540 = vst [vmem:[#allocation117_spill] sm:$0xff] %v10600_v58  ;;  %13541 = vst [vmem:[#allocation118_spill] sm:$0xff] %v10604_v1  ;;  %v10608_v3 = vld [vmem:[#allocation19 + $0x218] sm:$0xff] }
 0x933   :  { %3475 = vmatmul.mubr.f32.gmra.mxu1 %v10482_v28  ;;  %3566 = vmatprep.subr.mxu1 %v10593_v62  ;;  %13542 = vst [vmem:[#allocation119_spill] sm:$0xff] %v10608_v3 }
 0x934   :  { %3567 = vmatpush1.msra.mxu1 %v10596_v54  ;;  %3655 = vmatprep.subr.mxu0 %v10172_v4  ;;  %v10612_v54 = vld [vmem:[#allocation19 + $0x210] sm:$0xff]  ;;  %v10616_v4 = vld [vmem:[#allocation19 + $0x1e8] sm:$0xff] }
 0x935   :  { %3568 = vmatprep.subr.mxu1 %v10600_v58  ;;  %3656 = vmatpush1.msra.mxu0 %v10175_v50  ;;  %13543 = vst [vmem:[#allocation120_spill] sm:$0xff] %v10612_v54  ;;  %13544 = vst [vmem:[#allocation121_spill] sm:$0xff] %v10616_v4  ;;  %v10620_v50 = vld [vmem:[#allocation19 + $0x1e0] sm:$0xff] }
 0x936   :  { %3569 = vmatpush1.msra.mxu1 %v10604_v1  ;;  %3657 = vmatprep.subr.mxu0 %v10178_v60  ;;  %13545 = vst [vmem:[#allocation122_spill] sm:$0xff] %v10620_v50  ;;  %v10624_v60 = vld [vmem:[#allocation19 + $0x1b8] sm:$0xff] }
 0x937   :  { %3570 = vmatprep.subr.mxu1 %v10608_v3  ;;  %3658 = vmatpush1.msra.mxu0 %v10181_v33  ;;  %13546 = vst [vmem:[#allocation123_spill] sm:$0xff] %v10624_v60  ;;  %v10628_v33 = vld [vmem:[#allocation19 + $0x1b0] sm:$0xff] }
 0x938   :  { %3571 = vmatpush1.msra.mxu1 %v10612_v54  ;;  %3659 = vmatprep.subr.mxu0 %v10184_v41  ;;  %13547 = vst [vmem:[#allocation124_spill] sm:$0xff] %v10628_v33  ;;  %v10632_v41 = vld [vmem:[#allocation19 + $0x188] sm:$0xff]  ;;  %v13568_v1 = vld [vmem:[#allocation75_spill] sm:$0xff] }
 0x939   :  { %3572 = vmatprep.subr.mxu1 %v10616_v4  ;;  %3660 = vmatpush1.msra.mxu0 %v10187_v43  ;;  %13548 = vst [vmem:[#allocation125_spill] sm:$0xff] %v10632_v41  ;;  %v10636_v43 = vld [vmem:[#allocation19 + $0x180] sm:$0xff] }
 0x93a   :  { %3573 = vmatpush1.msra.mxu1 %v10620_v50  ;;  %3661 = vmatprep.subr.mxu0 %v10190_v10  ;;  %13549 = vst [vmem:[#allocation126_spill] sm:$0xff] %v10636_v43  ;;  %v10640_v10 = vld [vmem:[#allocation19 + $0x158] sm:$0xff] }
 0x93b   :  { %3574 = vmatprep.subr.mxu1 %v10624_v60  ;;  %3662 = vmatpush1.msra.mxu0 %v10193_v5  ;;  %13550 = vst [vmem:[#allocation127_spill] sm:$0xff] %v10640_v10  ;;  %v10644_v5 = vld [vmem:[#allocation19 + $0x150] sm:$0xff] }
 0x93c   :  { %3575 = vmatpush1.msra.mxu1 %v10628_v33  ;;  %3663 = vmatprep.subr.mxu0 %v10196_v37  ;;  %13551 = vst [vmem:[#allocation128_spill] sm:$0xff] %v10644_v5  ;;  %v10648_v37 = vld [vmem:[#allocation19 + $0x128] sm:$0xff] }
 0x93d   :  { %3576 = vmatprep.subr.mxu1 %v10632_v41  ;;  %3664 = vmatpush1.msra.mxu0 %v10199_v49  ;;  %13552 = vst [vmem:[#allocation129_spill] sm:$0xff] %v10648_v37  ;;  %v10652_v49 = vld [vmem:[#allocation19 + $0x120] sm:$0xff] }
 0x93e   :  { %3577 = vmatpush1.msra.mxu1 %v10636_v43  ;;  %3665 = vmatprep.subr.mxu0 %v10202_v11  ;;  %13553 = vst [vmem:[#allocation130_spill] sm:$0xff] %v10652_v49  ;;  %v10656_v11 = vld [vmem:[#allocation19 + $0xf8] sm:$0xff] }
 0x93f   :  { %3578 = vmatprep.subr.mxu1 %v10640_v10  ;;  %3666 = vmatpush1.msra.mxu0 %v10205_v31  ;;  %13554 = vst [vmem:[#allocation131_spill] sm:$0xff] %v10656_v11  ;;  %v10660_v31 = vld [vmem:[#allocation19 + $0xf0] sm:$0xff] }
 0x940   :  { %3579 = vmatpush1.msra.mxu1 %v10644_v5  ;;  %3667 = vmatprep.subr.mxu0 %v10208_v12  ;;  %13555 = vst [vmem:[#allocation132_spill] sm:$0xff] %v10660_v31  ;;  %v10664_v12 = vld [vmem:[#allocation19 + $0xc8] sm:$0xff] }
 0x941   :  { %3580 = vmatprep.subr.mxu1 %v10648_v37  ;;  %3668 = vmatpush1.msra.mxu0 %v10211_v14  ;;  %13556 = vst [vmem:[#allocation133_spill] sm:$0xff] %v10664_v12  ;;  %v10668_v14 = vld [vmem:[#allocation19 + $0xc0] sm:$0xff] }
 0x942   :  { %3581 = vmatpush1.msra.mxu1 %v10652_v49  ;;  %3669 = vmatprep.subr.mxu0 %v10218_v15  ;;  %13557 = vst [vmem:[#allocation134_spill] sm:$0xff] %v10668_v14  ;;  %v10672_v15 = vld [vmem:[#allocation19 + $0x98] sm:$0xff]  ;;  %v10699_v49 = vld [vmem:[#allocation23] ss:$0 sm:$0xff] }
 0x943   :  { %3582 = vmatprep.subr.mxu1 %v10656_v11  ;;  %3626 = vmatprep.mubr.f32.mxu1 %v13482_v44  ;;  %13558 = vst [vmem:[#allocation135_spill] sm:$0xff] %v10672_v15  ;;  %v10675_v11 = vld [vmem:[#allocation19 + $0x90] sm:$0xff] }
 0x944   :  { %3583 = vmatpush1.msra.mxu1 %v10660_v31  ;;  %3670 = vmatpush1.msra.mxu0 %v10221_v16  ;;  %13559 = vst [vmem:[#allocation136_spill] sm:$0xff] %v10675_v11  ;;  %v10678_v16 = vld [vmem:[#allocation19 + $0x68] sm:$0xff]  ;;  %v10684_v31 = vld [vmem:[#allocation19 + $0x38] sm:$0xff] }
 0x945   :  { %3584 = vmatprep.subr.mxu1 %v10664_v12  ;;  %3703 = vmatprep.mubr.f32.mxu0 %v13482_v44  ;;  %13560 = vst [vmem:[#allocation137_spill] sm:$0xff] %v10678_v16  ;;  %v10681_v12 = vld [vmem:[#allocation19 + $0x60] sm:$0xff]  ;;  %13562 = vst [vmem:[#allocation139_spill] sm:$0xff] %v10684_v31 }
 0x946   :  { %3585 = vmatpush1.msra.mxu1 %v10668_v14  ;;  %7136 = vmatprep.subr.mxu0 %v10231_v35  ;;  %13561 = vst [vmem:[#allocation138_spill] sm:$0xff] %v10681_v12  ;;  %v10687_v35 = vld [vmem:[#allocation19 + $0x30] sm:$0xff]  ;;  %v7666_v14 = vpop.f32.mrf.mxu0 }
 0x947   :  { %3586 = vmatprep.subr.mxu1 %v10672_v15  ;;  %13563 = vst [vmem:[#allocation140_spill] sm:$0xff] %v10687_v35  ;;  %v10690_v15 = vld [vmem:[#allocation19 + $0x8] sm:$0xff] }
 0x948   :  { %3587 = vmatpush1.msra.mxu1 %v10675_v11  ;;  %13564 = vst [vmem:[#allocation141_spill] sm:$0xff] %v10690_v15  ;;  %v10693_v11 = vld [vmem:[#allocation19] sm:$0xff]  ;;  %v3377_v10 = vpop.f32.mrf.mxu0 }
 0x949   :  { %3588 = vmatprep.subr.mxu1 %v10678_v16  ;;  %13565 = vst [vmem:[#allocation142_spill] sm:$0xff] %v10693_v11  ;;  %v10696_v16 = vld [vmem:[#allocation19 + $0x2f8] sm:$0xff] }
 0x94a   :  { %3589 = vmatpush1.msra.mxu1 %v10681_v12  ;;  %13566 = vst [vmem:[#allocation143_spill] sm:$0xff] %v10696_v16 }
 0x94b   :  { %3590 = vmatprep.subr.mxu1 %v10684_v31 }
 0x94c   :  { %3591 = vmatpush1.msra.mxu1 %v10687_v35 }
 0x94d   :  { %3592 = vmatprep.subr.mxu1 %v10690_v15 }
 0x94e   :  { %3593 = vmatpush1.msra.mxu1 %v10693_v11 }
 0x94f   :  { %3716 = vmatprep.subr.mxu1 %v10696_v16 }
 0x9cf   :  { %v7112_v12 = vpop.f32.mrf.mxu1 }
 0x9d1   :  { %v7113_v31 = vpop.f32.mrf.mxu1 }
 0x9d2   :  { %v7114_v37 = vadd.f32 %v7113_v31, %v7112_v12  ;;  %v13567_v31 = vlaneseq }
 0x9d3   :  { %v7115_v5 = vpop.f32.mrf.mxu1 }
 0x9d4   :  { %v3303_v35 = vadd.f32 %v7114_v37, %v10699_v49  ;;  %v2734_v12 = vand.u32 127, %v13567_v31  ;;  %v10731_v31 = vld [vmem:[#allocation19 + $0x2c0] sm:$0xff] }
 0x9d5   :  { %v7116_v43 = vpop.f32.mrf.mxu1  ;;  %13575 = vst [vmem:[#allocation144_spill] sm:$0xff] %v10731_v31 }
 0x9d6   :  { %v3378_v15 = vadd.f32 %v3377_v10, %v3303_v35  ;;  %v7117_v41 = vadd.f32 %v7116_v43, %v7115_v5  ;;  %vm2740_vm5 = vcmp.ge.s32.totalorder %v2734_v12, 2  ;;  %vm2741_vm6 = vcmp.lt.s32.totalorder %v2734_v12, 4  ;;  %v10727_v35 = vld [vmem:[#allocation19 + $0x2c8] sm:$0xff]  ;;  %v10736_v12 = vld [vmem:[#allocation19 + $0x298] sm:$0xff] }
 0x9d7   :  { %vm10711_vm7 = vmand %vm2740_vm5, %vm2741_vm6  ;;  %13576 = vst [vmem:[#allocation145_spill] sm:$0xff] %v10736_v12 }
 0x9d8   :  { %v6892_v33 = vmul.f32 -1.442695, %v3378_v15  ;;  %v3308_v11 = vadd.f32 %v7117_v41, %v10699_v49  ;;  %v13569_v41 = vld [vmem:[#allocation77_spill] sm:$0xff] }
 0x9da   :  { %7894 = vpow2.f32 %v6892_v33  ;;  %v3383_v60 = vadd.f32 %v7666_v14, %v3308_v11  ;;  %v10719_v14 = vld [vmem:[#allocation19 + $0x2f0] sm:$0xff] }
 0x9dc   :  { %v6893_v50 = vmul.f32 -1.442695, %v3383_v60 }
 0x9de   :  { %7896 = vpow2.f32 %v6893_v50 }
 0x9e7   :  { %v7895_v16 = vpop.eup %7894 }
 0x9e8   :  { %v3392_v4 = vadd.f32 1.0, %v7895_v16 }
 0x9ea   :  { %7898 = vrcp.f32 %v3392_v4  ;;  %v13570_v4 = vmov 0 }
 0x9eb   :  { %v7897_v54 = vpop.eup %7896  ;;  %v13571_v4 = vsel %vm10711_vm7, 4294967295, %v13570_v4 }
 0x9ec   :  { %v3393_v3 = vadd.f32 1.0, %v7897_v54  ;;  %13572 = vst [vmem:[#allocation77_spill] sm:$0xff] %v13571_v4  ;;  %v13573_v54 = vld [vmem:[#allocation76_spill] sm:$0xff] }
 0x9ed   :  { %13574 = vst [vmem:[#allocation76_spill] sm:$0xff] %v10727_v35  ;;  %v10798_v4 = vld [vmem:[#allocation19 + $0x140] sm:$0xff] }
 0x9ee   :  { %7900 = vrcp.f32 %v3393_v3 }
 0x9ef   :  { %v3470_v37 = vpop.f32.mrf.mxu1 }
 0x9f0   :  { %v3471_v58 = vadd.f32 %v3470_v37, %v13568_v1  ;;  %v10741_v37 = vld [vmem:[#allocation19 + $0x290] sm:$0xff] }
 0x9f1   :  { %v10705_v10 = vpop.f32.mrf.mxu1  ;;  %13577 = vst [vmem:[#allocation146_spill] sm:$0xff] %v10741_v37 }
 0x9f2   :  { %v3558_v33 = vadd.f32 %v3471_v58, %v13569_v41 }
 0x9f3   :  { %v3476_v43 = vpop.f32.mrf.mxu1 }
 0x9f4   :  { %v10708_v5 = vmax.f32 %v3558_v33, 0.0  ;;  %v3477_v50 = vadd.f32 %v3476_v43, %v13568_v1  ;;  %v10746_v33 = vld [vmem:[#allocation19 + $0x268] sm:$0xff]  ;;  %v10754_v43 = vld [vmem:[#allocation19 + $0x238] sm:$0xff] }
 0x9f5   :  { %13578 = vst [vmem:[#allocation147_spill] sm:$0xff] %v10746_v33  ;;  %13580 = vst [vmem:[#allocation149_spill] sm:$0xff] %v10754_v43 }
 0x9f6   :  { %4060 = vst [vmem:[#allocation25 + $0x10] sm:$0xff] %v10708_v5  ;;  %v3559_v3 = vadd.f32 %v3477_v50, %v13573_v54  ;;  %3627 = vmatmul.mubr.f32.vlgmr.msra.gmra.mxu1 %v10708_v5  ;;  %3704 = vmatmul.mubr.f32.vlgmr.msra.gmra.mxu0 %v10708_v5  ;;  %v10762_v50 = vld [vmem:[#allocation19 + $0x208] sm:$0xff]  ;;  %v10766_v54 = vld [vmem:[#allocation19 + $0x200] sm:$0xff] }
 0x9f7   :  { %v7899_v11 = vpop.eup %7898  ;;  %3717 = vmatpush1.msra.mxu1 %v10719_v14  ;;  %3632 = vmatprep.mubr.f32.mxu1 %v13482_v44  ;;  %13582 = vst [vmem:[#allocation151_spill] sm:$0xff] %v10762_v50  ;;  %13583 = vst [vmem:[#allocation152_spill] sm:$0xff] %v10766_v54 }
 0x9f8   :  { %v3398_v58 = vsel %vm10711_vm7, %v7899_v11, %v3378_v15  ;;  %v10725_v16 = vmax.f32 %v3559_v3, 0.0  ;;  %3718 = vmatprep.subr.mxu1 %v10727_v35  ;;  %3709 = vmatprep.mubr.f32.mxu0 %v13482_v44  ;;  %v10778_v3 = vld [vmem:[#allocation19 + $0x1a8] sm:$0xff]  ;;  %v10782_v11 = vld [vmem:[#allocation19 + $0x1a0] sm:$0xff] }
 0x9f9   :  { %3402 = vst [vmem:[#allocation26] sm:$0xff] %v3398_v58  ;;  %3719 = vmatpush1.msra.mxu1 %v10731_v31  ;;  %7137 = vmatpush3.msra.mxu0 %v10234_v59  ;;  %v10750_v59 = vld [vmem:[#allocation19 + $0x260] sm:$0xff]  ;;  %v10786_v58 = vld [vmem:[#allocation19 + $0x178] sm:$0xff] }
 0x9fa   :  { %4061 = vst [vmem:[#allocation25 + $0x18] sm:$0xff] %v10725_v16  ;;  %3720 = vmatprep.subr.mxu1 %v10736_v12  ;;  %3633 = vmatmul.mubr.f32.gmra.mxu1 %v10725_v16  ;;  %13579 = vst [vmem:[#allocation148_spill] sm:$0xff] %v10750_v59 }
 0x9fb   :  { %v7901_v15 = vpop.eup %7900  ;;  %3710 = vmatmul.mubr.f32.gmra.mxu0 %v10725_v16  ;;  %3721 = vmatpush1.msra.mxu1 %v10741_v37 }
 0x9fc   :  { %v3399_v41 = vsel %vm10711_vm7, %v7901_v15, %v3383_v60  ;;  %3722 = vmatprep.subr.mxu1 %v10746_v33  ;;  %3780 = vmatprep.mubr.f32.mxu1 %v13482_v44  ;;  %v10758_v60 = vld [vmem:[#allocation19 + $0x230] sm:$0xff] }
 0x9fd   :  { %3403 = vst [vmem:[#allocation26 + $0x8] sm:$0xff] %v3399_v41  ;;  %3723 = vmatpush1.msra.mxu1 %v10750_v59  ;;  %7138 = vmatprep.subr.mxu0 %v10237_v39  ;;  %13581 = vst [vmem:[#allocation150_spill] sm:$0xff] %v10758_v60  ;;  %v10770_v39 = vld [vmem:[#allocation19 + $0x1d8] sm:$0xff]  ;;  %v10790_v15 = vld [vmem:[#allocation19 + $0x170] sm:$0xff] }
 0x9fe   :  { %3724 = vmatprep.subr.mxu1 %v10754_v43  ;;  %7139 = vmatpush3.msra.mxu0 %v10240_v26  ;;  %13584 = vst [vmem:[#allocation153_spill] sm:$0xff] %v10770_v39  ;;  %v10774_v26 = vld [vmem:[#allocation19 + $0x1d0] sm:$0xff]  ;;  %v13594_v41 = vld [vmem:[#allocation92_spill] sm:$0xff] }
 0x9ff   :  { %3725 = vmatpush1.msra.mxu1 %v10758_v60  ;;  %7140 = vmatprep.subr.mxu0 %v10243_v21  ;;  %13585 = vst [vmem:[#allocation154_spill] sm:$0xff] %v10774_v26  ;;  %v13586_v21 = vld [vmem:[#allocation88_spill] sm:$0xff]  ;;  %v13649_v60 = vld [vmem:[#allocation57_spill] sm:$0xff]  ;;  %v13650_v59 = vld [vmem:[#allocation115_spill] sm:$0xff] }
 0xa00   :  { %3726 = vmatprep.subr.mxu1 %v10762_v50  ;;  %7141 = vmatpush3.msra.mxu0 %v10246_v46  ;;  %13587 = vst [vmem:[#allocation88_spill] sm:$0xff] %v10778_v3  ;;  %v13588_v46 = vld [vmem:[#allocation89_spill] sm:$0xff] }
 0xa01   :  { %3727 = vmatpush1.msra.mxu1 %v10766_v54  ;;  %7142 = vmatprep.subr.mxu0 %v10249_v17  ;;  %13589 = vst [vmem:[#allocation89_spill] sm:$0xff] %v10782_v11  ;;  %v13590_v17 = vld [vmem:[#allocation90_spill] sm:$0xff]  ;;  %v13648_v54 = vld [vmem:[#allocation56_spill] sm:$0xff] }
 0xa02   :  { %3728 = vmatprep.subr.mxu1 %v10770_v39  ;;  %7143 = vmatpush3.msra.mxu0 %v10252_v63  ;;  %13591 = vst [vmem:[#allocation90_spill] sm:$0xff] %v10786_v58  ;;  %v13592_v63 = vld [vmem:[#allocation91_spill] sm:$0xff] }
 0xa03   :  { %3729 = vmatpush1.msra.mxu1 %v10774_v26  ;;  %7144 = vmatprep.subr.mxu0 %v13586_v21  ;;  %13593 = vst [vmem:[#allocation91_spill] sm:$0xff] %v10790_v15  ;;  %v10794_v21 = vld [vmem:[#allocation19 + $0x148] sm:$0xff] }
 0xa04   :  { %3730 = vmatprep.subr.mxu1 %v10778_v3  ;;  %7145 = vmatpush3.msra.mxu0 %v13588_v46  ;;  %13595 = vst [vmem:[#allocation92_spill] sm:$0xff] %v10794_v21  ;;  %v13596_v46 = vld [vmem:[#allocation93_spill] sm:$0xff] }
 0xa05   :  { %3731 = vmatpush1.msra.mxu1 %v10782_v11  ;;  %7146 = vmatprep.subr.mxu0 %v13590_v17  ;;  %13597 = vst [vmem:[#allocation93_spill] sm:$0xff] %v10798_v4  ;;  %v13598_v17 = vld [vmem:[#allocation94_spill] sm:$0xff] }
 0xa06   :  { %3732 = vmatprep.subr.mxu1 %v10786_v58  ;;  %7147 = vmatpush3.msra.mxu0 %v13592_v63  ;;  %v10802_v58 = vld [vmem:[#allocation19 + $0x118] sm:$0xff] }
 0xa07   :  { %3733 = vmatpush1.msra.mxu1 %v10790_v15  ;;  %7148 = vmatprep.subr.mxu0 %v13594_v41  ;;  %13599 = vst [vmem:[#allocation94_spill] sm:$0xff] %v10802_v58  ;;  %v13600_v63 = vld [vmem:[#allocation95_spill] sm:$0xff]  ;;  %v13602_v41 = vld [vmem:[#allocation96_spill] sm:$0xff] }
 0xa08   :  { %3734 = vmatprep.subr.mxu1 %v10794_v21  ;;  %7149 = vmatpush3.msra.mxu0 %v13596_v46  ;;  %v10806_v15 = vld [vmem:[#allocation19 + $0x110] sm:$0xff]  ;;  %v10810_v21 = vld [vmem:[#allocation19 + $0xe8] sm:$0xff] }
 0xa09   :  { %3735 = vmatpush1.msra.mxu1 %v10798_v4  ;;  %7150 = vmatprep.subr.mxu0 %v13598_v17  ;;  %13601 = vst [vmem:[#allocation95_spill] sm:$0xff] %v10806_v15  ;;  %13603 = vst [vmem:[#allocation96_spill] sm:$0xff] %v10810_v21  ;;  %v13604_v46 = vld [vmem:[#allocation97_spill] sm:$0xff]  ;;  %v13606_v17 = vld [vmem:[#allocation98_spill] sm:$0xff] }
 0xa0a   :  { %3736 = vmatprep.subr.mxu1 %v10802_v58  ;;  %7151 = vmatpush3.msra.mxu0 %v13600_v63  ;;  %v10814_v4 = vld [vmem:[#allocation19 + $0xe0] sm:$0xff]  ;;  %v10818_v58 = vld [vmem:[#allocation19 + $0xb8] sm:$0xff] }
 0xa0b   :  { %3737 = vmatpush1.msra.mxu1 %v10806_v15  ;;  %7152 = vmatprep.subr.mxu0 %v13602_v41  ;;  %13605 = vst [vmem:[#allocation97_spill] sm:$0xff] %v10814_v4  ;;  %13607 = vst [vmem:[#allocation98_spill] sm:$0xff] %v10818_v58  ;;  %v13608_v63 = vld [vmem:[#allocation99_spill] sm:$0xff]  ;;  %v13610_v41 = vld [vmem:[#allocation100_spill] sm:$0xff] }
 0xa0c   :  { %3738 = vmatprep.subr.mxu1 %v10810_v21  ;;  %7153 = vmatpush3.msra.mxu0 %v13604_v46  ;;  %v10822_v15 = vld [vmem:[#allocation19 + $0xb0] sm:$0xff]  ;;  %v10826_v21 = vld [vmem:[#allocation19 + $0x88] sm:$0xff] }
 0xa0d   :  { %3739 = vmatpush1.msra.mxu1 %v10814_v4  ;;  %7154 = vmatprep.subr.mxu0 %v13606_v17  ;;  %13609 = vst [vmem:[#allocation99_spill] sm:$0xff] %v10822_v15  ;;  %13611 = vst [vmem:[#allocation100_spill] sm:$0xff] %v10826_v21  ;;  %v13612_v46 = vld [vmem:[#allocation101_spill] sm:$0xff]  ;;  %v13614_v17 = vld [vmem:[#allocation102_spill] sm:$0xff] }
 0xa0e   :  { %3740 = vmatprep.subr.mxu1 %v10818_v58  ;;  %7155 = vmatpush3.msra.mxu0 %v13608_v63  ;;  %v10830_v4 = vld [vmem:[#allocation19 + $0x80] sm:$0xff]  ;;  %v10834_v58 = vld [vmem:[#allocation19 + $0x58] sm:$0xff] }
 0xa0f   :  { %3741 = vmatpush1.msra.mxu1 %v10822_v15  ;;  %7156 = vmatprep.subr.mxu0 %v13610_v41  ;;  %13613 = vst [vmem:[#allocation101_spill] sm:$0xff] %v10830_v4  ;;  %13615 = vst [vmem:[#allocation102_spill] sm:$0xff] %v10834_v58  ;;  %v13616_v63 = vld [vmem:[#allocation103_spill] sm:$0xff]  ;;  %v13618_v41 = vld [vmem:[#allocation104_spill] sm:$0xff] }
 0xa10   :  { %3742 = vmatprep.subr.mxu1 %v10826_v21  ;;  %7157 = vmatpush3.msra.mxu0 %v13612_v46  ;;  %v10838_v15 = vld [vmem:[#allocation19 + $0x50] sm:$0xff]  ;;  %v10842_v21 = vld [vmem:[#allocation19 + $0x28] sm:$0xff] }
 0xa11   :  { %3743 = vmatpush1.msra.mxu1 %v10830_v4  ;;  %7158 = vmatprep.subr.mxu0 %v13614_v17  ;;  %13617 = vst [vmem:[#allocation103_spill] sm:$0xff] %v10838_v15  ;;  %13619 = vst [vmem:[#allocation104_spill] sm:$0xff] %v10842_v21  ;;  %v13620_v46 = vld [vmem:[#allocation105_spill] sm:$0xff]  ;;  %v13622_v17 = vld [vmem:[#allocation106_spill] sm:$0xff] }
 0xa12   :  { %3744 = vmatprep.subr.mxu1 %v10834_v58  ;;  %7159 = vmatpush3.msra.mxu0 %v13616_v63  ;;  %v10846_v4 = vld [vmem:[#allocation19 + $0x20] sm:$0xff]  ;;  %v13623_v63 = vld [vmem:[#allocation107_spill] sm:$0xff] }
 0xa13   :  { %3745 = vmatpush1.msra.mxu1 %v10838_v15  ;;  %7160 = vmatprep.subr.mxu0 %v13618_v41  ;;  %13621 = vst [vmem:[#allocation105_spill] sm:$0xff] %v10846_v4  ;;  %v13624_v15 = vld [vmem:[#allocation108_spill] sm:$0xff]  ;;  %v13625_v41 = vld [vmem:[#allocation109_spill] sm:$0xff] }
 0xa14   :  { %3746 = vmatprep.subr.mxu1 %v10842_v21  ;;  %7161 = vmatpush3.msra.mxu0 %v13620_v46  ;;  %v10855_v58 = vld [vmem:[#allocation22 + $0x178] sm:$0xff]  ;;  %v13627_v46 = vld [vmem:[#allocation110_spill] sm:$0xff] }
 0xa15   :  { %3747 = vmatpush1.msra.mxu1 %v10846_v4  ;;  %7162 = vmatprep.subr.mxu0 %v13622_v17  ;;  %13626 = vst [vmem:[#allocation106_spill] sm:$0xff] %v10855_v58  ;;  %v13628_v17 = vld [vmem:[#allocation111_spill] sm:$0xff] }
 0xa16   :  { %3781 = vmatmul.mubr.f32.vlgmr.msra.gmra.mxu1 %v10708_v5  ;;  %7163 = vmatpush3.msra.mxu0 %v13623_v63  ;;  %v13629_v5 = vld [vmem:[#allocation112_spill] sm:$0xff]  ;;  %v10863_v63 = vld [vmem:[#allocation22 + $0x170] sm:$0xff] }
 0xa17   :  { %3786 = vmatprep.mubr.f32.mxu1 %v13482_v44  ;;  %7164 = vmatprep.subr.mxu0 %v13624_v15  ;;  %13630 = vst [vmem:[#allocation107_spill] sm:$0xff] %v10863_v63  ;;  %v10867_v15 = vld [vmem:[#allocation22 + $0x168] sm:$0xff] }
 0xa18   :  { %7165 = vmatpush3.msra.mxu0 %v13625_v41  ;;  %7667 = vmatprep.subr.mxu1 %v10855_v58  ;;  %13631 = vst [vmem:[#allocation108_spill] sm:$0xff] %v10867_v15  ;;  %v10871_v41 = vld [vmem:[#allocation22 + $0x160] sm:$0xff] }
 0xa19   :  { %7166 = vmatprep.subr.mxu0 %v13627_v46  ;;  %7668 = vmatpush3.msra.mxu1 %v10855_v58  ;;  %13632 = vst [vmem:[#allocation109_spill] sm:$0xff] %v10871_v41  ;;  %v10879_v46 = vld [vmem:[#allocation22 + $0x150] sm:$0xff] }
 0xa1a   :  { %3787 = vmatmul.mubr.f32.gmra.mxu1 %v10725_v16  ;;  %7167 = vmatpush3.msra.mxu0 %v13628_v17  ;;  %v10875_v16 = vld [vmem:[#allocation22 + $0x158] sm:$0xff]  ;;  %13634 = vst [vmem:[#allocation111_spill] sm:$0xff] %v10879_v46  ;;  %v10883_v17 = vld [vmem:[#allocation22 + $0x148] sm:$0xff] }
 0xa1b   :  { %4065 = vmatprep.subr.mxu0 %v13629_v5  ;;  %7669 = vmatprep.subr.mxu1 %v10863_v63  ;;  %13633 = vst [vmem:[#allocation110_spill] sm:$0xff] %v10875_v16  ;;  %13635 = vst [vmem:[#allocation112_spill] sm:$0xff] %v10883_v17  ;;  %v10887_v5 = vld [vmem:[#allocation22 + $0x140] sm:$0xff] }
 0xa1c   :  { %7670 = vmatpush3.msra.mxu1 %v10863_v63  ;;  %13636 = vst [vmem:[#allocation155_spill] sm:$0xff] %v10887_v5  ;;  %v13646_v63 = vld [vmem:[#allocation78_spill] sm:$0xff] }
 0xa1d   :  { %7671 = vmatprep.subr.mxu1 %v10867_v15  ;;  %v3473_v58 = vadd.f32 %v10705_v10, %v13646_v63  ;;  %v13651_v10 = vld [vmem:[#allocation58_spill] sm:$0xff] }
 0xa1e   :  { %7672 = vmatpush3.msra.mxu1 %v10867_v15 }
 0xa1f   :  { %7673 = vmatprep.subr.mxu1 %v10871_v41 }
 0xa20   :  { %7674 = vmatpush3.msra.mxu1 %v10871_v41  ;;  %v10891_v41 = vld [vmem:[#allocation22 + $0x138] sm:$0xff] }
 0xa21   :  { %7675 = vmatprep.subr.mxu1 %v10875_v16  ;;  %13637 = vst [vmem:[#allocation156_spill] sm:$0xff] %v10891_v41 }
 0xa22   :  { %7676 = vmatpush3.msra.mxu1 %v10875_v16  ;;  %v10895_v16 = vld [vmem:[#allocation22 + $0x130] sm:$0xff] }
 0xa23   :  { %7677 = vmatprep.subr.mxu1 %v10879_v46  ;;  %13638 = vst [vmem:[#allocation157_spill] sm:$0xff] %v10895_v16 }
 0xa24   :  { %7678 = vmatpush3.msra.mxu1 %v10879_v46  ;;  %v10899_v46 = vld [vmem:[#allocation22 + $0x128] sm:$0xff] }
 0xa25   :  { %7679 = vmatprep.subr.mxu1 %v10883_v17  ;;  %13639 = vst [vmem:[#allocation158_spill] sm:$0xff] %v10899_v46 }
 0xa26   :  { %7680 = vmatpush3.msra.mxu1 %v10883_v17  ;;  %v10903_v17 = vld [vmem:[#allocation22 + $0x120] sm:$0xff] }
 0xa27   :  { %7681 = vmatprep.subr.mxu1 %v10887_v5  ;;  %13640 = vst [vmem:[#allocation159_spill] sm:$0xff] %v10903_v17 }
 0xa28   :  { %7682 = vmatpush3.msra.mxu1 %v10887_v5  ;;  %v10907_v5 = vld [vmem:[#allocation22 + $0x118] sm:$0xff] }
 0xa29   :  { %7683 = vmatprep.subr.mxu1 %v10891_v41  ;;  %13641 = vst [vmem:[#allocation160_spill] sm:$0xff] %v10907_v5 }
 0xa2a   :  { %7684 = vmatpush3.msra.mxu1 %v10891_v41  ;;  %v10911_v41 = vld [vmem:[#allocation22 + $0x110] sm:$0xff] }
 0xa2b   :  { %7685 = vmatprep.subr.mxu1 %v10895_v16  ;;  %13642 = vst [vmem:[#allocation161_spill] sm:$0xff] %v10911_v41 }
 0xa2c   :  { %7686 = vmatpush3.msra.mxu1 %v10895_v16  ;;  %v10915_v16 = vld [vmem:[#allocation22 + $0x108] sm:$0xff] }
 0xa2d   :  { %7687 = vmatprep.subr.mxu1 %v10899_v46  ;;  %13643 = vst [vmem:[#allocation162_spill] sm:$0xff] %v10915_v16 }
 0xa2e   :  { %7688 = vmatpush3.msra.mxu1 %v10899_v46  ;;  %v10919_v46 = vld [vmem:[#allocation22 + $0x100] sm:$0xff] }
 0xa2f   :  { %7689 = vmatprep.subr.mxu1 %v10903_v17  ;;  %13644 = vst [vmem:[#allocation163_spill] sm:$0xff] %v10919_v46 }
 0xa30   :  { %7690 = vmatpush3.msra.mxu1 %v10903_v17  ;;  %v3547_v17 = vpop.f32.mrf.mxu0 }
 0xa31   :  { %7691 = vmatprep.subr.mxu1 %v10907_v5  ;;  %v3548_v33 = vadd.f32 %v3547_v17, %v13650_v59 }
 0xa32   :  { %7692 = vmatpush3.msra.mxu1 %v10907_v5  ;;  %v10926_v5 = vld [vmem:[%s13030_s13 + $0x1f8] sm:$0xff]  ;;  %v3549_v11 = vpop.f32.mrf.mxu0 }
 0xa33   :  { %7693 = vmatprep.subr.mxu1 %v10911_v41  ;;  %13645 = vst [vmem:[#allocation164_spill] sm:$0xff] %v10926_v5 }
 0xa34   :  { %7694 = vmatpush3.msra.mxu1 %v10911_v41  ;;  %v3478_v41 = vpop.f32.mrf.mxu1  ;;  %v3553_v37 = vpop.f32.mrf.mxu0 }
 0xa35   :  { %7695 = vmatprep.subr.mxu1 %v10915_v16 }
 0xa36   :  { %7696 = vmatpush3.msra.mxu1 %v10915_v16  ;;  %v13647_v16 = vld [vmem:[#allocation55_spill] sm:$0xff] }
 0xa37   :  { %7697 = vmatprep.subr.mxu1 %v10919_v46 }
 0xa38   :  { %7698 = vmatpush3.msra.mxu1 %v10919_v46  ;;  %v3479_v46 = vadd.f32 %v3478_v41, %v13646_v63 }
 0xa39   :  { %4142 = vmatprep.subr.mxu1 %v10926_v5 }
 0xab6   :  { %v3628_v15 = vpop.f32.mrf.mxu1 }
 0xab7   :  { %v3793_v4 = vadd.f32 %v3628_v15, %v13647_v16 }
 0xab8   :  { %v3630_v21 = vpop.f32.mrf.mxu1 }
 0xab9   :  { %v3799_v3 = vadd.f32 %v3793_v4, %v3473_v58  ;;  %v3794_v50 = vadd.f32 %v3630_v21, %v13648_v54  ;;  %v3554_v4 = vadd.f32 %v3553_v37, %v13650_v59  ;;  %v3555_v54 = vpop.f32.mrf.mxu0 }
 0xaba   :  { %v3634_v26 = vpop.f32.mrf.mxu1 }
 0xabb   :  { %v6894_v39 = vmul.f32 -1.442695, %v3799_v3  ;;  %v3796_v43 = vadd.f32 %v3634_v26, %v13649_v60  ;;  %v3813_v15 = vadd.f32 %v3794_v50, %v3548_v33  ;;  %v3705_v26 = vpop.f32.mrf.mxu0 }
 0xabc   :  { %v3636_v5 = vpop.f32.mrf.mxu1 }
 0xabd   :  { %7902 = vpow2.f32 %v6894_v39  ;;  %v3800_v12 = vadd.f32 %v3796_v43, %v3479_v46  ;;  %v3797_v31 = vadd.f32 %v3636_v5, %v13651_v10  ;;  %v6896_v41 = vmul.f32 -1.442695, %v3813_v15  ;;  %v3707_v39 = vpop.f32.mrf.mxu0  ;;  %v13652_v15 = vld [vmem:[#allocation44_spill] sm:$0xff] }
 0xabf   :  { %v6895_v16 = vmul.f32 -1.442695, %v3800_v12  ;;  %v3814_v58 = vadd.f32 %v3797_v31, %v3554_v4  ;;  %v3711_v46 = vpop.f32.mrf.mxu0  ;;  %v3841_v12 = vadd.f32 %v3707_v39, %v10360_v9 }
 0xac1   :  { %7904 = vpow2.f32 %v6895_v16  ;;  %v6897_v3 = vmul.f32 -1.442695, %v3814_v58  ;;  %v3713_v5 = vpop.f32.mrf.mxu0  ;;  %v901_v16 = vadd.f32 %v13652_v15, %v13527_v32  ;;  %v3550_v58 = vadd.f32 %v3549_v11, %v10353_v0 }
 0xac2   :  { %7906 = vpow2.f32 %v6896_v41  ;;  %v3844_v39 = vadd.f32 %v3713_v5, %v10360_v9  ;;  %v3556_v32 = vadd.f32 %v3555_v54, %v10353_v0 }
 0xac3   :  { %7908 = vpow2.f32 %v6897_v3  ;;  %v13653_v3 = vld [vmem:[#allocation80_spill] sm:$0xff] }
 0xaca   :  { %v7903_v21 = vpop.eup %7902 }
 0xacb   :  { %v3807_v60 = vadd.f32 1.0, %v7903_v21 }
 0xacd   :  { %7910 = vrcp.f32 %v3807_v60 }
 0xace   :  { %v7905_v17 = vpop.eup %7904 }
 0xacf   :  { %v3808_v43 = vadd.f32 1.0, %v7905_v17  ;;  %v7907_v33 = vpop.eup %7906  ;;  %v3795_v17 = vadd.f32 %v3705_v26, %v901_v16 }
 0xad0   :  { %v7909_v50 = vpop.eup %7908  ;;  %v3821_v31 = vadd.f32 1.0, %v7907_v33 }
 0xad1   :  { %7912 = vrcp.f32 %v3808_v43  ;;  %v3847_v43 = vmax.f32 %v3841_v12, 0.0  ;;  %v3822_v59 = vadd.f32 1.0, %v7909_v50  ;;  %v3850_v50 = vmax.f32 %v3844_v39, 0.0  ;;  %v13668_v39 = vld [vmem:[#allocation122_spill] sm:$0xff] }
 0xad2   :  { %7914 = vrcp.f32 %v3821_v31  ;;  %v13654_v31 = vld [vmem:[#allocation43_spill] sm:$0xff] }
 0xad6   :  { %v3782_v37 = vpop.f32.mrf.mxu1 }
 0xad7   :  { %v3842_v10 = vadd.f32 %v3782_v37, %v10215_v8 }
 0xad8   :  { %v3784_v4 = vpop.f32.mrf.mxu1 }
 0xad9   :  { %v3848_v41 = vmax.f32 %v3842_v10, 0.0  ;;  %v3843_v21 = vadd.f32 %v3784_v4, %v13653_v3  ;;  %v13660_v4 = vld [vmem:[#allocation81_spill] sm:$0xff] }
 0xada   :  { %v7911_v60 = vpop.eup %7910  ;;  %v3788_v63 = vpop.f32.mrf.mxu1 }
 0xadb   :  { %v3827_v33 = vmul.f32 %v7911_v60, %v3550_v58  ;;  %v6900_v35 = vmul.f32 -1.442695, %v3843_v21  ;;  %v3845_v37 = vadd.f32 %v3788_v63, %v10215_v8  ;;  %3959 = vmatprep.mubr.f32.mxu0 %v3848_v41  ;;  %v3798_v63 = vadd.f32 %v3711_v46, %v13654_v31  ;;  %v13659_v46 = vld [vmem:[#allocation53_spill] sm:$0xff]  ;;  %v13673_v31 = vld [vmem:[#allocation127_spill] sm:$0xff] }
 0xadc   :  { %v3790_v15 = vpop.f32.mrf.mxu1  ;;  %3960 = vmatmul.mubr.f32.vlgmr.msra.gmra.mxu0 %v3847_v43 }
 0xadd   :  { %v3829_v11 = vadd.f32 %v3827_v33, %v3795_v17  ;;  %7916 = vpow2.f32 %v6900_v35  ;;  %v3851_v10 = vmax.f32 %v3845_v37, 0.0  ;;  %v3846_v26 = vadd.f32 %v3790_v15, %v13653_v3  ;;  %4066 = vmatpush1.msra.mxu0 %v10372_v61  ;;  %v13655_v61 = vld [vmem:[#allocation79_spill] sm:$0xff]  ;;  %v11066_v33 = vld [vmem:[%s13030_s13 + $0x150] sm:$0xff]  ;;  %v13670_v15 = vld [vmem:[#allocation124_spill] sm:$0xff] }
 0xade   :  { %v7913_v12 = vpop.eup %7912  ;;  %7918 = vrcp.f32 %v3822_v59  ;;  %4067 = vmatprep.subr.mxu0 %v10378_v47  ;;  %v13656_v47 = vld [vmem:[#allocation39_spill] sm:$0xff]  ;;  %v13658_v59 = vld [vmem:[#allocation41_spill] sm:$0xff] }
 0xadf   :  { %7920 = vtanh.f32 %v3829_v11  ;;  %v3828_v5 = vmul.f32 %v7913_v12, %v3556_v32  ;;  %v6903_v16 = vmul.f32 -1.442695, %v3846_v26  ;;  %4068 = vmatpush1.msra.mxu0 %v10384_v57  ;;  %3964 = vmatprep.mubr.f32.mxu0 %v3851_v10  ;;  %v7915_v57 = vpop.eup %7914  ;;  %v13669_v37 = vld [vmem:[#allocation123_spill] sm:$0xff]  ;;  %v11080_v11 = vld [vmem:[%s13030_s13 + $0x130] sm:$0xff]  ;;  %v13671_v10 = vld [vmem:[#allocation125_spill] sm:$0xff] }
 0xae0   :  { %4069 = vmatprep.subr.mxu0 %v10390_v19  ;;  %3965 = vmatmul.mubr.f32.gmra.mxu0 %v3850_v50  ;;  %v13657_v19 = vld [vmem:[#allocation42_spill] sm:$0xff]  ;;  %v3837_v58 = vmul.f32 %v7915_v57, %v10454_v25  ;;  %v11073_v32 = vld [vmem:[%s13030_s13 + $0x138] sm:$0xff] }
 0xae1   :  { %v3830_v35 = vadd.f32 %v3828_v5, %v3798_v63  ;;  %7922 = vpow2.f32 %v6903_v16  ;;  %4070 = vmatpush1.msra.mxu0 %v10396_v34  ;;  %4129 = vmatprep.mubr.f32.mxu0 %v13482_v44  ;;  %v11087_v26 = vld [vmem:[%s13030_s13 + $0x118] sm:$0xff]  ;;  %v13672_v12 = vld [vmem:[#allocation126_spill] sm:$0xff]  ;;  %v13674_v5 = vld [vmem:[#allocation128_spill] sm:$0xff] }
 0xae2   :  { %4071 = vmatprep.subr.mxu0 %v10403_v29  ;;  %v11094_v50 = vld [vmem:[%s13030_s13 + $0x110] sm:$0xff]  ;;  %v11101_v63 = vld [vmem:[%s13030_s13 + $0xf8] sm:$0xff] }
 0xae3   :  { %7924 = vtanh.f32 %v3830_v35  ;;  %4072 = vmatpush1.msra.mxu0 %v10409_v51  ;;  %v3833_v51 = vsub.f32 1.0, %v7915_v57  ;;  %v11108_v16 = vld [vmem:[%s13030_s13 + $0xf0] sm:$0xff]  ;;  %v13675_v35 = vld [vmem:[#allocation129_spill] sm:$0xff] }
 0xae4   :  { %4073 = vmatprep.subr.mxu0 %v10415_v53  ;;  %v11122_v57 = vld [vmem:[%s13030_s13 + $0xd0] sm:$0xff] }
 0xae5   :  { %4074 = vmatpush1.msra.mxu0 %v10421_v2 }
 0xae6   :  { %4075 = vmatprep.subr.mxu0 %v13655_v61  ;;  %v11115_v61 = vld [vmem:[%s13030_s13 + $0xd8] sm:$0xff] }
 0xae7   :  { %4076 = vmatpush1.msra.mxu0 %v13656_v47  ;;  %v13676_v47 = vld [vmem:[#allocation130_spill] sm:$0xff] }
 0xae8   :  { %4077 = vmatprep.subr.mxu0 %v13657_v19  ;;  %v13677_v19 = vld [vmem:[#allocation131_spill] sm:$0xff] }
 0xae9   :  { %4078 = vmatpush1.msra.mxu0 %v10445_v45 }
 0xaea   :  { %v7917_v34 = vpop.eup %7916  ;;  %4079 = vmatprep.subr.mxu0 %v13658_v59  ;;  %v13678_v59 = vld [vmem:[#allocation132_spill] sm:$0xff] }
 0xaeb   :  { %v7919_v29 = vpop.eup %7918  ;;  %v3873_v54 = vadd.f32 1.0, %v7917_v34  ;;  %4080 = vmatpush1.msra.mxu0 %v13659_v46  ;;  %v11129_v34 = vld [vmem:[%s13030_s13 + $0xb8] sm:$0xff] }
 0xaec   :  { %v7921_v53 = vpop.eup %7920  ;;  %4081 = vmatprep.subr.mxu0 %v13660_v4  ;;  %v3834_v60 = vsub.f32 1.0, %v7919_v29  ;;  %v11143_v46 = vld [vmem:[%s13030_s13 + $0x98] sm:$0xff] }
 0xaed   :  { %7926 = vrcp.f32 %v3873_v54  ;;  %4082 = vmatpush1.msra.mxu0 %v10472_v7  ;;  %v3835_v2 = vmul.f32 %v7921_v53, %v3833_v51  ;;  %v3838_v7 = vmul.f32 %v7919_v29, %v10482_v28  ;;  %v11136_v29 = vld [vmem:[%s13030_s13 + $0xb0] sm:$0xff]  ;;  %v13679_v54 = vld [vmem:[#allocation133_spill] sm:$0xff]  ;;  %v13681_v4 = vld [vmem:[#allocation135_spill] sm:$0xff] }
 0xaee   :  { %v7923_v41 = vpop.eup %7922  ;;  %4083 = vmatprep.subr.mxu0 %v10479_v20  ;;  %v13680_v51 = vld [vmem:[#allocation134_spill] sm:$0xff] }
 0xaef   :  { %v3876_v45 = vadd.f32 1.0, %v7923_v41  ;;  %4084 = vmatpush1.msra.mxu0 %v10488_v13  ;;  %v10970_v21 = vadd.f32 %v3837_v58, %v3835_v2  ;;  %v13661_v13 = vld [vmem:[#allocation40_spill] sm:$0xff]  ;;  %v11150_v53 = vld [vmem:[%s13030_s13 + $0x90] sm:$0xff]  ;;  %v11157_v2 = vld [vmem:[%s13030_s13 + $0x78] sm:$0xff] }
 0xaf0   :  { %v7925_v17 = vpop.eup %7924  ;;  %4085 = vmatprep.subr.mxu0 %v10495_v30  ;;  %v10997_v30 = vld [vmem:[%s13030_s13 + $0x1f0] sm:$0xff]  ;;  %v13682_v58 = vld [vmem:[#allocation136_spill] sm:$0xff] }
 0xaf1   :  { %7928 = vrcp.f32 %v3876_v45  ;;  %4086 = vmatpush1.msra.mxu0 %v10502_v22  ;;  %v3836_v43 = vmul.f32 %v7925_v17, %v3834_v60  ;;  %v11003_v22 = vld [vmem:[%s13030_s13 + $0x1d8] sm:$0xff]  ;;  %v11164_v41 = vld [vmem:[%s13030_s13 + $0x70] sm:$0xff]  ;;  %v13683_v45 = vld [vmem:[#allocation137_spill] sm:$0xff] }
 0xaf2   :  { %4087 = vmatprep.subr.mxu0 %v10509_v23  ;;  %v11010_v23 = vld [vmem:[%s13030_s13 + $0x1d0] sm:$0xff]  ;;  %v11171_v60 = vld [vmem:[%s13030_s13 + $0x58] sm:$0xff] }
 0xaf3   :  { %4088 = vmatpush1.msra.mxu0 %v10516_v27  ;;  %v10977_v25 = vadd.f32 %v3838_v7, %v3836_v43  ;;  %v11017_v27 = vld [vmem:[%s13030_s13 + $0x1b8] sm:$0xff]  ;;  %v13684_v17 = vld [vmem:[#allocation138_spill] sm:$0xff] }
 0xaf4   :  { %4089 = vmatprep.subr.mxu0 %v10523_v24  ;;  %v13662_v24 = vld [vmem:[#allocation116_spill] sm:$0xff]  ;;  %v11178_v43 = vld [vmem:[%s13030_s13 + $0x50] sm:$0xff]  ;;  %v13685_v7 = vld [vmem:[#allocation139_spill] sm:$0xff] }
 0xaf5   :  { %4090 = vmatpush1.msra.mxu0 %v10530_v36  ;;  %v11024_v36 = vld [vmem:[%s13030_s13 + $0x1b0] sm:$0xff] }
 0xaf6   :  { %4091 = vmatprep.subr.mxu0 %v10537_v40  ;;  %v13663_v40 = vld [vmem:[#allocation117_spill] sm:$0xff] }
 0xaf7   :  { %4092 = vmatpush1.msra.mxu0 %v10544_v42  ;;  %v11031_v42 = vld [vmem:[%s13030_s13 + $0x198] sm:$0xff] }
 0xaf8   :  { %4093 = vmatprep.subr.mxu0 %v10551_v48  ;;  %v13664_v48 = vld [vmem:[#allocation118_spill] sm:$0xff] }
 0xaf9   :  { %4094 = vmatpush1.msra.mxu0 %v10558_v52  ;;  %v11038_v52 = vld [vmem:[%s13030_s13 + $0x190] sm:$0xff] }
 0xafa   :  { %v7927_v20 = vpop.eup %7926  ;;  %4095 = vmatprep.subr.mxu0 %v10565_v6  ;;  %v13665_v6 = vld [vmem:[#allocation119_spill] sm:$0xff] }
 0xafb   :  { %4096 = vmatpush1.msra.mxu0 %v10572_v55  ;;  %7699 = vmatprep.mubr.f32.mxu1 %v7927_v20  ;;  %v11045_v55 = vld [vmem:[%s13030_s13 + $0x178] sm:$0xff] }
 0xafc   :  { %4130 = vmatmul.mubr.f32.vlgmr.msra.gmra.mxu0 %v10970_v21  ;;  %4223 = vmatprep.subr.mxu0 %v10577_v56  ;;  %v13666_v56 = vld [vmem:[#allocation120_spill] sm:$0xff]  ;;  %v11185_v20 = vld [vmem:[%s13030_s13 + $0x38] sm:$0xff] }
 0xafd   :  { %4135 = vmatprep.mubr.f32.mxu0 %v13482_v44  ;;  %4224 = vmatpush1.msra.mxu0 %v10581_v18  ;;  %v11052_v18 = vld [vmem:[%s13030_s13 + $0x170] sm:$0xff] }
 0xafe   :  { %v7929_v28 = vpop.eup %7928  ;;  %4225 = vmatprep.subr.mxu0 %v13661_v13  ;;  %v11192_v13 = vld [vmem:[%s13030_s13 + $0x30] sm:$0xff] }
 0xaff   :  { %7700 = vmatmul.mubr.f32.vlgmr.msra.gmra.mxu1 %v7929_v28  ;;  %4226 = vmatpush1.msra.mxu0 %v10588_v38  ;;  %v13667_v38 = vld [vmem:[#allocation121_spill] sm:$0xff]  ;;  %v13686_v28 = vld [vmem:[#allocation140_spill] sm:$0xff] }
 0xb00   :  { %4136 = vmatmul.mubr.f32.gmra.mxu0 %v10977_v25  ;;  %4143 = vmatpush1.msra.mxu1 %v10997_v30 }
 0xb01   :  { %4144 = vmatprep.subr.mxu1 %v11003_v22  ;;  %4206 = vmatprep.mubr.f32.mxu1 %v13482_v44 }
 0xb02   :  { %4145 = vmatpush1.msra.mxu1 %v11010_v23  ;;  %4227 = vmatprep.subr.mxu0 %v10593_v62  ;;  %v11059_v62 = vld [vmem:[%s13030_s13 + $0x158] sm:$0xff] }
 0xb03   :  { %4146 = vmatprep.subr.mxu1 %v11017_v27  ;;  %4228 = vmatpush1.msra.mxu0 %v13662_v24  ;;  %v13687_v24 = vld [vmem:[#allocation141_spill] sm:$0xff] }
 0xb04   :  { %4147 = vmatpush1.msra.mxu1 %v11024_v36  ;;  %4229 = vmatprep.subr.mxu0 %v13663_v40  ;;  %v11199_v40 = vld [vmem:[%s13030_s13 + $0x18] sm:$0xff] }
 0xb05   :  { %4148 = vmatprep.subr.mxu1 %v11031_v42  ;;  %4230 = vmatpush1.msra.mxu0 %v13664_v48  ;;  %v13688_v48 = vld [vmem:[#allocation142_spill] sm:$0xff] }
 0xb06   :  { %4149 = vmatpush1.msra.mxu1 %v11038_v52  ;;  %4231 = vmatprep.subr.mxu0 %v13665_v6  ;;  %v11206_v6 = vld [vmem:[%s13030_s13 + $0x10] sm:$0xff] }
 0xb07   :  { %4150 = vmatprep.subr.mxu1 %v11045_v55  ;;  %4232 = vmatpush1.msra.mxu0 %v13666_v56  ;;  %v11211_v56 = vld [vmem:[#allocation19 + $0x2e8] sm:$0xff] }
 0xb08   :  { %4151 = vmatpush1.msra.mxu1 %v11052_v18  ;;  %4233 = vmatprep.subr.mxu0 %v13667_v38  ;;  %v11215_v38 = vld [vmem:[#allocation19 + $0x2e0] sm:$0xff] }
 0xb09   :  { %4152 = vmatprep.subr.mxu1 %v11059_v62  ;;  %4234 = vmatpush1.msra.mxu0 %v13668_v39  ;;  %v11218_v39 = vld [vmem:[#allocation19 + $0x2b8] sm:$0xff] }
 0xb0a   :  { %4153 = vmatpush1.msra.mxu1 %v11066_v33  ;;  %4235 = vmatprep.subr.mxu0 %v13669_v37  ;;  %13689 = vst [vmem:[#allocation55_spill] sm:$0xff] %v11218_v39  ;;  %v13690_v37 = vld [vmem:[#allocation143_spill] sm:$0xff] }
 0xb0b   :  { %4154 = vmatprep.subr.mxu1 %v11073_v32  ;;  %4236 = vmatpush1.msra.mxu0 %v13670_v15  ;;  %v11222_v15 = vld [vmem:[#allocation19 + $0x2b0] sm:$0xff] }
 0xb0c   :  { %4155 = vmatpush1.msra.mxu1 %v11080_v11  ;;  %4237 = vmatprep.subr.mxu0 %v13671_v10  ;;  %13691 = vst [vmem:[#allocation56_spill] sm:$0xff] %v11222_v15  ;;  %v11226_v10 = vld [vmem:[#allocation19 + $0x288] sm:$0xff] }
 0xb0d   :  { %4156 = vmatprep.subr.mxu1 %v11087_v26  ;;  %4238 = vmatpush1.msra.mxu0 %v13672_v12  ;;  %13692 = vst [vmem:[#allocation57_spill] sm:$0xff] %v11226_v10  ;;  %v11229_v12 = vld [vmem:[#allocation19 + $0x280] sm:$0xff] }
 0xb0e   :  { %4157 = vmatpush1.msra.mxu1 %v11094_v50  ;;  %4239 = vmatprep.subr.mxu0 %v13673_v31  ;;  %13693 = vst [vmem:[#allocation58_spill] sm:$0xff] %v11229_v12  ;;  %v11233_v31 = vld [vmem:[#allocation19 + $0x258] sm:$0xff] }
 0xb0f   :  { %4158 = vmatprep.subr.mxu1 %v11101_v63  ;;  %4240 = vmatpush1.msra.mxu0 %v13674_v5  ;;  %13694 = vst [vmem:[#allocation44_spill] sm:$0xff] %v11233_v31  ;;  %v11236_v5 = vld [vmem:[#allocation19 + $0x250] sm:$0xff] }
 0xb10   :  { %4159 = vmatpush1.msra.mxu1 %v11108_v16  ;;  %4241 = vmatprep.subr.mxu0 %v13675_v35  ;;  %13695 = vst [vmem:[#allocation80_spill] sm:$0xff] %v11236_v5  ;;  %v11239_v35 = vld [vmem:[#allocation19 + $0x228] sm:$0xff] }
 0xb11   :  { %4160 = vmatprep.subr.mxu1 %v11115_v61  ;;  %4242 = vmatpush1.msra.mxu0 %v13676_v47  ;;  %13696 = vst [vmem:[#allocation43_spill] sm:$0xff] %v11239_v35  ;;  %v11242_v47 = vld [vmem:[#allocation19 + $0x220] sm:$0xff] }
 0xb12   :  { %4161 = vmatpush1.msra.mxu1 %v11122_v57  ;;  %4243 = vmatprep.subr.mxu0 %v13677_v19  ;;  %13697 = vst [vmem:[#allocation79_spill] sm:$0xff] %v11242_v47  ;;  %v11245_v19 = vld [vmem:[#allocation19 + $0x1f8] sm:$0xff] }
 0xb13   :  { %4162 = vmatprep.subr.mxu1 %v11129_v34  ;;  %4244 = vmatpush1.msra.mxu0 %v13678_v59  ;;  %13698 = vst [vmem:[#allocation39_spill] sm:$0xff] %v11245_v19  ;;  %v11248_v59 = vld [vmem:[#allocation19 + $0x1f0] sm:$0xff] }
 0xb14   :  { %4163 = vmatpush1.msra.mxu1 %v11136_v29  ;;  %4245 = vmatprep.subr.mxu0 %v13679_v54  ;;  %13699 = vst [vmem:[#allocation42_spill] sm:$0xff] %v11248_v59  ;;  %v11251_v54 = vld [vmem:[#allocation19 + $0x1c8] sm:$0xff] }
 0xb15   :  { %4164 = vmatprep.subr.mxu1 %v11143_v46  ;;  %4246 = vmatpush1.msra.mxu0 %v13680_v51  ;;  %13700 = vst [vmem:[#allocation41_spill] sm:$0xff] %v11251_v54  ;;  %v11254_v51 = vld [vmem:[#allocation19 + $0x1c0] sm:$0xff] }
 0xb16   :  { %4165 = vmatpush1.msra.mxu1 %v11150_v53  ;;  %4247 = vmatprep.subr.mxu0 %v13681_v4  ;;  %13701 = vst [vmem:[#allocation53_spill] sm:$0xff] %v11254_v51  ;;  %v11257_v4 = vld [vmem:[#allocation19 + $0x198] sm:$0xff] }
 0xb17   :  { %4166 = vmatprep.subr.mxu1 %v11157_v2  ;;  %4248 = vmatpush1.msra.mxu0 %v13682_v58  ;;  %13702 = vst [vmem:[#allocation81_spill] sm:$0xff] %v11257_v4  ;;  %v11260_v58 = vld [vmem:[#allocation19 + $0x190] sm:$0xff] }
 0xb18   :  { %4167 = vmatpush1.msra.mxu1 %v11164_v41  ;;  %4249 = vmatprep.subr.mxu0 %v13683_v45  ;;  %13703 = vst [vmem:[#allocation40_spill] sm:$0xff] %v11260_v58  ;;  %v11263_v45 = vld [vmem:[#allocation19 + $0x168] sm:$0xff] }
 0xb19   :  { %4168 = vmatprep.subr.mxu1 %v11171_v60  ;;  %4250 = vmatpush1.msra.mxu0 %v13684_v17  ;;  %13704 = vst [vmem:[#allocation116_spill] sm:$0xff] %v11263_v45  ;;  %v11266_v17 = vld [vmem:[#allocation19 + $0x160] sm:$0xff] }
 0xb1a   :  { %4169 = vmatpush1.msra.mxu1 %v11178_v43  ;;  %4251 = vmatprep.subr.mxu0 %v13685_v7  ;;  %13705 = vst [vmem:[#allocation117_spill] sm:$0xff] %v11266_v17  ;;  %v11269_v7 = vld [vmem:[#allocation19 + $0x138] sm:$0xff] }
 0xb1b   :  { %4170 = vmatprep.subr.mxu1 %v11185_v20  ;;  %4252 = vmatpush1.msra.mxu0 %v13686_v28  ;;  %13706 = vst [vmem:[#allocation118_spill] sm:$0xff] %v11269_v7  ;;  %v11272_v28 = vld [vmem:[#allocation19 + $0x130] sm:$0xff] }
 0xb1c   :  { %4171 = vmatpush1.msra.mxu1 %v11192_v13  ;;  %4253 = vmatprep.subr.mxu0 %v13687_v24  ;;  %13707 = vst [vmem:[#allocation119_spill] sm:$0xff] %v11272_v28  ;;  %v11275_v24 = vld [vmem:[#allocation19 + $0x108] sm:$0xff] }
 0xb1d   :  { %4172 = vmatprep.subr.mxu1 %v11199_v40  ;;  %4254 = vmatpush1.msra.mxu0 %v13688_v48  ;;  %13708 = vst [vmem:[#allocation120_spill] sm:$0xff] %v11275_v24  ;;  %v11278_v48 = vld [vmem:[#allocation19 + $0x100] sm:$0xff] }
 0xb1e   :  { %4173 = vmatpush1.msra.mxu1 %v11206_v6  ;;  %4287 = vmatprep.mubr.f32.mxu0 %v13482_v44  ;;  %13709 = vst [vmem:[#allocation121_spill] sm:$0xff] %v11278_v48 }
 0xb1f   :  { %4207 = vmatmul.mubr.f32.vlgmr.msra.gmra.mxu1 %v10970_v21  ;;  %4300 = vmatprep.subr.mxu1 %v11211_v56 }
 0xb20   :  { %4212 = vmatprep.mubr.f32.mxu1 %v13482_v44  ;;  %4301 = vmatpush1.msra.mxu1 %v11215_v38 }
 0xb21   :  { %4302 = vmatprep.subr.mxu1 %v11218_v39  ;;  %4377 = vmatprep.subr.mxu0 %v13690_v37  ;;  %v11281_v37 = vld [vmem:[#allocation19 + $0xd8] sm:$0xff] }
 0xb22   :  { %4303 = vmatpush1.msra.mxu1 %v11222_v15  ;;  %13710 = vst [vmem:[#allocation122_spill] sm:$0xff] %v11281_v37 }
 0xb23   :  { %4213 = vmatmul.mubr.f32.gmra.mxu1 %v10977_v25  ;;  %4304 = vmatprep.subr.mxu1 %v11226_v10 }
 0xb24   :  { %4305 = vmatpush1.msra.mxu1 %v11229_v12  ;;  %4364 = vmatprep.mubr.f32.mxu1 %v13482_v44 }
 0xb25   :  { %4306 = vmatprep.subr.mxu1 %v11233_v31 }
 0xb26   :  { %4307 = vmatpush1.msra.mxu1 %v11236_v5 }
 0xb27   :  { %4308 = vmatprep.subr.mxu1 %v11239_v35 }
 0xb28   :  { %4309 = vmatpush1.msra.mxu1 %v11242_v47 }
 0xb29   :  { %4310 = vmatprep.subr.mxu1 %v11245_v19  ;;  %v13721_v19 = vld [vmem:[#allocation83_spill] sm:$0xff] }
 0xb2a   :  { %4311 = vmatpush1.msra.mxu1 %v11248_v59 }
 0xb2b   :  { %4312 = vmatprep.subr.mxu1 %v11251_v54 }
 0xb2c   :  { %4313 = vmatpush1.msra.mxu1 %v11254_v51 }
 0xb2d   :  { %4314 = vmatprep.subr.mxu1 %v11257_v4 }
 0xb2e   :  { %4315 = vmatpush1.msra.mxu1 %v11260_v58 }
 0xb2f   :  { %4316 = vmatprep.subr.mxu1 %v11263_v45 }
 0xb30   :  { %4317 = vmatpush1.msra.mxu1 %v11266_v17  ;;  %v11284_v17 = vld [vmem:[#allocation19 + $0xd0] sm:$0xff] }
 0xb31   :  { %4318 = vmatprep.subr.mxu1 %v11269_v7  ;;  %13711 = vst [vmem:[#allocation123_spill] sm:$0xff] %v11284_v17  ;;  %v11287_v7 = vld [vmem:[#allocation19 + $0xa8] sm:$0xff] }
 0xb32   :  { %4319 = vmatpush1.msra.mxu1 %v11272_v28  ;;  %13712 = vst [vmem:[#allocation124_spill] sm:$0xff] %v11287_v7  ;;  %v11290_v28 = vld [vmem:[#allocation19 + $0xa0] sm:$0xff] }
 0xb33   :  { %4320 = vmatprep.subr.mxu1 %v11275_v24  ;;  %13713 = vst [vmem:[#allocation125_spill] sm:$0xff] %v11290_v28  ;;  %v11293_v24 = vld [vmem:[#allocation19 + $0x78] sm:$0xff] }
 0xb34   :  { %4321 = vmatpush1.msra.mxu1 %v11278_v48  ;;  %13714 = vst [vmem:[#allocation126_spill] sm:$0xff] %v11293_v24  ;;  %v11296_v48 = vld [vmem:[#allocation19 + $0x70] sm:$0xff] }
 0xb35   :  { %4322 = vmatprep.subr.mxu1 %v11281_v37  ;;  %13715 = vst [vmem:[#allocation127_spill] sm:$0xff] %v11296_v48  ;;  %v11299_v37 = vld [vmem:[#allocation19 + $0x48] sm:$0xff] }
 0xb36   :  { %4323 = vmatpush1.msra.mxu1 %v11284_v17  ;;  %13716 = vst [vmem:[#allocation128_spill] sm:$0xff] %v11299_v37  ;;  %v11302_v17 = vld [vmem:[#allocation19 + $0x40] sm:$0xff] }
 0xb37   :  { %4324 = vmatprep.subr.mxu1 %v11287_v7  ;;  %13717 = vst [vmem:[#allocation129_spill] sm:$0xff] %v11302_v17  ;;  %v11305_v7 = vld [vmem:[#allocation19 + $0x18] sm:$0xff] }
 0xb38   :  { %4325 = vmatpush1.msra.mxu1 %v11290_v28  ;;  %13718 = vst [vmem:[#allocation130_spill] sm:$0xff] %v11305_v7  ;;  %v11308_v28 = vld [vmem:[#allocation19 + $0x10] sm:$0xff] }
 0xb39   :  { %4326 = vmatprep.subr.mxu1 %v11293_v24  ;;  %13719 = vst [vmem:[#allocation131_spill] sm:$0xff] %v11308_v28  ;;  %v11311_v24 = vld [vmem:[#allocation22 + $0xf8] sm:$0xff] }
 0xb3a   :  { %4327 = vmatpush1.msra.mxu1 %v11296_v48  ;;  %13720 = vst [vmem:[#allocation132_spill] sm:$0xff] %v11311_v24 }
 0xb3b   :  { %4328 = vmatprep.subr.mxu1 %v11299_v37 }
 0xb3c   :  { %4329 = vmatpush1.msra.mxu1 %v11302_v17 }
 0xb3d   :  { %4330 = vmatprep.subr.mxu1 %v11305_v7 }
 0xb3e   :  { %4331 = vmatpush1.msra.mxu1 %v11308_v28 }
 0xb3f   :  { %7192 = vmatprep.subr.mxu1 %v11311_v24 }
 0xb9c   :  { %v7168_v48 = vpop.f32.mrf.mxu0 }
 0xb9e   :  { %v7169_v45 = vpop.f32.mrf.mxu0 }
 0xb9f   :  { %v7170_v51 = vadd.f32 %v7169_v45, %v7168_v48 }
 0xba0   :  { %v7171_v58 = vpop.f32.mrf.mxu0 }
 0xba1   :  { %v3962_v24 = vadd.f32 %v7170_v51, %v10699_v49  ;;  %v11340_v51 = vld [vmem:[#allocation22 + $0x78] sm:$0xff] }
 0xba2   :  { %v7172_v37 = vpop.f32.mrf.mxu0  ;;  %13725 = vst [vmem:[#allocation133_spill] sm:$0xff] %v11340_v51 }
 0xba3   :  { %v7173_v4 = vadd.f32 %v7172_v37, %v7171_v58 }
 0xba5   :  { %v3967_v7 = vadd.f32 %v7173_v4, %v10699_v49  ;;  %v13722_v4 = vld [vmem:[#allocation82_spill] sm:$0xff] }
 0xbbc   :  { %v4131_v54 = vpop.f32.mrf.mxu0 }
 0xbbd   :  { %v4132_v17 = vadd.f32 %v4131_v54, %v13568_v1 }
 0xbbe   :  { %v11315_v59 = vpop.f32.mrf.mxu0 }
 0xbbf   :  { %v4219_v47 = vadd.f32 %v4132_v17, %v13721_v19  ;;  %v7701_v28 = vpop.f32.mrf.mxu1  ;;  %v13724_v19 = vld [vmem:[#allocation144_spill] sm:$0xff]  ;;  %v13726_v17 = vld [vmem:[#allocation145_spill] sm:$0xff] }
 0xbc0   :  { %v11319_v35 = vadd.f32 %v7701_v28, %v3967_v7  ;;  %v4137_v5 = vpop.f32.mrf.mxu0  ;;  %v13728_v7 = vld [vmem:[#allocation147_spill] sm:$0xff]  ;;  %v13729_v28 = vld [vmem:[#allocation148_spill] sm:$0xff] }
 0xbc1   :  { %v11322_v31 = vmax.f32 %v4219_v47, 0.0  ;;  %v4138_v58 = vadd.f32 %v4137_v5, %v13568_v1  ;;  %v4036_v45 = vpop.f32.mrf.mxu1  ;;  %v13723_v47 = vld [vmem:[#allocation76_spill] sm:$0xff]  ;;  %v13807_v1 = vld [vmem:[#allocation115_spill] sm:$0xff] }
 0xbc2   :  { %v6905_v48 = vmul.f32 -1.442695, %v11319_v35  ;;  %v11326_v54 = vadd.f32 %v4036_v45, %v3962_v24  ;;  %v11351_v24 = vld [vmem:[#allocation22 + $0xf0] sm:$0xff] }
 0xbc3   :  { %4721 = vst [vmem:[#allocation25 + $0x20] sm:$0xff] %v11322_v31  ;;  %v4220_v37 = vadd.f32 %v4138_v58, %v13722_v4  ;;  %4288 = vmatmul.mubr.f32.vlgmr.msra.gmra.mxu0 %v11322_v31  ;;  %4365 = vmatmul.mubr.f32.vlgmr.msra.gmra.mxu1 %v11322_v31  ;;  %13730 = vst [vmem:[#allocation134_spill] sm:$0xff] %v11351_v24  ;;  %v13731_v58 = vld [vmem:[#allocation149_spill] sm:$0xff]  ;;  %v11355_v45 = vld [vmem:[#allocation22 + $0x70] sm:$0xff] }
 0xbc4   :  { %7930 = vpow2.f32 %v6905_v48  ;;  %v6904_v49 = vmul.f32 -1.442695, %v11326_v54  ;;  %4378 = vmatpush1.msra.mxu0 %v10719_v14  ;;  %4293 = vmatprep.mubr.f32.mxu0 %v13482_v44  ;;  %v13727_v14 = vld [vmem:[#allocation146_spill] sm:$0xff]  ;;  %13732 = vst [vmem:[#allocation135_spill] sm:$0xff] %v11355_v45 }
 0xbc5   :  { %v11335_v5 = vmax.f32 %v4220_v37, 0.0  ;;  %4379 = vmatprep.subr.mxu0 %v13723_v47  ;;  %4370 = vmatprep.mubr.f32.mxu1 %v13482_v44  ;;  %v13733_v48 = vld [vmem:[#allocation150_spill] sm:$0xff]  ;;  %v13735_v37 = vld [vmem:[#allocation151_spill] sm:$0xff]  ;;  %v13737_v47 = vld [vmem:[#allocation152_spill] sm:$0xff] }
 0xbc6   :  { %7932 = vpow2.f32 %v6904_v49  ;;  %4380 = vmatpush1.msra.mxu0 %v13724_v19  ;;  %7193 = vmatpush3.msra.mxu1 %v11340_v51  ;;  %v11359_v4 = vld [vmem:[#allocation22 + $0xe8] sm:$0xff]  ;;  %v11367_v19 = vld [vmem:[#allocation22 + $0xe0] sm:$0xff] }
 0xbc7   :  { %4722 = vst [vmem:[#allocation25 + $0x28] sm:$0xff] %v11335_v5  ;;  %4381 = vmatprep.subr.mxu0 %v13726_v17  ;;  %4294 = vmatmul.mubr.f32.gmra.mxu0 %v11335_v5  ;;  %13734 = vst [vmem:[#allocation136_spill] sm:$0xff] %v11359_v4  ;;  %v11363_v49 = vld [vmem:[#allocation22 + $0x68] sm:$0xff] }
 0xbc8   :  { %4371 = vmatmul.mubr.f32.gmra.mxu1 %v11335_v5  ;;  %4382 = vmatpush1.msra.mxu0 %v13727_v14  ;;  %13736 = vst [vmem:[#allocation137_spill] sm:$0xff] %v11363_v49  ;;  %13738 = vst [vmem:[#allocation138_spill] sm:$0xff] %v11367_v19  ;;  %v13739_v17 = vld [vmem:[#allocation153_spill] sm:$0xff] }
 0xbc9   :  { %4383 = vmatprep.subr.mxu0 %v13728_v7  ;;  %4441 = vmatprep.mubr.f32.mxu0 %v13482_v44  ;;  %v11371_v14 = vld [vmem:[#allocation22 + $0x60] sm:$0xff]  ;;  %v13741_v7 = vld [vmem:[#allocation154_spill] sm:$0xff] }
 0xbca   :  { %4384 = vmatpush1.msra.mxu0 %v13729_v28  ;;  %7194 = vmatprep.subr.mxu1 %v11351_v24  ;;  %13740 = vst [vmem:[#allocation139_spill] sm:$0xff] %v11371_v14  ;;  %v11375_v28 = vld [vmem:[#allocation22 + $0xd8] sm:$0xff] }
 0xbcb   :  { %4385 = vmatprep.subr.mxu0 %v13731_v58  ;;  %7195 = vmatpush3.msra.mxu1 %v11355_v45  ;;  %13742 = vst [vmem:[#allocation140_spill] sm:$0xff] %v11375_v28  ;;  %v13805_v45 = vld [vmem:[#allocation60_spill] sm:$0xff] }
 0xbcc   :  { %4386 = vmatpush1.msra.mxu0 %v13733_v48  ;;  %7196 = vmatprep.subr.mxu1 %v11359_v4  ;;  %v13743_v48 = vld [vmem:[#allocation88_spill] sm:$0xff]  ;;  %v11391_v4 = vld [vmem:[#allocation22 + $0xc8] sm:$0xff] }
 0xbcd   :  { %4387 = vmatprep.subr.mxu0 %v13735_v37  ;;  %7197 = vmatpush3.msra.mxu1 %v11363_v49  ;;  %v11379_v37 = vld [vmem:[#allocation22 + $0x58] sm:$0xff]  ;;  %v11387_v49 = vld [vmem:[#allocation22 + $0x50] sm:$0xff]  ;;  %13750 = vst [vmem:[#allocation83_spill] sm:$0xff] %v11391_v4 }
 0xbce   :  { %4388 = vmatpush1.msra.mxu0 %v13737_v47  ;;  %7198 = vmatprep.subr.mxu1 %v11367_v19  ;;  %13744 = vst [vmem:[#allocation141_spill] sm:$0xff] %v11379_v37  ;;  %v13745_v19 = vld [vmem:[#allocation89_spill] sm:$0xff]  ;;  %13748 = vst [vmem:[#allocation143_spill] sm:$0xff] %v11387_v49 }
 0xbcf   :  { %4389 = vmatprep.subr.mxu0 %v13739_v17  ;;  %7199 = vmatpush3.msra.mxu1 %v11371_v14  ;;  %v11383_v17 = vld [vmem:[#allocation22 + $0xd0] sm:$0xff] }
 0xbd0   :  { %4390 = vmatpush1.msra.mxu0 %v13741_v7  ;;  %7200 = vmatprep.subr.mxu1 %v11375_v28  ;;  %13746 = vst [vmem:[#allocation142_spill] sm:$0xff] %v11383_v17  ;;  %v13747_v7 = vld [vmem:[#allocation90_spill] sm:$0xff]  ;;  %v13749_v28 = vld [vmem:[#allocation91_spill] sm:$0xff] }
 0xbd1   :  { %v7931_v58 = vpop.eup %7930  ;;  %4391 = vmatprep.subr.mxu0 %v13743_v48  ;;  %7201 = vmatpush3.msra.mxu1 %v11379_v37 }
 0xbd2   :  { %v4052_v47 = vadd.f32 1.0, %v7931_v58  ;;  %4392 = vmatpush1.msra.mxu0 %v13745_v19  ;;  %7202 = vmatprep.subr.mxu1 %v11383_v17  ;;  %v13751_v19 = vld [vmem:[#allocation92_spill] sm:$0xff]  ;;  %v11395_v58 = vld [vmem:[#allocation22 + $0x48] sm:$0xff] }
 0xbd3   :  { %v7933_v14 = vpop.eup %7932  ;;  %4393 = vmatprep.subr.mxu0 %v13747_v7  ;;  %7203 = vmatpush3.msra.mxu1 %v11387_v49  ;;  %13752 = vst [vmem:[#allocation82_spill] sm:$0xff] %v11395_v58  ;;  %v13753_v7 = vld [vmem:[#allocation93_spill] sm:$0xff] }
 0xbd4   :  { %7934 = vrcp.f32 %v4052_v47  ;;  %v4051_v48 = vadd.f32 1.0, %v7933_v14  ;;  %4394 = vmatpush1.msra.mxu0 %v13749_v28  ;;  %7204 = vmatprep.subr.mxu1 %v11391_v4  ;;  %v11399_v17 = vld [vmem:[#allocation22 + $0xc0] sm:$0xff]  ;;  %v13755_v14 = vld [vmem:[#allocation94_spill] sm:$0xff]  ;;  %v13757_v47 = vld [vmem:[#allocation95_spill] sm:$0xff] }
 0xbd5   :  { %4395 = vmatprep.subr.mxu0 %v13751_v19  ;;  %7205 = vmatpush3.msra.mxu1 %v11395_v58  ;;  %13754 = vst [vmem:[#allocation76_spill] sm:$0xff] %v11399_v17  ;;  %v11403_v28 = vld [vmem:[#allocation22 + $0x40] sm:$0xff]  ;;  %v11407_v19 = vld [vmem:[#allocation22 + $0xb8] sm:$0xff] }
 0xbd6   :  { %7936 = vrcp.f32 %v4051_v48  ;;  %4396 = vmatpush1.msra.mxu0 %v13753_v7  ;;  %7206 = vmatprep.subr.mxu1 %v11399_v17  ;;  %13756 = vst [vmem:[#allocation144_spill] sm:$0xff] %v11403_v28  ;;  %13758 = vst [vmem:[#allocation145_spill] sm:$0xff] %v11407_v19  ;;  %v13759_v58 = vld [vmem:[#allocation96_spill] sm:$0xff]  ;;  %v13761_v7 = vld [vmem:[#allocation97_spill] sm:$0xff] }
 0xbd7   :  { %4397 = vmatprep.subr.mxu0 %v13755_v14  ;;  %7207 = vmatpush3.msra.mxu1 %v11403_v28  ;;  %v11411_v48 = vld [vmem:[#allocation22 + $0x38] sm:$0xff]  ;;  %v11415_v17 = vld [vmem:[#allocation22 + $0xb0] sm:$0xff]  ;;  %v13778_v4 = vld [vmem:[#allocation105_spill] sm:$0xff] }
 0xbd8   :  { %4398 = vmatpush1.msra.mxu0 %v13757_v47  ;;  %7208 = vmatprep.subr.mxu1 %v11407_v19  ;;  %13760 = vst [vmem:[#allocation146_spill] sm:$0xff] %v11411_v48  ;;  %13762 = vst [vmem:[#allocation147_spill] sm:$0xff] %v11415_v17  ;;  %v13763_v14 = vld [vmem:[#allocation98_spill] sm:$0xff]  ;;  %v13765_v47 = vld [vmem:[#allocation99_spill] sm:$0xff] }
 0xbd9   :  { %4399 = vmatprep.subr.mxu0 %v13759_v58  ;;  %7209 = vmatpush3.msra.mxu1 %v11411_v48  ;;  %v11419_v28 = vld [vmem:[#allocation22 + $0x30] sm:$0xff]  ;;  %v11423_v19 = vld [vmem:[#allocation22 + $0xa8] sm:$0xff]  ;;  %v13767_v58 = vld [vmem:[#allocation100_spill] sm:$0xff] }
 0xbda   :  { %4400 = vmatpush1.msra.mxu0 %v13761_v7  ;;  %7210 = vmatprep.subr.mxu1 %v11415_v17  ;;  %13764 = vst [vmem:[#allocation148_spill] sm:$0xff] %v11419_v28  ;;  %13766 = vst [vmem:[#allocation149_spill] sm:$0xff] %v11423_v19  ;;  %v11427_v48 = vld [vmem:[#allocation22 + $0x28] sm:$0xff]  ;;  %v11431_v17 = vld [vmem:[#allocation22 + $0xa0] sm:$0xff] }
 0xbdb   :  { %4401 = vmatprep.subr.mxu0 %v13763_v14  ;;  %7211 = vmatpush3.msra.mxu1 %v11419_v28  ;;  %13768 = vst [vmem:[#allocation150_spill] sm:$0xff] %v11427_v48  ;;  %v13769_v7 = vld [vmem:[#allocation101_spill] sm:$0xff]  ;;  %13770 = vst [vmem:[#allocation151_spill] sm:$0xff] %v11431_v17  ;;  %v13771_v14 = vld [vmem:[#allocation102_spill] sm:$0xff] }
 0xbdc   :  { %4402 = vmatpush1.msra.mxu0 %v13765_v47  ;;  %7212 = vmatprep.subr.mxu1 %v11423_v19  ;;  %v11435_v28 = vld [vmem:[#allocation22 + $0x20] sm:$0xff]  ;;  %v13773_v47 = vld [vmem:[#allocation103_spill] sm:$0xff] }
 0xbdd   :  { %4403 = vmatprep.subr.mxu0 %v13767_v58  ;;  %7213 = vmatpush3.msra.mxu1 %v11427_v48  ;;  %13772 = vst [vmem:[#allocation152_spill] sm:$0xff] %v11435_v28  ;;  %v11439_v19 = vld [vmem:[#allocation22 + $0x98] sm:$0xff] }
 0xbde   :  { %4404 = vmatpush1.msra.mxu0 %v13769_v7  ;;  %7214 = vmatprep.subr.mxu1 %v11431_v17  ;;  %13774 = vst [vmem:[#allocation153_spill] sm:$0xff] %v11439_v19  ;;  %v13775_v48 = vld [vmem:[#allocation104_spill] sm:$0xff] }
 0xbdf   :  { %4405 = vmatprep.subr.mxu0 %v13771_v14  ;;  %7215 = vmatpush3.msra.mxu1 %v11435_v28  ;;  %v11443_v7 = vld [vmem:[#allocation22 + $0x18] sm:$0xff]  ;;  %v11450_v28 = vld [vmem:[#allocation22 + $0x90] sm:$0xff] }
 0xbe0   :  { %4406 = vmatpush1.msra.mxu0 %v13773_v47  ;;  %7216 = vmatprep.subr.mxu1 %v11439_v19  ;;  %13776 = vst [vmem:[#allocation154_spill] sm:$0xff] %v11443_v7  ;;  %13779 = vst [vmem:[#allocation88_spill] sm:$0xff] %v11450_v28  ;;  %v11454_v19 = vld [vmem:[#allocation22 + $0x10] sm:$0xff] }
 0xbe1   :  { %v7935_v58 = vpop.eup %7934  ;;  %4407 = vmatprep.subr.mxu0 %v13775_v48  ;;  %7217 = vmatpush3.msra.mxu1 %v11443_v7  ;;  %13780 = vst [vmem:[#allocation89_spill] sm:$0xff] %v11454_v19 }
 0xbe2   :  { %v4058_v14 = vsel %vm10711_vm7, %v7935_v58, %v11319_v35  ;;  %4408 = vmatpush1.msra.mxu0 %v13778_v4  ;;  %7218 = vmatprep.subr.mxu1 %v11450_v28  ;;  %v11461_v35 = vld [vmem:[#allocation22 + $0x88] sm:$0xff]  ;;  %v11468_v58 = vld [vmem:[#allocation22 + $0x80] sm:$0xff] }
 0xbe3   :  { %v7937_v47 = vpop.eup %7936  ;;  %4064 = vst [vmem:[#allocation26 + $0x18] sm:$0xff] %v4058_v14  ;;  %4442 = vmatmul.mubr.f32.vlgmr.msra.gmra.mxu0 %v11322_v31  ;;  %7219 = vmatpush3.msra.mxu1 %v11454_v19  ;;  %13781 = vst [vmem:[#allocation90_spill] sm:$0xff] %v11461_v35  ;;  %v11464_v4 = vld [vmem:[#allocation22 + $0x8] sm:$0xff]  ;;  %v13804_v19 = vld [vmem:[#allocation59_spill] sm:$0xff] }
 0xbe4   :  { %v4057_v48 = vsel %vm10711_vm7, %v7937_v47, %v11326_v54  ;;  %4447 = vmatprep.mubr.f32.mxu0 %v13482_v44  ;;  %7220 = vmatprep.subr.mxu1 %v11461_v35  ;;  %13782 = vst [vmem:[#allocation91_spill] sm:$0xff] %v11464_v4  ;;  %v13783_v31 = vld [vmem:[#allocation106_spill] sm:$0xff]  ;;  %13784 = vst [vmem:[#allocation92_spill] sm:$0xff] %v11468_v58  ;;  %v11473_v54 = vld [vmem:[#allocation22] sm:$0xff] }
 0xbe5   :  { %4063 = vst [vmem:[#allocation26 + $0x10] sm:$0xff] %v4057_v48  ;;  %7221 = vmatpush3.msra.mxu1 %v11464_v4  ;;  %7702 = vmatprep.subr.mxu0 %v13783_v31  ;;  %13785 = vst [vmem:[#allocation93_spill] sm:$0xff] %v11473_v54  ;;  %v11479_v14 = vld [vmem:[%s13030_s13 + $0x1e8] sm:$0xff]  ;;  %v13787_v47 = vld [vmem:[#allocation107_spill] sm:$0xff] }
 0xbe6   :  { %7222 = vmatprep.subr.mxu1 %v11468_v58  ;;  %7703 = vmatpush3.msra.mxu0 %v13783_v31  ;;  %13786 = vst [vmem:[#allocation94_spill] sm:$0xff] %v11479_v14  ;;  %v13788_v48 = vld [vmem:[#allocation108_spill] sm:$0xff]  ;;  %v13790_v31 = vld [vmem:[#allocation110_spill] sm:$0xff]  ;;  %v4139_v58 = vpop.f32.mrf.mxu0 }
 0xbe7   :  { %4448 = vmatmul.mubr.f32.gmra.mxu0 %v11335_v5  ;;  %7223 = vmatpush3.msra.mxu1 %v11473_v54  ;;  %v13789_v5 = vld [vmem:[#allocation109_spill] sm:$0xff]  ;;  %v13791_v54 = vld [vmem:[#allocation111_spill] sm:$0xff]  ;;  %v13803_v35 = vld [vmem:[#allocation78_spill] sm:$0xff] }
 0xbe8   :  { %4726 = vmatprep.subr.mxu1 %v11479_v14  ;;  %7704 = vmatprep.subr.mxu0 %v13787_v47  ;;  %v13792_v14 = vld [vmem:[#allocation112_spill] sm:$0xff] }
 0xbe9   :  { %7705 = vmatpush3.msra.mxu0 %v13787_v47  ;;  %v13793_v47 = vld [vmem:[#allocation155_spill] sm:$0xff] }
 0xbea   :  { %7706 = vmatprep.subr.mxu0 %v13788_v48 }
 0xbeb   :  { %7707 = vmatpush3.msra.mxu0 %v13788_v48  ;;  %v13794_v48 = vld [vmem:[#allocation156_spill] sm:$0xff] }
 0xbec   :  { %7708 = vmatprep.subr.mxu0 %v13789_v5 }
 0xbed   :  { %7709 = vmatpush3.msra.mxu0 %v13789_v5  ;;  %v13795_v5 = vld [vmem:[#allocation157_spill] sm:$0xff] }
 0xbee   :  { %7710 = vmatprep.subr.mxu0 %v13790_v31 }
 0xbef   :  { %7711 = vmatpush3.msra.mxu0 %v13790_v31  ;;  %v13796_v31 = vld [vmem:[#allocation158_spill] sm:$0xff] }
 0xbf0   :  { %7712 = vmatprep.subr.mxu0 %v13791_v54 }
 0xbf1   :  { %7713 = vmatpush3.msra.mxu0 %v13791_v54  ;;  %v13797_v54 = vld [vmem:[#allocation159_spill] sm:$0xff] }
 0xbf2   :  { %7714 = vmatprep.subr.mxu0 %v13792_v14 }
 0xbf3   :  { %7715 = vmatpush3.msra.mxu0 %v13792_v14  ;;  %v13798_v14 = vld [vmem:[#allocation160_spill] sm:$0xff] }
 0xbf4   :  { %7716 = vmatprep.subr.mxu0 %v13793_v47 }
 0xbf5   :  { %7717 = vmatpush3.msra.mxu0 %v13793_v47  ;;  %v13799_v47 = vld [vmem:[#allocation161_spill] sm:$0xff] }
 0xbf6   :  { %7718 = vmatprep.subr.mxu0 %v13794_v48 }
 0xbf7   :  { %7719 = vmatpush3.msra.mxu0 %v13794_v48  ;;  %v13800_v48 = vld [vmem:[#allocation162_spill] sm:$0xff] }
 0xbf8   :  { %7720 = vmatprep.subr.mxu0 %v13795_v5 }
 0xbf9   :  { %7721 = vmatpush3.msra.mxu0 %v13795_v5  ;;  %v13801_v5 = vld [vmem:[#allocation163_spill] sm:$0xff] }
 0xbfa   :  { %7722 = vmatprep.subr.mxu0 %v13796_v31 }
 0xbfb   :  { %7723 = vmatpush3.msra.mxu0 %v13796_v31  ;;  %v13802_v31 = vld [vmem:[#allocation164_spill] sm:$0xff] }
 0xbfc   :  { %7724 = vmatprep.subr.mxu0 %v13797_v54 }
 0xbfd   :  { %7725 = vmatpush3.msra.mxu0 %v13797_v54  ;;  %v4208_v54 = vpop.f32.mrf.mxu1 }
 0xbfe   :  { %7726 = vmatprep.subr.mxu0 %v13798_v14  ;;  %v4209_v12 = vadd.f32 %v4208_v54, %v13807_v1 }
 0xbff   :  { %7727 = vmatpush3.msra.mxu0 %v13798_v14  ;;  %v4134_v14 = vadd.f32 %v11315_v59, %v13803_v35  ;;  %v13808_v59 = vld [vmem:[#allocation62_spill] sm:$0xff] }
 0xc00   :  { %7728 = vmatprep.subr.mxu0 %v13799_v47 }
 0xc01   :  { %7729 = vmatpush3.msra.mxu0 %v13799_v47  ;;  %v4210_v47 = vpop.f32.mrf.mxu1 }
 0xc02   :  { %7730 = vmatprep.subr.mxu0 %v13800_v48 }
 0xc03   :  { %7731 = vmatpush3.msra.mxu0 %v13800_v48  ;;  %v4140_v48 = vadd.f32 %v4139_v58, %v13803_v35  ;;  %v4214_v10 = vpop.f32.mrf.mxu1 }
 0xc04   :  { %7732 = vmatprep.subr.mxu0 %v13801_v5 }
 0xc05   :  { %7733 = vmatpush3.msra.mxu0 %v13801_v5  ;;  %v13806_v5 = vld [vmem:[#allocation61_spill] sm:$0xff] }
 0xc06   :  { %4803 = vmatprep.subr.mxu0 %v13802_v31 }
 0xc83   :  { %v4289_v4 = vpop.f32.mrf.mxu0 }
 0xc84   :  { %v4454_v28 = vadd.f32 %v4289_v4, %v13804_v19 }
 0xc85   :  { %v4291_v17 = vpop.f32.mrf.mxu0 }
 0xc86   :  { %v4460_v7 = vadd.f32 %v4454_v28, %v4134_v14  ;;  %v4455_v24 = vadd.f32 %v4291_v17, %v13805_v45  ;;  %v4215_v28 = vadd.f32 %v4214_v10, %v13807_v1  ;;  %v4216_v45 = vpop.f32.mrf.mxu1 }
 0xc87   :  { %v4295_v49 = vpop.f32.mrf.mxu0 }
 0xc88   :  { %v6906_v37 = vmul.f32 -1.442695, %v4460_v7  ;;  %v4457_v51 = vadd.f32 %v4295_v49, %v13806_v5  ;;  %v4474_v19 = vadd.f32 %v4455_v24, %v4209_v12  ;;  %v4366_v5 = vpop.f32.mrf.mxu1 }
 0xc89   :  { %v4297_v31 = vpop.f32.mrf.mxu0 }
 0xc8a   :  { %7938 = vpow2.f32 %v6906_v37  ;;  %v4461_v15 = vadd.f32 %v4457_v51, %v4140_v48  ;;  %v4458_v39 = vadd.f32 %v4297_v31, %v13808_v59  ;;  %v6908_v58 = vmul.f32 -1.442695, %v4474_v19  ;;  %v4368_v37 = vpop.f32.mrf.mxu1 }
 0xc8c   :  { %v6907_v4 = vmul.f32 -1.442695, %v4461_v15  ;;  %v4475_v14 = vadd.f32 %v4458_v39, %v4215_v28  ;;  %v4372_v48 = vpop.f32.mrf.mxu1  ;;  %v4502_v15 = vadd.f32 %v4368_v37, %v10360_v9 }
 0xc8e   :  { %7940 = vpow2.f32 %v6907_v4  ;;  %v6909_v7 = vmul.f32 -1.442695, %v4475_v14  ;;  %v4374_v31 = vpop.f32.mrf.mxu1  ;;  %v4211_v4 = vadd.f32 %v4210_v47, %v10353_v0 }
 0xc8f   :  { %7942 = vpow2.f32 %v6908_v58 }
 0xc90   :  { %7944 = vpow2.f32 %v6909_v7  ;;  %v13809_v7 = vld [vmem:[#allocation46_spill] sm:$0xff] }
 0xc97   :  { %v7939_v17 = vpop.eup %7938 }
 0xc98   :  { %v4468_v49 = vadd.f32 1.0, %v7939_v17  ;;  %v4456_v17 = vadd.f32 %v4366_v5, %v13809_v7  ;;  %v11566_v7 = vld [vmem:[%s13030_s13 + $0x188] sm:$0xff] }
 0xc9a   :  { %7946 = vrcp.f32 %v4468_v49  ;;  %v4508_v49 = vmax.f32 %v4502_v15, 0.0  ;;  %v11534_v15 = vld [vmem:[%s13030_s13 + $0x1e0] sm:$0xff] }
 0xc9b   :  { %v7941_v54 = vpop.eup %7940 }
 0xc9c   :  { %v4469_v51 = vadd.f32 1.0, %v7941_v54  ;;  %v7943_v12 = vpop.eup %7942 }
 0xc9d   :  { %v7945_v24 = vpop.eup %7944  ;;  %v4482_v39 = vadd.f32 1.0, %v7943_v12 }
 0xc9e   :  { %7948 = vrcp.f32 %v4469_v51  ;;  %v4483_v54 = vadd.f32 1.0, %v7945_v24  ;;  %v4505_v51 = vadd.f32 %v4374_v31, %v10360_v9 }
 0xc9f   :  { %7950 = vrcp.f32 %v4482_v39 }
 0xca0   :  { %v4511_v39 = vmax.f32 %v4505_v51, 0.0  ;;  %v11590_v51 = vld [vmem:[%s13030_s13 + $0x148] sm:$0xff] }
 0xca3   :  { %v4443_v10 = vpop.f32.mrf.mxu0 }
 0xca4   :  { %v4503_v59 = vadd.f32 %v4443_v10, %v10215_v8  ;;  %v4217_v10 = vadd.f32 %v4216_v45, %v10353_v0  ;;  %v11540_v45 = vld [vmem:[%s13030_s13 + $0x1c8] sm:$0xff] }
 0xca5   :  { %v4445_v19 = vpop.f32.mrf.mxu0 }
 0xca6   :  { %v4509_v28 = vmax.f32 %v4503_v59, 0.0  ;;  %v4504_v14 = vadd.f32 %v4445_v19, %v13653_v3 }
 0xca7   :  { %v7947_v58 = vpop.eup %7946  ;;  %v4449_v37 = vpop.f32.mrf.mxu0 }
 0xca8   :  { %v4488_v1 = vmul.f32 %v7947_v58, %v4211_v4  ;;  %v6912_v12 = vmul.f32 -1.442695, %v4504_v14  ;;  %v4506_v35 = vadd.f32 %v4449_v37, %v10215_v8  ;;  %4620 = vmatprep.mubr.f32.mxu1 %v4509_v28  ;;  %v11547_v28 = vld [vmem:[%s13030_s13 + $0x1c0] sm:$0xff]  ;;  %v11553_v14 = vld [vmem:[%s13030_s13 + $0x1a8] sm:$0xff] }
 0xca9   :  { %v4451_v47 = vpop.f32.mrf.mxu0  ;;  %4621 = vmatmul.mubr.f32.vlgmr.msra.gmra.mxu1 %v4508_v49  ;;  %v11578_v49 = vld [vmem:[%s13030_s13 + $0x168] sm:$0xff]  ;;  %v11596_v37 = vld [vmem:[%s13030_s13 + $0x140] sm:$0xff] }
 0xcaa   :  { %v4490_v59 = vadd.f32 %v4488_v1, %v4456_v17  ;;  %7952 = vpow2.f32 %v6912_v12  ;;  %v4512_v19 = vmax.f32 %v4506_v35, 0.0  ;;  %v4507_v5 = vadd.f32 %v4451_v47, %v13653_v3  ;;  %4727 = vmatpush1.msra.mxu1 %v11534_v15  ;;  %v13810_v1 = vld [vmem:[#allocation45_spill] sm:$0xff]  ;;  %v11572_v17 = vld [vmem:[%s13030_s13 + $0x180] sm:$0xff] }
 0xcab   :  { %v7949_v24 = vpop.eup %7948  ;;  %7954 = vrcp.f32 %v4483_v54  ;;  %4728 = vmatprep.subr.mxu1 %v11540_v45  ;;  %v4459_v35 = vadd.f32 %v4372_v48, %v13810_v1  ;;  %v11559_v48 = vld [vmem:[%s13030_s13 + $0x1a0] sm:$0xff] }
 0xcac   :  { %7956 = vtanh.f32 %v4490_v59  ;;  %v4489_v31 = vmul.f32 %v7949_v24, %v4217_v10  ;;  %v6915_v4 = vmul.f32 -1.442695, %v4507_v5  ;;  %4729 = vmatpush1.msra.mxu1 %v11547_v28  ;;  %4625 = vmatprep.mubr.f32.mxu1 %v4512_v19  ;;  %v11584_v54 = vld [vmem:[%s13030_s13 + $0x160] sm:$0xff]  ;;  %v7951_v12 = vpop.eup %7950  ;;  %v11602_v10 = vld [vmem:[%s13030_s13 + $0x128] sm:$0xff] }
 0xcad   :  { %4730 = vmatprep.subr.mxu1 %v11553_v14  ;;  %4626 = vmatmul.mubr.f32.gmra.mxu1 %v4511_v39  ;;  %v11608_v47 = vld [vmem:[%s13030_s13 + $0x120] sm:$0xff]  ;;  %v11614_v19 = vld [vmem:[%s13030_s13 + $0x108] sm:$0xff]  ;;  %v4494_v1 = vsub.f32 1.0, %v7951_v12 }
 0xcae   :  { %v4491_v58 = vadd.f32 %v4489_v31, %v4459_v35  ;;  %7958 = vpow2.f32 %v6915_v4  ;;  %4731 = vmatpush1.msra.mxu1 %v11559_v48  ;;  %4790 = vmatprep.mubr.f32.mxu1 %v13482_v44  ;;  %13811 = vst [vmem:[#allocation95_spill] sm:$0xff] %v11614_v19  ;;  %v11620_v39 = vld [vmem:[%s13030_s13 + $0x100] sm:$0xff]  ;;  %v11626_v31 = vld [vmem:[%s13030_s13 + $0xe8] sm:$0xff] }
 0xcaf   :  { %4732 = vmatprep.subr.mxu1 %v11566_v7  ;;  %13812 = vst [vmem:[#allocation96_spill] sm:$0xff] %v11620_v39  ;;  %13813 = vst [vmem:[#allocation97_spill] sm:$0xff] %v11626_v31  ;;  %v11632_v4 = vld [vmem:[%s13030_s13 + $0xe0] sm:$0xff] }
 0xcb0   :  { %7960 = vtanh.f32 %v4491_v58  ;;  %4733 = vmatpush1.msra.mxu1 %v11572_v17  ;;  %13814 = vst [vmem:[#allocation98_spill] sm:$0xff] %v11632_v4 }
 0xcb1   :  { %4734 = vmatprep.subr.mxu1 %v11578_v49 }
 0xcb2   :  { %4735 = vmatpush1.msra.mxu1 %v11584_v54 }
 0xcb3   :  { %4736 = vmatprep.subr.mxu1 %v11590_v51 }
 0xcb4   :  { %4737 = vmatpush1.msra.mxu1 %v11596_v37 }
 0xcb5   :  { %4738 = vmatprep.subr.mxu1 %v11602_v10 }
 0xcb6   :  { %4739 = vmatpush1.msra.mxu1 %v11608_v47 }
 0xcb7   :  { %v7953_v59 = vpop.eup %7952  ;;  %4740 = vmatprep.subr.mxu1 %v11614_v19  ;;  %v11639_v19 = vld [vmem:[%s13030_s13 + $0xc8] sm:$0xff] }
 0xcb8   :  { %v7955_v5 = vpop.eup %7954  ;;  %v4534_v24 = vadd.f32 1.0, %v7953_v59  ;;  %4741 = vmatpush1.msra.mxu1 %v11620_v39  ;;  %v4498_v59 = vmul.f32 %v7951_v12, %v10970_v21  ;;  %v11653_v12 = vld [vmem:[%s13030_s13 + $0xa8] sm:$0xff] }
 0xcb9   :  { %v7957_v35 = vpop.eup %7956  ;;  %4742 = vmatprep.subr.mxu1 %v11626_v31  ;;  %13815 = vst [vmem:[#allocation99_spill] sm:$0xff] %v11653_v12 }
 0xcba   :  { %7962 = vrcp.f32 %v4534_v24  ;;  %4743 = vmatpush1.msra.mxu1 %v11632_v4  ;;  %v4496_v58 = vmul.f32 %v7957_v35, %v4494_v1  ;;  %v11645_v24 = vld [vmem:[%s13030_s13 + $0xc0] sm:$0xff]  ;;  %v4495_v1 = vsub.f32 1.0, %v7955_v5 }
 0xcbb   :  { %v7959_v39 = vpop.eup %7958  ;;  %4744 = vmatprep.subr.mxu1 %v11639_v19 }
 0xcbc   :  { %v4537_v31 = vadd.f32 1.0, %v7959_v39  ;;  %4745 = vmatpush1.msra.mxu1 %v11645_v24  ;;  %v11648_v4 = vadd.f32 %v4498_v59, %v4496_v58  ;;  %v11659_v39 = vld [vmem:[%s13030_s13 + $0xa0] sm:$0xff]  ;;  %v4499_v58 = vmul.f32 %v7955_v5, %v10977_v25  ;;  %v11666_v59 = vld [vmem:[%s13030_s13 + $0x88] sm:$0xff] }
 0xcbd   :  { %v7961_v21 = vpop.eup %7960  ;;  %4746 = vmatprep.subr.mxu1 %v11653_v12  ;;  %v11680_v25 = vld [vmem:[%s13030_s13 + $0x68] sm:$0xff]  ;;  %v11686_v5 = vld [vmem:[%s13030_s13 + $0x60] sm:$0xff] }
 0xcbe   :  { %7964 = vrcp.f32 %v4537_v31  ;;  %4747 = vmatpush1.msra.mxu1 %v11659_v39  ;;  %v4497_v35 = vmul.f32 %v7961_v21, %v4495_v1  ;;  %v11672_v31 = vld [vmem:[%s13030_s13 + $0x80] sm:$0xff]  ;;  %13816 = vst [vmem:[#allocation100_spill] sm:$0xff] %v11680_v25  ;;  %13817 = vst [vmem:[#allocation101_spill] sm:$0xff] %v11686_v5  ;;  %v11692_v1 = vld [vmem:[%s13030_s13 + $0x48] sm:$0xff] }
 0xcbf   :  { %4748 = vmatprep.subr.mxu1 %v11666_v59  ;;  %13818 = vst [vmem:[#allocation102_spill] sm:$0xff] %v11692_v1  ;;  %v11698_v21 = vld [vmem:[%s13030_s13 + $0x40] sm:$0xff] }
 0xcc0   :  { %4749 = vmatpush1.msra.mxu1 %v11672_v31  ;;  %v11675_v12 = vadd.f32 %v4499_v58, %v4497_v35  ;;  %13819 = vst [vmem:[#allocation103_spill] sm:$0xff] %v11698_v21  ;;  %v11704_v35 = vld [vmem:[%s13030_s13 + $0x28] sm:$0xff]  ;;  %v11710_v58 = vld [vmem:[%s13030_s13 + $0x20] sm:$0xff] }
 0xcc1   :  { %4750 = vmatprep.subr.mxu1 %v11680_v25  ;;  %13820 = vst [vmem:[#allocation104_spill] sm:$0xff] %v11704_v35  ;;  %13821 = vst [vmem:[#allocation105_spill] sm:$0xff] %v11710_v58  ;;  %v11733_v25 = vld [vmem:[#allocation19 + $0x2a8] sm:$0xff] }
 0xcc2   :  { %4751 = vmatpush1.msra.mxu1 %v11686_v5  ;;  %v11716_v5 = vld [vmem:[%s13030_s13 + $0x8] sm:$0xff] }
 0xcc3   :  { %4752 = vmatprep.subr.mxu1 %v11692_v1  ;;  %13822 = vst [vmem:[#allocation106_spill] sm:$0xff] %v11716_v5 }
 0xcc4   :  { %4753 = vmatpush1.msra.mxu1 %v11698_v21  ;;  %v11722_v21 = vld [vmem:[%s13030_s13] sm:$0xff] }
 0xcc5   :  { %4754 = vmatprep.subr.mxu1 %v11704_v35  ;;  %13823 = vst [vmem:[#allocation107_spill] sm:$0xff] %v11722_v21  ;;  %v11726_v35 = vld [vmem:[#allocation19 + $0x2d8] sm:$0xff] }
 0xcc6   :  { %4755 = vmatpush1.msra.mxu1 %v11710_v58  ;;  %v11730_v58 = vld [vmem:[#allocation19 + $0x2d0] sm:$0xff] }
 0xcc7   :  { %v7963_v1 = vpop.eup %7962  ;;  %4756 = vmatprep.subr.mxu1 %v11716_v5 }
 0xcc8   :  { %4757 = vmatpush1.msra.mxu1 %v11722_v21  ;;  %7734 = vmatprep.mubr.f32.mxu0 %v7963_v1  ;;  %v11736_v21 = vld [vmem:[#allocation19 + $0x2a0] sm:$0xff]  ;;  %v11744_v1 = vld [vmem:[#allocation19 + $0x278] sm:$0xff] }
 0xcc9   :  { %4791 = vmatmul.mubr.f32.vlgmr.msra.gmra.mxu1 %v11648_v4  ;;  %4884 = vmatprep.subr.mxu1 %v11726_v35  ;;  %13824 = vst [vmem:[#allocation108_spill] sm:$0xff] %v11736_v21 }
 0xcca   :  { %4796 = vmatprep.mubr.f32.mxu1 %v13482_v44  ;;  %4885 = vmatpush1.msra.mxu1 %v11730_v58 }
 0xccb   :  { %v7965_v5 = vpop.eup %7964  ;;  %4886 = vmatprep.subr.mxu1 %v11733_v25 }
 0xccc   :  { %7735 = vmatmul.mubr.f32.vlgmr.msra.gmra.mxu0 %v7965_v5  ;;  %4887 = vmatpush1.msra.mxu1 %v11736_v21  ;;  %v11748_v5 = vld [vmem:[#allocation19 + $0x270] sm:$0xff]  ;;  %v11752_v21 = vld [vmem:[#allocation19 + $0x248] sm:$0xff] }
 0xccd   :  { %4797 = vmatmul.mubr.f32.gmra.mxu1 %v11675_v12  ;;  %4804 = vmatpush1.msra.mxu0 %v10997_v30  ;;  %v11756_v30 = vld [vmem:[#allocation19 + $0x240] sm:$0xff] }
 0xcce   :  { %4805 = vmatprep.subr.mxu0 %v11003_v22  ;;  %4867 = vmatprep.mubr.f32.mxu0 %v13482_v44  ;;  %v11760_v22 = vld [vmem:[#allocation19 + $0x218] sm:$0xff] }
 0xccf   :  { %4806 = vmatpush1.msra.mxu0 %v11010_v23  ;;  %4888 = vmatprep.subr.mxu1 %v11744_v1  ;;  %v11764_v23 = vld [vmem:[#allocation19 + $0x210] sm:$0xff] }
 0xcd0   :  { %4807 = vmatprep.subr.mxu0 %v11017_v27  ;;  %4889 = vmatpush1.msra.mxu1 %v11748_v5  ;;  %v11768_v27 = vld [vmem:[#allocation19 + $0x1e8] sm:$0xff] }
 0xcd1   :  { %4808 = vmatpush1.msra.mxu0 %v11024_v36  ;;  %4890 = vmatprep.subr.mxu1 %v11752_v21  ;;  %v11772_v36 = vld [vmem:[#allocation19 + $0x1e0] sm:$0xff] }
 0xcd2   :  { %4809 = vmatprep.subr.mxu0 %v11031_v42  ;;  %4891 = vmatpush1.msra.mxu1 %v11756_v30  ;;  %v11776_v42 = vld [vmem:[#allocation19 + $0x1b8] sm:$0xff] }
 0xcd3   :  { %4810 = vmatpush1.msra.mxu0 %v11038_v52  ;;  %4892 = vmatprep.subr.mxu1 %v11760_v22  ;;  %v11780_v52 = vld [vmem:[#allocation19 + $0x1b0] sm:$0xff] }
 0xcd4   :  { %4811 = vmatprep.subr.mxu0 %v11045_v55  ;;  %4893 = vmatpush1.msra.mxu1 %v11764_v23  ;;  %v11784_v55 = vld [vmem:[#allocation19 + $0x188] sm:$0xff] }
 0xcd5   :  { %4812 = vmatpush1.msra.mxu0 %v11052_v18  ;;  %4894 = vmatprep.subr.mxu1 %v11768_v27  ;;  %v11788_v18 = vld [vmem:[#allocation19 + $0x180] sm:$0xff] }
 0xcd6   :  { %4813 = vmatprep.subr.mxu0 %v11059_v62  ;;  %4895 = vmatpush1.msra.mxu1 %v11772_v36  ;;  %v11792_v62 = vld [vmem:[#allocation19 + $0x158] sm:$0xff] }
 0xcd7   :  { %4814 = vmatpush1.msra.mxu0 %v11066_v33  ;;  %4896 = vmatprep.subr.mxu1 %v11776_v42  ;;  %13825 = vst [vmem:[#allocation109_spill] sm:$0xff] %v11792_v62  ;;  %v11796_v33 = vld [vmem:[#allocation19 + $0x150] sm:$0xff] }
 0xcd8   :  { %4815 = vmatprep.subr.mxu0 %v11073_v32  ;;  %4897 = vmatpush1.msra.mxu1 %v11780_v52  ;;  %13826 = vst [vmem:[#allocation110_spill] sm:$0xff] %v11796_v33  ;;  %v11800_v32 = vld [vmem:[#allocation19 + $0x128] sm:$0xff] }
 0xcd9   :  { %4816 = vmatpush1.msra.mxu0 %v11080_v11  ;;  %4898 = vmatprep.subr.mxu1 %v11784_v55  ;;  %13827 = vst [vmem:[#allocation111_spill] sm:$0xff] %v11800_v32  ;;  %v11804_v11 = vld [vmem:[#allocation19 + $0x120] sm:$0xff] }
 0xcda   :  { %4817 = vmatprep.subr.mxu0 %v11087_v26  ;;  %4899 = vmatpush1.msra.mxu1 %v11788_v18  ;;  %13828 = vst [vmem:[#allocation112_spill] sm:$0xff] %v11804_v11  ;;  %v11808_v26 = vld [vmem:[#allocation19 + $0xf8] sm:$0xff] }
 0xcdb   :  { %4818 = vmatpush1.msra.mxu0 %v11094_v50  ;;  %4900 = vmatprep.subr.mxu1 %v11792_v62  ;;  %13829 = vst [vmem:[#allocation155_spill] sm:$0xff] %v11808_v26  ;;  %v11812_v50 = vld [vmem:[#allocation19 + $0xf0] sm:$0xff] }
 0xcdc   :  { %4819 = vmatprep.subr.mxu0 %v11101_v63  ;;  %4901 = vmatpush1.msra.mxu1 %v11796_v33  ;;  %13830 = vst [vmem:[#allocation156_spill] sm:$0xff] %v11812_v50  ;;  %v11816_v63 = vld [vmem:[#allocation19 + $0xc8] sm:$0xff] }
 0xcdd   :  { %4820 = vmatpush1.msra.mxu0 %v11108_v16  ;;  %4902 = vmatprep.subr.mxu1 %v11800_v32  ;;  %13831 = vst [vmem:[#allocation157_spill] sm:$0xff] %v11816_v63  ;;  %v11820_v16 = vld [vmem:[#allocation19 + $0xc0] sm:$0xff] }
 0xcde   :  { %4821 = vmatprep.subr.mxu0 %v11115_v61  ;;  %4903 = vmatpush1.msra.mxu1 %v11804_v11  ;;  %13832 = vst [vmem:[#allocation158_spill] sm:$0xff] %v11820_v16  ;;  %v11824_v61 = vld [vmem:[#allocation19 + $0x98] sm:$0xff] }
 0xcdf   :  { %4822 = vmatpush1.msra.mxu0 %v11122_v57  ;;  %4904 = vmatprep.subr.mxu1 %v11808_v26  ;;  %13833 = vst [vmem:[#allocation159_spill] sm:$0xff] %v11824_v61  ;;  %v11828_v57 = vld [vmem:[#allocation19 + $0x90] sm:$0xff] }
 0xce0   :  { %4823 = vmatprep.subr.mxu0 %v11129_v34  ;;  %4905 = vmatpush1.msra.mxu1 %v11812_v50  ;;  %13834 = vst [vmem:[#allocation160_spill] sm:$0xff] %v11828_v57  ;;  %v11832_v34 = vld [vmem:[#allocation19 + $0x68] sm:$0xff]  ;;  %v13962_v26 = vld [vmem:[#allocation115_spill] sm:$0xff] }
 0xce1   :  { %4824 = vmatpush1.msra.mxu0 %v11136_v29  ;;  %4906 = vmatprep.subr.mxu1 %v11816_v63  ;;  %13835 = vst [vmem:[#allocation161_spill] sm:$0xff] %v11832_v34  ;;  %v11836_v29 = vld [vmem:[#allocation19 + $0x60] sm:$0xff] }
 0xce2   :  { %4825 = vmatprep.subr.mxu0 %v11143_v46  ;;  %4907 = vmatpush1.msra.mxu1 %v11820_v16  ;;  %13836 = vst [vmem:[#allocation162_spill] sm:$0xff] %v11836_v29  ;;  %v11840_v46 = vld [vmem:[#allocation19 + $0x38] sm:$0xff] }
 0xce3   :  { %4826 = vmatpush1.msra.mxu0 %v11150_v53  ;;  %4908 = vmatprep.subr.mxu1 %v11824_v61  ;;  %13837 = vst [vmem:[#allocation163_spill] sm:$0xff] %v11840_v46  ;;  %v11844_v53 = vld [vmem:[#allocation19 + $0x30] sm:$0xff] }
 0xce4   :  { %4827 = vmatprep.subr.mxu0 %v11157_v2  ;;  %4909 = vmatpush1.msra.mxu1 %v11828_v57  ;;  %13838 = vst [vmem:[#allocation164_spill] sm:$0xff] %v11844_v53  ;;  %v11848_v2 = vld [vmem:[#allocation19 + $0x8] sm:$0xff] }
 0xce5   :  { %4828 = vmatpush1.msra.mxu0 %v11164_v41  ;;  %4910 = vmatprep.subr.mxu1 %v11832_v34  ;;  %13839 = vst [vmem:[#allocation59_spill] sm:$0xff] %v11848_v2  ;;  %v11852_v41 = vld [vmem:[#allocation19] sm:$0xff] }
 0xce6   :  { %4829 = vmatprep.subr.mxu0 %v11171_v60  ;;  %4911 = vmatpush1.msra.mxu1 %v11836_v29  ;;  %13840 = vst [vmem:[#allocation60_spill] sm:$0xff] %v11852_v41  ;;  %v13841_v60 = vld [vmem:[#allocation55_spill] sm:$0xff] }
 0xce7   :  { %4830 = vmatpush1.msra.mxu0 %v11178_v43  ;;  %4912 = vmatprep.subr.mxu1 %v11840_v46  ;;  %v11862_v43 = vld [vmem:[#allocation19 + $0x2f8] sm:$0xff] }
 0xce8   :  { %4831 = vmatprep.subr.mxu0 %v11185_v20  ;;  %4913 = vmatpush1.msra.mxu1 %v11844_v53  ;;  %13842 = vst [vmem:[#allocation61_spill] sm:$0xff] %v11862_v43  ;;  %v13843_v20 = vld [vmem:[#allocation56_spill] sm:$0xff] }
 0xce9   :  { %4832 = vmatpush1.msra.mxu0 %v11192_v13  ;;  %4914 = vmatprep.subr.mxu1 %v11848_v2  ;;  %v13844_v13 = vld [vmem:[#allocation57_spill] sm:$0xff]  ;;  %v13856_v53 = vld [vmem:[#allocation116_spill] sm:$0xff] }
 0xcea   :  { %4833 = vmatprep.subr.mxu0 %v11199_v40  ;;  %4915 = vmatpush1.msra.mxu1 %v11852_v41  ;;  %v13845_v40 = vld [vmem:[#allocation58_spill] sm:$0xff]  ;;  %v13850_v41 = vld [vmem:[#allocation39_spill] sm:$0xff]  ;;  %v13853_v2 = vld [vmem:[#allocation53_spill] sm:$0xff] }
 0xceb   :  { %4834 = vmatpush1.msra.mxu0 %v11206_v6  ;;  %4948 = vmatprep.mubr.f32.mxu1 %v13482_v44  ;;  %v13846_v6 = vld [vmem:[#allocation44_spill] sm:$0xff] }
 0xcec   :  { %4868 = vmatmul.mubr.f32.vlgmr.msra.gmra.mxu0 %v11648_v4  ;;  %4961 = vmatprep.subr.mxu0 %v11211_v56  ;;  %v13847_v56 = vld [vmem:[#allocation80_spill] sm:$0xff] }
 0xced   :  { %4873 = vmatprep.mubr.f32.mxu0 %v13482_v44  ;;  %4962 = vmatpush1.msra.mxu0 %v11215_v38  ;;  %v13848_v38 = vld [vmem:[#allocation43_spill] sm:$0xff] }
 0xcee   :  { %4963 = vmatprep.subr.mxu0 %v13841_v60  ;;  %5038 = vmatprep.subr.mxu1 %v11862_v43  ;;  %v13849_v60 = vld [vmem:[#allocation79_spill] sm:$0xff]  ;;  %v13851_v43 = vld [vmem:[#allocation42_spill] sm:$0xff] }
 0xcef   :  { %4964 = vmatpush1.msra.mxu0 %v13843_v20  ;;  %v13852_v20 = vld [vmem:[#allocation41_spill] sm:$0xff] }
 0xcf0   :  { %4874 = vmatmul.mubr.f32.gmra.mxu0 %v11675_v12  ;;  %4965 = vmatprep.subr.mxu0 %v13844_v13  ;;  %v13854_v13 = vld [vmem:[#allocation81_spill] sm:$0xff] }
 0xcf1   :  { %4966 = vmatpush1.msra.mxu0 %v13845_v40  ;;  %5025 = vmatprep.mubr.f32.mxu0 %v13482_v44  ;;  %v13855_v40 = vld [vmem:[#allocation40_spill] sm:$0xff] }
 0xcf2   :  { %4967 = vmatprep.subr.mxu0 %v13846_v6  ;;  %v13857_v6 = vld [vmem:[#allocation117_spill] sm:$0xff] }
 0xcf3   :  { %4968 = vmatpush1.msra.mxu0 %v13847_v56  ;;  %v13858_v56 = vld [vmem:[#allocation118_spill] sm:$0xff] }
 0xcf4   :  { %4969 = vmatprep.subr.mxu0 %v13848_v38  ;;  %v13859_v38 = vld [vmem:[#allocation119_spill] sm:$0xff] }
 0xcf5   :  { %4970 = vmatpush1.msra.mxu0 %v13849_v60  ;;  %v13860_v60 = vld [vmem:[#allocation120_spill] sm:$0xff] }
 0xcf6   :  { %4971 = vmatprep.subr.mxu0 %v13850_v41  ;;  %v13861_v41 = vld [vmem:[#allocation121_spill] sm:$0xff] }
 0xcf7   :  { %4972 = vmatpush1.msra.mxu0 %v13851_v43  ;;  %v13862_v43 = vld [vmem:[#allocation122_spill] sm:$0xff] }
 0xcf8   :  { %4973 = vmatprep.subr.mxu0 %v13852_v20  ;;  %v13863_v20 = vld [vmem:[#allocation123_spill] sm:$0xff] }
 0xcf9   :  { %4974 = vmatpush1.msra.mxu0 %v13853_v2  ;;  %v13864_v2 = vld [vmem:[#allocation124_spill] sm:$0xff] }
 0xcfa   :  { %4975 = vmatprep.subr.mxu0 %v13854_v13  ;;  %v13865_v13 = vld [vmem:[#allocation125_spill] sm:$0xff] }
 0xcfb   :  { %4976 = vmatpush1.msra.mxu0 %v13855_v40  ;;  %v13866_v40 = vld [vmem:[#allocation126_spill] sm:$0xff] }
 0xcfc   :  { %4977 = vmatprep.subr.mxu0 %v13856_v53  ;;  %v13867_v53 = vld [vmem:[#allocation127_spill] sm:$0xff] }
 0xcfd   :  { %4978 = vmatpush1.msra.mxu0 %v13857_v6  ;;  %v13868_v6 = vld [vmem:[#allocation128_spill] sm:$0xff] }
 0xcfe   :  { %4979 = vmatprep.subr.mxu0 %v13858_v56  ;;  %v13869_v56 = vld [vmem:[#allocation129_spill] sm:$0xff] }
 0xcff   :  { %4980 = vmatpush1.msra.mxu0 %v13859_v38  ;;  %v13870_v38 = vld [vmem:[#allocation130_spill] sm:$0xff] }
 0xd00   :  { %4981 = vmatprep.subr.mxu0 %v13860_v60  ;;  %v13871_v60 = vld [vmem:[#allocation131_spill] sm:$0xff] }
 0xd01   :  { %4982 = vmatpush1.msra.mxu0 %v13861_v41  ;;  %v13872_v41 = vld [vmem:[#allocation132_spill] sm:$0xff] }
 0xd02   :  { %4983 = vmatprep.subr.mxu0 %v13862_v43 }
 0xd03   :  { %4984 = vmatpush1.msra.mxu0 %v13863_v20 }
 0xd04   :  { %4985 = vmatprep.subr.mxu0 %v13864_v2 }
 0xd05   :  { %4986 = vmatpush1.msra.mxu0 %v13865_v13 }
 0xd06   :  { %4987 = vmatprep.subr.mxu0 %v13866_v40  ;;  %v13873_v40 = vld [vmem:[#allocation75_spill] sm:$0xff] }
 0xd07   :  { %4988 = vmatpush1.msra.mxu0 %v13867_v53 }
 0xd08   :  { %4989 = vmatprep.subr.mxu0 %v13868_v6  ;;  %v11900_v6 = vld [vmem:[#allocation23] ss:$0 sm:$0xff] }
 0xd09   :  { %4990 = vmatpush1.msra.mxu0 %v13869_v56  ;;  %13874 = vst [vmem:[#allocation62_spill] sm:$0xff] %v11900_v6 }
 0xd0a   :  { %4991 = vmatprep.subr.mxu0 %v13870_v38  ;;  %v13875_v38 = vld [vmem:[#allocation85_spill] sm:$0xff] }
 0xd0b   :  { %4992 = vmatpush1.msra.mxu0 %v13871_v60 }
 0xd0c   :  { %7248 = vmatprep.subr.mxu0 %v13872_v41 }
 0xd69   :  { %v7224_v43 = vpop.f32.mrf.mxu1 }
 0xd6b   :  { %v7225_v20 = vpop.f32.mrf.mxu1 }
 0xd6c   :  { %v7226_v13 = vadd.f32 %v7225_v20, %v7224_v43 }
 0xd6d   :  { %v7227_v46 = vpop.f32.mrf.mxu1 }
 0xd6e   :  { %v4623_v63 = vadd.f32 %v11900_v6, %v7226_v13 }
 0xd6f   :  { %v7228_v2 = vpop.f32.mrf.mxu1 }
 0xd70   :  { %v7229_v29 = vadd.f32 %v7228_v2, %v7227_v46 }
 0xd72   :  { %v4628_v56 = vadd.f32 %v11900_v6, %v7229_v29  ;;  %v13876_v29 = vld [vmem:[#allocation84_spill] sm:$0xff]  ;;  %v13961_v6 = vld [vmem:[#allocation65_spill] sm:$0xff] }
 0xd89   :  { %v4792_v34 = vpop.f32.mrf.mxu1 }
 0xd8a   :  { %v4793_v57 = vadd.f32 %v4792_v34, %v13873_v40 }
 0xd8b   :  { %v11898_v53 = vpop.f32.mrf.mxu1 }
 0xd8c   :  { %v4880_v61 = vadd.f32 %v4793_v57, %v13875_v38  ;;  %v7736_v60 = vpop.f32.mrf.mxu0  ;;  %v13880_v38 = vld [vmem:[#allocation133_spill] sm:$0xff] }
 0xd8d   :  { %v11904_v16 = vadd.f32 %v7736_v60, %v4628_v56  ;;  %v4798_v41 = vpop.f32.mrf.mxu1  ;;  %v11928_v56 = vld [vmem:[#allocation19 + $0x2c0] sm:$0xff]  ;;  %v11933_v60 = vld [vmem:[#allocation19 + $0x298] sm:$0xff] }
 0xd8e   :  { %v11907_v50 = vmax.f32 %v4880_v61, 0.0  ;;  %v4799_v46 = vadd.f32 %v4798_v41, %v13873_v40  ;;  %v4697_v43 = vpop.f32.mrf.mxu0  ;;  %v11918_v61 = vld [vmem:[#allocation19 + $0x2f0] sm:$0xff]  ;;  %13879 = vst [vmem:[#allocation55_spill] sm:$0xff] %v11928_v56  ;;  %13881 = vst [vmem:[#allocation56_spill] sm:$0xff] %v11933_v60 }
 0xd8f   :  { %v6917_v34 = vmul.f32 -1.442695, %v11904_v16  ;;  %v11911_v20 = vadd.f32 %v4697_v43, %v4623_v63  ;;  %13877 = vst [vmem:[#allocation46_spill] sm:$0xff] %v11918_v61  ;;  %v11924_v63 = vld [vmem:[#allocation19 + $0x2c8] sm:$0xff]  ;;  %v11938_v41 = vld [vmem:[#allocation19 + $0x290] sm:$0xff]  ;;  %v11945_v43 = vld [vmem:[#allocation19 + $0x260] sm:$0xff] }
 0xd90   :  { %5382 = vst [vmem:[#allocation25 + $0x30] sm:$0xff] %v11907_v50  ;;  %v4881_v2 = vadd.f32 %v4799_v46, %v13876_v29  ;;  %4949 = vmatmul.mubr.f32.vlgmr.msra.gmra.mxu1 %v11907_v50  ;;  %5026 = vmatmul.mubr.f32.vlgmr.msra.gmra.mxu0 %v11907_v50  ;;  %13878 = vst [vmem:[#allocation45_spill] sm:$0xff] %v11924_v63  ;;  %v11941_v46 = vld [vmem:[#allocation19 + $0x268] sm:$0xff]  ;;  %v11949_v29 = vld [vmem:[#allocation19 + $0x238] sm:$0xff] }
 0xd91   :  { %7966 = vpow2.f32 %v6917_v34  ;;  %v6916_v57 = vmul.f32 -1.442695, %v11911_v20  ;;  %5039 = vmatpush1.msra.mxu1 %v11918_v61  ;;  %4954 = vmatprep.mubr.f32.mxu1 %v13482_v44  ;;  %13882 = vst [vmem:[#allocation57_spill] sm:$0xff] %v11938_v41  ;;  %13883 = vst [vmem:[#allocation58_spill] sm:$0xff] %v11941_v46  ;;  %v13885_v34 = vld [vmem:[#allocation134_spill] sm:$0xff] }
 0xd92   :  { %v11922_v13 = vmax.f32 %v4881_v2, 0.0  ;;  %5040 = vmatprep.subr.mxu1 %v11924_v63  ;;  %5031 = vmatprep.mubr.f32.mxu0 %v13482_v44  ;;  %13884 = vst [vmem:[#allocation44_spill] sm:$0xff] %v11945_v43  ;;  %13886 = vst [vmem:[#allocation80_spill] sm:$0xff] %v11949_v29  ;;  %v13887_v2 = vld [vmem:[#allocation135_spill] sm:$0xff] }
 0xd93   :  { %7968 = vpow2.f32 %v6916_v57  ;;  %5041 = vmatpush1.msra.mxu1 %v11928_v56  ;;  %7249 = vmatpush3.msra.mxu0 %v13880_v38  ;;  %v11953_v57 = vld [vmem:[#allocation19 + $0x230] sm:$0xff]  ;;  %v13889_v38 = vld [vmem:[#allocation136_spill] sm:$0xff] }
 0xd94   :  { %5383 = vst [vmem:[#allocation25 + $0x38] sm:$0xff] %v11922_v13  ;;  %5042 = vmatprep.subr.mxu1 %v11933_v60  ;;  %4955 = vmatmul.mubr.f32.gmra.mxu1 %v11922_v13  ;;  %13888 = vst [vmem:[#allocation43_spill] sm:$0xff] %v11953_v57  ;;  %v11977_v60 = vld [vmem:[#allocation19 + $0x1a0] sm:$0xff]  ;;  %v11981_v56 = vld [vmem:[#allocation19 + $0x178] sm:$0xff] }
 0xd95   :  { %5032 = vmatmul.mubr.f32.gmra.mxu0 %v11922_v13  ;;  %5043 = vmatpush1.msra.mxu1 %v11938_v41  ;;  %v13891_v41 = vld [vmem:[#allocation137_spill] sm:$0xff]  ;;  %13900 = vst [vmem:[#allocation81_spill] sm:$0xff] %v11977_v60  ;;  %13902 = vst [vmem:[#allocation40_spill] sm:$0xff] %v11981_v56  ;;  %v11985_v63 = vld [vmem:[#allocation19 + $0x170] sm:$0xff] }
 0xd96   :  { %5044 = vmatprep.subr.mxu1 %v11941_v46  ;;  %5102 = vmatprep.mubr.f32.mxu1 %v13482_v44  ;;  %v11957_v46 = vld [vmem:[#allocation19 + $0x208] sm:$0xff]  ;;  %13904 = vst [vmem:[#allocation116_spill] sm:$0xff] %v11985_v63 }
 0xd97   :  { %5045 = vmatpush1.msra.mxu1 %v11945_v43  ;;  %7250 = vmatprep.subr.mxu0 %v13885_v34  ;;  %13890 = vst [vmem:[#allocation79_spill] sm:$0xff] %v11957_v46  ;;  %v11961_v43 = vld [vmem:[#allocation19 + $0x200] sm:$0xff]  ;;  %v13893_v34 = vld [vmem:[#allocation138_spill] sm:$0xff] }
 0xd98   :  { %5046 = vmatprep.subr.mxu1 %v11949_v29  ;;  %7251 = vmatpush3.msra.mxu0 %v13887_v2  ;;  %13892 = vst [vmem:[#allocation39_spill] sm:$0xff] %v11961_v43  ;;  %v11965_v29 = vld [vmem:[#allocation19 + $0x1d8] sm:$0xff] }
 0xd99   :  { %5047 = vmatpush1.msra.mxu1 %v11953_v57  ;;  %7252 = vmatprep.subr.mxu0 %v13889_v38  ;;  %13894 = vst [vmem:[#allocation42_spill] sm:$0xff] %v11965_v29  ;;  %v13895_v2 = vld [vmem:[#allocation139_spill] sm:$0xff]  ;;  %v13897_v38 = vld [vmem:[#allocation140_spill] sm:$0xff] }
 0xd9a   :  { %5048 = vmatprep.subr.mxu1 %v11957_v46  ;;  %7253 = vmatpush3.msra.mxu0 %v13891_v41  ;;  %v11969_v57 = vld [vmem:[#allocation19 + $0x1d0] sm:$0xff]  ;;  %v11973_v41 = vld [vmem:[#allocation19 + $0x1a8] sm:$0xff] }
 0xd9b   :  { %5049 = vmatpush1.msra.mxu1 %v11961_v43  ;;  %7254 = vmatprep.subr.mxu0 %v13893_v34  ;;  %13896 = vst [vmem:[#allocation41_spill] sm:$0xff] %v11969_v57  ;;  %13898 = vst [vmem:[#allocation53_spill] sm:$0xff] %v11973_v41  ;;  %v13899_v43 = vld [vmem:[#allocation141_spill] sm:$0xff] }
 0xd9c   :  { %5050 = vmatprep.subr.mxu1 %v11965_v29  ;;  %7255 = vmatpush3.msra.mxu0 %v13895_v2  ;;  %v13901_v29 = vld [vmem:[#allocation142_spill] sm:$0xff] }
 0xd9d   :  { %5051 = vmatpush1.msra.mxu1 %v11969_v57  ;;  %7256 = vmatprep.subr.mxu0 %v13897_v38  ;;  %v13903_v38 = vld [vmem:[#allocation143_spill] sm:$0xff] }
 0xd9e   :  { %v7967_v46 = vpop.eup %7966  ;;  %5052 = vmatprep.subr.mxu1 %v11973_v41  ;;  %7257 = vmatpush3.msra.mxu0 %v13899_v43  ;;  %v11989_v43 = vld [vmem:[#allocation19 + $0x148] sm:$0xff]  ;;  %v13960_v41 = vld [vmem:[#allocation64_spill] sm:$0xff] }
 0xd9f   :  { %v4713_v34 = vadd.f32 1.0, %v7967_v46  ;;  %5053 = vmatpush1.msra.mxu1 %v11977_v60  ;;  %7258 = vmatprep.subr.mxu0 %v13901_v29  ;;  %v13905_v46 = vld [vmem:[#allocation83_spill] sm:$0xff]  ;;  %13906 = vst [vmem:[#allocation117_spill] sm:$0xff] %v11989_v43  ;;  %v13907_v29 = vld [vmem:[#allocation82_spill] sm:$0xff]  ;;  %v11993_v60 = vld [vmem:[#allocation19 + $0x140] sm:$0xff] }
 0xda0   :  { %v7969_v2 = vpop.eup %7968  ;;  %5054 = vmatprep.subr.mxu1 %v11981_v56  ;;  %7259 = vmatpush3.msra.mxu0 %v13903_v38  ;;  %13908 = vst [vmem:[#allocation118_spill] sm:$0xff] %v11993_v60  ;;  %v13909_v38 = vld [vmem:[#allocation76_spill] sm:$0xff] }
 0xda1   :  { %7970 = vrcp.f32 %v4713_v34  ;;  %v4712_v57 = vadd.f32 1.0, %v7969_v2  ;;  %5055 = vmatpush1.msra.mxu1 %v11985_v63  ;;  %7260 = vmatprep.subr.mxu0 %v13905_v46  ;;  %v11997_v34 = vld [vmem:[#allocation19 + $0x118] sm:$0xff]  ;;  %v12001_v46 = vld [vmem:[#allocation19 + $0x110] sm:$0xff] }
 0xda2   :  { %5056 = vmatprep.subr.mxu1 %v11989_v43  ;;  %7261 = vmatpush3.msra.mxu0 %v13907_v29  ;;  %13910 = vst [vmem:[#allocation119_spill] sm:$0xff] %v11997_v34  ;;  %v13911_v2 = vld [vmem:[#allocation144_spill] sm:$0xff]  ;;  %13912 = vst [vmem:[#allocation120_spill] sm:$0xff] %v12001_v46  ;;  %v13913_v43 = vld [vmem:[#allocation145_spill] sm:$0xff] }
 0xda3   :  { %7972 = vrcp.f32 %v4712_v57  ;;  %5057 = vmatpush1.msra.mxu1 %v11993_v60  ;;  %7262 = vmatprep.subr.mxu0 %v13909_v38  ;;  %v12005_v29 = vld [vmem:[#allocation19 + $0xe8] sm:$0xff]  ;;  %v12009_v60 = vld [vmem:[#allocation19 + $0xe0] sm:$0xff]  ;;  %v13917_v38 = vld [vmem:[#allocation147_spill] sm:$0xff] }
 0xda4   :  { %5058 = vmatprep.subr.mxu1 %v11997_v34  ;;  %7263 = vmatpush3.msra.mxu0 %v13911_v2  ;;  %13914 = vst [vmem:[#allocation121_spill] sm:$0xff] %v12005_v29  ;;  %v13915_v57 = vld [vmem:[#allocation146_spill] sm:$0xff]  ;;  %13916 = vst [vmem:[#allocation122_spill] sm:$0xff] %v12009_v60  ;;  %v12013_v34 = vld [vmem:[#allocation19 + $0xb8] sm:$0xff] }
 0xda5   :  { %5059 = vmatpush1.msra.mxu1 %v12001_v46  ;;  %7264 = vmatprep.subr.mxu0 %v13913_v43  ;;  %13918 = vst [vmem:[#allocation123_spill] sm:$0xff] %v12013_v34  ;;  %v13919_v2 = vld [vmem:[#allocation148_spill] sm:$0xff]  ;;  %v12017_v46 = vld [vmem:[#allocation19 + $0xb0] sm:$0xff]  ;;  %v13921_v43 = vld [vmem:[#allocation149_spill] sm:$0xff] }
 0xda6   :  { %5060 = vmatprep.subr.mxu1 %v12005_v29  ;;  %7265 = vmatpush3.msra.mxu0 %v13915_v57  ;;  %13920 = vst [vmem:[#allocation124_spill] sm:$0xff] %v12017_v46  ;;  %v12021_v29 = vld [vmem:[#allocation19 + $0x88] sm:$0xff] }
 0xda7   :  { %5061 = vmatpush1.msra.mxu1 %v12009_v60  ;;  %7266 = vmatprep.subr.mxu0 %v13917_v38  ;;  %13922 = vst [vmem:[#allocation125_spill] sm:$0xff] %v12021_v29  ;;  %v13923_v57 = vld [vmem:[#allocation150_spill] sm:$0xff]  ;;  %v12025_v60 = vld [vmem:[#allocation19 + $0x80] sm:$0xff]  ;;  %v13925_v38 = vld [vmem:[#allocation151_spill] sm:$0xff] }
 0xda8   :  { %5062 = vmatprep.subr.mxu1 %v12013_v34  ;;  %7267 = vmatpush3.msra.mxu0 %v13919_v2  ;;  %13924 = vst [vmem:[#allocation126_spill] sm:$0xff] %v12025_v60  ;;  %v12029_v34 = vld [vmem:[#allocation19 + $0x58] sm:$0xff] }
 0xda9   :  { %5063 = vmatpush1.msra.mxu1 %v12017_v46  ;;  %7268 = vmatprep.subr.mxu0 %v13921_v43  ;;  %13926 = vst [vmem:[#allocation127_spill] sm:$0xff] %v12029_v34  ;;  %v13927_v2 = vld [vmem:[#allocation152_spill] sm:$0xff]  ;;  %v12033_v46 = vld [vmem:[#allocation19 + $0x50] sm:$0xff]  ;;  %v13929_v43 = vld [vmem:[#allocation153_spill] sm:$0xff] }
 0xdaa   :  { %5064 = vmatprep.subr.mxu1 %v12021_v29  ;;  %7269 = vmatpush3.msra.mxu0 %v13923_v57  ;;  %13928 = vst [vmem:[#allocation128_spill] sm:$0xff] %v12033_v46  ;;  %v12037_v57 = vld [vmem:[#allocation19 + $0x28] sm:$0xff] }
 0xdab   :  { %5065 = vmatpush1.msra.mxu1 %v12025_v60  ;;  %7270 = vmatprep.subr.mxu0 %v13925_v38  ;;  %13930 = vst [vmem:[#allocation129_spill] sm:$0xff] %v12037_v57  ;;  %v13931_v60 = vld [vmem:[#allocation154_spill] sm:$0xff] }
 0xdac   :  { %5066 = vmatprep.subr.mxu1 %v12029_v34  ;;  %7271 = vmatpush3.msra.mxu0 %v13927_v2  ;;  %v12044_v34 = vld [vmem:[#allocation19 + $0x20] sm:$0xff] }
 0xdad   :  { %5067 = vmatpush1.msra.mxu1 %v12033_v46  ;;  %7272 = vmatprep.subr.mxu0 %v13929_v43  ;;  %13933 = vst [vmem:[#allocation130_spill] sm:$0xff] %v12044_v34  ;;  %v13934_v2 = vld [vmem:[#allocation88_spill] sm:$0xff]  ;;  %v13935_v43 = vld [vmem:[#allocation89_spill] sm:$0xff] }
 0xdae   :  { %v7971_v29 = vpop.eup %7970  ;;  %5068 = vmatprep.subr.mxu1 %v12037_v57  ;;  %7273 = vmatpush3.msra.mxu0 %v13931_v60  ;;  %v13936_v57 = vld [vmem:[#allocation90_spill] sm:$0xff] }
 0xdaf   :  { %v4719_v63 = vsel %vm10711_vm7, %v7971_v29, %v11904_v16  ;;  %5069 = vmatpush1.msra.mxu1 %v12044_v34  ;;  %7274 = vmatprep.subr.mxu0 %v13934_v2  ;;  %v13937_v16 = vld [vmem:[#allocation91_spill] sm:$0xff]  ;;  %v12072_v2 = vld [vmem:[#allocation22 + $0x160] sm:$0xff] }
 0xdb0   :  { %v7973_v46 = vpop.eup %7972  ;;  %4725 = vst [vmem:[#allocation26 + $0x28] sm:$0xff] %v4719_v63  ;;  %5103 = vmatmul.mubr.f32.vlgmr.msra.gmra.mxu1 %v11907_v50  ;;  %7275 = vmatpush3.msra.mxu0 %v13935_v43  ;;  %v12056_v29 = vld [vmem:[#allocation22 + $0x178] sm:$0xff]  ;;  %v13940_v50 = vld [vmem:[#allocation93_spill] sm:$0xff]  ;;  %13944 = vst [vmem:[#allocation84_spill] sm:$0xff] %v12072_v2 }
 0xdb1   :  { %v4718_v60 = vsel %vm10711_vm7, %v7973_v46, %v11911_v20  ;;  %5108 = vmatprep.mubr.f32.mxu1 %v13482_v44  ;;  %7276 = vmatprep.subr.mxu0 %v13936_v57  ;;  %13938 = vst [vmem:[#allocation131_spill] sm:$0xff] %v12056_v29  ;;  %v13939_v63 = vld [vmem:[#allocation92_spill] sm:$0xff]  ;;  %v13941_v20 = vld [vmem:[#allocation94_spill] sm:$0xff] }
 0xdb2   :  { %4724 = vst [vmem:[#allocation26 + $0x20] sm:$0xff] %v4718_v60  ;;  %7277 = vmatpush3.msra.mxu0 %v13937_v16  ;;  %7737 = vmatprep.subr.mxu1 %v12056_v29  ;;  %v12064_v46 = vld [vmem:[#allocation22 + $0x170] sm:$0xff]  ;;  %v12068_v57 = vld [vmem:[#allocation22 + $0x168] sm:$0xff]  ;;  %v12088_v16 = vld [vmem:[#allocation22 + $0x140] sm:$0xff] }
 0xdb3   :  { %7278 = vmatprep.subr.mxu0 %v13939_v63  ;;  %7738 = vmatpush3.msra.mxu1 %v12056_v29  ;;  %13942 = vst [vmem:[#allocation132_spill] sm:$0xff] %v12064_v46  ;;  %13943 = vst [vmem:[#allocation85_spill] sm:$0xff] %v12068_v57  ;;  %v12080_v43 = vld [vmem:[#allocation22 + $0x150] sm:$0xff]  ;;  %v12084_v60 = vld [vmem:[#allocation22 + $0x148] sm:$0xff] }
 0xdb4   :  { %5109 = vmatmul.mubr.f32.gmra.mxu1 %v11922_v13  ;;  %7279 = vmatpush3.msra.mxu0 %v13940_v50  ;;  %v12076_v13 = vld [vmem:[#allocation22 + $0x158] sm:$0xff]  ;;  %13946 = vst [vmem:[#allocation134_spill] sm:$0xff] %v12080_v43  ;;  %13947 = vst [vmem:[#allocation135_spill] sm:$0xff] %v12084_v60  ;;  %v12096_v50 = vld [vmem:[#allocation22 + $0x130] sm:$0xff] }
 0xdb5   :  { %5387 = vmatprep.subr.mxu0 %v13941_v20  ;;  %7739 = vmatprep.subr.mxu1 %v12064_v46  ;;  %13945 = vst [vmem:[#allocation133_spill] sm:$0xff] %v12076_v13  ;;  %13948 = vst [vmem:[#allocation136_spill] sm:$0xff] %v12088_v16  ;;  %v12092_v63 = vld [vmem:[#allocation22 + $0x138] sm:$0xff]  ;;  %v12100_v20 = vld [vmem:[#allocation22 + $0x128] sm:$0xff] }
 0xdb6   :  { %7740 = vmatpush3.msra.mxu1 %v12064_v46  ;;  %13949 = vst [vmem:[#allocation137_spill] sm:$0xff] %v12092_v63  ;;  %13950 = vst [vmem:[#allocation138_spill] sm:$0xff] %v12096_v50 }
 0xdb7   :  { %7741 = vmatprep.subr.mxu1 %v12068_v57  ;;  %13951 = vst [vmem:[#allocation139_spill] sm:$0xff] %v12100_v20 }
 0xdb8   :  { %7742 = vmatpush3.msra.mxu1 %v12068_v57 }
 0xdb9   :  { %7743 = vmatprep.subr.mxu1 %v12072_v2 }
 0xdba   :  { %7744 = vmatpush3.msra.mxu1 %v12072_v2 }
 0xdbb   :  { %7745 = vmatprep.subr.mxu1 %v12076_v13 }
 0xdbc   :  { %7746 = vmatpush3.msra.mxu1 %v12076_v13  ;;  %v13958_v13 = vld [vmem:[#allocation78_spill] sm:$0xff] }
 0xdbd   :  { %7747 = vmatprep.subr.mxu1 %v12080_v43  ;;  %v4795_v2 = vadd.f32 %v11898_v53, %v13958_v13  ;;  %v13963_v53 = vld [vmem:[#allocation66_spill] sm:$0xff] }
 0xdbe   :  { %7748 = vmatpush3.msra.mxu1 %v12080_v43 }
 0xdbf   :  { %7749 = vmatprep.subr.mxu1 %v12084_v60 }
 0xdc0   :  { %7750 = vmatpush3.msra.mxu1 %v12084_v60  ;;  %v12104_v60 = vld [vmem:[#allocation22 + $0x120] sm:$0xff] }
 0xdc1   :  { %7751 = vmatprep.subr.mxu1 %v12088_v16  ;;  %13952 = vst [vmem:[#allocation140_spill] sm:$0xff] %v12104_v60 }
 0xdc2   :  { %7752 = vmatpush3.msra.mxu1 %v12088_v16  ;;  %v12108_v16 = vld [vmem:[#allocation22 + $0x118] sm:$0xff] }
 0xdc3   :  { %7753 = vmatprep.subr.mxu1 %v12092_v63  ;;  %13953 = vst [vmem:[#allocation141_spill] sm:$0xff] %v12108_v16 }
 0xdc4   :  { %7754 = vmatpush3.msra.mxu1 %v12092_v63  ;;  %v12112_v63 = vld [vmem:[#allocation22 + $0x110] sm:$0xff] }
 0xdc5   :  { %7755 = vmatprep.subr.mxu1 %v12096_v50  ;;  %13954 = vst [vmem:[#allocation142_spill] sm:$0xff] %v12112_v63 }
 0xdc6   :  { %7756 = vmatpush3.msra.mxu1 %v12096_v50  ;;  %v12116_v50 = vld [vmem:[#allocation22 + $0x108] sm:$0xff] }
 0xdc7   :  { %7757 = vmatprep.subr.mxu1 %v12100_v20  ;;  %13955 = vst [vmem:[#allocation143_spill] sm:$0xff] %v12116_v50 }
 0xdc8   :  { %7758 = vmatpush3.msra.mxu1 %v12100_v20  ;;  %v12120_v20 = vld [vmem:[#allocation22 + $0x100] sm:$0xff] }
 0xdc9   :  { %7759 = vmatprep.subr.mxu1 %v12104_v60  ;;  %13956 = vst [vmem:[#allocation83_spill] sm:$0xff] %v12120_v20 }
 0xdca   :  { %7760 = vmatpush3.msra.mxu1 %v12104_v60  ;;  %v4869_v60 = vpop.f32.mrf.mxu0 }
 0xdcb   :  { %7761 = vmatprep.subr.mxu1 %v12108_v16  ;;  %v4870_v11 = vadd.f32 %v4869_v60, %v13962_v26 }
 0xdcc   :  { %7762 = vmatpush3.msra.mxu1 %v12108_v16  ;;  %v12127_v16 = vld [vmem:[%s13030_s13 + $0x1f8] sm:$0xff]  ;;  %v4871_v29 = vpop.f32.mrf.mxu0 }
 0xdcd   :  { %7763 = vmatprep.subr.mxu1 %v12112_v63  ;;  %13957 = vst [vmem:[#allocation82_spill] sm:$0xff] %v12127_v16 }
 0xdce   :  { %7764 = vmatpush3.msra.mxu1 %v12112_v63  ;;  %v4800_v63 = vpop.f32.mrf.mxu1  ;;  %v4875_v32 = vpop.f32.mrf.mxu0 }
 0xdcf   :  { %7765 = vmatprep.subr.mxu1 %v12116_v50 }
 0xdd0   :  { %7766 = vmatpush3.msra.mxu1 %v12116_v50  ;;  %v13959_v50 = vld [vmem:[#allocation63_spill] sm:$0xff] }
 0xdd1   :  { %7767 = vmatprep.subr.mxu1 %v12120_v20 }
 0xdd2   :  { %7768 = vmatpush3.msra.mxu1 %v12120_v20  ;;  %v4801_v20 = vadd.f32 %v4800_v63, %v13958_v13 }
 0xdd3   :  { %5464 = vmatprep.subr.mxu1 %v12127_v16 }
 0xe50   :  { %v4950_v43 = vpop.f32.mrf.mxu1 }
 0xe51   :  { %v5115_v57 = vadd.f32 %v4950_v43, %v13959_v50 }
 0xe52   :  { %v4952_v46 = vpop.f32.mrf.mxu1 }
 0xe53   :  { %v5121_v34 = vadd.f32 %v5115_v57, %v4795_v2  ;;  %v5116_v61 = vadd.f32 %v4952_v46, %v13960_v41  ;;  %v4876_v57 = vadd.f32 %v4875_v32, %v13962_v26  ;;  %v4877_v41 = vpop.f32.mrf.mxu0 }
 0xe54   :  { %v4956_v38 = vpop.f32.mrf.mxu1 }
 0xe55   :  { %v6918_v56 = vmul.f32 -1.442695, %v5121_v34  ;;  %v5118_v40 = vadd.f32 %v4956_v38, %v13961_v6  ;;  %v5135_v43 = vadd.f32 %v5116_v61, %v4870_v11  ;;  %v5027_v38 = vpop.f32.mrf.mxu0 }
 0xe56   :  { %v4958_v16 = vpop.f32.mrf.mxu1 }
 0xe57   :  { %7974 = vpow2.f32 %v6918_v56  ;;  %v5122_v33 = vadd.f32 %v5118_v40, %v4801_v20  ;;  %v5119_v62 = vadd.f32 %v4958_v16, %v13963_v53  ;;  %v6920_v63 = vmul.f32 -1.442695, %v5135_v43  ;;  %v5029_v56 = vpop.f32.mrf.mxu0 }
 0xe59   :  { %v6919_v50 = vmul.f32 -1.442695, %v5122_v33  ;;  %v5136_v2 = vadd.f32 %v5119_v62, %v4876_v57  ;;  %v5033_v16 = vpop.f32.mrf.mxu0  ;;  %v5163_v33 = vadd.f32 %v5029_v56, %v10360_v9 }
 0xe5b   :  { %7976 = vpow2.f32 %v6919_v50  ;;  %v6921_v34 = vmul.f32 -1.442695, %v5136_v2  ;;  %v5035_v20 = vpop.f32.mrf.mxu0  ;;  %v4872_v50 = vadd.f32 %v4871_v29, %v10353_v0 }
 0xe5c   :  { %7978 = vpow2.f32 %v6920_v63 }
 0xe5d   :  { %7980 = vpow2.f32 %v6921_v34  ;;  %v13964_v34 = vld [vmem:[#allocation48_spill] sm:$0xff] }
 0xe64   :  { %v7975_v46 = vpop.eup %7974 }
 0xe65   :  { %v5129_v6 = vadd.f32 1.0, %v7975_v46  ;;  %v5117_v46 = vadd.f32 %v5027_v38, %v13964_v34 }
 0xe67   :  { %7982 = vrcp.f32 %v5129_v6  ;;  %v5169_v6 = vmax.f32 %v5163_v33, 0.0 }
 0xe68   :  { %v7977_v60 = vpop.eup %7976 }
 0xe69   :  { %v5130_v40 = vadd.f32 1.0, %v7977_v60  ;;  %v7979_v11 = vpop.eup %7978 }
 0xe6a   :  { %v7981_v61 = vpop.eup %7980  ;;  %v5143_v62 = vadd.f32 1.0, %v7979_v11 }
 0xe6b   :  { %7984 = vrcp.f32 %v5130_v40  ;;  %v5144_v60 = vadd.f32 1.0, %v7981_v61  ;;  %v5166_v40 = vadd.f32 %v5035_v20, %v10360_v9 }
 0xe6c   :  { %7986 = vrcp.f32 %v5143_v62  ;;  %v13965_v62 = vld [vmem:[#allocation47_spill] sm:$0xff] }
 0xe6d   :  { %v5172_v61 = vmax.f32 %v5166_v40, 0.0  ;;  %v5120_v20 = vadd.f32 %v5033_v16, %v13965_v62  ;;  %v13975_v40 = vld [vmem:[#allocation104_spill] sm:$0xff]  ;;  %v12322_v62 = vld [vmem:[%s13030_s13 + $0xd0] sm:$0xff] }
 0xe70   :  { %v5104_v32 = vpop.f32.mrf.mxu1 }
 0xe71   :  { %v5164_v53 = vadd.f32 %v5104_v32, %v10215_v8  ;;  %v4878_v32 = vadd.f32 %v4877_v41, %v10353_v0 }
 0xe72   :  { %v5106_v43 = vpop.f32.mrf.mxu1 }
 0xe73   :  { %v5170_v57 = vmax.f32 %v5164_v53, 0.0  ;;  %v5165_v2 = vadd.f32 %v5106_v43, %v13653_v3 }
 0xe74   :  { %v7983_v63 = vpop.eup %7982  ;;  %v5110_v56 = vpop.f32.mrf.mxu1 }
 0xe75   :  { %v5149_v26 = vmul.f32 %v7983_v63, %v4872_v50  ;;  %v6924_v11 = vmul.f32 -1.442695, %v5165_v2  ;;  %v5167_v13 = vadd.f32 %v5110_v56, %v10215_v8  ;;  %5281 = vmatprep.mubr.f32.mxu0 %v5170_v57  ;;  %v13970_v63 = vld [vmem:[#allocation99_spill] sm:$0xff] }
 0xe76   :  { %v5112_v29 = vpop.f32.mrf.mxu1  ;;  %5282 = vmatmul.mubr.f32.vlgmr.msra.gmra.mxu0 %v5169_v6  ;;  %v13973_v6 = vld [vmem:[#allocation102_spill] sm:$0xff] }
 0xe77   :  { %v5151_v53 = vadd.f32 %v5149_v26, %v5117_v46  ;;  %7988 = vpow2.f32 %v6924_v11  ;;  %v5173_v43 = vmax.f32 %v5167_v13, 0.0  ;;  %v5168_v38 = vadd.f32 %v5112_v29, %v13653_v3  ;;  %5388 = vmatpush1.msra.mxu0 %v11534_v15  ;;  %v13968_v13 = vld [vmem:[#allocation97_spill] sm:$0xff]  ;;  %v13979_v11 = vld [vmem:[#allocation108_spill] sm:$0xff]  ;;  %v12224_v29 = vld [vmem:[%s13030_s13 + $0x1b0] sm:$0xff] }
 0xe78   :  { %v7985_v33 = vpop.eup %7984  ;;  %7990 = vrcp.f32 %v5144_v60  ;;  %5389 = vmatprep.subr.mxu0 %v11540_v45  ;;  %v13974_v60 = vld [vmem:[#allocation103_spill] sm:$0xff] }
 0xe79   :  { %7992 = vtanh.f32 %v5151_v53  ;;  %v5150_v50 = vmul.f32 %v7985_v33, %v4878_v32  ;;  %v6927_v57 = vmul.f32 -1.442695, %v5168_v38  ;;  %5390 = vmatpush1.msra.mxu0 %v11547_v28  ;;  %5286 = vmatprep.mubr.f32.mxu0 %v5173_v43  ;;  %v7987_v15 = vpop.eup %7986  ;;  %v13966_v28 = vld [vmem:[#allocation95_spill] sm:$0xff]  ;;  %v12197_v32 = vld [vmem:[%s13030_s13 + $0x1f0] sm:$0xff]  ;;  %v13980_v53 = vld [vmem:[#allocation109_spill] sm:$0xff] }
 0xe7a   :  { %5391 = vmatprep.subr.mxu0 %v11553_v14  ;;  %5287 = vmatmul.mubr.f32.gmra.mxu0 %v5172_v61  ;;  %v13981_v43 = vld [vmem:[#allocation110_spill] sm:$0xff]  ;;  %v13982_v38 = vld [vmem:[#allocation111_spill] sm:$0xff]  ;;  %v13983_v61 = vld [vmem:[#allocation112_spill] sm:$0xff] }
 0xe7b   :  { %v5152_v26 = vadd.f32 %v5150_v50, %v5120_v20  ;;  %7994 = vpow2.f32 %v6927_v57  ;;  %5392 = vmatpush1.msra.mxu0 %v11559_v48  ;;  %5451 = vmatprep.mubr.f32.mxu0 %v13482_v44  ;;  %v12315_v33 = vld [vmem:[%s13030_s13 + $0xd8] sm:$0xff]  ;;  %v13985_v57 = vld [vmem:[#allocation156_spill] sm:$0xff] }
 0xe7c   :  { %5393 = vmatprep.subr.mxu0 %v11566_v7  ;;  %v13967_v7 = vld [vmem:[#allocation96_spill] sm:$0xff]  ;;  %v13984_v20 = vld [vmem:[#allocation155_spill] sm:$0xff] }
 0xe7d   :  { %7996 = vtanh.f32 %v5152_v26  ;;  %5394 = vmatpush1.msra.mxu0 %v11572_v17  ;;  %v5155_v17 = vsub.f32 1.0, %v7987_v15  ;;  %v12329_v50 = vld [vmem:[%s13030_s13 + $0xb8] sm:$0xff]  ;;  %v12336_v26 = vld [vmem:[%s13030_s13 + $0xb0] sm:$0xff] }
 0xe7e   :  { %5395 = vmatprep.subr.mxu0 %v11578_v49 }
 0xe7f   :  { %5396 = vmatpush1.msra.mxu0 %v11584_v54  ;;  %v13969_v54 = vld [vmem:[#allocation98_spill] sm:$0xff] }
 0xe80   :  { %5397 = vmatprep.subr.mxu0 %v11590_v51 }
 0xe81   :  { %5398 = vmatpush1.msra.mxu0 %v11596_v37  ;;  %v5159_v37 = vmul.f32 %v7987_v15, %v11648_v4  ;;  %v13971_v4 = vld [vmem:[#allocation100_spill] sm:$0xff]  ;;  %v13986_v15 = vld [vmem:[#allocation157_spill] sm:$0xff] }
 0xe82   :  { %5399 = vmatprep.subr.mxu0 %v11602_v10 }
 0xe83   :  { %5400 = vmatpush1.msra.mxu0 %v11608_v47 }
 0xe84   :  { %v7989_v45 = vpop.eup %7988  ;;  %5401 = vmatprep.subr.mxu0 %v13966_v28  ;;  %v13987_v28 = vld [vmem:[#allocation158_spill] sm:$0xff] }
 0xe85   :  { %v7991_v14 = vpop.eup %7990  ;;  %v5195_v48 = vadd.f32 1.0, %v7989_v45  ;;  %5402 = vmatpush1.msra.mxu0 %v13967_v7  ;;  %v12343_v45 = vld [vmem:[%s13030_s13 + $0x98] sm:$0xff] }
 0xe86   :  { %v7993_v49 = vpop.eup %7992  ;;  %5403 = vmatprep.subr.mxu0 %v13968_v13  ;;  %v5156_v16 = vsub.f32 1.0, %v7991_v14  ;;  %v5160_v46 = vmul.f32 %v7991_v14, %v11675_v12  ;;  %v13977_v12 = vld [vmem:[#allocation106_spill] sm:$0xff]  ;;  %v12357_v7 = vld [vmem:[%s13030_s13 + $0x78] sm:$0xff]  ;;  %v13990_v13 = vld [vmem:[#allocation161_spill] sm:$0xff] }
 0xe87   :  { %7998 = vrcp.f32 %v5195_v48  ;;  %5404 = vmatpush1.msra.mxu0 %v13969_v54  ;;  %v5157_v51 = vmul.f32 %v7993_v49, %v5155_v17  ;;  %v12350_v14 = vld [vmem:[%s13030_s13 + $0x90] sm:$0xff]  ;;  %v13988_v48 = vld [vmem:[#allocation159_spill] sm:$0xff]  ;;  %v13989_v17 = vld [vmem:[#allocation160_spill] sm:$0xff] }
 0xe88   :  { %v7995_v10 = vpop.eup %7994  ;;  %5405 = vmatprep.subr.mxu0 %v11639_v19  ;;  %v12364_v49 = vld [vmem:[%s13030_s13 + $0x70] sm:$0xff]  ;;  %v12371_v54 = vld [vmem:[%s13030_s13 + $0x58] sm:$0xff] }
 0xe89   :  { %v5198_v47 = vadd.f32 1.0, %v7995_v10  ;;  %5406 = vmatpush1.msra.mxu0 %v11645_v24  ;;  %v12170_v41 = vadd.f32 %v5159_v37, %v5157_v51  ;;  %v13972_v24 = vld [vmem:[#allocation101_spill] sm:$0xff]  ;;  %v13991_v51 = vld [vmem:[#allocation162_spill] sm:$0xff]  ;;  %v13992_v10 = vld [vmem:[#allocation163_spill] sm:$0xff] }
 0xe8a   :  { %v7997_v2 = vpop.eup %7996  ;;  %5407 = vmatprep.subr.mxu0 %v13970_v63  ;;  %v12378_v37 = vld [vmem:[%s13030_s13 + $0x50] sm:$0xff]  ;;  %v13994_v63 = vld [vmem:[#allocation59_spill] sm:$0xff] }
 0xe8b   :  { %8000 = vrcp.f32 %v5198_v47  ;;  %5408 = vmatpush1.msra.mxu0 %v11659_v39  ;;  %v5158_v34 = vmul.f32 %v7997_v2, %v5156_v16  ;;  %v13976_v39 = vld [vmem:[#allocation105_spill] sm:$0xff]  ;;  %v12385_v47 = vld [vmem:[%s13030_s13 + $0x38] sm:$0xff]  ;;  %v13993_v16 = vld [vmem:[#allocation164_spill] sm:$0xff] }
 0xe8c   :  { %5409 = vmatprep.subr.mxu0 %v11666_v59  ;;  %v13978_v59 = vld [vmem:[#allocation107_spill] sm:$0xff]  ;;  %v12392_v2 = vld [vmem:[%s13030_s13 + $0x30] sm:$0xff] }
 0xe8d   :  { %5410 = vmatpush1.msra.mxu0 %v11672_v31  ;;  %v12177_v19 = vadd.f32 %v5160_v46, %v5158_v34  ;;  %v12399_v34 = vld [vmem:[%s13030_s13 + $0x18] sm:$0xff]  ;;  %v13995_v46 = vld [vmem:[#allocation60_spill] sm:$0xff] }
 0xe8e   :  { %5411 = vmatprep.subr.mxu0 %v13971_v4  ;;  %v12406_v4 = vld [vmem:[%s13030_s13 + $0x10] sm:$0xff] }
 0xe8f   :  { %5412 = vmatpush1.msra.mxu0 %v13972_v24  ;;  %v12411_v24 = vld [vmem:[#allocation19 + $0x2e8] sm:$0xff] }
 0xe90   :  { %5413 = vmatprep.subr.mxu0 %v13973_v6  ;;  %v12415_v6 = vld [vmem:[#allocation19 + $0x2e0] sm:$0xff] }
 0xe91   :  { %5414 = vmatpush1.msra.mxu0 %v13974_v60  ;;  %v12418_v60 = vld [vmem:[#allocation19 + $0x2b8] sm:$0xff] }
 0xe92   :  { %5415 = vmatprep.subr.mxu0 %v13975_v40  ;;  %13996 = vst [vmem:[#allocation76_spill] sm:$0xff] %v12418_v60  ;;  %v13997_v40 = vld [vmem:[#allocation61_spill] sm:$0xff] }
 0xe93   :  { %5416 = vmatpush1.msra.mxu0 %v13976_v39  ;;  %v12422_v39 = vld [vmem:[#allocation19 + $0x2b0] sm:$0xff] }
 0xe94   :  { %v7999_v56 = vpop.eup %7998  ;;  %5417 = vmatprep.subr.mxu0 %v13977_v12  ;;  %13998 = vst [vmem:[#allocation144_spill] sm:$0xff] %v12422_v39  ;;  %v12429_v12 = vld [vmem:[#allocation19 + $0x280] sm:$0xff] }
 0xe95   :  { %5418 = vmatpush1.msra.mxu0 %v13978_v59  ;;  %7769 = vmatprep.mubr.f32.mxu1 %v7999_v56  ;;  %v12426_v56 = vld [vmem:[#allocation19 + $0x288] sm:$0xff]  ;;  %14000 = vst [vmem:[#allocation146_spill] sm:$0xff] %v12429_v12  ;;  %v12433_v59 = vld [vmem:[#allocation19 + $0x258] sm:$0xff] }
 0xe96   :  { %5452 = vmatmul.mubr.f32.vlgmr.msra.gmra.mxu0 %v12170_v41  ;;  %5545 = vmatprep.subr.mxu0 %v11726_v35  ;;  %v12203_v35 = vld [vmem:[%s13030_s13 + $0x1d8] sm:$0xff]  ;;  %13999 = vst [vmem:[#allocation145_spill] sm:$0xff] %v12426_v56  ;;  %14001 = vst [vmem:[#allocation147_spill] sm:$0xff] %v12433_v59 }
 0xe97   :  { %5457 = vmatprep.mubr.f32.mxu0 %v13482_v44  ;;  %5546 = vmatpush1.msra.mxu0 %v11730_v58  ;;  %v12217_v58 = vld [vmem:[%s13030_s13 + $0x1b8] sm:$0xff] }
 0xe98   :  { %v8001_v31 = vpop.eup %8000  ;;  %5547 = vmatprep.subr.mxu0 %v11733_v25  ;;  %v12210_v25 = vld [vmem:[%s13030_s13 + $0x1d0] sm:$0xff] }
 0xe99   :  { %7770 = vmatmul.mubr.f32.vlgmr.msra.gmra.mxu1 %v8001_v31  ;;  %5548 = vmatpush1.msra.mxu0 %v13979_v11  ;;  %v12436_v31 = vld [vmem:[#allocation19 + $0x250] sm:$0xff]  ;;  %v12439_v11 = vld [vmem:[#allocation19 + $0x228] sm:$0xff] }
 0xe9a   :  { %5458 = vmatmul.mubr.f32.gmra.mxu0 %v12177_v19  ;;  %5465 = vmatpush1.msra.mxu1 %v12197_v32  ;;  %14002 = vst [vmem:[#allocation148_spill] sm:$0xff] %v12436_v31  ;;  %14003 = vst [vmem:[#allocation149_spill] sm:$0xff] %v12439_v11 }
 0xe9b   :  { %5466 = vmatprep.subr.mxu1 %v12203_v35  ;;  %5528 = vmatprep.mubr.f32.mxu1 %v13482_v44 }
 0xe9c   :  { %5467 = vmatpush1.msra.mxu1 %v12210_v25  ;;  %5549 = vmatprep.subr.mxu0 %v11744_v1  ;;  %v12231_v1 = vld [vmem:[%s13030_s13 + $0x198] sm:$0xff] }
 0xe9d   :  { %5468 = vmatprep.subr.mxu1 %v12217_v58  ;;  %5550 = vmatpush1.msra.mxu0 %v11748_v5  ;;  %v12238_v5 = vld [vmem:[%s13030_s13 + $0x190] sm:$0xff] }
 0xe9e   :  { %5469 = vmatpush1.msra.mxu1 %v12224_v29  ;;  %5551 = vmatprep.subr.mxu0 %v11752_v21  ;;  %v12245_v21 = vld [vmem:[%s13030_s13 + $0x178] sm:$0xff] }
 0xe9f   :  { %5470 = vmatprep.subr.mxu1 %v12231_v1  ;;  %5552 = vmatpush1.msra.mxu0 %v11756_v30  ;;  %v12252_v30 = vld [vmem:[%s13030_s13 + $0x170] sm:$0xff] }
 0xea0   :  { %5471 = vmatpush1.msra.mxu1 %v12238_v5  ;;  %5553 = vmatprep.subr.mxu0 %v11760_v22  ;;  %v12259_v22 = vld [vmem:[%s13030_s13 + $0x158] sm:$0xff] }
 0xea1   :  { %5472 = vmatprep.subr.mxu1 %v12245_v21  ;;  %5554 = vmatpush1.msra.mxu0 %v11764_v23  ;;  %v12266_v23 = vld [vmem:[%s13030_s13 + $0x150] sm:$0xff] }
 0xea2   :  { %5473 = vmatpush1.msra.mxu1 %v12252_v30  ;;  %5555 = vmatprep.subr.mxu0 %v11768_v27  ;;  %v12273_v27 = vld [vmem:[%s13030_s13 + $0x138] sm:$0xff] }
 0xea3   :  { %5474 = vmatprep.subr.mxu1 %v12259_v22  ;;  %5556 = vmatpush1.msra.mxu0 %v11772_v36  ;;  %v12280_v36 = vld [vmem:[%s13030_s13 + $0x130] sm:$0xff] }
 0xea4   :  { %5475 = vmatpush1.msra.mxu1 %v12266_v23  ;;  %5557 = vmatprep.subr.mxu0 %v11776_v42  ;;  %v12287_v42 = vld [vmem:[%s13030_s13 + $0x118] sm:$0xff] }
 0xea5   :  { %5476 = vmatprep.subr.mxu1 %v12273_v27  ;;  %5558 = vmatpush1.msra.mxu0 %v11780_v52  ;;  %v12294_v52 = vld [vmem:[%s13030_s13 + $0x110] sm:$0xff] }
 0xea6   :  { %5477 = vmatpush1.msra.mxu1 %v12280_v36  ;;  %5559 = vmatprep.subr.mxu0 %v11784_v55  ;;  %v12301_v55 = vld [vmem:[%s13030_s13 + $0xf8] sm:$0xff] }
 0xea7   :  { %5478 = vmatprep.subr.mxu1 %v12287_v42  ;;  %5560 = vmatpush1.msra.mxu0 %v11788_v18  ;;  %v12308_v18 = vld [vmem:[%s13030_s13 + $0xf0] sm:$0xff] }
 0xea8   :  { %5479 = vmatpush1.msra.mxu1 %v12294_v52  ;;  %5561 = vmatprep.subr.mxu0 %v13980_v53  ;;  %v12442_v53 = vld [vmem:[#allocation19 + $0x220] sm:$0xff] }
 0xea9   :  { %5480 = vmatprep.subr.mxu1 %v12301_v55  ;;  %5562 = vmatpush1.msra.mxu0 %v13981_v43  ;;  %14004 = vst [vmem:[#allocation150_spill] sm:$0xff] %v12442_v53  ;;  %v12445_v43 = vld [vmem:[#allocation19 + $0x1f8] sm:$0xff] }
 0xeaa   :  { %5481 = vmatpush1.msra.mxu1 %v12308_v18  ;;  %5563 = vmatprep.subr.mxu0 %v13982_v38  ;;  %14005 = vst [vmem:[#allocation151_spill] sm:$0xff] %v12445_v43  ;;  %v12448_v38 = vld [vmem:[#allocation19 + $0x1f0] sm:$0xff] }
 0xeab   :  { %5482 = vmatprep.subr.mxu1 %v12315_v33  ;;  %5564 = vmatpush1.msra.mxu0 %v13983_v61  ;;  %14006 = vst [vmem:[#allocation152_spill] sm:$0xff] %v12448_v38  ;;  %v12451_v61 = vld [vmem:[#allocation19 + $0x1c8] sm:$0xff] }
 0xeac   :  { %5483 = vmatpush1.msra.mxu1 %v12322_v62  ;;  %5565 = vmatprep.subr.mxu0 %v13984_v20  ;;  %14007 = vst [vmem:[#allocation153_spill] sm:$0xff] %v12451_v61  ;;  %v12454_v20 = vld [vmem:[#allocation19 + $0x1c0] sm:$0xff] }
 0xead   :  { %5484 = vmatprep.subr.mxu1 %v12329_v50  ;;  %5566 = vmatpush1.msra.mxu0 %v13985_v57  ;;  %14008 = vst [vmem:[#allocation154_spill] sm:$0xff] %v12454_v20  ;;  %v12457_v57 = vld [vmem:[#allocation19 + $0x198] sm:$0xff] }
 0xeae   :  { %5485 = vmatpush1.msra.mxu1 %v12336_v26  ;;  %5567 = vmatprep.subr.mxu0 %v13986_v15  ;;  %14009 = vst [vmem:[#allocation88_spill] sm:$0xff] %v12457_v57  ;;  %v12460_v15 = vld [vmem:[#allocation19 + $0x190] sm:$0xff] }
 0xeaf   :  { %5486 = vmatprep.subr.mxu1 %v12343_v45  ;;  %5568 = vmatpush1.msra.mxu0 %v13987_v28  ;;  %14010 = vst [vmem:[#allocation89_spill] sm:$0xff] %v12460_v15  ;;  %v12463_v28 = vld [vmem:[#allocation19 + $0x168] sm:$0xff] }
 0xeb0   :  { %5487 = vmatpush1.msra.mxu1 %v12350_v14  ;;  %5569 = vmatprep.subr.mxu0 %v13988_v48  ;;  %14011 = vst [vmem:[#allocation90_spill] sm:$0xff] %v12463_v28  ;;  %v12466_v48 = vld [vmem:[#allocation19 + $0x160] sm:$0xff] }
 0xeb1   :  { %5488 = vmatprep.subr.mxu1 %v12357_v7  ;;  %5570 = vmatpush1.msra.mxu0 %v13989_v17  ;;  %14012 = vst [vmem:[#allocation91_spill] sm:$0xff] %v12466_v48  ;;  %v12469_v17 = vld [vmem:[#allocation19 + $0x138] sm:$0xff] }
 0xeb2   :  { %5489 = vmatpush1.msra.mxu1 %v12364_v49  ;;  %5571 = vmatprep.subr.mxu0 %v13990_v13  ;;  %14013 = vst [vmem:[#allocation92_spill] sm:$0xff] %v12469_v17  ;;  %v12472_v13 = vld [vmem:[#allocation19 + $0x130] sm:$0xff] }
 0xeb3   :  { %5490 = vmatprep.subr.mxu1 %v12371_v54  ;;  %5572 = vmatpush1.msra.mxu0 %v13991_v51  ;;  %14014 = vst [vmem:[#allocation93_spill] sm:$0xff] %v12472_v13  ;;  %v12475_v51 = vld [vmem:[#allocation19 + $0x108] sm:$0xff] }
 0xeb4   :  { %5491 = vmatpush1.msra.mxu1 %v12378_v37  ;;  %5573 = vmatprep.subr.mxu0 %v13992_v10  ;;  %14015 = vst [vmem:[#allocation94_spill] sm:$0xff] %v12475_v51  ;;  %v12478_v10 = vld [vmem:[#allocation19 + $0x100] sm:$0xff] }
 0xeb5   :  { %5492 = vmatprep.subr.mxu1 %v12385_v47  ;;  %5574 = vmatpush1.msra.mxu0 %v13993_v16  ;;  %14016 = vst [vmem:[#allocation63_spill] sm:$0xff] %v12478_v10  ;;  %v12481_v16 = vld [vmem:[#allocation19 + $0xd8] sm:$0xff] }
 0xeb6   :  { %5493 = vmatpush1.msra.mxu1 %v12392_v2  ;;  %5575 = vmatprep.subr.mxu0 %v13994_v63  ;;  %14017 = vst [vmem:[#allocation64_spill] sm:$0xff] %v12481_v16  ;;  %v12484_v63 = vld [vmem:[#allocation19 + $0xd0] sm:$0xff] }
 0xeb7   :  { %5494 = vmatprep.subr.mxu1 %v12399_v34  ;;  %5576 = vmatpush1.msra.mxu0 %v13995_v46  ;;  %14018 = vst [vmem:[#allocation65_spill] sm:$0xff] %v12484_v63  ;;  %v12487_v46 = vld [vmem:[#allocation19 + $0xa8] sm:$0xff] }
 0xeb8   :  { %5495 = vmatpush1.msra.mxu1 %v12406_v4  ;;  %5609 = vmatprep.mubr.f32.mxu0 %v13482_v44  ;;  %14019 = vst [vmem:[#allocation66_spill] sm:$0xff] %v12487_v46 }
 0xeb9   :  { %5529 = vmatmul.mubr.f32.vlgmr.msra.gmra.mxu1 %v12170_v41  ;;  %5622 = vmatprep.subr.mxu1 %v12411_v24 }
 0xeba   :  { %5534 = vmatprep.mubr.f32.mxu1 %v13482_v44  ;;  %5623 = vmatpush1.msra.mxu1 %v12415_v6 }
 0xebb   :  { %5624 = vmatprep.subr.mxu1 %v12418_v60  ;;  %5699 = vmatprep.subr.mxu0 %v13997_v40  ;;  %v12490_v40 = vld [vmem:[#allocation19 + $0xa0] sm:$0xff] }
 0xebc   :  { %5625 = vmatpush1.msra.mxu1 %v12422_v39  ;;  %14020 = vst [vmem:[#allocation48_spill] sm:$0xff] %v12490_v40 }
 0xebd   :  { %5535 = vmatmul.mubr.f32.gmra.mxu1 %v12177_v19  ;;  %5626 = vmatprep.subr.mxu1 %v12426_v56 }
 0xebe   :  { %5627 = vmatpush1.msra.mxu1 %v12429_v12  ;;  %5686 = vmatprep.mubr.f32.mxu1 %v13482_v44 }
 0xebf   :  { %5628 = vmatprep.subr.mxu1 %v12433_v59  ;;  %v14116_v59 = vld [vmem:[#allocation115_spill] sm:$0xff] }
 0xec0   :  { %5629 = vmatpush1.msra.mxu1 %v12436_v31 }
 0xec1   :  { %5630 = vmatprep.subr.mxu1 %v12439_v11 }
 0xec2   :  { %5631 = vmatpush1.msra.mxu1 %v12442_v53 }
 0xec3   :  { %5632 = vmatprep.subr.mxu1 %v12445_v43 }
 0xec4   :  { %5633 = vmatpush1.msra.mxu1 %v12448_v38  ;;  %v14030_v38 = vld [vmem:[#allocation87_spill] sm:$0xff] }
 0xec5   :  { %5634 = vmatprep.subr.mxu1 %v12451_v61 }
 0xec6   :  { %5635 = vmatpush1.msra.mxu1 %v12454_v20 }
 0xec7   :  { %5636 = vmatprep.subr.mxu1 %v12457_v57 }
 0xec8   :  { %5637 = vmatpush1.msra.mxu1 %v12460_v15 }
 0xec9   :  { %5638 = vmatprep.subr.mxu1 %v12463_v28 }
 0xeca   :  { %5639 = vmatpush1.msra.mxu1 %v12466_v48 }
 0xecb   :  { %5640 = vmatprep.subr.mxu1 %v12469_v17 }
 0xecc   :  { %5641 = vmatpush1.msra.mxu1 %v12472_v13 }
 0xecd   :  { %5642 = vmatprep.subr.mxu1 %v12475_v51  ;;  %v12493_v51 = vld [vmem:[#allocation19 + $0x78] sm:$0xff] }
 0xece   :  { %5643 = vmatpush1.msra.mxu1 %v12478_v10  ;;  %14021 = vst [vmem:[#allocation47_spill] sm:$0xff] %v12493_v51  ;;  %v12496_v10 = vld [vmem:[#allocation19 + $0x70] sm:$0xff] }
 0xecf   :  { %5644 = vmatprep.subr.mxu1 %v12481_v16  ;;  %14022 = vst [vmem:[#allocation95_spill] sm:$0xff] %v12496_v10  ;;  %v12499_v16 = vld [vmem:[#allocation19 + $0x48] sm:$0xff] }
 0xed0   :  { %5645 = vmatpush1.msra.mxu1 %v12484_v63  ;;  %14023 = vst [vmem:[#allocation96_spill] sm:$0xff] %v12499_v16  ;;  %v12502_v63 = vld [vmem:[#allocation19 + $0x40] sm:$0xff] }
 0xed1   :  { %5646 = vmatprep.subr.mxu1 %v12487_v46  ;;  %14024 = vst [vmem:[#allocation97_spill] sm:$0xff] %v12502_v63  ;;  %v12505_v46 = vld [vmem:[#allocation19 + $0x18] sm:$0xff] }
 0xed2   :  { %5647 = vmatpush1.msra.mxu1 %v12490_v40  ;;  %14025 = vst [vmem:[#allocation98_spill] sm:$0xff] %v12505_v46  ;;  %v12508_v40 = vld [vmem:[#allocation19 + $0x10] sm:$0xff] }
 0xed3   :  { %5648 = vmatprep.subr.mxu1 %v12493_v51  ;;  %14026 = vst [vmem:[#allocation99_spill] sm:$0xff] %v12508_v40  ;;  %v12511_v51 = vld [vmem:[#allocation22 + $0xf8] sm:$0xff] }
 0xed4   :  { %5649 = vmatpush1.msra.mxu1 %v12496_v10  ;;  %14027 = vst [vmem:[#allocation100_spill] sm:$0xff] %v12511_v51 }
 0xed5   :  { %5650 = vmatprep.subr.mxu1 %v12499_v16 }
 0xed6   :  { %5651 = vmatpush1.msra.mxu1 %v12502_v63  ;;  %v14028_v63 = vld [vmem:[#allocation75_spill] sm:$0xff] }
 0xed7   :  { %5652 = vmatprep.subr.mxu1 %v12505_v46  ;;  %v14029_v46 = vld [vmem:[#allocation62_spill] sm:$0xff] }
 0xed8   :  { %5653 = vmatpush1.msra.mxu1 %v12508_v40 }
 0xed9   :  { %7304 = vmatprep.subr.mxu1 %v12511_v51 }
 0xf36   :  { %v7280_v10 = vpop.f32.mrf.mxu0 }
 0xf38   :  { %v7281_v13 = vpop.f32.mrf.mxu0 }
 0xf39   :  { %v7282_v28 = vadd.f32 %v7281_v13, %v7280_v10 }
 0xf3a   :  { %v7283_v17 = vpop.f32.mrf.mxu0 }
 0xf3b   :  { %v5284_v51 = vadd.f32 %v14029_v46, %v7282_v28  ;;  %v12540_v28 = vld [vmem:[#allocation22 + $0x78] sm:$0xff] }
 0xf3c   :  { %v7284_v16 = vpop.f32.mrf.mxu0  ;;  %14035 = vst [vmem:[#allocation101_spill] sm:$0xff] %v12540_v28 }
 0xf3d   :  { %v7285_v48 = vadd.f32 %v7284_v16, %v7283_v17 }
 0xf3f   :  { %v5289_v61 = vadd.f32 %v14029_v46, %v7285_v48  ;;  %v14031_v48 = vld [vmem:[#allocation86_spill] sm:$0xff]  ;;  %v14037_v46 = vld [vmem:[#allocation57_spill] sm:$0xff] }
 0xf56   :  { %v5453_v15 = vpop.f32.mrf.mxu0 }
 0xf57   :  { %v5454_v57 = vadd.f32 %v5453_v15, %v14028_v63 }
 0xf58   :  { %v12515_v20 = vpop.f32.mrf.mxu0 }
 0xf59   :  { %v5541_v43 = vadd.f32 %v5454_v57, %v14030_v38  ;;  %v7771_v40 = vpop.f32.mrf.mxu1  ;;  %v14034_v57 = vld [vmem:[#allocation55_spill] sm:$0xff] }
 0xf5a   :  { %v12519_v53 = vadd.f32 %v7771_v40, %v5289_v61  ;;  %v5459_v11 = vpop.f32.mrf.mxu0  ;;  %v14033_v61 = vld [vmem:[#allocation45_spill] sm:$0xff]  ;;  %v14038_v40 = vld [vmem:[#allocation58_spill] sm:$0xff] }
 0xf5b   :  { %v12522_v31 = vmax.f32 %v5541_v43, 0.0  ;;  %v5460_v17 = vadd.f32 %v5459_v11, %v14028_v63  ;;  %v5358_v13 = vpop.f32.mrf.mxu1  ;;  %v14032_v43 = vld [vmem:[#allocation46_spill] sm:$0xff] }
 0xf5c   :  { %v6929_v10 = vmul.f32 -1.442695, %v12519_v53  ;;  %v12526_v15 = vadd.f32 %v5358_v13, %v5284_v51  ;;  %v14036_v51 = vld [vmem:[#allocation56_spill] sm:$0xff]  ;;  %v12551_v13 = vld [vmem:[#allocation22 + $0xf0] sm:$0xff] }
 0xf5d   :  { %6043 = vst [vmem:[#allocation25 + $0x40] sm:$0xff] %v12522_v31  ;;  %v5542_v16 = vadd.f32 %v5460_v17, %v14031_v48  ;;  %5610 = vmatmul.mubr.f32.vlgmr.msra.gmra.mxu0 %v12522_v31  ;;  %5687 = vmatmul.mubr.f32.vlgmr.msra.gmra.mxu1 %v12522_v31  ;;  %v14039_v17 = vld [vmem:[#allocation44_spill] sm:$0xff]  ;;  %14040 = vst [vmem:[#allocation102_spill] sm:$0xff] %v12551_v13  ;;  %v12555_v48 = vld [vmem:[#allocation22 + $0x70] sm:$0xff] }
 0xf5e   :  { %8002 = vpow2.f32 %v6929_v10  ;;  %v6928_v38 = vmul.f32 -1.442695, %v12526_v15  ;;  %5700 = vmatpush1.msra.mxu0 %v14032_v43  ;;  %5615 = vmatprep.mubr.f32.mxu0 %v13482_v44  ;;  %v14041_v10 = vld [vmem:[#allocation80_spill] sm:$0xff]  ;;  %14042 = vst [vmem:[#allocation103_spill] sm:$0xff] %v12555_v48  ;;  %v14045_v43 = vld [vmem:[#allocation79_spill] sm:$0xff] }
 0xf5f   :  { %v12535_v11 = vmax.f32 %v5542_v16, 0.0  ;;  %5701 = vmatprep.subr.mxu0 %v14033_v61  ;;  %5692 = vmatprep.mubr.f32.mxu1 %v13482_v44  ;;  %v14043_v16 = vld [vmem:[#allocation43_spill] sm:$0xff]  ;;  %v12563_v61 = vld [vmem:[#allocation22 + $0x68] sm:$0xff] }
 0xf60   :  { %8004 = vpow2.f32 %v6928_v38  ;;  %5702 = vmatpush1.msra.mxu0 %v14034_v57  ;;  %7305 = vmatpush3.msra.mxu1 %v12540_v28  ;;  %v12559_v38 = vld [vmem:[#allocation22 + $0xe8] sm:$0xff]  ;;  %14046 = vst [vmem:[#allocation105_spill] sm:$0xff] %v12563_v61  ;;  %v14047_v57 = vld [vmem:[#allocation39_spill] sm:$0xff] }
 0xf61   :  { %6044 = vst [vmem:[#allocation25 + $0x48] sm:$0xff] %v12535_v11  ;;  %5703 = vmatprep.subr.mxu0 %v14036_v51  ;;  %5616 = vmatmul.mubr.f32.gmra.mxu0 %v12535_v11  ;;  %14044 = vst [vmem:[#allocation104_spill] sm:$0xff] %v12559_v38  ;;  %v12567_v51 = vld [vmem:[#allocation22 + $0xe0] sm:$0xff] }
 0xf62   :  { %5693 = vmatmul.mubr.f32.gmra.mxu1 %v12535_v11  ;;  %5704 = vmatpush1.msra.mxu0 %v14037_v46  ;;  %14048 = vst [vmem:[#allocation106_spill] sm:$0xff] %v12567_v51  ;;  %v14049_v46 = vld [vmem:[#allocation42_spill] sm:$0xff] }
 0xf63   :  { %5705 = vmatprep.subr.mxu0 %v14038_v40  ;;  %5763 = vmatprep.mubr.f32.mxu0 %v13482_v44  ;;  %v12571_v40 = vld [vmem:[#allocation22 + $0x60] sm:$0xff] }
 0xf64   :  { %5706 = vmatpush1.msra.mxu0 %v14039_v17  ;;  %7306 = vmatprep.subr.mxu1 %v12551_v13  ;;  %14050 = vst [vmem:[#allocation107_spill] sm:$0xff] %v12571_v40  ;;  %v14051_v17 = vld [vmem:[#allocation41_spill] sm:$0xff]  ;;  %v14114_v13 = vld [vmem:[#allocation68_spill] sm:$0xff] }
 0xf65   :  { %5707 = vmatprep.subr.mxu0 %v14041_v10  ;;  %7307 = vmatpush3.msra.mxu1 %v12555_v48  ;;  %v12575_v10 = vld [vmem:[#allocation22 + $0xd8] sm:$0xff]  ;;  %v12591_v48 = vld [vmem:[#allocation22 + $0xc8] sm:$0xff] }
 0xf66   :  { %5708 = vmatpush1.msra.mxu0 %v14043_v16  ;;  %7308 = vmatprep.subr.mxu1 %v12559_v38  ;;  %14052 = vst [vmem:[#allocation108_spill] sm:$0xff] %v12575_v10  ;;  %v12587_v38 = vld [vmem:[#allocation22 + $0x50] sm:$0xff]  ;;  %14060 = vst [vmem:[#allocation112_spill] sm:$0xff] %v12591_v48 }
 0xf67   :  { %5709 = vmatprep.subr.mxu0 %v14045_v43  ;;  %7309 = vmatpush3.msra.mxu1 %v12563_v61  ;;  %v14053_v43 = vld [vmem:[#allocation53_spill] sm:$0xff]  ;;  %14058 = vst [vmem:[#allocation111_spill] sm:$0xff] %v12587_v38 }
 0xf68   :  { %5710 = vmatpush1.msra.mxu0 %v14047_v57  ;;  %7310 = vmatprep.subr.mxu1 %v12567_v51  ;;  %v12579_v57 = vld [vmem:[#allocation22 + $0x58] sm:$0xff]  ;;  %v14055_v61 = vld [vmem:[#allocation81_spill] sm:$0xff] }
 0xf69   :  { %5711 = vmatprep.subr.mxu0 %v14049_v46  ;;  %7311 = vmatpush3.msra.mxu1 %v12571_v40  ;;  %14054 = vst [vmem:[#allocation109_spill] sm:$0xff] %v12579_v57  ;;  %v12583_v46 = vld [vmem:[#allocation22 + $0xd0] sm:$0xff] }
 0xf6a   :  { %5712 = vmatpush1.msra.mxu0 %v14051_v17  ;;  %7312 = vmatprep.subr.mxu1 %v12575_v10  ;;  %14056 = vst [vmem:[#allocation110_spill] sm:$0xff] %v12583_v46  ;;  %v14057_v17 = vld [vmem:[#allocation40_spill] sm:$0xff] }
 0xf6b   :  { %v8003_v16 = vpop.eup %8002  ;;  %5713 = vmatprep.subr.mxu0 %v14053_v43  ;;  %7313 = vmatpush3.msra.mxu1 %v12579_v57  ;;  %v14059_v10 = vld [vmem:[#allocation116_spill] sm:$0xff] }
 0xf6c   :  { %v5374_v51 = vadd.f32 1.0, %v8003_v16  ;;  %5714 = vmatpush1.msra.mxu0 %v14055_v61  ;;  %7314 = vmatprep.subr.mxu1 %v12583_v46  ;;  %v14061_v61 = vld [vmem:[#allocation117_spill] sm:$0xff] }
 0xf6d   :  { %v8005_v40 = vpop.eup %8004  ;;  %5715 = vmatprep.subr.mxu0 %v14057_v17  ;;  %7315 = vmatpush3.msra.mxu1 %v12587_v38  ;;  %v12595_v16 = vld [vmem:[#allocation22 + $0x48] sm:$0xff]  ;;  %v12599_v46 = vld [vmem:[#allocation22 + $0xc0] sm:$0xff] }
 0xf6e   :  { %8006 = vrcp.f32 %v5374_v51  ;;  %v5373_v43 = vadd.f32 1.0, %v8005_v40  ;;  %5716 = vmatpush1.msra.mxu0 %v14059_v10  ;;  %7316 = vmatprep.subr.mxu1 %v12591_v48  ;;  %14062 = vst [vmem:[#allocation155_spill] sm:$0xff] %v12595_v16  ;;  %v14063_v17 = vld [vmem:[#allocation118_spill] sm:$0xff]  ;;  %14064 = vst [vmem:[#allocation156_spill] sm:$0xff] %v12599_v46  ;;  %v14065_v51 = vld [vmem:[#allocation119_spill] sm:$0xff] }
 0xf6f   :  { %5717 = vmatprep.subr.mxu0 %v14061_v61  ;;  %7317 = vmatpush3.msra.mxu1 %v12595_v16  ;;  %v12603_v40 = vld [vmem:[#allocation22 + $0x40] sm:$0xff]  ;;  %v12607_v61 = vld [vmem:[#allocation22 + $0xb8] sm:$0xff]  ;;  %v14088_v48 = vld [vmem:[#allocation130_spill] sm:$0xff] }
 0xf70   :  { %8008 = vrcp.f32 %v5373_v43  ;;  %5718 = vmatpush1.msra.mxu0 %v14063_v17  ;;  %7318 = vmatprep.subr.mxu1 %v12599_v46  ;;  %14066 = vst [vmem:[#allocation157_spill] sm:$0xff] %v12603_v40  ;;  %v14067_v10 = vld [vmem:[#allocation120_spill] sm:$0xff]  ;;  %14068 = vst [vmem:[#allocation158_spill] sm:$0xff] %v12607_v61  ;;  %v14069_v16 = vld [vmem:[#allocation121_spill] sm:$0xff] }
 0xf71   :  { %5719 = vmatprep.subr.mxu0 %v14065_v51  ;;  %7319 = vmatpush3.msra.mxu1 %v12603_v40  ;;  %v12611_v43 = vld [vmem:[#allocation22 + $0x38] sm:$0xff]  ;;  %v14071_v17 = vld [vmem:[#allocation122_spill] sm:$0xff] }
 0xf72   :  { %5720 = vmatpush1.msra.mxu0 %v14067_v10  ;;  %7320 = vmatprep.subr.mxu1 %v12607_v61  ;;  %14070 = vst [vmem:[#allocation159_spill] sm:$0xff] %v12611_v43  ;;  %v12615_v46 = vld [vmem:[#allocation22 + $0xb0] sm:$0xff]  ;;  %v14075_v10 = vld [vmem:[#allocation124_spill] sm:$0xff]  ;;  %v12623_v61 = vld [vmem:[#allocation22 + $0xa8] sm:$0xff] }
 0xf73   :  { %5721 = vmatprep.subr.mxu0 %v14069_v16  ;;  %7321 = vmatpush3.msra.mxu1 %v12611_v43  ;;  %14072 = vst [vmem:[#allocation160_spill] sm:$0xff] %v12615_v46  ;;  %v14073_v51 = vld [vmem:[#allocation123_spill] sm:$0xff]  ;;  %14076 = vst [vmem:[#allocation162_spill] sm:$0xff] %v12623_v61  ;;  %v14077_v16 = vld [vmem:[#allocation125_spill] sm:$0xff] }
 0xf74   :  { %5722 = vmatpush1.msra.mxu0 %v14071_v17  ;;  %7322 = vmatprep.subr.mxu1 %v12615_v46  ;;  %v12619_v40 = vld [vmem:[#allocation22 + $0x30] sm:$0xff]  ;;  %v12627_v43 = vld [vmem:[#allocation22 + $0x28] sm:$0xff]  ;;  %v12631_v46 = vld [vmem:[#allocation22 + $0xa0] sm:$0xff] }
 0xf75   :  { %5723 = vmatprep.subr.mxu0 %v14073_v51  ;;  %14074 = vst [vmem:[#allocation161_spill] sm:$0xff] %v12619_v40  ;;  %7323 = vmatpush3.msra.mxu1 %v12619_v40  ;;  %14078 = vst [vmem:[#allocation163_spill] sm:$0xff] %v12627_v43  ;;  %v14079_v17 = vld [vmem:[#allocation126_spill] sm:$0xff]  ;;  %v14081_v51 = vld [vmem:[#allocation127_spill] sm:$0xff] }
 0xf76   :  { %5724 = vmatpush1.msra.mxu0 %v14075_v10  ;;  %7324 = vmatprep.subr.mxu1 %v12623_v61  ;;  %14080 = vst [vmem:[#allocation164_spill] sm:$0xff] %v12631_v46  ;;  %v12635_v40 = vld [vmem:[#allocation22 + $0x20] sm:$0xff]  ;;  %v12639_v61 = vld [vmem:[#allocation22 + $0x98] sm:$0xff] }
 0xf77   :  { %5725 = vmatprep.subr.mxu0 %v14077_v16  ;;  %7325 = vmatpush3.msra.mxu1 %v12627_v43  ;;  %14082 = vst [vmem:[#allocation59_spill] sm:$0xff] %v12635_v40  ;;  %v14083_v10 = vld [vmem:[#allocation128_spill] sm:$0xff]  ;;  %14084 = vst [vmem:[#allocation60_spill] sm:$0xff] %v12639_v61  ;;  %v14085_v43 = vld [vmem:[#allocation129_spill] sm:$0xff] }
 0xf78   :  { %5726 = vmatpush1.msra.mxu0 %v14079_v17  ;;  %7326 = vmatprep.subr.mxu1 %v12631_v46  ;;  %v12643_v17 = vld [vmem:[#allocation22 + $0x18] sm:$0xff] }
 0xf79   :  { %5727 = vmatprep.subr.mxu0 %v14081_v51  ;;  %7327 = vmatpush3.msra.mxu1 %v12635_v40  ;;  %14086 = vst [vmem:[#allocation61_spill] sm:$0xff] %v12643_v17  ;;  %v12650_v40 = vld [vmem:[#allocation22 + $0x90] sm:$0xff] }
 0xf7a   :  { %5728 = vmatpush1.msra.mxu0 %v14083_v10  ;;  %7328 = vmatprep.subr.mxu1 %v12639_v61  ;;  %14089 = vst [vmem:[#allocation62_spill] sm:$0xff] %v12650_v40  ;;  %v12654_v61 = vld [vmem:[#allocation22 + $0x10] sm:$0xff] }
 0xf7b   :  { %v8007_v16 = vpop.eup %8006  ;;  %5729 = vmatprep.subr.mxu0 %v14085_v43  ;;  %7329 = vmatpush3.msra.mxu1 %v12643_v17  ;;  %14090 = vst [vmem:[#allocation87_spill] sm:$0xff] %v12654_v61 }
 0xf7c   :  { %v5380_v51 = vsel %vm10711_vm7, %v8007_v16, %v12519_v53  ;;  %5730 = vmatpush1.msra.mxu0 %v14088_v48  ;;  %7330 = vmatprep.subr.mxu1 %v12650_v40  ;;  %v12661_v53 = vld [vmem:[#allocation22 + $0x88] sm:$0xff]  ;;  %v12668_v16 = vld [vmem:[#allocation22 + $0x80] sm:$0xff] }
 0xf7d   :  { %v8009_v10 = vpop.eup %8008  ;;  %5386 = vst [vmem:[#allocation26 + $0x38] sm:$0xff] %v5380_v51  ;;  %5764 = vmatmul.mubr.f32.vlgmr.msra.gmra.mxu0 %v12522_v31  ;;  %7331 = vmatpush3.msra.mxu1 %v12654_v61  ;;  %14091 = vst [vmem:[#allocation86_spill] sm:$0xff] %v12661_v53  ;;  %v12664_v48 = vld [vmem:[#allocation22 + $0x8] sm:$0xff]  ;;  %v14093_v31 = vld [vmem:[#allocation131_spill] sm:$0xff] }
 0xf7e   :  { %v5379_v43 = vsel %vm10711_vm7, %v8009_v10, %v12526_v15  ;;  %5769 = vmatprep.mubr.f32.mxu0 %v13482_v44  ;;  %7332 = vmatprep.subr.mxu1 %v12661_v53  ;;  %14092 = vst [vmem:[#allocation46_spill] sm:$0xff] %v12664_v48  ;;  %14094 = vst [vmem:[#allocation45_spill] sm:$0xff] %v12668_v16  ;;  %v12673_v15 = vld [vmem:[#allocation22] sm:$0xff]  ;;  %v14112_v53 = vld [vmem:[#allocation78_spill] sm:$0xff] }
 0xf7f   :  { %5385 = vst [vmem:[#allocation26 + $0x30] sm:$0xff] %v5379_v43  ;;  %7333 = vmatpush3.msra.mxu1 %v12664_v48  ;;  %7772 = vmatprep.subr.mxu0 %v14093_v31  ;;  %14095 = vst [vmem:[#allocation55_spill] sm:$0xff] %v12673_v15  ;;  %v8505_v51 = vld [vmem:[%s13030_s13 + $0x1e8] sm:$0xff]  ;;  %v14096_v10 = vld [vmem:[#allocation132_spill] sm:$0xff] }
 0xf80   :  { %7334 = vmatprep.subr.mxu1 %v12668_v16  ;;  %7773 = vmatpush3.msra.mxu0 %v14093_v31  ;;  %v14097_v43 = vld [vmem:[#allocation85_spill] sm:$0xff]  ;;  %v14098_v31 = vld [vmem:[#allocation84_spill] sm:$0xff]  ;;  %v5461_v16 = vpop.f32.mrf.mxu0  ;;  %v14113_v61 = vld [vmem:[#allocation67_spill] sm:$0xff] }
 0xf81   :  { %5770 = vmatmul.mubr.f32.gmra.mxu0 %v12535_v11  ;;  %7335 = vmatpush3.msra.mxu1 %v12673_v15  ;;  %v14099_v11 = vld [vmem:[#allocation133_spill] sm:$0xff]  ;;  %v14100_v15 = vld [vmem:[#allocation134_spill] sm:$0xff] }
 0xf82   :  { %6048 = vmatprep.subr.mxu1 %v8505_v51  ;;  %7774 = vmatprep.subr.mxu0 %v14096_v10  ;;  %v14101_v51 = vld [vmem:[#allocation135_spill] sm:$0xff] }
 0xf83   :  { %7775 = vmatpush3.msra.mxu0 %v14096_v10  ;;  %v14102_v10 = vld [vmem:[#allocation136_spill] sm:$0xff] }
 0xf84   :  { %7776 = vmatprep.subr.mxu0 %v14097_v43 }
 0xf85   :  { %7777 = vmatpush3.msra.mxu0 %v14097_v43  ;;  %v14103_v43 = vld [vmem:[#allocation137_spill] sm:$0xff] }
 0xf86   :  { %7778 = vmatprep.subr.mxu0 %v14098_v31 }
 0xf87   :  { %7779 = vmatpush3.msra.mxu0 %v14098_v31  ;;  %v14104_v31 = vld [vmem:[#allocation138_spill] sm:$0xff] }
 0xf88   :  { %7780 = vmatprep.subr.mxu0 %v14099_v11 }
 0xf89   :  { %7781 = vmatpush3.msra.mxu0 %v14099_v11  ;;  %v14105_v11 = vld [vmem:[#allocation139_spill] sm:$0xff] }
 0xf8a   :  { %7782 = vmatprep.subr.mxu0 %v14100_v15 }
 0xf8b   :  { %7783 = vmatpush3.msra.mxu0 %v14100_v15  ;;  %v14106_v15 = vld [vmem:[#allocation140_spill] sm:$0xff] }
 0xf8c   :  { %7784 = vmatprep.subr.mxu0 %v14101_v51 }
 0xf8d   :  { %7785 = vmatpush3.msra.mxu0 %v14101_v51  ;;  %v14107_v51 = vld [vmem:[#allocation141_spill] sm:$0xff] }
 0xf8e   :  { %7786 = vmatprep.subr.mxu0 %v14102_v10 }
 0xf8f   :  { %7787 = vmatpush3.msra.mxu0 %v14102_v10  ;;  %v14108_v10 = vld [vmem:[#allocation142_spill] sm:$0xff] }
 0xf90   :  { %7788 = vmatprep.subr.mxu0 %v14103_v43 }
 0xf91   :  { %7789 = vmatpush3.msra.mxu0 %v14103_v43  ;;  %v14109_v43 = vld [vmem:[#allocation143_spill] sm:$0xff] }
 0xf92   :  { %7790 = vmatprep.subr.mxu0 %v14104_v31 }
 0xf93   :  { %7791 = vmatpush3.msra.mxu0 %v14104_v31  ;;  %v14110_v31 = vld [vmem:[#allocation83_spill] sm:$0xff] }
 0xf94   :  { %7792 = vmatprep.subr.mxu0 %v14105_v11 }
 0xf95   :  { %7793 = vmatpush3.msra.mxu0 %v14105_v11  ;;  %v14111_v11 = vld [vmem:[#allocation82_spill] sm:$0xff] }
 0xf96   :  { %7794 = vmatprep.subr.mxu0 %v14106_v15 }
 0xf97   :  { %7795 = vmatpush3.msra.mxu0 %v14106_v15  ;;  %v5530_v15 = vpop.f32.mrf.mxu1 }
 0xf98   :  { %7796 = vmatprep.subr.mxu0 %v14107_v51  ;;  %v5531_v12 = vadd.f32 %v5530_v15, %v14116_v59 }
 0xf99   :  { %7797 = vmatpush3.msra.mxu0 %v14107_v51  ;;  %v5456_v51 = vadd.f32 %v12515_v20, %v14112_v53  ;;  %v14117_v20 = vld [vmem:[#allocation70_spill] sm:$0xff] }
 0xf9a   :  { %7798 = vmatprep.subr.mxu0 %v14108_v10 }
 0xf9b   :  { %7799 = vmatpush3.msra.mxu0 %v14108_v10  ;;  %v5532_v10 = vpop.f32.mrf.mxu1 }
 0xf9c   :  { %7800 = vmatprep.subr.mxu0 %v14109_v43 }
 0xf9d   :  { %7801 = vmatpush3.msra.mxu0 %v14109_v43  ;;  %v5462_v43 = vadd.f32 %v5461_v16, %v14112_v53  ;;  %v5536_v56 = vpop.f32.mrf.mxu1 }
 0xf9e   :  { %7802 = vmatprep.subr.mxu0 %v14110_v31 }
 0xf9f   :  { %7803 = vmatpush3.msra.mxu0 %v14110_v31  ;;  %v14115_v31 = vld [vmem:[#allocation69_spill] sm:$0xff] }
 0xfa0   :  { %6125 = vmatprep.subr.mxu0 %v14111_v11 }
0x101d   :  { %v5611_v48 = vpop.f32.mrf.mxu0 }
0x101e   :  { %v5776_v40 = vadd.f32 %v5611_v48, %v14113_v61 }
0x101f   :  { %v5613_v46 = vpop.f32.mrf.mxu0 }
0x1020   :  { %v5782_v17 = vadd.f32 %v5776_v40, %v5456_v51  ;;  %v5777_v28 = vadd.f32 %v5613_v46, %v14114_v13  ;;  %v5537_v40 = vadd.f32 %v5536_v56, %v14116_v59  ;;  %v5538_v13 = vpop.f32.mrf.mxu1 }
0x1021   :  { %v5617_v38 = vpop.f32.mrf.mxu0 }
0x1022   :  { %v6930_v57 = vmul.f32 -1.442695, %v5782_v17  ;;  %v5779_v63 = vadd.f32 %v5617_v38, %v14115_v31  ;;  %v5796_v61 = vadd.f32 %v5777_v28, %v5531_v12  ;;  %v5688_v31 = vpop.f32.mrf.mxu1 }
0x1023   :  { %v5619_v11 = vpop.f32.mrf.mxu0 }
0x1024   :  { %8010 = vpow2.f32 %v6930_v57  ;;  %v5783_v39 = vadd.f32 %v5779_v63, %v5462_v43  ;;  %v5780_v60 = vadd.f32 %v5619_v11, %v14117_v20  ;;  %v6932_v16 = vmul.f32 -1.442695, %v5796_v61  ;;  %v5690_v57 = vpop.f32.mrf.mxu1 }
0x1026   :  { %v6931_v48 = vmul.f32 -1.442695, %v5783_v39  ;;  %v5797_v51 = vadd.f32 %v5780_v60, %v5537_v40  ;;  %v5694_v43 = vpop.f32.mrf.mxu1  ;;  %v5824_v39 = vadd.f32 %v5690_v57, %v10360_v9 }
0x1028   :  { %8012 = vpow2.f32 %v6931_v48  ;;  %v6933_v17 = vmul.f32 -1.442695, %v5797_v51  ;;  %v5696_v11 = vpop.f32.mrf.mxu1  ;;  %v5533_v48 = vadd.f32 %v5532_v10, %v10353_v0 }
0x1029   :  { %8014 = vpow2.f32 %v6932_v16 }
0x102a   :  { %8016 = vpow2.f32 %v6933_v17  ;;  %v14118_v17 = vld [vmem:[#allocation50_spill] sm:$0xff] }
0x1031   :  { %v8011_v46 = vpop.eup %8010 }
0x1032   :  { %v5790_v38 = vadd.f32 1.0, %v8011_v46  ;;  %v5778_v46 = vadd.f32 %v5688_v31, %v14118_v17  ;;  %v8511_v17 = vld [vmem:[%s13030_s13 + $0x188] sm:$0xff] }
0x1034   :  { %8018 = vrcp.f32 %v5790_v38  ;;  %v5830_v38 = vmax.f32 %v5824_v39, 0.0  ;;  %v8506_v39 = vld [vmem:[%s13030_s13 + $0x1e0] sm:$0xff] }
0x1035   :  { %v8013_v15 = vpop.eup %8012 }
0x1036   :  { %v5791_v63 = vadd.f32 1.0, %v8013_v15  ;;  %v8015_v12 = vpop.eup %8014 }
0x1037   :  { %v8017_v28 = vpop.eup %8016  ;;  %v5804_v60 = vadd.f32 1.0, %v8015_v12 }
0x1038   :  { %8020 = vrcp.f32 %v5791_v63  ;;  %v5805_v15 = vadd.f32 1.0, %v8017_v28  ;;  %v5827_v63 = vadd.f32 %v5696_v11, %v10360_v9  ;;  %v8507_v11 = vld [vmem:[%s13030_s13 + $0x1c8] sm:$0xff] }
0x1039   :  { %8022 = vrcp.f32 %v5804_v60 }
0x103a   :  { %v5833_v60 = vmax.f32 %v5827_v63, 0.0  ;;  %v8515_v63 = vld [vmem:[%s13030_s13 + $0x148] sm:$0xff] }
0x103d   :  { %v5765_v56 = vpop.f32.mrf.mxu0 }
0x103e   :  { %v5825_v20 = vadd.f32 %v5765_v56, %v10215_v8  ;;  %v5539_v56 = vadd.f32 %v5538_v13, %v10353_v0  ;;  %v14119_v13 = vld [vmem:[#allocation49_spill] sm:$0xff] }
0x103f   :  { %v5767_v61 = vpop.f32.mrf.mxu0 }
0x1040   :  { %v5831_v40 = vmax.f32 %v5825_v20, 0.0  ;;  %v5826_v51 = vadd.f32 %v5767_v61, %v13653_v3 }
0x1041   :  { %v8019_v16 = vpop.eup %8018  ;;  %v5771_v57 = vpop.f32.mrf.mxu0 }
0x1042   :  { %v5810_v59 = vmul.f32 %v8019_v16, %v5533_v48  ;;  %v6936_v12 = vmul.f32 -1.442695, %v5826_v51  ;;  %v5828_v53 = vadd.f32 %v5771_v57, %v10215_v8  ;;  %5942 = vmatprep.mubr.f32.mxu1 %v5831_v40  ;;  %v8508_v40 = vld [vmem:[%s13030_s13 + $0x1c0] sm:$0xff]  ;;  %v8509_v51 = vld [vmem:[%s13030_s13 + $0x1a8] sm:$0xff] }
0x1043   :  { %v5773_v10 = vpop.f32.mrf.mxu0  ;;  %5943 = vmatmul.mubr.f32.vlgmr.msra.gmra.mxu1 %v5830_v38  ;;  %v8513_v38 = vld [vmem:[%s13030_s13 + $0x168] sm:$0xff]  ;;  %v8516_v57 = vld [vmem:[%s13030_s13 + $0x140] sm:$0xff] }
0x1044   :  { %v5812_v20 = vadd.f32 %v5810_v59, %v5778_v46  ;;  %8024 = vpow2.f32 %v6936_v12  ;;  %v5834_v61 = vmax.f32 %v5828_v53, 0.0  ;;  %v5829_v31 = vadd.f32 %v5773_v10, %v13653_v3  ;;  %6049 = vmatpush1.msra.mxu1 %v8506_v39  ;;  %v8512_v46 = vld [vmem:[%s13030_s13 + $0x180] sm:$0xff] }
0x1045   :  { %v8021_v28 = vpop.eup %8020  ;;  %8026 = vrcp.f32 %v5805_v15  ;;  %6050 = vmatprep.subr.mxu1 %v8507_v11  ;;  %v5781_v59 = vadd.f32 %v5694_v43, %v14119_v13  ;;  %v8510_v43 = vld [vmem:[%s13030_s13 + $0x1a0] sm:$0xff]  ;;  %v8521_v13 = vld [vmem:[%s13030_s13 + $0xe8] sm:$0xff] }
0x1046   :  { %8028 = vtanh.f32 %v5812_v20  ;;  %v5811_v48 = vmul.f32 %v8021_v28, %v5539_v56  ;;  %v6939_v53 = vmul.f32 -1.442695, %v5829_v31  ;;  %6051 = vmatpush1.msra.mxu1 %v8508_v40  ;;  %5947 = vmatprep.mubr.f32.mxu1 %v5834_v61  ;;  %v8514_v15 = vld [vmem:[%s13030_s13 + $0x160] sm:$0xff]  ;;  %v8023_v12 = vpop.eup %8022  ;;  %v8517_v56 = vld [vmem:[%s13030_s13 + $0x128] sm:$0xff] }
0x1047   :  { %6052 = vmatprep.subr.mxu1 %v8509_v51  ;;  %5948 = vmatmul.mubr.f32.gmra.mxu1 %v5833_v60  ;;  %v8518_v10 = vld [vmem:[%s13030_s13 + $0x120] sm:$0xff]  ;;  %v8519_v61 = vld [vmem:[%s13030_s13 + $0x108] sm:$0xff]  ;;  %v5816_v60 = vsub.f32 1.0, %v8023_v12 }
0x1048   :  { %v5813_v16 = vadd.f32 %v5811_v48, %v5781_v59  ;;  %8030 = vpow2.f32 %v6939_v53  ;;  %6053 = vmatpush1.msra.mxu1 %v8510_v43  ;;  %6112 = vmatprep.mubr.f32.mxu1 %v13482_v44  ;;  %v8520_v28 = vld [vmem:[%s13030_s13 + $0x100] sm:$0xff]  ;;  %v5820_v53 = vmul.f32 %v8023_v12, %v12170_v41  ;;  %v8523_v51 = vld [vmem:[%s13030_s13 + $0xc8] sm:$0xff] }
0x1049   :  { %6054 = vmatprep.subr.mxu1 %v8511_v17  ;;  %v8522_v59 = vld [vmem:[%s13030_s13 + $0xe0] sm:$0xff]  ;;  %v8525_v41 = vld [vmem:[%s13030_s13 + $0xa8] sm:$0xff] }
0x104a   :  { %8032 = vtanh.f32 %v5813_v16  ;;  %6055 = vmatpush1.msra.mxu1 %v8512_v46  ;;  %v8524_v43 = vld [vmem:[%s13030_s13 + $0xc0] sm:$0xff]  ;;  %v8527_v12 = vld [vmem:[%s13030_s13 + $0x88] sm:$0xff] }
0x104b   :  { %6056 = vmatprep.subr.mxu1 %v8513_v38 }
0x104c   :  { %6057 = vmatpush1.msra.mxu1 %v8514_v15  ;;  %v8526_v15 = vld [vmem:[%s13030_s13 + $0xa0] sm:$0xff] }
0x104d   :  { %6058 = vmatprep.subr.mxu1 %v8515_v63 }
0x104e   :  { %6059 = vmatpush1.msra.mxu1 %v8516_v57 }
0x104f   :  { %6060 = vmatprep.subr.mxu1 %v8517_v56  ;;  %v8528_v56 = vld [vmem:[%s13030_s13 + $0x80] sm:$0xff] }
0x1050   :  { %6061 = vmatpush1.msra.mxu1 %v8518_v10 }
0x1051   :  { %v8025_v20 = vpop.eup %8024  ;;  %6062 = vmatprep.subr.mxu1 %v8519_v61  ;;  %v8531_v61 = vld [vmem:[%s13030_s13 + $0x48] sm:$0xff] }
0x1052   :  { %v8027_v31 = vpop.eup %8026  ;;  %v5856_v39 = vadd.f32 1.0, %v8025_v20  ;;  %6063 = vmatpush1.msra.mxu1 %v8520_v28  ;;  %v8529_v20 = vld [vmem:[%s13030_s13 + $0x68] sm:$0xff]  ;;  %v8534_v28 = vld [vmem:[%s13030_s13 + $0x20] sm:$0xff] }
0x1053   :  { %v8029_v11 = vpop.eup %8028  ;;  %6064 = vmatprep.subr.mxu1 %v8521_v13  ;;  %v5817_v46 = vsub.f32 1.0, %v8027_v31  ;;  %v5821_v57 = vmul.f32 %v8027_v31, %v12177_v19  ;;  %v8530_v19 = vld [vmem:[%s13030_s13 + $0x60] sm:$0xff] }
0x1054   :  { %8034 = vrcp.f32 %v5856_v39  ;;  %6065 = vmatpush1.msra.mxu1 %v8522_v59  ;;  %v5818_v48 = vmul.f32 %v8029_v11, %v5816_v60  ;;  %v8532_v31 = vld [vmem:[%s13030_s13 + $0x40] sm:$0xff]  ;;  %v8533_v39 = vld [vmem:[%s13030_s13 + $0x28] sm:$0xff] }
0x1055   :  { %v8031_v40 = vpop.eup %8030  ;;  %6066 = vmatprep.subr.mxu1 %v8523_v51  ;;  %v8535_v11 = vld [vmem:[%s13030_s13 + $0x8] sm:$0xff]  ;;  %v8536_v13 = vld [vmem:[%s13030_s13] sm:$0xff]  ;;  %s8999_s13 = smov [#allocation25]  }
0x1056   :  { %v5859_v16 = vadd.f32 1.0, %v8031_v40  ;;  %6067 = vmatpush1.msra.mxu1 %v8524_v43  ;;  %v12788_v17 = vadd.f32 %v5820_v53, %v5818_v48  ;;  %v8537_v59 = vld [vmem:[#allocation19 + $0x2d8] sm:$0xff]  ;;  %v8538_v48 = vld [vmem:[#allocation19 + $0x2d0] sm:$0xff]  ;;  %v8539_v40 = vld [vmem:[#allocation19 + $0x2a8] sm:$0xff]  ;;  %s6716_s28 = sshll.u32 %s8999_s13, 4  ;;  %s6717_s28 = int_to_ptr.vmem [resolvable:$true] %s6716_s28 }
0x1057   :  { %v8033_v38 = vpop.eup %8032  ;;  %6068 = vmatprep.subr.mxu1 %v8525_v41  ;;  %v8540_v51 = vld [vmem:[#allocation19 + $0x2a0] sm:$0xff]  ;;  %v8542_v43 = vld [vmem:[#allocation19 + $0x270] sm:$0xff]  ;;  %s8898_s6 = scalar_lea.vmem %s6717_s28, 1536  ;;  %p8903_p1 = scmp.lt.s32.totalorder %s6717_s28, %s6717_s28 }
0x1058   :  { %8036 = vrcp.f32 %v5859_v16  ;;  %6069 = vmatpush1.msra.mxu1 %v8526_v15  ;;  %v5819_v63 = vmul.f32 %v8033_v38, %v5817_v46  ;;  %v8541_v16 = vld [vmem:[#allocation19 + $0x278] sm:$0xff]  ;;  %v8543_v46 = vld [vmem:[#allocation19 + $0x248] sm:$0xff]  ;;  %v8544_v38 = vld [vmem:[#allocation19 + $0x240] sm:$0xff]  ;;  %p8899_p0 = scmp.ne.s32.totalorder %s6717_s28, %s8898_s6  ;;  %p8904_p2 = scmp.lt.s32.totalorder %s8898_s6, %s8898_s6 }
0x1059   :  { %6070 = vmatprep.subr.mxu1 %v8527_v12  ;;  %v14128_v41 = vld [vmem:[#allocation151_spill] sm:$0xff]  ;;  %v14129_v15 = vld [vmem:[#allocation152_spill] sm:$0xff] }
0x105a   :  { %6071 = vmatpush1.msra.mxu1 %v8528_v56  ;;  %v12803_v10 = vadd.f32 %v5821_v57, %v5819_v63  ;;  %v14130_v63 = vld [vmem:[#allocation153_spill] sm:$0xff]  ;;  %v14131_v57 = vld [vmem:[#allocation154_spill] sm:$0xff]  ;;  %v14132_v12 = vld [vmem:[#allocation88_spill] sm:$0xff]  ;;  %p8905_p3 = por %p8904_p2, %p8903_p1 }
0x105b   :  { %6072 = vmatprep.subr.mxu1 %v8529_v20  ;;  %v14133_v56 = vld [vmem:[#allocation89_spill] sm:$0xff]  ;;  %v14134_v20 = vld [vmem:[#allocation90_spill] sm:$0xff] }
0x105c   :  { %6073 = vmatpush1.msra.mxu1 %v8530_v19  ;;  %v14135_v19 = vld [vmem:[#allocation91_spill] sm:$0xff]  ;;  %p8906_p4 = pnand %p8905_p3, %p8899_p0 }
0x105d   :  { %6074 = vmatprep.subr.mxu1 %v8531_v61  ;;  %v14136_v61 = vld [vmem:[#allocation92_spill] sm:$0xff] }
0x105e   :  { %6075 = vmatpush1.msra.mxu1 %v8532_v31  ;;  %v14137_v31 = vld [vmem:[#allocation93_spill] sm:$0xff] }
0x105f   :  { %6076 = vmatprep.subr.mxu1 %v8533_v39  ;;  %v14138_v39 = vld [vmem:[#allocation94_spill] sm:$0xff] }
0x1060   :  { %6077 = vmatpush1.msra.mxu1 %v8534_v28  ;;  %v14139_v28 = vld [vmem:[#allocation63_spill] sm:$0xff] }
0x1061   :  { %v8035_v60 = vpop.eup %8034  ;;  %6078 = vmatprep.subr.mxu1 %v8535_v11  ;;  %v14141_v11 = vld [vmem:[#allocation65_spill] sm:$0xff] }
0x1062   :  { %6079 = vmatpush1.msra.mxu1 %v8536_v13  ;;  %7804 = vmatprep.mubr.f32.mxu0 %v8035_v60  ;;  %v14140_v60 = vld [vmem:[#allocation64_spill] sm:$0xff]  ;;  %v14142_v13 = vld [vmem:[#allocation66_spill] sm:$0xff] }
0x1063   :  { %6113 = vmatmul.mubr.f32.vlgmr.msra.gmra.mxu1 %v12788_v17  ;;  %6206 = vmatprep.subr.mxu1 %v8537_v59  ;;  %v14143_v59 = vld [vmem:[#allocation48_spill] sm:$0xff] }
0x1064   :  { %6118 = vmatprep.mubr.f32.mxu1 %v13482_v44  ;;  %6207 = vmatpush1.msra.mxu1 %v8538_v48  ;;  %v14144_v48 = vld [vmem:[#allocation47_spill] sm:$0xff] }
0x1065   :  { %v8037_v53 = vpop.eup %8036  ;;  %6208 = vmatprep.subr.mxu1 %v8539_v40  ;;  %v14146_v40 = vld [vmem:[#allocation96_spill] sm:$0xff] }
0x1066   :  { %7805 = vmatmul.mubr.f32.vlgmr.msra.gmra.mxu0 %v8037_v53  ;;  %6209 = vmatpush1.msra.mxu1 %v8540_v51  ;;  %v14145_v53 = vld [vmem:[#allocation95_spill] sm:$0xff]  ;;  %v14147_v51 = vld [vmem:[#allocation97_spill] sm:$0xff] }
0x1067   :  { %6119 = vmatmul.mubr.f32.gmra.mxu1 %v12803_v10  ;;  %6126 = vmatpush1.msra.mxu0 %v12197_v32  ;;  %v8545_v32 = vld [vmem:[#allocation19 + $0x218] sm:$0xff] }
0x1068   :  { %6127 = vmatprep.subr.mxu0 %v12203_v35  ;;  %6189 = vmatprep.mubr.f32.mxu0 %v13482_v44  ;;  %v8546_v35 = vld [vmem:[#allocation19 + $0x210] sm:$0xff] }
0x1069   :  { %6128 = vmatpush1.msra.mxu0 %v12210_v25  ;;  %6210 = vmatprep.subr.mxu1 %v8541_v16  ;;  %v8547_v25 = vld [vmem:[#allocation19 + $0x1e8] sm:$0xff] }
0x106a   :  { %6129 = vmatprep.subr.mxu0 %v12217_v58  ;;  %6211 = vmatpush1.msra.mxu1 %v8542_v43  ;;  %v8548_v58 = vld [vmem:[#allocation19 + $0x1e0] sm:$0xff]  ;;  %v14148_v16 = vld [vmem:[#allocation98_spill] sm:$0xff]  ;;  %v14149_v43 = vld [vmem:[#allocation99_spill] sm:$0xff] }
0x106b   :  { %6130 = vmatpush1.msra.mxu0 %v12224_v29  ;;  %6212 = vmatprep.subr.mxu1 %v8543_v46  ;;  %v8549_v29 = vld [vmem:[#allocation19 + $0x1b8] sm:$0xff] }
0x106c   :  { %6131 = vmatprep.subr.mxu0 %v12231_v1  ;;  %6213 = vmatpush1.msra.mxu1 %v8544_v38  ;;  %v8550_v1 = vld [vmem:[#allocation19 + $0x1b0] sm:$0xff]  ;;  %v14150_v46 = vld [vmem:[#allocation100_spill] sm:$0xff] }
0x106d   :  { %6132 = vmatpush1.msra.mxu0 %v12238_v5  ;;  %6214 = vmatprep.subr.mxu1 %v8545_v32  ;;  %v8551_v5 = vld [vmem:[#allocation19 + $0x188] sm:$0xff] }
0x106e   :  { %6133 = vmatprep.subr.mxu0 %v12245_v21  ;;  %6215 = vmatpush1.msra.mxu1 %v8546_v35  ;;  %v8552_v21 = vld [vmem:[#allocation19 + $0x180] sm:$0xff] }
0x106f   :  { %6134 = vmatpush1.msra.mxu0 %v12252_v30  ;;  %6216 = vmatprep.subr.mxu1 %v8547_v25  ;;  %v8553_v30 = vld [vmem:[#allocation19 + $0x158] sm:$0xff] }
0x1070   :  { %6135 = vmatprep.subr.mxu0 %v12259_v22  ;;  %6217 = vmatpush1.msra.mxu1 %v8548_v58  ;;  %v8554_v22 = vld [vmem:[#allocation19 + $0x150] sm:$0xff] }
0x1071   :  { %6136 = vmatpush1.msra.mxu0 %v12266_v23  ;;  %6218 = vmatprep.subr.mxu1 %v8549_v29  ;;  %v8555_v23 = vld [vmem:[#allocation19 + $0x128] sm:$0xff] }
0x1072   :  { %6137 = vmatprep.subr.mxu0 %v12273_v27  ;;  %6219 = vmatpush1.msra.mxu1 %v8550_v1  ;;  %v8556_v27 = vld [vmem:[#allocation19 + $0x120] sm:$0xff] }
0x1073   :  { %6138 = vmatpush1.msra.mxu0 %v12280_v36  ;;  %6220 = vmatprep.subr.mxu1 %v8551_v5  ;;  %v8557_v36 = vld [vmem:[#allocation19 + $0xf8] sm:$0xff] }
0x1074   :  { %6139 = vmatprep.subr.mxu0 %v12287_v42  ;;  %6221 = vmatpush1.msra.mxu1 %v8552_v21  ;;  %v8558_v42 = vld [vmem:[#allocation19 + $0xf0] sm:$0xff] }
0x1075   :  { %6140 = vmatpush1.msra.mxu0 %v12294_v52  ;;  %6222 = vmatprep.subr.mxu1 %v8553_v30  ;;  %v8559_v52 = vld [vmem:[#allocation19 + $0xc8] sm:$0xff]  ;;  %v14151_v5 = vld [vmem:[#allocation75_spill] sm:$0xff] }
0x1076   :  { %6141 = vmatprep.subr.mxu0 %v12301_v55  ;;  %6223 = vmatpush1.msra.mxu1 %v8554_v22  ;;  %v8560_v55 = vld [vmem:[#allocation19 + $0xc0] sm:$0xff] }
0x1077   :  { %6142 = vmatpush1.msra.mxu0 %v12308_v18  ;;  %6224 = vmatprep.subr.mxu1 %v8555_v23  ;;  %v8561_v18 = vld [vmem:[#allocation19 + $0x98] sm:$0xff]  ;;  %v12905_v22 = vld [vmem:[#allocation23] ss:$0 sm:$0xff] }
0x1078   :  { %6143 = vmatprep.subr.mxu0 %v12315_v33  ;;  %6225 = vmatpush1.msra.mxu1 %v8556_v27  ;;  %v8562_v33 = vld [vmem:[#allocation19 + $0x90] sm:$0xff] }
0x1079   :  { %6144 = vmatpush1.msra.mxu0 %v12322_v62  ;;  %6226 = vmatprep.subr.mxu1 %v8557_v36  ;;  %v8563_v62 = vld [vmem:[#allocation19 + $0x68] sm:$0xff] }
0x107a   :  { %6145 = vmatprep.subr.mxu0 %v12329_v50  ;;  %6227 = vmatpush1.msra.mxu1 %v8558_v42  ;;  %v8564_v50 = vld [vmem:[#allocation19 + $0x60] sm:$0xff]  ;;  %v14152_v27 = vld [vmem:[#allocation114_spill] sm:$0xff] }
0x107b   :  { %6146 = vmatpush1.msra.mxu0 %v12336_v26  ;;  %6228 = vmatprep.subr.mxu1 %v8559_v52  ;;  %v8565_v26 = vld [vmem:[#allocation19 + $0x38] sm:$0xff] }
0x107c   :  { %6147 = vmatprep.subr.mxu0 %v12343_v45  ;;  %6229 = vmatpush1.msra.mxu1 %v8560_v55  ;;  %v8566_v45 = vld [vmem:[#allocation19 + $0x30] sm:$0xff] }
0x107d   :  { %6148 = vmatpush1.msra.mxu0 %v12350_v14  ;;  %6230 = vmatprep.subr.mxu1 %v8561_v18  ;;  %v8567_v14 = vld [vmem:[#allocation19 + $0x8] sm:$0xff] }
0x107e   :  { %6149 = vmatprep.subr.mxu0 %v12357_v7  ;;  %6231 = vmatpush1.msra.mxu1 %v8562_v33  ;;  %v8568_v7 = vld [vmem:[#allocation19] sm:$0xff] }
0x107f   :  { %6150 = vmatpush1.msra.mxu0 %v12364_v49  ;;  %6232 = vmatprep.subr.mxu1 %v8563_v62  ;;  %v14120_v49 = vld [vmem:[#allocation76_spill] sm:$0xff] }
0x1080   :  { %6151 = vmatprep.subr.mxu0 %v12371_v54  ;;  %6233 = vmatpush1.msra.mxu1 %v8564_v50  ;;  %v8569_v54 = vld [vmem:[#allocation19 + $0x2f8] sm:$0xff] }
0x1081   :  { %6152 = vmatpush1.msra.mxu0 %v12378_v37  ;;  %6234 = vmatprep.subr.mxu1 %v8565_v26  ;;  %v14121_v37 = vld [vmem:[#allocation144_spill] sm:$0xff] }
0x1082   :  { %6153 = vmatprep.subr.mxu0 %v12385_v47  ;;  %6235 = vmatpush1.msra.mxu1 %v8566_v45  ;;  %v14122_v47 = vld [vmem:[#allocation145_spill] sm:$0xff] }
0x1083   :  { %6154 = vmatpush1.msra.mxu0 %v12392_v2  ;;  %6236 = vmatprep.subr.mxu1 %v8567_v14  ;;  %v14123_v2 = vld [vmem:[#allocation146_spill] sm:$0xff]  ;;  %v14153_v14 = vld [vmem:[#allocation113_spill] sm:$0xff] }
0x1084   :  { %6155 = vmatprep.subr.mxu0 %v12399_v34  ;;  %6237 = vmatpush1.msra.mxu1 %v8568_v7  ;;  %v14124_v34 = vld [vmem:[#allocation147_spill] sm:$0xff] }
0x1085   :  { %6156 = vmatpush1.msra.mxu0 %v12406_v4  ;;  %6270 = vmatprep.mubr.f32.mxu1 %v13482_v44  ;;  %v14125_v4 = vld [vmem:[#allocation148_spill] sm:$0xff] }
0x1086   :  { %6190 = vmatmul.mubr.f32.vlgmr.msra.gmra.mxu0 %v12788_v17  ;;  %6283 = vmatprep.subr.mxu0 %v12411_v24  ;;  %v14126_v24 = vld [vmem:[#allocation149_spill] sm:$0xff] }
0x1087   :  { %6195 = vmatprep.mubr.f32.mxu0 %v13482_v44  ;;  %6284 = vmatpush1.msra.mxu0 %v12415_v6  ;;  %v14127_v6 = vld [vmem:[#allocation150_spill] sm:$0xff] }
0x1088   :  { %6285 = vmatprep.subr.mxu0 %v14120_v49  ;;  %6360 = vmatprep.subr.mxu1 %v8569_v54  ;;  %v8571_v54 = vld [vmem:[#allocation19 + $0x2f0] sm:$0xff] }
0x1089   :  { %6286 = vmatpush1.msra.mxu0 %v14121_v37 }
0x108a   :  { %6196 = vmatmul.mubr.f32.gmra.mxu0 %v12803_v10  ;;  %6287 = vmatprep.subr.mxu0 %v14122_v47  ;;  %v8572_v47 = vld [vmem:[#allocation19 + $0x2c8] sm:$0xff] }
0x108b   :  { %6288 = vmatpush1.msra.mxu0 %v14123_v2  ;;  %6347 = vmatprep.mubr.f32.mxu0 %v13482_v44  ;;  %v8573_v2 = vld [vmem:[#allocation19 + $0x2c0] sm:$0xff] }
0x108c   :  { %6289 = vmatprep.subr.mxu0 %v14124_v34  ;;  %v14154_v34 = vld [vmem:[#allocation101_spill] sm:$0xff] }
0x108d   :  { %6290 = vmatpush1.msra.mxu0 %v14125_v4  ;;  %v8574_v4 = vld [vmem:[#allocation19 + $0x298] sm:$0xff] }
0x108e   :  { %6291 = vmatprep.subr.mxu0 %v14126_v24  ;;  %v8575_v24 = vld [vmem:[#allocation19 + $0x290] sm:$0xff] }
0x108f   :  { %6292 = vmatpush1.msra.mxu0 %v14127_v6  ;;  %v8576_v6 = vld [vmem:[#allocation19 + $0x268] sm:$0xff] }
0x1090   :  { %6293 = vmatprep.subr.mxu0 %v14128_v41  ;;  %v8577_v41 = vld [vmem:[#allocation19 + $0x260] sm:$0xff] }
0x1091   :  { %6294 = vmatpush1.msra.mxu0 %v14129_v15  ;;  %v14155_v15 = vld [vmem:[#allocation102_spill] sm:$0xff] }
0x1092   :  { %6295 = vmatprep.subr.mxu0 %v14130_v63  ;;  %v8578_v63 = vld [vmem:[#allocation19 + $0x238] sm:$0xff] }
0x1093   :  { %6296 = vmatpush1.msra.mxu0 %v14131_v57  ;;  %v14156_v57 = vld [vmem:[#allocation103_spill] sm:$0xff] }
0x1094   :  { %6297 = vmatprep.subr.mxu0 %v14132_v12  ;;  %v8579_v12 = vld [vmem:[#allocation19 + $0x230] sm:$0xff] }
0x1095   :  { %6298 = vmatpush1.msra.mxu0 %v14133_v56  ;;  %v14157_v56 = vld [vmem:[#allocation104_spill] sm:$0xff] }
0x1096   :  { %6299 = vmatprep.subr.mxu0 %v14134_v20  ;;  %v8580_v20 = vld [vmem:[#allocation19 + $0x208] sm:$0xff] }
0x1097   :  { %6300 = vmatpush1.msra.mxu0 %v14135_v19  ;;  %v14158_v19 = vld [vmem:[#allocation105_spill] sm:$0xff] }
0x1098   :  { %6301 = vmatprep.subr.mxu0 %v14136_v61  ;;  %v8581_v61 = vld [vmem:[#allocation19 + $0x200] sm:$0xff] }
0x1099   :  { %6302 = vmatpush1.msra.mxu0 %v14137_v31  ;;  %v14159_v31 = vld [vmem:[#allocation106_spill] sm:$0xff] }
0x109a   :  { %6303 = vmatprep.subr.mxu0 %v14138_v39  ;;  %v8582_v39 = vld [vmem:[#allocation19 + $0x1d8] sm:$0xff] }
0x109b   :  { %6304 = vmatpush1.msra.mxu0 %v14139_v28  ;;  %v14160_v28 = vld [vmem:[#allocation107_spill] sm:$0xff] }
0x109c   :  { %6305 = vmatprep.subr.mxu0 %v14140_v60  ;;  %v8583_v60 = vld [vmem:[#allocation19 + $0x1d0] sm:$0xff] }
0x109d   :  { %6306 = vmatpush1.msra.mxu0 %v14141_v11  ;;  %v14161_v11 = vld [vmem:[#allocation108_spill] sm:$0xff] }
0x109e   :  { %6307 = vmatprep.subr.mxu0 %v14142_v13 }
0x109f   :  { %6308 = vmatpush1.msra.mxu0 %v14143_v59  ;;  %v8584_v59 = vld [vmem:[#allocation19 + $0x1a8] sm:$0xff] }
0x10a0   :  { %6309 = vmatprep.subr.mxu0 %v14144_v48  ;;  %v14162_v48 = vld [vmem:[#allocation109_spill] sm:$0xff] }
0x10a1   :  { %6310 = vmatpush1.msra.mxu0 %v14145_v53 }
0x10a2   :  { %6311 = vmatprep.subr.mxu0 %v14146_v40  ;;  %v8585_v40 = vld [vmem:[#allocation19 + $0x1a0] sm:$0xff] }
0x10a3   :  { %6312 = vmatpush1.msra.mxu0 %v14147_v51  ;;  %v14163_v51 = vld [vmem:[#allocation110_spill] sm:$0xff] }
0x10a4   :  { %6313 = vmatprep.subr.mxu0 %v14148_v16 }
0x10a5   :  { %6314 = vmatpush1.msra.mxu0 %v14149_v43  ;;  %v8586_v43 = vld [vmem:[#allocation19 + $0x178] sm:$0xff] }
0x10a6   :  { %7360 = vmatprep.subr.mxu0 %v14150_v46  ;;  %v14164_v46 = vld [vmem:[#allocation111_spill] sm:$0xff] }
0x1103   :  { %v7336_v38 = vpop.f32.mrf.mxu1 }
0x1105   :  { %v7337_v32 = vpop.f32.mrf.mxu1 }
0x1106   :  { %v7338_v29 = vadd.f32 %v7337_v32, %v7336_v38  ;;  %v8587_v32 = vld [vmem:[#allocation19 + $0x170] sm:$0xff] }
0x1107   :  { %v7339_v35 = vpop.f32.mrf.mxu1 }
0x1108   :  { %v5945_v18 = vadd.f32 %v12905_v22, %v7338_v29  ;;  %v8589_v29 = vld [vmem:[#allocation19 + $0x140] sm:$0xff] }
0x1109   :  { %v7340_v25 = vpop.f32.mrf.mxu1 }
0x110a   :  { %v7341_v58 = vadd.f32 %v7340_v25, %v7339_v35  ;;  %v14165_v35 = vld [vmem:[#allocation112_spill] sm:$0xff]  ;;  %v8588_v25 = vld [vmem:[#allocation19 + $0x148] sm:$0xff] }
0x110c   :  { %v5950_v23 = vadd.f32 %v12905_v22, %v7341_v58  ;;  %v14166_v58 = vld [vmem:[#allocation155_spill] sm:$0xff] }
0x1123   :  { %v6114_v1 = vpop.f32.mrf.mxu1 }
0x1124   :  { %v6115_v21 = vadd.f32 %v6114_v1, %v14151_v5  ;;  %v14167_v1 = vld [vmem:[#allocation156_spill] sm:$0xff] }
0x1125   :  { %v12903_v30 = vpop.f32.mrf.mxu1 }
0x1126   :  { %v6202_v36 = vadd.f32 %v6115_v21, %v14152_v27  ;;  %v7806_v42 = vpop.f32.mrf.mxu0  ;;  %v14168_v21 = vld [vmem:[#allocation157_spill] sm:$0xff]  ;;  %v14169_v27 = vld [vmem:[#allocation158_spill] sm:$0xff] }
0x1127   :  { %v12909_v52 = vadd.f32 %v7806_v42, %v5950_v23  ;;  %v6120_v55 = vpop.f32.mrf.mxu1  ;;  %v8591_v23 = vld [vmem:[#allocation19 + $0x110] sm:$0xff] }
0x1128   :  { %v12912_v33 = vmax.f32 %v6202_v36, 0.0  ;;  %v6121_v62 = vadd.f32 %v6120_v55, %v14151_v5  ;;  %v6019_v50 = vpop.f32.mrf.mxu0  ;;  %v8590_v5 = vld [vmem:[#allocation19 + $0x118] sm:$0xff]  ;;  %v8592_v36 = vld [vmem:[#allocation19 + $0xe8] sm:$0xff]  ;;  %v8593_v55 = vld [vmem:[#allocation19 + $0xe0] sm:$0xff] }
0x1129   :  { %v6941_v26 = vmul.f32 -1.442695, %v12909_v52  ;;  %v12916_v45 = vadd.f32 %v6019_v50, %v5945_v18  ;;  %v14170_v42 = vld [vmem:[#allocation159_spill] sm:$0xff]  ;;  %v14171_v18 = vld [vmem:[#allocation160_spill] sm:$0xff]  ;;  %v14172_v50 = vld [vmem:[#allocation161_spill] sm:$0xff] }
0x112a   :  { %6704 = vst [vmem:[#allocation25 + $0x50] sm:$0xff] %v12912_v33  ;;  %v6203_v7 = vadd.f32 %v6121_v62, %v14153_v14  ;;  %6271 = vmatmul.mubr.f32.vlgmr.msra.gmra.mxu1 %v12912_v33  ;;  %6348 = vmatmul.mubr.f32.vlgmr.msra.gmra.mxu0 %v12912_v33  ;;  %v8594_v62 = vld [vmem:[#allocation19 + $0xb8] sm:$0xff]  ;;  %v14173_v14 = vld [vmem:[#allocation162_spill] sm:$0xff] }
0x112b   :  { %8038 = vpow2.f32 %v6941_v26  ;;  %v6940_v49 = vmul.f32 -1.442695, %v12916_v45  ;;  %6361 = vmatpush1.msra.mxu1 %v8571_v54  ;;  %6276 = vmatprep.mubr.f32.mxu1 %v13482_v44  ;;  %v8595_v26 = vld [vmem:[#allocation19 + $0xb0] sm:$0xff]  ;;  %v8597_v54 = vld [vmem:[#allocation19 + $0x80] sm:$0xff] }
0x112c   :  { %v12924_v37 = vmax.f32 %v6203_v7, 0.0  ;;  %6362 = vmatprep.subr.mxu1 %v8572_v47  ;;  %6353 = vmatprep.mubr.f32.mxu0 %v13482_v44  ;;  %v8596_v7 = vld [vmem:[#allocation19 + $0x88] sm:$0xff]  ;;  %v14175_v47 = vld [vmem:[#allocation164_spill] sm:$0xff] }
0x112d   :  { %8040 = vpow2.f32 %v6940_v49  ;;  %6363 = vmatpush1.msra.mxu1 %v8573_v2  ;;  %7361 = vmatpush3.msra.mxu0 %v14154_v34  ;;  %v14174_v49 = vld [vmem:[#allocation163_spill] sm:$0xff] }
0x112e   :  { %6705 = vst [vmem:[#allocation25 + $0x58] sm:$0xff] %v12924_v37  ;;  %6364 = vmatprep.subr.mxu1 %v8574_v4  ;;  %6277 = vmatmul.mubr.f32.gmra.mxu1 %v12924_v37  ;;  %v8598_v2 = vld [vmem:[#allocation19 + $0x58] sm:$0xff]  ;;  %v8599_v4 = vld [vmem:[#allocation19 + $0x50] sm:$0xff] }
0x112f   :  { %6354 = vmatmul.mubr.f32.gmra.mxu0 %v12924_v37  ;;  %6365 = vmatpush1.msra.mxu1 %v8575_v24  ;;  %v14176_v34 = vld [vmem:[#allocation59_spill] sm:$0xff]  ;;  %v14177_v24 = vld [vmem:[#allocation60_spill] sm:$0xff] }
0x1130   :  { %6366 = vmatprep.subr.mxu1 %v8576_v6  ;;  %6424 = vmatprep.mubr.f32.mxu1 %v13482_v44 }
0x1131   :  { %6367 = vmatpush1.msra.mxu1 %v8577_v41  ;;  %7362 = vmatprep.subr.mxu0 %v14155_v15  ;;  %v8600_v41 = vld [vmem:[#allocation19 + $0x28] sm:$0xff] }
0x1132   :  { %6368 = vmatprep.subr.mxu1 %v8578_v63  ;;  %7363 = vmatpush3.msra.mxu0 %v14156_v57  ;;  %v14178_v15 = vld [vmem:[#allocation61_spill] sm:$0xff] }
0x1133   :  { %6369 = vmatpush1.msra.mxu1 %v8579_v12  ;;  %7364 = vmatprep.subr.mxu0 %v14157_v56  ;;  %v8601_v12 = vld [vmem:[#allocation19 + $0x20] sm:$0xff]  ;;  %v14180_v56 = vld [vmem:[#allocation62_spill] sm:$0xff] }
0x1134   :  { %6370 = vmatprep.subr.mxu1 %v8580_v20  ;;  %7365 = vmatpush3.msra.mxu0 %v14158_v19  ;;  %v14181_v19 = vld [vmem:[#allocation87_spill] sm:$0xff] }
0x1135   :  { %6371 = vmatpush1.msra.mxu1 %v8581_v61  ;;  %7366 = vmatprep.subr.mxu0 %v14159_v31  ;;  %v14182_v31 = vld [vmem:[#allocation86_spill] sm:$0xff] }
0x1136   :  { %6372 = vmatprep.subr.mxu1 %v8582_v39  ;;  %7367 = vmatpush3.msra.mxu0 %v14160_v28  ;;  %v8602_v39 = vld [vmem:[#allocation22 + $0x178] sm:$0xff]  ;;  %v14184_v28 = vld [vmem:[#allocation45_spill] sm:$0xff] }
0x1137   :  { %6373 = vmatpush1.msra.mxu1 %v8583_v60  ;;  %7368 = vmatprep.subr.mxu0 %v14161_v11  ;;  %v8603_v60 = vld [vmem:[#allocation22 + $0x170] sm:$0xff]  ;;  %v8606_v11 = vld [vmem:[#allocation22 + $0x158] sm:$0xff] }
0x1138   :  { %v8039_v13 = vpop.eup %8038  ;;  %6374 = vmatprep.subr.mxu1 %v8584_v59  ;;  %7369 = vmatpush3.msra.mxu0 %v14162_v48  ;;  %v8608_v59 = vld [vmem:[#allocation22 + $0x148] sm:$0xff]  ;;  %v8610_v48 = vld [vmem:[#allocation22 + $0x138] sm:$0xff] }
0x1139   :  { %v6035_v53 = vadd.f32 1.0, %v8039_v13  ;;  %6375 = vmatpush1.msra.mxu1 %v8585_v40  ;;  %7370 = vmatprep.subr.mxu0 %v14163_v51  ;;  %v8607_v13 = vld [vmem:[#allocation22 + $0x150] sm:$0xff]  ;;  %v8612_v40 = vld [vmem:[#allocation22 + $0x128] sm:$0xff]  ;;  %v8613_v51 = vld [vmem:[#allocation22 + $0x120] sm:$0xff] }
0x113a   :  { %v8041_v16 = vpop.eup %8040  ;;  %6376 = vmatprep.subr.mxu1 %v8586_v43  ;;  %7371 = vmatpush3.msra.mxu0 %v14164_v46  ;;  %v8615_v43 = vld [vmem:[#allocation22 + $0x110] sm:$0xff]  ;;  %v8616_v46 = vld [vmem:[#allocation22 + $0x108] sm:$0xff] }
0x113b   :  { %8042 = vrcp.f32 %v6035_v53  ;;  %v6034_v38 = vadd.f32 1.0, %v8041_v16  ;;  %6377 = vmatpush1.msra.mxu1 %v8587_v32  ;;  %7372 = vmatprep.subr.mxu0 %v14165_v35  ;;  %v8611_v53 = vld [vmem:[#allocation22 + $0x130] sm:$0xff]  ;;  %v8614_v16 = vld [vmem:[#allocation22 + $0x118] sm:$0xff]  ;;  %v6122_v32 = vpop.f32.mrf.mxu1 }
0x113c   :  { %6378 = vmatprep.subr.mxu1 %v8588_v25  ;;  %7373 = vmatpush3.msra.mxu0 %v14166_v58  ;;  %v14186_v58 = vld [vmem:[#allocation78_spill] sm:$0xff] }
0x113d   :  { %8044 = vrcp.f32 %v6034_v38  ;;  %6379 = vmatpush1.msra.mxu1 %v8589_v29  ;;  %7374 = vmatprep.subr.mxu0 %v14167_v1  ;;  %v8617_v38 = vld [vmem:[#allocation22 + $0x100] sm:$0xff]  ;;  %v6117_v29 = vadd.f32 %v12903_v30, %v14186_v58  ;;  %v14187_v1 = vld [vmem:[#allocation71_spill] sm:$0xff] }
0x113e   :  { %6380 = vmatprep.subr.mxu1 %v8590_v5  ;;  %7375 = vmatpush3.msra.mxu0 %v14168_v21 }
0x113f   :  { %6381 = vmatpush1.msra.mxu1 %v8591_v23  ;;  %7376 = vmatprep.subr.mxu0 %v14169_v27 }
0x1140   :  { %6382 = vmatprep.subr.mxu1 %v8592_v36  ;;  %7377 = vmatpush3.msra.mxu0 %v14170_v42  ;;  %v6123_v42 = vadd.f32 %v6122_v32, %v14186_v58 }
0x1141   :  { %6383 = vmatpush1.msra.mxu1 %v8593_v55  ;;  %7378 = vmatprep.subr.mxu0 %v14171_v18  ;;  %v14188_v18 = vld [vmem:[#allocation72_spill] sm:$0xff] }
0x1142   :  { %6384 = vmatprep.subr.mxu1 %v8594_v62  ;;  %7379 = vmatpush3.msra.mxu0 %v14172_v50  ;;  %v14189_v50 = vld [vmem:[#allocation73_spill] sm:$0xff] }
0x1143   :  { %6385 = vmatpush1.msra.mxu1 %v8595_v26  ;;  %7380 = vmatprep.subr.mxu0 %v14173_v14  ;;  %v14190_v14 = vld [vmem:[#allocation54_spill] sm:$0xff] }
0x1144   :  { %6386 = vmatprep.subr.mxu1 %v8596_v7  ;;  %7381 = vmatpush3.msra.mxu0 %v14174_v49  ;;  %v14191_v7 = vld [vmem:[#allocation74_spill] sm:$0xff] }
0x1145   :  { %6387 = vmatpush1.msra.mxu1 %v8597_v54  ;;  %7382 = vmatprep.subr.mxu0 %v14175_v47  ;;  %v822_v49 = vadd.f32 %v14191_v7, %v14190_v14  ;;  %v14192_v47 = vld [vmem:[#allocation115_spill] sm:$0xff] }
0x1146   :  { %6388 = vmatprep.subr.mxu1 %v8598_v2  ;;  %7383 = vmatpush3.msra.mxu0 %v14176_v34  ;;  %v6191_v35 = vpop.f32.mrf.mxu0 }
0x1147   :  { %6389 = vmatpush1.msra.mxu1 %v8599_v4  ;;  %7384 = vmatprep.subr.mxu0 %v14177_v24  ;;  %v6192_v2 = vadd.f32 %v6191_v35, %v14192_v47 }
0x1148   :  { %v8043_v6 = vpop.eup %8042  ;;  %6390 = vmatprep.subr.mxu1 %v8600_v41  ;;  %7385 = vmatpush3.msra.mxu0 %v14178_v15  ;;  %v6193_v23 = vpop.f32.mrf.mxu0 }
0x1149   :  { %v6041_v57 = vsel %vm10711_vm7, %v8043_v6, %v12909_v52  ;;  %6391 = vmatpush1.msra.mxu1 %v8601_v12  ;;  %7386 = vmatprep.subr.mxu0 %v14180_v56  ;;  %v14183_v52 = vld [vmem:[#allocation46_spill] sm:$0xff] }
0x114a   :  { %v8045_v20 = vpop.eup %8044  ;;  %6047 = vst [vmem:[#allocation26 + $0x48] sm:$0xff] %v6041_v57  ;;  %6425 = vmatmul.mubr.f32.vlgmr.msra.gmra.mxu1 %v12912_v33  ;;  %7387 = vmatpush3.msra.mxu0 %v14181_v19  ;;  %v14185_v33 = vld [vmem:[#allocation55_spill] sm:$0xff]  ;;  %v6197_v30 = vpop.f32.mrf.mxu0 }
0x114b   :  { %v6040_v61 = vsel %vm10711_vm7, %v8045_v20, %v12916_v45  ;;  %6430 = vmatprep.mubr.f32.mxu1 %v13482_v44  ;;  %7388 = vmatprep.subr.mxu0 %v14182_v31  ;;  %v8604_v45 = vld [vmem:[#allocation22 + $0x168] sm:$0xff]  ;;  %v8605_v44 = vld [vmem:[#allocation22 + $0x160] sm:$0xff]  ;;  %v6198_v41 = vadd.f32 %v6197_v30, %v14192_v47 }
0x114c   :  { %6046 = vst [vmem:[#allocation26 + $0x40] sm:$0xff] %v6040_v61  ;;  %7389 = vmatpush3.msra.mxu0 %v14183_v52  ;;  %7807 = vmatprep.subr.mxu1 %v8602_v39  ;;  %v6199_v56 = vpop.f32.mrf.mxu0 }
0x114d   :  { %7390 = vmatprep.subr.mxu0 %v14184_v28  ;;  %7808 = vmatpush3.msra.mxu1 %v8602_v39 }
0x114e   :  { %6431 = vmatmul.mubr.f32.gmra.mxu1 %v12924_v37  ;;  %7391 = vmatpush3.msra.mxu0 %v14185_v33  ;;  %v8609_v37 = vld [vmem:[#allocation22 + $0x140] sm:$0xff] }
0x114f   :  { %7809 = vmatprep.subr.mxu1 %v8603_v60 }
0x1150   :  { %7810 = vmatpush3.msra.mxu1 %v8603_v60 }
0x1151   :  { %7811 = vmatprep.subr.mxu1 %v8604_v45 }
0x1152   :  { %7812 = vmatpush3.msra.mxu1 %v8604_v45 }
0x1153   :  { %7813 = vmatprep.subr.mxu1 %v8605_v44 }
0x1154   :  { %7814 = vmatpush3.msra.mxu1 %v8605_v44 }
0x1155   :  { %7815 = vmatprep.subr.mxu1 %v8606_v11 }
0x1156   :  { %7816 = vmatpush3.msra.mxu1 %v8606_v11 }
0x1157   :  { %7817 = vmatprep.subr.mxu1 %v8607_v13 }
0x1158   :  { %7818 = vmatpush3.msra.mxu1 %v8607_v13 }
0x1159   :  { %7819 = vmatprep.subr.mxu1 %v8608_v59 }
0x115a   :  { %7820 = vmatpush3.msra.mxu1 %v8608_v59 }
0x115b   :  { %7821 = vmatprep.subr.mxu1 %v8609_v37 }
0x115c   :  { %7822 = vmatpush3.msra.mxu1 %v8609_v37 }
0x115d   :  { %7823 = vmatprep.subr.mxu1 %v8610_v48 }
0x115e   :  { %7824 = vmatpush3.msra.mxu1 %v8610_v48  ;;  %v6194_v48 = vadd.f32 %v6193_v23, %v10353_v0 }
0x115f   :  { %7825 = vmatprep.subr.mxu1 %v8611_v53 }
0x1160   :  { %7826 = vmatpush3.msra.mxu1 %v8611_v53 }
0x1161   :  { %7827 = vmatprep.subr.mxu1 %v8612_v40 }
0x1162   :  { %7828 = vmatpush3.msra.mxu1 %v8612_v40 }
0x1163   :  { %7829 = vmatprep.subr.mxu1 %v8613_v51 }
0x1164   :  { %7830 = vmatpush3.msra.mxu1 %v8613_v51 }
0x1165   :  { %7831 = vmatprep.subr.mxu1 %v8614_v16 }
0x1166   :  { %7832 = vmatpush3.msra.mxu1 %v8614_v16  ;;  %v14193_v16 = vld [vmem:[#allocation52_spill] sm:$0xff] }
0x1167   :  { %7833 = vmatprep.subr.mxu1 %v8615_v43 }
0x1168   :  { %7834 = vmatpush3.msra.mxu1 %v8615_v43 }
0x1169   :  { %7835 = vmatprep.subr.mxu1 %v8616_v46 }
0x116a   :  { %7836 = vmatpush3.msra.mxu1 %v8616_v46 }
0x116b   :  { %7837 = vmatprep.subr.mxu1 %v8617_v38 }
0x116c   :  { %7838 = vmatpush3.msra.mxu1 %v8617_v38 }
0x11ea   :  { %v6272_v25 = vpop.f32.mrf.mxu1  ;;  %v6349_v61 = vpop.f32.mrf.mxu0 }
0x11eb   :  { %v6437_v5 = vadd.f32 %v6272_v25, %v14187_v1  ;;  %v6439_v43 = vadd.f32 %v6349_v61, %v14193_v16  ;;  %v6200_v1 = vadd.f32 %v6199_v56, %v10353_v0 }
0x11ec   :  { %v6274_v21 = vpop.f32.mrf.mxu1  ;;  %v6351_v52 = vpop.f32.mrf.mxu0 }
0x11ed   :  { %v6443_v27 = vadd.f32 %v6437_v5, %v6117_v29  ;;  %v6438_v62 = vadd.f32 %v6274_v21, %v14188_v18  ;;  %v6485_v60 = vadd.f32 %v6351_v52, %v10360_v9 }
0x11ee   :  { %v6278_v36 = vpop.f32.mrf.mxu1 }
0x11ef   :  { %v6942_v55 = vmul.f32 -1.442695, %v6443_v27  ;;  %v6440_v26 = vadd.f32 %v6278_v36, %v14189_v50  ;;  %v6457_v24 = vadd.f32 %v6438_v62, %v6192_v2  ;;  %v6355_v28 = vpop.f32.mrf.mxu0  ;;  %v6491_v46 = vmax.f32 %v6485_v60, 0.0 }
0x11f0   :  { %v6280_v54 = vpop.f32.mrf.mxu1 }
0x11f1   :  { %8046 = vpow2.f32 %v6942_v55  ;;  %v6444_v34 = vadd.f32 %v6440_v26, %v6123_v42  ;;  %v6441_v4 = vadd.f32 %v6280_v54, %v822_v49  ;;  %v6944_v57 = vmul.f32 -1.442695, %v6457_v24  ;;  %v6357_v13 = vpop.f32.mrf.mxu0 }
0x11f2   :  { %v6488_v32 = vadd.f32 %v6357_v13, %v10360_v9  ;;  %v14194_v9 = vld [vmem:[#allocation51_spill] sm:$0xff] }
0x11f3   :  { %v6943_v6 = vmul.f32 -1.442695, %v6444_v34  ;;  %v6458_v15 = vadd.f32 %v6441_v4, %v6198_v41  ;;  %v6442_v55 = vadd.f32 %v6355_v28, %v14194_v9 }
0x11f4   :  { %v6494_v42 = vmax.f32 %v6488_v32, 0.0 }
0x11f5   :  { %8048 = vpow2.f32 %v6943_v6  ;;  %v6945_v12 = vmul.f32 -1.442695, %v6458_v15 }
0x11f6   :  { %8050 = vpow2.f32 %v6944_v57 }
0x11f7   :  { %8052 = vpow2.f32 %v6945_v12 }
0x11fe   :  { %v8047_v20 = vpop.eup %8046 }
0x11ff   :  { %v6451_v19 = vadd.f32 1.0, %v8047_v20 }
0x1201   :  { %8054 = vrcp.f32 %v6451_v19 }
0x1202   :  { %v8049_v31 = vpop.eup %8048 }
0x1203   :  { %v6452_v39 = vadd.f32 1.0, %v8049_v31  ;;  %v8051_v33 = vpop.eup %8050 }
0x1204   :  { %v8053_v44 = vpop.eup %8052  ;;  %v6465_v11 = vadd.f32 1.0, %v8051_v33 }
0x1205   :  { %8056 = vrcp.f32 %v6452_v39  ;;  %v6466_v38 = vadd.f32 1.0, %v8053_v44 }
0x1206   :  { %8058 = vrcp.f32 %v6465_v11 }
0x120a   :  { %v6426_v45 = vpop.f32.mrf.mxu1 }
0x120b   :  { %v6486_v59 = vadd.f32 %v6426_v45, %v10215_v8 }
0x120c   :  { %v6428_v37 = vpop.f32.mrf.mxu1 }
0x120d   :  { %v6492_v53 = vmax.f32 %v6486_v59, 0.0  ;;  %v6487_v40 = vadd.f32 %v6428_v37, %v13653_v3 }
0x120e   :  { %v8055_v51 = vpop.eup %8054  ;;  %v6432_v35 = vpop.f32.mrf.mxu1 }
0x120f   :  { %v6471_v25 = vmul.f32 %v8055_v51, %v6194_v48  ;;  %v6948_v58 = vmul.f32 -1.442695, %v6487_v40  ;;  %v6489_v29 = vadd.f32 %v6432_v35, %v10215_v8  ;;  %6603 = vmatprep.mubr.f32.mxu0 %v6492_v53 }
0x1210   :  { %v6434_v5 = vpop.f32.mrf.mxu1  ;;  %6604 = vmatmul.mubr.f32.vlgmr.msra.gmra.mxu0 %v6491_v46 }
0x1211   :  { %v6473_v21 = vadd.f32 %v6471_v25, %v6439_v43  ;;  %8060 = vpow2.f32 %v6948_v58  ;;  %v6495_v23 = vmax.f32 %v6489_v29, 0.0  ;;  %v6490_v27 = vadd.f32 %v6434_v5, %v13653_v3 }
0x1212   :  { %v8057_v36 = vpop.eup %8056  ;;  %8062 = vrcp.f32 %v6466_v38 }
0x1213   :  { %8064 = vtanh.f32 %v6473_v21  ;;  %v6472_v18 = vmul.f32 %v8057_v36, %v6200_v1  ;;  %v6951_v62 = vmul.f32 -1.442695, %v6490_v27  ;;  %6608 = vmatprep.mubr.f32.mxu0 %v6495_v23  ;;  %v8059_v0 = vpop.eup %8058 }
0x1214   :  { %6609 = vmatmul.mubr.f32.gmra.mxu0 %v6494_v42  ;;  %v6477_v7 = vsub.f32 1.0, %v8059_v0  ;;  %v6481_v54 = vmul.f32 %v8059_v0, %v12788_v17 }
0x1215   :  { %v6474_v8 = vadd.f32 %v6472_v18, %v6442_v55  ;;  %8066 = vpow2.f32 %v6951_v62 }
0x1217   :  { %8068 = vtanh.f32 %v6474_v8 }
0x121e   :  { %v8061_v50 = vpop.eup %8060 }
0x121f   :  { %v8063_v26 = vpop.eup %8062  ;;  %v6517_v14 = vadd.f32 1.0, %v8061_v50 }
0x1220   :  { %v8065_v49 = vpop.eup %8064  ;;  %v6478_v30 = vsub.f32 1.0, %v8063_v26  ;;  %v6482_v6 = vmul.f32 %v8063_v26, %v12803_v10 }
0x1221   :  { %8070 = vrcp.f32 %v6517_v14  ;;  %v6479_v3 = vmul.f32 %v8065_v49, %v6477_v7 }
0x1222   :  { %v8067_v47 = vpop.eup %8066 }
0x1223   :  { %v6520_v2 = vadd.f32 1.0, %v8067_v47  ;;  %v6483_v34 = vadd.f32 %v6481_v54, %v6479_v3 }
0x1224   :  { %v8069_v4 = vpop.eup %8068 }
0x1225   :  { %8072 = vrcp.f32 %v6520_v2  ;;  %v6480_v24 = vmul.f32 %v8069_v4, %v6478_v30  ;;  %6709 = vst [vmem:[#allocation28] sm:$0xff] %v6483_v34 }
0x1227   :  { %v6484_v41 = vadd.f32 %v6482_v6, %v6480_v24 }
0x1229   :  { %6710 = vst [vmem:[#allocation28 + $0x8] sm:$0xff] %v6484_v41 }
0x122e   :  { %v8071_v15 = vpop.eup %8070 }
0x122f   :  { %7839 = vmatprep.mubr.f32.mxu1 %v8071_v15 }
0x1232   :  { %v8073_v57 = vpop.eup %8072 }
0x1233   :  { %7840 = vmatmul.mubr.f32.vlgmr.msra.gmra.mxu1 %v8073_v57 }
0x1234   :  { %8909 = shalt.err (!%p8906_p4)
}
0x1235   :  { %6722 = dma.vmem_to_hbm [thread:$0]  %s6717_s28, 1536, %s13036_s19, [#allocation4], %s8984_s27, %s8984_s27, %s8985_s3  }
0x1236   :  { %s9000_s19 = smov [#allocation26]   ;;  %s9001_s0 = smov [#allocation28]  }
0x1237   :  { %s6728_s12 = sshll.u32 %s9000_s19, 4  ;;  %s6740_s4 = sshll.u32 %s9001_s0, 4  ;;  %s6729_s12 = int_to_ptr.vmem [resolvable:$true] %s6728_s12  ;;  %s6741_s4 = int_to_ptr.vmem [resolvable:$true] %s6740_s4 }
0x1238   :  { %s8918_s15 = scalar_lea.vmem %s6729_s12, 1536  ;;  %p8923_p6 = scmp.lt.s32.totalorder %s6729_s12, %s6729_s12 }
0x1239   :  { %p8919_p5 = scmp.ne.s32.totalorder %s6729_s12, %s8918_s15  ;;  %p8924_p7 = scmp.lt.s32.totalorder %s8918_s15, %s8918_s15 }
0x123b   :  { %p8925_p8 = por %p8924_p7, %p8923_p6 }
0x123d   :  { %p8926_p9 = pnand %p8925_p8, %p8919_p5 }
0x12d0   :  { %v7392_v17 = vpop.f32.mrf.mxu0 }
0x12d2   :  { %v7393_v10 = vpop.f32.mrf.mxu0 }
0x12d3   :  { %v7394_v19 = vadd.f32 %v7393_v10, %v7392_v17 }
0x12d4   :  { %v7395_v12 = vpop.f32.mrf.mxu0 }
0x12d5   :  { %v6606_v39 = vadd.f32 %v12905_v22, %v7394_v19 }
0x12d6   :  { %v7396_v56 = vpop.f32.mrf.mxu0 }
0x12d7   :  { %v7397_v20 = vadd.f32 %v7396_v56, %v7395_v12 }
0x12d9   :  { %v6611_v61 = vadd.f32 %v12905_v22, %v7397_v20 }
0x12f3   :  { %v7841_v31 = vpop.f32.mrf.mxu1 }
0x12f4   :  { %v6686_v52 = vadd.f32 %v7841_v31, %v6611_v61 }
0x12f5   :  { %v6680_v28 = vpop.f32.mrf.mxu1 }
0x12f6   :  { %v6953_v33 = vmul.f32 -1.442695, %v6686_v52  ;;  %v6681_v60 = vadd.f32 %v6680_v28, %v6606_v39 }
0x12f8   :  { %8074 = vpow2.f32 %v6953_v33  ;;  %v6952_v45 = vmul.f32 -1.442695, %v6681_v60 }
0x12fa   :  { %8076 = vpow2.f32 %v6952_v45 }
0x1305   :  { %v8075_v44 = vpop.eup %8074 }
0x1306   :  { %v6696_v11 = vadd.f32 1.0, %v8075_v44 }
0x1307   :  { %v8077_v13 = vpop.eup %8076 }
0x1308   :  { %8078 = vrcp.f32 %v6696_v11  ;;  %v6695_v59 = vadd.f32 1.0, %v8077_v13 }
0x130a   :  { %8080 = vrcp.f32 %v6695_v59 }
0x1315   :  { %v8079_v37 = vpop.eup %8078 }
0x1316   :  { %v6702_v22 = vsel %vm10711_vm7, %v8079_v37, %v6686_v52 }
0x1317   :  { %v8081_v48 = vpop.eup %8080  ;;  %6708 = vst [vmem:[#allocation26 + $0x58] sm:$0xff] %v6702_v22 }
0x1318   :  { %v6701_v53 = vsel %vm10711_vm7, %v8081_v48, %v6681_v60 }
0x1319   :  { %6707 = vst [vmem:[#allocation26 + $0x50] sm:$0xff] %v6701_v53 }
0x131a   :  { %8929 = shalt.err (!%p8926_p9)
}
0x131b   :  { %6734 = dma.vmem_to_hbm [thread:$0]  %s6729_s12, 1536, %s13037_s20, [#allocation27], %s8984_s27, %s8984_s27, %s8985_s3  }
0x131c   :  { %s8938_s5 = scalar_lea.vmem %s6741_s4, 256  ;;  %p8943_p11 = scmp.lt.s32.totalorder %s6741_s4, %s6741_s4 }
0x131d   :  { %p8939_p10 = scmp.ne.s32.totalorder %s6741_s4, %s8938_s5  ;;  %p8944_p12 = scmp.lt.s32.totalorder %s8938_s5, %s8938_s5 }
0x131f   :  { %p8945_p13 = por %p8944_p12, %p8943_p11 }
0x1321   :  { %p8946_p0 = pnand %p8945_p13, %p8939_p10 }
0x1323   :  { %8949 = shalt.err (!%p8946_p0)
}
0x1324   :  { %6746 = dma.vmem_to_hbm [thread:$0]  %s6741_s4, 256, %s13038_s21, [#allocation27], %s8984_s27, %s8984_s27, %s8985_s3  }
0x1325   :  { %8974 = dma.done.wait [#allocation4], 1536  }
0x1326   :  { %8975 = vsyncadd [#allocation4], 4294965760 }
0x1327   :  { %8976 = dma.done.wait [#allocation27], 1792  }
0x1328   :  { %8977 = vsyncadd [#allocation27], 4294965504 }
0x1329   :  { %6756 = vsyncpa [#allocation3], 1 }
0x132a   :  { %6757 = vsyncpa [#allocation6], 1 }
0x132b   :  { %6758 = vsyncpa [#allocation9], 1 }
0x132c   :  { %6759 = vsyncpa [#allocation12], 1 }
0x132d   :  { %6760 = vsyncpa [#allocation15], 1 }
0x132e   :  { %6761 = vsyncpa [#allocation18], 1 }
0x132f   :  { %6762 = vsyncpa [#allocation21], 1 }
0x1330   :  { %6763 = vsyncpa [#allocation24], 1 }
0x1331   :  { %6764 = vsyncpa [#allocation4], 1 }
0x1332   :  { %6765 = vsyncpa [#allocation27], 1 }

</bundles_post_ra>
